<compile_context>
chip_gen: v5e
topology: v5e:2x2
jax: 0.10.0
libtpu: 0.0.40
codegen_flags: <defaults>
</compile_context>

<pallas_src>
import jax
import jax.numpy as jnp
from jax.experimental import pallas as pl
from jax.experimental.pallas import tpu as pltpu

INPUT_SIZE = 28 * 28      # 784 (logical)
HIDDEN = 400              # logical hidden width
LATENT = 15               # logical latent size
LEAK = 0.01

IN_PAD = 896              # 784 -> 7*128 (lane-dense x / xhat / w1 / d4)
HID_PAD = 512             # 400 -> 4*128 (lane-dense h / g and all hidden weights)
LAT_PAD = 128             # 15  -> 128   (lane-dense eps / mu / logvar)


def _round_up(x, m):
    return ((x + m - 1) // m) * m


def _leaky_relu(v):
    # max(v, 0.01*v) == LeakyReLU(0.01): mul+max instead of cmp+mul+select.
    return jnp.maximum(v, LEAK * v)


def _dot(act, w_ref):
    # bf16 operands on the MXU, f32 accumulation.
    return jnp.dot(act.astype(jnp.bfloat16), w_ref[...],
                   preferred_element_type=jnp.float32)


def vae_kernel(x_ref, eps_ref,
               w1, b1, w2, b2, w3, b3,
               wh, bh,
               d1, db1, d2, db2, d3, db3, d4, db4,
               xhat_ref, heads_ref):
    # ---- encoder: 3x (Linear + LeakyReLU(0.01)); biases + elementwise math in f32 ----
    h = _leaky_relu(_dot(x_ref[...], w1) + b1[...])
    h = _leaky_relu(_dot(h, w2) + b2[...])
    h = _leaky_relu(_dot(h, w3) + b3[...])

    # ---- fused mu || logvar heads: one (HID_PAD, 2*LAT_PAD) matmul, one f32 output ----
    heads = _dot(h, wh) + bh[...]
    heads_ref[...] = heads
    mu = heads[:, :LAT_PAD]
    logvar = heads[:, LAT_PAD:]

    # ---- reparametrize (f32 on VPU/EUP): z = exp(0.5*logvar) * eps + mu ----
    sigma = jnp.exp(0.5 * logvar)
    z = sigma * eps_ref[...].astype(jnp.float32) + mu

    # ---- decoder: 3x (Linear + LeakyReLU) + Linear + Sigmoid ----
    g = _leaky_relu(_dot(z, d1) + db1[...])      # padded z dims hit zero rows of d1
    g = _leaky_relu(_dot(g, d2) + db2[...])
    g = _leaky_relu(_dot(g, d3) + db3[...])
    logits = _dot(g, d4) + db4[...]

    # sigmoid = 1 / (1 + exp(-x)): exp + approx-reciprocal both route to the EUP slot.
    xhat = pl.reciprocal(1.0 + jnp.exp(-logits), approx=True)
    xhat_ref[...] = xhat.astype(xhat_ref.dtype)


def init_params(key, input_size=INPUT_SIZE, hidden=HIDDEN, latent=LATENT):
    """PyTorch-nn.Linear-style init: U(-1/sqrt(fan_in), 1/sqrt(fan_in)); W stored (in, out)."""
    shapes = [
        (input_size, hidden), (hidden, hidden), (hidden, hidden),   # encoder
        (hidden, latent), (hidden, latent),                         # mu / logvar heads
        (latent, hidden), (hidden, hidden), (hidden, hidden),       # decoder hidden
        (hidden, input_size),                                       # decoder output
    ]
    params = []
    for shp in shapes:
        key, kw, kb = jax.random.split(key, 3)
        bound = 1.0 / jnp.sqrt(jnp.float32(shp[0]))
        w = jax.random.uniform(kw, shp, jnp.float32, -bound, bound)
        b = jax.random.uniform(kb, (1, shp[1]), jnp.float32, -bound, bound)
        params += [w, b]
    return params


def prepare_params(params):
    """Pad to lane-dense shapes (784->896, 400->512, 15->128), fuse mu||logvar head,
    cast weights to bf16 (biases stay f32). All padding is zero-filled -> inert."""
    (w1, b1, w2, b2, w3, b3,
     wmu, bmu, wlv, blv,
     d1, db1, d2, db2, d3, db3, d4, db4) = params

    def pad2(a, shape):
        out = jnp.zeros(shape, a.dtype)
        return out.at[:a.shape[0], :a.shape[1]].set(a)

    w1p, b1p = pad2(w1, (IN_PAD, HID_PAD)), pad2(b1, (1, HID_PAD))
    w2p, b2p = pad2(w2, (HID_PAD, HID_PAD)), pad2(b2, (1, HID_PAD))
    w3p, b3p = pad2(w3, (HID_PAD, HID_PAD)), pad2(b3, (1, HID_PAD))
    wh = jnp.concatenate([pad2(wmu, (HID_PAD, LAT_PAD)),
                          pad2(wlv, (HID_PAD, LAT_PAD))], axis=1)
    bh = jnp.concatenate([pad2(bmu, (1, LAT_PAD)),
                          pad2(blv, (1, LAT_PAD))], axis=1)
    d1p, db1p = pad2(d1, (LAT_PAD, HID_PAD)), pad2(db1, (1, HID_PAD))
    d2p, db2p = pad2(d2, (HID_PAD, HID_PAD)), pad2(db2, (1, HID_PAD))
    d3p, db3p = pad2(d3, (HID_PAD, HID_PAD)), pad2(db3, (1, HID_PAD))
    d4p, db4p = pad2(d4, (HID_PAD, IN_PAD)), pad2(db4, (1, IN_PAD))

    bf = lambda w: w.astype(jnp.bfloat16)
    return [bf(w1p), b1p, bf(w2p), b2p, bf(w3p), b3p,
            bf(wh), bh,
            bf(d1p), db1p, bf(d2p), db2p, bf(d3p), db3p,
            bf(d4p), db4p]


def _pick_tile_n(n):
    # Big tiles for big batches (amortize per-step overhead on v5e/v6e);
    # always >= 2 tiles once n >= 32 so v7x's two TensorCores both engage.
    if n >= 1024:
        return 512
    if n >= 512:
        return 256
    if n >= 256:
        return 128
    if n >= 32:
        return _round_up((n + 1) // 2, 16)   # two tiles, bf16-sublane aligned
    return _round_up(n, 16)                  # single tile == full padded array


def vae_forward(x_nchw, eps, kparams):
    """x_nchw: (N, 1, 28, 28) f32; eps: (N, LATENT) f32 (the randn_like draw);
    kparams: output of prepare_params."""
    n = x_nchw.shape[0]
    tile_n = _pick_tile_n(n)
    n_pad = _round_up(n, tile_n)
    num_tiles = n_pad // tile_n

    # Single producer per streamed input: reshape + cast-to-bf16 + zero-pad.
    x_flat = x_nchw.reshape(n, INPUT_SIZE).astype(jnp.bfloat16)       # nn.Flatten()
    x_pad = jnp.pad(x_flat, ((0, n_pad - n), (0, IN_PAD - INPUT_SIZE)))
    eps_pad = jnp.pad(eps.astype(jnp.bfloat16),
                      ((0, n_pad - n), (0, LAT_PAD - LATENT)))

    row_in = pl.BlockSpec((tile_n, IN_PAD), lambda i: (i, 0))
    row_lat = pl.BlockSpec((tile_n, LAT_PAD), lambda i: (i, 0))
    row_heads = pl.BlockSpec((tile_n, 2 * LAT_PAD), lambda i: (i, 0))

    def resident(arr):
        # Full-array block, constant block index: DMA'd once, VMEM-resident for all
        # tiles (~4.3 MiB bf16 weights total; fits even double-buffered in 32 MiB).
        return pl.BlockSpec(arr.shape, lambda i: (0, 0))

    in_specs = [row_in, row_lat] + [resident(p) for p in kparams]
    out_specs = (row_in, row_heads)
    out_shapes = (
        jax.ShapeDtypeStruct((n_pad, IN_PAD), jnp.bfloat16),       # x_hat (flat, padded)
        jax.ShapeDtypeStruct((n_pad, 2 * LAT_PAD), jnp.float32),   # mu || logvar (padded)
    )

    xhat_pad, heads_pad = pl.pallas_call(
        vae_kernel,
        grid=(num_tiles,),
        in_specs=in_specs,
        out_specs=out_specs,
        out_shape=out_shapes,
        compiler_params=pltpu.CompilerParams(
            dimension_semantics=("parallel",),   # shard batch tiles across TCs (v7x)
            vmem_limit_bytes=32 << 20,           # safe on v7x (64 MiB) and roomy on v5e/v6e
        ),
    )(x_pad, eps_pad, *kparams)

    x_hat = (xhat_pad[:n, :INPUT_SIZE].astype(jnp.float32)
             .reshape(n, 1, 28, 28))                                # nn.Unflatten(1,(1,28,28))
    mu = heads_pad[:n, :LATENT]
    logvar = heads_pad[:n, LAT_PAD:LAT_PAD + LATENT]
    return x_hat, mu, logvar


def vae_reference(x_nchw, eps, params):
    """Pure-JAX f32 reference mirroring the PyTorch module."""
    (w1, b1, w2, b2, w3, b3, wmu, bmu, wlv, blv,
     d1, db1, d2, db2, d3, db3, d4, db4) = params
    n = x_nchw.shape[0]
    x = x_nchw.reshape(n, INPUT_SIZE)
    lrelu = lambda v: jnp.where(v > 0, v, LEAK * v)
    h = lrelu(x @ w1 + b1)
    h = lrelu(h @ w2 + b2)
    h = lrelu(h @ w3 + b3)
    mu = h @ wmu + bmu
    logvar = h @ wlv + blv
    z = jnp.exp(0.5 * logvar) * eps + mu
    g = lrelu(z @ d1 + db1)
    g = lrelu(g @ d2 + db2)
    g = lrelu(g @ d3 + db3)
    x_hat = jax.nn.sigmoid(g @ d4 + db4)
    return x_hat.reshape(n, 1, 28, 28), mu, logvar


if __name__ == "__main__":
    key = jax.random.PRNGKey(0)
    k_params, k_x, k_eps = jax.random.split(key, 3)

    params = init_params(k_params)            # f32, PyTorch layout
    kparams = prepare_params(params)          # padded / fused / bf16 for the kernel

    N = 2
    x = jax.random.uniform(k_x, (N, 1, 28, 28), jnp.float32)     # input images
    eps = jax.random.normal(k_eps, (N, LATENT), jnp.float32)     # torch.randn_like(sigma)

    x_hat, mu, logvar = jax.jit(vae_forward)(x, eps, kparams)
    jax.block_until_ready((x_hat, mu, logvar))

    # shape / range sanity (approx reciprocal + bf16 store can sit a hair above 1.0)
    assert x_hat.shape == (N, 1, 28, 28)
    assert mu.shape == (N, LATENT) and logvar.shape == (N, LATENT)
    assert bool(jnp.all((x_hat >= 0.0) & (x_hat <= 1.0 + 1e-2)))

    # numerical check vs pure-JAX f32 reference (bf16 weights/activations -> loose tol)
    r_xhat, r_mu, r_logvar = vae_reference(x, eps, params)
    assert float(jnp.max(jnp.abs(x_hat - r_xhat))) < 3e-2
    assert float(jnp.max(jnp.abs(mu - r_mu))) < 3e-2
    assert float(jnp.max(jnp.abs(logvar - r_logvar))) < 3e-2

    print("KERNEL_OK")
</pallas_src>

<mosaic_0001>
module attributes {stable_mosaic.version = 11 : i64} {
  func.func @vae_kernel(%arg0: i32, %arg1: memref<16x896xbf16, #tpu.memory_space<vmem>>, %arg2: memref<16x128xbf16, #tpu.memory_space<vmem>>, %arg3: memref<896x512xbf16, #tpu.memory_space<vmem>>, %arg4: memref<1x512xf32, #tpu.memory_space<vmem>>, %arg5: memref<512x512xbf16, #tpu.memory_space<vmem>>, %arg6: memref<1x512xf32, #tpu.memory_space<vmem>>, %arg7: memref<512x512xbf16, #tpu.memory_space<vmem>>, %arg8: memref<1x512xf32, #tpu.memory_space<vmem>>, %arg9: memref<512x256xbf16, #tpu.memory_space<vmem>>, %arg10: memref<1x256xf32, #tpu.memory_space<vmem>>, %arg11: memref<128x512xbf16, #tpu.memory_space<vmem>>, %arg12: memref<1x512xf32, #tpu.memory_space<vmem>>, %arg13: memref<512x512xbf16, #tpu.memory_space<vmem>>, %arg14: memref<1x512xf32, #tpu.memory_space<vmem>>, %arg15: memref<512x512xbf16, #tpu.memory_space<vmem>>, %arg16: memref<1x512xf32, #tpu.memory_space<vmem>>, %arg17: memref<512x896xbf16, #tpu.memory_space<vmem>>, %arg18: memref<1x896xf32, #tpu.memory_space<vmem>>, %arg19: memref<16x896xbf16, #tpu.memory_space<vmem>>, %arg20: memref<16x256xf32, #tpu.memory_space<vmem>>) attributes {dimension_semantics = [#tpu.dimension_semantics<parallel>], iteration_bounds = array<i64: 1>, scalar_prefetch = 0 : i64, scratch_operands = 0 : i64, tpu.core_type = #tpu.core_type<tc>, window_params = [{transform_indices = @transform_0, window_bounds = array<i64: 16, 896>}, {transform_indices = @transform_1, window_bounds = array<i64: 16, 128>}, {pipeline_mode = #tpu.pipeline_mode<synchronous>, transform_indices = @transform_2, window_bounds = array<i64: 896, 512>}, {pipeline_mode = #tpu.pipeline_mode<synchronous>, transform_indices = @transform_3, window_bounds = array<i64: 1, 512>}, {pipeline_mode = #tpu.pipeline_mode<synchronous>, transform_indices = @transform_4, window_bounds = array<i64: 512, 512>}, {pipeline_mode = #tpu.pipeline_mode<synchronous>, transform_indices = @transform_5, window_bounds = array<i64: 1, 512>}, {pipeline_mode = #tpu.pipeline_mode<synchronous>, transform_indices = @transform_6, window_bounds = array<i64: 512, 512>}, {pipeline_mode = #tpu.pipeline_mode<synchronous>, transform_indices = @transform_7, window_bounds = array<i64: 1, 512>}, {pipeline_mode = #tpu.pipeline_mode<synchronous>, transform_indices = @transform_8, window_bounds = array<i64: 512, 256>}, {pipeline_mode = #tpu.pipeline_mode<synchronous>, transform_indices = @transform_9, window_bounds = array<i64: 1, 256>}, {pipeline_mode = #tpu.pipeline_mode<synchronous>, transform_indices = @transform_10, window_bounds = array<i64: 128, 512>}, {pipeline_mode = #tpu.pipeline_mode<synchronous>, transform_indices = @transform_11, window_bounds = array<i64: 1, 512>}, {pipeline_mode = #tpu.pipeline_mode<synchronous>, transform_indices = @transform_12, window_bounds = array<i64: 512, 512>}, {pipeline_mode = #tpu.pipeline_mode<synchronous>, transform_indices = @transform_13, window_bounds = array<i64: 1, 512>}, {pipeline_mode = #tpu.pipeline_mode<synchronous>, transform_indices = @transform_14, window_bounds = array<i64: 512, 512>}, {pipeline_mode = #tpu.pipeline_mode<synchronous>, transform_indices = @transform_15, window_bounds = array<i64: 1, 512>}, {pipeline_mode = #tpu.pipeline_mode<synchronous>, transform_indices = @transform_16, window_bounds = array<i64: 512, 896>}, {pipeline_mode = #tpu.pipeline_mode<synchronous>, transform_indices = @transform_17, window_bounds = array<i64: 1, 896>}, {transform_indices = @transform_18, window_bounds = array<i64: 16, 896>}, {transform_indices = @transform_19, window_bounds = array<i64: 16, 256>}]} {
    %c0 = arith.constant 0 : index
    %c0_0 = arith.constant 0 : index
    %0 = vector.load %arg1[%c0, %c0_0] : memref<16x896xbf16, #tpu.memory_space<vmem>>, vector<16x896xbf16>
    %c0_1 = arith.constant 0 : index
    %c0_2 = arith.constant 0 : index
    %1 = vector.load %arg3[%c0_1, %c0_2] : memref<896x512xbf16, #tpu.memory_space<vmem>>, vector<896x512xbf16>
    %cst = arith.constant dense<0.000000e+00> : vector<16x512xf32>
    %2 = tpu.matmul %0, %1, %cst {dimension_numbers = #tpu.dot_dimension_numbers<[1], [0], [0], [1], [0, 0, 1, 1], [], []>} : vector<16x896xbf16>, vector<896x512xbf16>, vector<16x512xf32> -> vector<16x512xf32>
    %c0_3 = arith.constant 0 : index
    %c0_4 = arith.constant 0 : index
    %3 = vector.load %arg4[%c0_3, %c0_4] : memref<1x512xf32, #tpu.memory_space<vmem>>, vector<1x512xf32>
    %4 = vector.broadcast %3 : vector<1x512xf32> to vector<16x512xf32>
    %5 = arith.addf %2, %4 : vector<16x512xf32>
    %cst_5 = arith.constant 0.00999999977 : f32
    %6 = vector.broadcast %cst_5 : f32 to vector<16x512xf32>
    %7 = arith.mulf %6, %5 : vector<16x512xf32>
    %8 = arith.maximumf %5, %7 : vector<16x512xf32>
    %9 = arith.truncf %8 : vector<16x512xf32> to vector<16x512xbf16>
    %c0_6 = arith.constant 0 : index
    %c0_7 = arith.constant 0 : index
    %10 = vector.load %arg5[%c0_6, %c0_7] : memref<512x512xbf16, #tpu.memory_space<vmem>>, vector<512x512xbf16>
    %cst_8 = arith.constant dense<0.000000e+00> : vector<16x512xf32>
    %11 = tpu.matmul %9, %10, %cst_8 {dimension_numbers = #tpu.dot_dimension_numbers<[1], [0], [0], [1], [0, 0, 1, 1], [], []>} : vector<16x512xbf16>, vector<512x512xbf16>, vector<16x512xf32> -> vector<16x512xf32>
    %c0_9 = arith.constant 0 : index
    %c0_10 = arith.constant 0 : index
    %12 = vector.load %arg6[%c0_9, %c0_10] : memref<1x512xf32, #tpu.memory_space<vmem>>, vector<1x512xf32>
    %13 = vector.broadcast %12 : vector<1x512xf32> to vector<16x512xf32>
    %14 = arith.addf %11, %13 : vector<16x512xf32>
    %cst_11 = arith.constant 0.00999999977 : f32
    %15 = vector.broadcast %cst_11 : f32 to vector<16x512xf32>
    %16 = arith.mulf %15, %14 : vector<16x512xf32>
    %17 = arith.maximumf %14, %16 : vector<16x512xf32>
    %18 = arith.truncf %17 : vector<16x512xf32> to vector<16x512xbf16>
    %c0_12 = arith.constant 0 : index
    %c0_13 = arith.constant 0 : index
    %19 = vector.load %arg7[%c0_12, %c0_13] : memref<512x512xbf16, #tpu.memory_space<vmem>>, vector<512x512xbf16>
    %cst_14 = arith.constant dense<0.000000e+00> : vector<16x512xf32>
    %20 = tpu.matmul %18, %19, %cst_14 {dimension_numbers = #tpu.dot_dimension_numbers<[1], [0], [0], [1], [0, 0, 1, 1], [], []>} : vector<16x512xbf16>, vector<512x512xbf16>, vector<16x512xf32> -> vector<16x512xf32>
    %c0_15 = arith.constant 0 : index
    %c0_16 = arith.constant 0 : index
    %21 = vector.load %arg8[%c0_15, %c0_16] : memref<1x512xf32, #tpu.memory_space<vmem>>, vector<1x512xf32>
    %22 = vector.broadcast %21 : vector<1x512xf32> to vector<16x512xf32>
    %23 = arith.addf %20, %22 : vector<16x512xf32>
    %cst_17 = arith.constant 0.00999999977 : f32
    %24 = vector.broadcast %cst_17 : f32 to vector<16x512xf32>
    %25 = arith.mulf %24, %23 : vector<16x512xf32>
    %26 = arith.maximumf %23, %25 : vector<16x512xf32>
    %27 = arith.truncf %26 : vector<16x512xf32> to vector<16x512xbf16>
    %c0_18 = arith.constant 0 : index
    %c0_19 = arith.constant 0 : index
    %28 = vector.load %arg9[%c0_18, %c0_19] : memref<512x256xbf16, #tpu.memory_space<vmem>>, vector<512x256xbf16>
    %cst_20 = arith.constant dense<0.000000e+00> : vector<16x256xf32>
    %29 = tpu.matmul %27, %28, %cst_20 {dimension_numbers = #tpu.dot_dimension_numbers<[1], [0], [0], [1], [0, 0, 1, 1], [], []>} : vector<16x512xbf16>, vector<512x256xbf16>, vector<16x256xf32> -> vector<16x256xf32>
    %c0_21 = arith.constant 0 : index
    %c0_22 = arith.constant 0 : index
    %30 = vector.load %arg10[%c0_21, %c0_22] : memref<1x256xf32, #tpu.memory_space<vmem>>, vector<1x256xf32>
    %31 = vector.broadcast %30 : vector<1x256xf32> to vector<16x256xf32>
    %32 = arith.addf %29, %31 : vector<16x256xf32>
    %c0_23 = arith.constant 0 : index
    %c0_24 = arith.constant 0 : index
    %33 = vector.load %arg20[%c0_23, %c0_24] : memref<16x256xf32, #tpu.memory_space<vmem>>, vector<16x256xf32>
    tpu.vector_store %arg20[%c0_23, %c0_24], %32 {strides = array<i32>} : memref<16x256xf32, #tpu.memory_space<vmem>>, vector<16x256xf32>,
    %34 = vector.extract_strided_slice %32 {offsets = [0, 0], sizes = [16, 128], strides = [1, 1]} : vector<16x256xf32> to vector<16x128xf32>
    %35 = vector.extract_strided_slice %32 {offsets = [0, 128], sizes = [16, 128], strides = [1, 1]} : vector<16x256xf32> to vector<16x128xf32>
    %cst_25 = arith.constant 5.000000e-01 : f32
    %36 = vector.broadcast %cst_25 : f32 to vector<16x128xf32>
    %37 = arith.mulf %36, %35 : vector<16x128xf32>
    %38 = math.exp %37 : vector<16x128xf32>
    %c0_26 = arith.constant 0 : index
    %c0_27 = arith.constant 0 : index
    %39 = vector.load %arg2[%c0_26, %c0_27] : memref<16x128xbf16, #tpu.memory_space<vmem>>, vector<16x128xbf16>
    %40 = arith.extf %39 : vector<16x128xbf16> to vector<16x128xf32>
    %41 = arith.mulf %38, %40 : vector<16x128xf32>
    %42 = arith.addf %41, %34 : vector<16x128xf32>
    %43 = arith.truncf %42 : vector<16x128xf32> to vector<16x128xbf16>
    %c0_28 = arith.constant 0 : index
    %c0_29 = arith.constant 0 : index
    %44 = vector.load %arg11[%c0_28, %c0_29] : memref<128x512xbf16, #tpu.memory_space<vmem>>, vector<128x512xbf16>
    %cst_30 = arith.constant dense<0.000000e+00> : vector<16x512xf32>
    %45 = tpu.matmul %43, %44, %cst_30 {dimension_numbers = #tpu.dot_dimension_numbers<[1], [0], [0], [1], [0, 0, 1, 1], [], []>} : vector<16x128xbf16>, vector<128x512xbf16>, vector<16x512xf32> -> vector<16x512xf32>
    %c0_31 = arith.constant 0 : index
    %c0_32 = arith.constant 0 : index
    %46 = vector.load %arg12[%c0_31, %c0_32] : memref<1x512xf32, #tpu.memory_space<vmem>>, vector<1x512xf32>
    %47 = vector.broadcast %46 : vector<1x512xf32> to vector<16x512xf32>
    %48 = arith.addf %45, %47 : vector<16x512xf32>
    %cst_33 = arith.constant 0.00999999977 : f32
    %49 = vector.broadcast %cst_33 : f32 to vector<16x512xf32>
    %50 = arith.mulf %49, %48 : vector<16x512xf32>
    %51 = arith.maximumf %48, %50 : vector<16x512xf32>
    %52 = arith.truncf %51 : vector<16x512xf32> to vector<16x512xbf16>
    %c0_34 = arith.constant 0 : index
    %c0_35 = arith.constant 0 : index
    %53 = vector.load %arg13[%c0_34, %c0_35] : memref<512x512xbf16, #tpu.memory_space<vmem>>, vector<512x512xbf16>
    %cst_36 = arith.constant dense<0.000000e+00> : vector<16x512xf32>
    %54 = tpu.matmul %52, %53, %cst_36 {dimension_numbers = #tpu.dot_dimension_numbers<[1], [0], [0], [1], [0, 0, 1, 1], [], []>} : vector<16x512xbf16>, vector<512x512xbf16>, vector<16x512xf32> -> vector<16x512xf32>
    %c0_37 = arith.constant 0 : index
    %c0_38 = arith.constant 0 : index
    %55 = vector.load %arg14[%c0_37, %c0_38] : memref<1x512xf32, #tpu.memory_space<vmem>>, vector<1x512xf32>
    %56 = vector.broadcast %55 : vector<1x512xf32> to vector<16x512xf32>
    %57 = arith.addf %54, %56 : vector<16x512xf32>
    %cst_39 = arith.constant 0.00999999977 : f32
    %58 = vector.broadcast %cst_39 : f32 to vector<16x512xf32>
    %59 = arith.mulf %58, %57 : vector<16x512xf32>
    %60 = arith.maximumf %57, %59 : vector<16x512xf32>
    %61 = arith.truncf %60 : vector<16x512xf32> to vector<16x512xbf16>
    %c0_40 = arith.constant 0 : index
    %c0_41 = arith.constant 0 : index
    %62 = vector.load %arg15[%c0_40, %c0_41] : memref<512x512xbf16, #tpu.memory_space<vmem>>, vector<512x512xbf16>
    %cst_42 = arith.constant dense<0.000000e+00> : vector<16x512xf32>
    %63 = tpu.matmul %61, %62, %cst_42 {dimension_numbers = #tpu.dot_dimension_numbers<[1], [0], [0], [1], [0, 0, 1, 1], [], []>} : vector<16x512xbf16>, vector<512x512xbf16>, vector<16x512xf32> -> vector<16x512xf32>
    %c0_43 = arith.constant 0 : index
    %c0_44 = arith.constant 0 : index
    %64 = vector.load %arg16[%c0_43, %c0_44] : memref<1x512xf32, #tpu.memory_space<vmem>>, vector<1x512xf32>
    %65 = vector.broadcast %64 : vector<1x512xf32> to vector<16x512xf32>
    %66 = arith.addf %63, %65 : vector<16x512xf32>
    %cst_45 = arith.constant 0.00999999977 : f32
    %67 = vector.broadcast %cst_45 : f32 to vector<16x512xf32>
    %68 = arith.mulf %67, %66 : vector<16x512xf32>
    %69 = arith.maximumf %66, %68 : vector<16x512xf32>
    %70 = arith.truncf %69 : vector<16x512xf32> to vector<16x512xbf16>
    %c0_46 = arith.constant 0 : index
    %c0_47 = arith.constant 0 : index
    %71 = vector.load %arg17[%c0_46, %c0_47] : memref<512x896xbf16, #tpu.memory_space<vmem>>, vector<512x896xbf16>
    %cst_48 = arith.constant dense<0.000000e+00> : vector<16x896xf32>
    %72 = tpu.matmul %70, %71, %cst_48 {dimension_numbers = #tpu.dot_dimension_numbers<[1], [0], [0], [1], [0, 0, 1, 1], [], []>} : vector<16x512xbf16>, vector<512x896xbf16>, vector<16x896xf32> -> vector<16x896xf32>
    %c0_49 = arith.constant 0 : index
    %c0_50 = arith.constant 0 : index
    %73 = vector.load %arg18[%c0_49, %c0_50] : memref<1x896xf32, #tpu.memory_space<vmem>>, vector<1x896xf32>
    %74 = vector.broadcast %73 : vector<1x896xf32> to vector<16x896xf32>
    %75 = arith.addf %72, %74 : vector<16x896xf32>
    %cst_51 = arith.constant 0.000000e+00 : f32
    %76 = vector.broadcast %cst_51 : f32 to vector<16x896xf32>
    %77 = arith.subf %76, %75 : vector<16x896xf32>
    %78 = math.exp %77 : vector<16x896xf32>
    %cst_52 = arith.constant 1.000000e+00 : f32
    %79 = vector.broadcast %cst_52 : f32 to vector<16x896xf32>
    %80 = arith.addf %79, %78 : vector<16x896xf32>
    %81 = tpu.reciprocal %80 {approx = true} : vector<16x896xf32> -> vector<16x896xf32>
    %82 = arith.truncf %81 : vector<16x896xf32> to vector<16x896xbf16>
    %c0_53 = arith.constant 0 : index
    %c0_54 = arith.constant 0 : index
    %83 = vector.load %arg19[%c0_53, %c0_54] : memref<16x896xbf16, #tpu.memory_space<vmem>>, vector<16x896xbf16>
    tpu.vector_store %arg19[%c0_53, %c0_54], %82 {strides = array<i32>} : memref<16x896xbf16, #tpu.memory_space<vmem>>, vector<16x896xbf16>,
    return
  }
  func.func @transform_0(%arg0: i32) -> (i32, i32) {
    %c0_i32 = arith.constant 0 : i32
    %c0_i32_0 = arith.constant 0 : i32
    return %arg0, %c0_i32 : i32, i32
  }
  func.func @transform_1(%arg0: i32) -> (i32, i32) {
    %c0_i32 = arith.constant 0 : i32
    %c0_i32_0 = arith.constant 0 : i32
    return %arg0, %c0_i32 : i32, i32
  }
  func.func @transform_2(%arg0: i32) -> (i32, i32) {
    %c0_i32 = arith.constant 0 : i32
    %c0_i32_0 = arith.constant 0 : i32
    %c0_i32_1 = arith.constant 0 : i32
    return %c0_i32, %c0_i32_0 : i32, i32
  }
  func.func @transform_3(%arg0: i32) -> (i32, i32) {
    %c0_i32 = arith.constant 0 : i32
    %c0_i32_0 = arith.constant 0 : i32
    %c0_i32_1 = arith.constant 0 : i32
    return %c0_i32, %c0_i32_0 : i32, i32
  }
  func.func @transform_4(%arg0: i32) -> (i32, i32) {
    %c0_i32 = arith.constant 0 : i32
    %c0_i32_0 = arith.constant 0 : i32
    %c0_i32_1 = arith.constant 0 : i32
    return %c0_i32, %c0_i32_0 : i32, i32
  }
  func.func @transform_5(%arg0: i32) -> (i32, i32) {
    %c0_i32 = arith.constant 0 : i32
    %c0_i32_0 = arith.constant 0 : i32
    %c0_i32_1 = arith.constant 0 : i32
    return %c0_i32, %c0_i32_0 : i32, i32
  }
  func.func @transform_6(%arg0: i32) -> (i32, i32) {
    %c0_i32 = arith.constant 0 : i32
    %c0_i32_0 = arith.constant 0 : i32
    %c0_i32_1 = arith.constant 0 : i32
    return %c0_i32, %c0_i32_0 : i32, i32
  }
  func.func @transform_7(%arg0: i32) -> (i32, i32) {
    %c0_i32 = arith.constant 0 : i32
    %c0_i32_0 = arith.constant 0 : i32
    %c0_i32_1 = arith.constant 0 : i32
    return %c0_i32, %c0_i32_0 : i32, i32
  }
  func.func @transform_8(%arg0: i32) -> (i32, i32) {
    %c0_i32 = arith.constant 0 : i32
    %c0_i32_0 = arith.constant 0 : i32
    %c0_i32_1 = arith.constant 0 : i32
    return %c0_i32, %c0_i32_0 : i32, i32
  }
  func.func @transform_9(%arg0: i32) -> (i32, i32) {
    %c0_i32 = arith.constant 0 : i32
    %c0_i32_0 = arith.constant 0 : i32
    %c0_i32_1 = arith.constant 0 : i32
    return %c0_i32, %c0_i32_0 : i32, i32
  }
  func.func @transform_10(%arg0: i32) -> (i32, i32) {
    %c0_i32 = arith.constant 0 : i32
    %c0_i32_0 = arith.constant 0 : i32
    %c0_i32_1 = arith.constant 0 : i32
    return %c0_i32, %c0_i32_0 : i32, i32
  }
  func.func @transform_11(%arg0: i32) -> (i32, i32) {
    %c0_i32 = arith.constant 0 : i32
    %c0_i32_0 = arith.constant 0 : i32
    %c0_i32_1 = arith.constant 0 : i32
    return %c0_i32, %c0_i32_0 : i32, i32
  }
  func.func @transform_12(%arg0: i32) -> (i32, i32) {
    %c0_i32 = arith.constant 0 : i32
    %c0_i32_0 = arith.constant 0 : i32
    %c0_i32_1 = arith.constant 0 : i32
    return %c0_i32, %c0_i32_0 : i32, i32
  }
  func.func @transform_13(%arg0: i32) -> (i32, i32) {
    %c0_i32 = arith.constant 0 : i32
    %c0_i32_0 = arith.constant 0 : i32
    %c0_i32_1 = arith.constant 0 : i32
    return %c0_i32, %c0_i32_0 : i32, i32
  }
  func.func @transform_14(%arg0: i32) -> (i32, i32) {
    %c0_i32 = arith.constant 0 : i32
    %c0_i32_0 = arith.constant 0 : i32
    %c0_i32_1 = arith.constant 0 : i32
    return %c0_i32, %c0_i32_0 : i32, i32
  }
  func.func @transform_15(%arg0: i32) -> (i32, i32) {
    %c0_i32 = arith.constant 0 : i32
    %c0_i32_0 = arith.constant 0 : i32
    %c0_i32_1 = arith.constant 0 : i32
    return %c0_i32, %c0_i32_0 : i32, i32
  }
  func.func @transform_16(%arg0: i32) -> (i32, i32) {
    %c0_i32 = arith.constant 0 : i32
    %c0_i32_0 = arith.constant 0 : i32
    %c0_i32_1 = arith.constant 0 : i32
    return %c0_i32, %c0_i32_0 : i32, i32
  }
  func.func @transform_17(%arg0: i32) -> (i32, i32) {
    %c0_i32 = arith.constant 0 : i32
    %c0_i32_0 = arith.constant 0 : i32
    %c0_i32_1 = arith.constant 0 : i32
    return %c0_i32, %c0_i32_0 : i32, i32
  }
  func.func @transform_18(%arg0: i32) -> (i32, i32) {
    %c0_i32 = arith.constant 0 : i32
    %c0_i32_0 = arith.constant 0 : i32
    return %arg0, %c0_i32 : i32, i32
  }
  func.func @transform_19(%arg0: i32) -> (i32, i32) {
    %c0_i32 = arith.constant 0 : i32
    %c0_i32_0 = arith.constant 0 : i32
    return %arg0, %c0_i32 : i32, i32
  }
}

</mosaic_0001>

<bundles_post_ra>
// kernel: vae_forward.1
= control target key start
LH: loop header
LB: loop body
LE: loop exit
PB: predicated region body
PF: predicated region fallthrough
CT: control target
= control target key end

     0   :  { %s14917_s0 = inlined_call_operand.vmem [shape: bf16[16,896], index: 0, kind: input, shape index: {}]   ;;  %s14918_s1 = inlined_call_operand.vmem [shape: bf16[16,128], index: 1, kind: input, shape index: {}]   ;;  %s14919_s2 = inlined_call_operand.hbm [shape: bf16[896,512], index: 2, kind: input, shape index: {}]   ;;  %s14920_s3 = inlined_call_operand.vmem [shape: f32[1,512], index: 3, kind: input, shape index: {}]   ;;  %s14921_s4 = inlined_call_operand.hbm [shape: bf16[512,512], index: 4, kind: input, shape index: {}]   ;;  %s14922_s5 = inlined_call_operand.vmem [shape: f32[1,512], index: 5, kind: input, shape index: {}]   ;;  %s14923_s6 = inlined_call_operand.hbm [shape: bf16[512,512], index: 6, kind: input, shape index: {}]   ;;  %s14924_s7 = inlined_call_operand.vmem [shape: f32[1,512], index: 7, kind: input, shape index: {}]   ;;  %s14925_s8 = inlined_call_operand.hbm [shape: bf16[512,256], index: 8, kind: input, shape index: {}]   ;;  %s14926_s9 = inlined_call_operand.vmem [shape: f32[1,256], index: 9, kind: input, shape index: {}]   ;;  %s14927_s10 = inlined_call_operand.hbm [shape: bf16[128,512], index: 10, kind: input, shape index: {}]   ;;  %s14928_s11 = inlined_call_operand.vmem [shape: f32[1,512], index: 11, kind: input, shape index: {}]   ;;  %s14929_s12 = inlined_call_operand.hbm [shape: bf16[512,512], index: 12, kind: input, shape index: {}]   ;;  %s14930_s13 = inlined_call_operand.vmem [shape: f32[1,512], index: 13, kind: input, shape index: {}]   ;;  %s14931_s14 = inlined_call_operand.hbm [shape: bf16[512,512], index: 14, kind: input, shape index: {}]   ;;  %s14932_s15 = inlined_call_operand.vmem [shape: f32[1,512], index: 15, kind: input, shape index: {}]   ;;  %s14933_s16 = inlined_call_operand.hbm [shape: bf16[512,896], index: 16, kind: input, shape index: {}]   ;;  %s14934_s17 = inlined_call_operand.vmem [shape: f32[1,896], index: 17, kind: input, shape index: {}]   ;;  %s14935_s18 = inlined_call_operand.vmem [shape: bf16[16,896], index: 18, kind: output, shape index: {0}]   ;;  %s14936_s19 = inlined_call_operand.vmem [shape: f32[16,256], index: 19, kind: output, shape index: {1}]  }
   0x1   :  { %14940 = sst [smem:[#allocation20_spill]] %s14917_s0 }
   0x2   :  { %14941 = sst [smem:[#allocation21_spill]] %s14918_s1 }
   0x3   :  { %14942 = sst [smem:[#allocation22_spill]] %s14919_s2 }
   0x4   :  { %14943 = sst [smem:[#allocation23_spill]] %s14920_s3 }
   0x5   :  { %14944 = sst [smem:[#allocation24_spill]] %s14935_s18 }
   0x6   :  { %25 = vsyncpa [#allocation3], 0 }
   0x7   :  { %26 = vsyncpa [#allocation5], 0 }
   0x8   :  { %27 = vsyncpa [#allocation8], 0 }
   0x9   :  { %28 = vsyncpa [#allocation11], 0 }
   0xa   :  { %29 = vsyncpa [#allocation14], 0  ;;  %s53_s20 = sshll.u32 %s14921_s4, 4  ;;  %s14394_s21 = smov [#allocation4]   ;;  %s54_s20 = int_to_ptr.hbm [resolvable:$true] %s53_s20 }
   0xb   :  { %s55_s1 = sshll.u32 %s14394_s21, 4  ;;  %s83_s23 = sshll.u32 %s14925_s8, 4  ;;  %s56_s1 = int_to_ptr.vmem [resolvable:$true] %s55_s1  ;;  %s84_s23 = int_to_ptr.hbm [resolvable:$true] %s83_s23 }
   0xc   :  { %s14395_s24 = smov 256   ;;  %s14396_s25 = smov 16  }
   0xd   :  { %61 = dma.hbm_to_vmem [thread:$0]  %s54_s20, 16384, %s56_s1, [#allocation5], %s14395_s24, %s14395_s24, %s14396_s25  }
   0xe   :  { %s14397_s3 = smov [#allocation7]   ;;  %s14398_s27 = smov 128  }
   0xf   :  { %s85_s26 = sshll.u32 %s14397_s3, 4  ;;  %s14399_s4 = smov 8   ;;  %s86_s26 = int_to_ptr.vmem [resolvable:$true] %s85_s26 }
  0x10   :  { %91 = dma.hbm_to_vmem [thread:$0]  %s84_s23, 8192, %s86_s26, [#allocation8], %s14398_s27, %s14398_s27, %s14399_s4  }
  0x11   :  { %s113_s0 = sshll.u32 %s14929_s12, 4  ;;  %s14400_s30 = smov [#allocation10]   ;;  %s114_s0 = int_to_ptr.hbm [resolvable:$true] %s113_s0 }
  0x12   :  { %s115_s8 = sshll.u32 %s14400_s30, 4  ;;  %s14945_s2 = sld [smem:[#allocation22_spill]]  ;;  %s116_s8 = int_to_ptr.vmem [resolvable:$true] %s115_s8 }
  0x13   :  { %121 = dma.hbm_to_vmem [thread:$0]  %s114_s0, 16384, %s116_s8, [#allocation11], %s14395_s24, %s14395_s24, %s14396_s25  }
  0x14   :  { %s14401_s20 = smov [#allocation2]   ;;  %s68_s26 = sshll.u32 %s14923_s6, 4  ;;  %s69_s26 = int_to_ptr.hbm [resolvable:$true] %s68_s26 }
  0x15   :  { %s40_s1 = sshll.u32 %s14401_s20, 4  ;;  %s98_s4 = sshll.u32 %s14927_s10, 4  ;;  %s41_s1 = int_to_ptr.vmem [resolvable:$true] %s40_s1  ;;  %s99_s4 = int_to_ptr.hbm [resolvable:$true] %s98_s4 }
  0x16   :  { %s14402_s28 = smov [#allocation6]   ;;  %s14403_s0 = smov [#allocation9]  }
  0x17   :  { %s70_s29 = sshll.u32 %s14402_s28, 4  ;;  %s100_s6 = sshll.u32 %s14403_s0, 4  ;;  %s71_s29 = int_to_ptr.vmem [resolvable:$true] %s70_s29  ;;  %s101_s6 = int_to_ptr.vmem [resolvable:$true] %s100_s6 }
  0x18   :  { %s38_s18 = sshll.u32 %s14945_s2, 4  ;;  %s128_s21 = sshll.u32 %s14931_s14, 4  ;;  %s39_s18 = int_to_ptr.hbm [resolvable:$true] %s38_s18  ;;  %s129_s21 = int_to_ptr.hbm [resolvable:$true] %s128_s21 }
  0x19   :  { %46 = dma.hbm_to_vmem [thread:$0]  %s39_s18, 28672, %s41_s1, [#allocation3], %s14395_s24, %s14395_s24, %s14396_s25  }
  0x1a   :  { %76 = dma.hbm_to_vmem [thread:$0]  %s69_s26, 16384, %s71_s29, [#allocation5], %s14395_s24, %s14395_s24, %s14396_s25  }
  0x1b   :  { %106 = dma.hbm_to_vmem [thread:$0]  %s99_s4, 4096, %s101_s6, [#allocation8], %s14395_s24, %s14395_s24, %s14396_s25  }
  0x1c   :  { %s143_s22 = sshll.u32 %s14933_s16, 4  ;;  %s14404_s2 = smov [#allocation12]   ;;  %s144_s22 = int_to_ptr.hbm [resolvable:$true] %s143_s22 }
  0x1d   :  { %s130_s20 = sshll.u32 %s14404_s2, 4  ;;  %s14405_s1 = smov [#allocation13]   ;;  %s131_s20 = int_to_ptr.vmem [resolvable:$true] %s130_s20 }
  0x1e   :  { %136 = dma.hbm_to_vmem [thread:$0]  %s129_s21, 16384, %s131_s20, [#allocation11], %s14395_s24, %s14395_s24, %s14396_s25  }
  0x1f   :  { %s145_s14 = sshll.u32 %s14405_s1, 4  ;;  %s14406_s23 = smov 448   ;;  %s146_s14 = int_to_ptr.vmem [resolvable:$true] %s145_s14 }
  0x20   :  { %s14407_s3 = smov 28  }
  0x21   :  { %151 = dma.hbm_to_vmem [thread:$0]  %s144_s22, 28672, %s146_s14, [#allocation14], %s14406_s23, %s14406_s23, %s14407_s3  }
  0x22   :  { %14384 = dma.done.wait [#allocation3], 28672  }
  0x23   :  { %14385 = vsyncadd [#allocation3], 4294938624 }
  0x24   :  { %14386 = dma.done.wait [#allocation5], 32768  }
  0x25   :  { %14387 = vsyncadd [#allocation5], 4294934528 }
  0x26   :  { %14388 = dma.done.wait [#allocation8], 12288  }
  0x27   :  { %14389 = vsyncadd [#allocation8], 4294955008 }
  0x28   :  { %14390 = dma.done.wait [#allocation11], 32768  }
  0x29   :  { %14391 = vsyncadd [#allocation11], 4294934528 }
  0x2a   :  { %14392 = dma.done.wait [#allocation14], 28672  }
  0x2b   :  { %14393 = vsyncadd [#allocation14], 4294938624  ;;  %v8940_v0 = vld [vmem:[#allocation2 + $0xe0] sm:$0xf]  ;;  %v13087_v1 = vld [vmem:[#allocation2 + $0xec] sm:$0xf0] }
  0x2c   :  { %v9068_v2 = vld [vmem:[#allocation2 + $0x1e0] sm:$0xf]  ;;  %v8941_v3 = vor.u32 %v13087_v1, %v8940_v0  ;;  %v13119_v4 = vld [vmem:[#allocation2 + $0x1ec] sm:$0xf0]  ;;  %s14946_s25 = sld [smem:[#allocation20_spill]] }
  0x2d   :  { %v9196_v5 = vld [vmem:[#allocation2 + $0x2e0] sm:$0xf]  ;;  %v13151_v6 = vld [vmem:[#allocation2 + $0x2ec] sm:$0xf0]  ;;  %v9069_v7 = vor.u32 %v13119_v4, %v9068_v2  ;;  %s14947_s29 = sld [smem:[#allocation23_spill]] }
  0x2e   :  { %v9197_v8 = vor.u32 %v13151_v6, %v9196_v5  ;;  %v9324_v9 = vld [vmem:[#allocation2 + $0x3e0] sm:$0xf]  ;;  %v13183_v10 = vld [vmem:[#allocation2 + $0x3ec] sm:$0xf0]  ;;  %1584 = vmatpush.bf16.msra.mxu0 %v8941_v3  ;;  %s14948_s3 = sld [smem:[#allocation21_spill]] }
  0x2f   :  { %v8924_v11 = vld [vmem:[#allocation2 + $0xc0] sm:$0xf]  ;;  %v9325_v12 = vor.u32 %v13183_v10, %v9324_v9  ;;  %v13083_v13 = vld [vmem:[#allocation2 + $0xcc] sm:$0xf0]  ;;  %1598 = vmatpush.bf16.msra.mxu1 %v9069_v7  ;;  %s14949_s28 = sld [smem:[#allocation24_spill]] }
  0x30   :  { %v9052_v14 = vld [vmem:[#allocation2 + $0x1c0] sm:$0xf]  ;;  %v13115_v15 = vld [vmem:[#allocation2 + $0x1cc] sm:$0xf0]  ;;  %1612 = vmatpush.bf16.msra.mxu2 %v9197_v8  ;;  %v8925_v16 = vor.u32 %v13083_v13, %v8924_v11 }
  0x31   :  { %v9053_v17 = vor.u32 %v13115_v15, %v9052_v14  ;;  %v9180_v18 = vld [vmem:[#allocation2 + $0x2c0] sm:$0xf]  ;;  %v13147_v19 = vld [vmem:[#allocation2 + $0x2cc] sm:$0xf0]  ;;  %1626 = vmatpush.bf16.msra.mxu3 %v9325_v12 }
  0x32   :  { %v9308_v20 = vld [vmem:[#allocation2 + $0x3c0] sm:$0xf]  ;;  %v9181_v21 = vor.u32 %v13147_v19, %v9180_v18  ;;  %v13179_v22 = vld [vmem:[#allocation2 + $0x3cc] sm:$0xf0]  ;;  %1585 = vmatpush.bf16.msra.mxu0 %v8925_v16 }
  0x33   :  { %v8908_v23 = vld [vmem:[#allocation2 + $0xa0] sm:$0xf]  ;;  %v13079_v24 = vld [vmem:[#allocation2 + $0xac] sm:$0xf0]  ;;  %v9309_v25 = vor.u32 %v13179_v22, %v9308_v20  ;;  %1599 = vmatpush.bf16.msra.mxu1 %v9053_v17 }
  0x34   :  { %v9036_v26 = vld [vmem:[#allocation2 + $0x1a0] sm:$0xf]  ;;  %v13111_v27 = vld [vmem:[#allocation2 + $0x1ac] sm:$0xf0]  ;;  %v8909_v29 = vor.u32 %v13079_v24, %v8908_v23  ;;  %1613 = vmatpush.bf16.msra.mxu2 %v9181_v21 }
  0x35   :  { %v9164_v28 = vld [vmem:[#allocation2 + $0x2a0] sm:$0xf]  ;;  %v13143_v30 = vld [vmem:[#allocation2 + $0x2ac] sm:$0xf0]  ;;  %v9037_v33 = vor.u32 %v13111_v27, %v9036_v26  ;;  %1627 = vmatpush.bf16.msra.mxu3 %v9309_v25 }
  0x36   :  { %v9292_v31 = vld [vmem:[#allocation2 + $0x3a0] sm:$0xf]  ;;  %v13175_v32 = vld [vmem:[#allocation2 + $0x3ac] sm:$0xf0]  ;;  %v9165_v34 = vor.u32 %v13143_v30, %v9164_v28  ;;  %1586 = vmatpush.bf16.msra.mxu0 %v8909_v29 }
  0x37   :  { %v8892_v35 = vld [vmem:[#allocation2 + $0x80] sm:$0xf]  ;;  %v13075_v36 = vld [vmem:[#allocation2 + $0x8c] sm:$0xf0]  ;;  %v9293_v38 = vor.u32 %v13175_v32, %v9292_v31  ;;  %1600 = vmatpush.bf16.msra.mxu1 %v9037_v33 }
  0x38   :  { %v9020_v37 = vld [vmem:[#allocation2 + $0x180] sm:$0xf]  ;;  %v13107_v39 = vld [vmem:[#allocation2 + $0x18c] sm:$0xf0]  ;;  %v8893_v44 = vor.u32 %v13075_v36, %v8892_v35  ;;  %1614 = vmatpush.bf16.msra.mxu2 %v9165_v34 }
  0x39   :  { %v9148_v40 = vld [vmem:[#allocation2 + $0x280] sm:$0xf]  ;;  %v13139_v41 = vld [vmem:[#allocation2 + $0x28c] sm:$0xf0]  ;;  %v9021_v45 = vor.u32 %v13107_v39, %v9020_v37  ;;  %1628 = vmatpush.bf16.msra.mxu3 %v9293_v38  ;;  %v13085_v37 = vld [vmem:[#allocation2 + $0xe4] sm:$0xf] }
  0x3a   :  { %v9276_v42 = vld [vmem:[#allocation2 + $0x380] sm:$0xf]  ;;  %v13171_v43 = vld [vmem:[#allocation2 + $0x38c] sm:$0xf0]  ;;  %v9149_v46 = vor.u32 %v13139_v41, %v9148_v40  ;;  %1587 = vmatpush.bf16.msra.mxu0 %v8893_v44  ;;  %v8942_v38 = vld [vmem:[#allocation2 + $0xf0] sm:$0xf0] }
  0x3b   :  { %v8876_v47 = vld [vmem:[#allocation2 + $0x60] sm:$0xf]  ;;  %v13071_v48 = vld [vmem:[#allocation2 + $0x6c] sm:$0xf0]  ;;  %v9277_v50 = vor.u32 %v13171_v43, %v9276_v42  ;;  %1601 = vmatpush.bf16.msra.mxu1 %v9021_v45 }
  0x3c   :  { %v9004_v49 = vld [vmem:[#allocation2 + $0x160] sm:$0xf]  ;;  %v13103_v51 = vld [vmem:[#allocation2 + $0x16c] sm:$0xf0]  ;;  %v8877_v56 = vor.u32 %v13071_v48, %v8876_v47  ;;  %1615 = vmatpush.bf16.msra.mxu2 %v9149_v46  ;;  %v8945_v48 = vor.u32 %v13085_v37, %v8942_v38 }
  0x3d   :  { %v9132_v52 = vld [vmem:[#allocation2 + $0x260] sm:$0xf]  ;;  %v13135_v53 = vld [vmem:[#allocation2 + $0x26c] sm:$0xf0]  ;;  %v9005_v57 = vor.u32 %v13103_v51, %v9004_v49  ;;  %1629 = vmatpush.bf16.msra.mxu3 %v9277_v50  ;;  %v13081_v50 = vld [vmem:[#allocation2 + $0xc4] sm:$0xf] }
  0x3e   :  { %v9260_v54 = vld [vmem:[#allocation2 + $0x360] sm:$0xf]  ;;  %v13167_v55 = vld [vmem:[#allocation2 + $0x36c] sm:$0xf0]  ;;  %v9133_v58 = vor.u32 %v13135_v53, %v9132_v52  ;;  %1588 = vmatpush.bf16.msra.mxu0 %v8877_v56  ;;  %v8926_v51 = vld [vmem:[#allocation2 + $0xd0] sm:$0xf0] }
  0x3f   :  { %v8860_v59 = vld [vmem:[#allocation2 + $0x40] sm:$0xf]  ;;  %v13067_v60 = vld [vmem:[#allocation2 + $0x4c] sm:$0xf0]  ;;  %v9261_v62 = vor.u32 %v13167_v55, %v9260_v54  ;;  %1602 = vmatpush.bf16.msra.mxu1 %v9005_v57  ;;  %v13053_v53 = vld [vmem:[%s14946_s25 + $0x18] sm:$0xf0] }
  0x40   :  { %v8988_v61 = vld [vmem:[#allocation2 + $0x140] sm:$0xf]  ;;  %v13099_v63 = vld [vmem:[#allocation2 + $0x14c] sm:$0xf0]  ;;  %v8861_v4 = vor.u32 %v13067_v60, %v8860_v59  ;;  %1616 = vmatpush.bf16.msra.mxu2 %v9133_v58  ;;  %v8808_v54 = vld [vmem:[%s14946_s25 + $0x8] sm:$0xf] }
  0x41   :  { %v9116_v0 = vld [vmem:[#allocation2 + $0x240] sm:$0xf]  ;;  %v13131_v1 = vld [vmem:[#allocation2 + $0x24c] sm:$0xf0]  ;;  %v8989_v5 = vor.u32 %v13099_v63, %v8988_v61  ;;  %1630 = vmatpush.bf16.msra.mxu3 %v9261_v62  ;;  %v13054_v58 = vld [vmem:[%s14946_s25 + $0x20] sm:$0xf0] }
  0x42   :  { %v9244_v2 = vld [vmem:[#allocation2 + $0x340] sm:$0xf]  ;;  %v13163_v3 = vld [vmem:[#allocation2 + $0x34c] sm:$0xf0]  ;;  %v9117_v6 = vor.u32 %v13131_v1, %v9116_v0  ;;  %1589 = vmatpush.bf16.msra.mxu0 %v8861_v4  ;;  %v14564_v0 = vor.u32 %v13054_v58, %v8808_v54  ;;  %v8929_v1 = vor.u32 %v13081_v50, %v8926_v51  ;;  %v13077_v4 = vld [vmem:[#allocation2 + $0xa4] sm:$0xf] }
  0x43   :  { %v8844_v7 = vld [vmem:[#allocation2 + $0x20] sm:$0xf]  ;;  %v13063_v8 = vld [vmem:[#allocation2 + $0x2c] sm:$0xf0]  ;;  %v9245_v10 = vor.u32 %v13163_v3, %v9244_v2  ;;  %1603 = vmatpush.bf16.msra.mxu1 %v8989_v5  ;;  %v8910_v5 = vld [vmem:[#allocation2 + $0xb0] sm:$0xf0] }
  0x44   :  { %v8972_v9 = vld [vmem:[#allocation2 + $0x120] sm:$0xf]  ;;  %v13095_v11 = vld [vmem:[#allocation2 + $0x12c] sm:$0xf0]  ;;  %v8845_v16 = vor.u32 %v13063_v8, %v8844_v7  ;;  %1617 = vmatpush.bf16.msra.mxu2 %v9117_v6  ;;  %v13050_v6 = vld [vmem:[%s14946_s25 + $0x4] sm:$0xf] }
  0x45   :  { %v9100_v12 = vld [vmem:[#allocation2 + $0x220] sm:$0xf]  ;;  %v13127_v13 = vld [vmem:[#allocation2 + $0x22c] sm:$0xf0]  ;;  %v8973_v19 = vor.u32 %v13095_v11, %v8972_v9  ;;  %1631 = vmatpush.bf16.msra.mxu3 %v9245_v10 }
  0x46   :  { %v9228_v14 = vld [vmem:[#allocation2 + $0x320] sm:$0xf]  ;;  %v13159_v15 = vld [vmem:[#allocation2 + $0x32c] sm:$0xf0]  ;;  %v9101_v20 = vor.u32 %v13127_v13, %v9100_v12  ;;  %1590 = vmatpush.bf16.msra.mxu0 %v8845_v16 }
  0x47   :  { %v8828_v17 = vld [vmem:[#allocation2] sm:$0xf]  ;;  %v13059_v18 = vld [vmem:[#allocation2 + $0xc] sm:$0xf0]  ;;  %v9229_v24 = vor.u32 %v13159_v15, %v9228_v14  ;;  %1604 = vmatpush.bf16.msra.mxu1 %v8973_v19  ;;  %v13051_v19 = vld [vmem:[%s14946_s25 + $0xc] sm:$0xf] }
  0x48   :  { %v8956_v21 = vld [vmem:[#allocation2 + $0x100] sm:$0xf]  ;;  %v13091_v22 = vld [vmem:[#allocation2 + $0x10c] sm:$0xf0]  ;;  %v8829_v31 = vor.u32 %v13059_v18, %v8828_v17  ;;  %1618 = vmatpush.bf16.msra.mxu2 %v9101_v20  ;;  %v8913_v17 = vor.u32 %v13077_v4, %v8910_v5  ;;  %v8810_v20 = vld [vmem:[%s14946_s25 + $0x24] sm:$0xf0] }
  0x49   :  { %v9084_v23 = vld [vmem:[#allocation2 + $0x200] sm:$0xf]  ;;  %v13123_v25 = vld [vmem:[#allocation2 + $0x20c] sm:$0xf0]  ;;  %v8957_v35 = vor.u32 %v13091_v22, %v8956_v21  ;;  %1632 = vmatpush.bf16.msra.mxu3 %v9229_v24  ;;  %v13073_v21 = vld [vmem:[#allocation2 + $0x84] sm:$0xf] }
  0x4a   :  { %v9212_v26 = vld [vmem:[#allocation2 + $0x300] sm:$0xf]  ;;  %v13155_v27 = vld [vmem:[#allocation2 + $0x30c] sm:$0xf0]  ;;  %v9085_v36 = vor.u32 %v13123_v25, %v9084_v23  ;;  %1591 = vmatpush.bf16.msra.mxu0 %v8829_v31  ;;  %v8894_v22 = vld [vmem:[#allocation2 + $0x90] sm:$0xf0]  ;;  %v14583_v23 = vor.u32 %v13051_v19, %v8810_v20 }
  0x4b   :  { %v9452_v28 = vld [vmem:[#allocation2 + $0x4e0] sm:$0xf]  ;;  %v13215_v29 = vld [vmem:[#allocation2 + $0x4ec] sm:$0xf0]  ;;  %v9213_v39 = vor.u32 %v13155_v27, %v9212_v26  ;;  %1605 = vmatpush.bf16.msra.mxu1 %v8957_v35  ;;  %v8878_v35 = vld [vmem:[#allocation2 + $0x70] sm:$0xf0] }
  0x4c   :  { %v9580_v30 = vld [vmem:[#allocation2 + $0x5e0] sm:$0xf]  ;;  %v13247_v32 = vld [vmem:[#allocation2 + $0x5ec] sm:$0xf0]  ;;  %v9453_v40 = vor.u32 %v13215_v29, %v9452_v28  ;;  %1619 = vmatpush.bf16.msra.mxu2 %v9085_v36  ;;  %v9454_v19 = vld [vmem:[#allocation2 + $0x4f0] sm:$0xf0] }
  0x4d   :  { %v9708_v33 = vld [vmem:[#allocation2 + $0x6e0] sm:$0xf]  ;;  %v13279_v34 = vld [vmem:[#allocation2 + $0x6ec] sm:$0xf0]  ;;  %v9581_v43 = vor.u32 %v13247_v32, %v9580_v30  ;;  %1633 = vmatpush.bf16.msra.mxu3 %v9213_v39  ;;  %v8897_v30 = vor.u32 %v13073_v21, %v8894_v22 }
  0x4e   :  { %v9436_v41 = vld [vmem:[#allocation2 + $0x4c0] sm:$0xf]  ;;  %v13211_v42 = vld [vmem:[#allocation2 + $0x4cc] sm:$0xf0]  ;;  %v9709_v44 = vor.u32 %v13279_v34, %v9708_v33  ;;  %1640 = vmatpush.bf16.msrb.mxu0 %v9453_v40  ;;  %v13069_v34 = vld [vmem:[#allocation2 + $0x64] sm:$0xf] }
  0x4f   :  { %v9564_v45 = vld [vmem:[#allocation2 + $0x5c0] sm:$0xf]  ;;  %v13243_v46 = vld [vmem:[#allocation2 + $0x5cc] sm:$0xf0]  ;;  %v9437_v55 = vor.u32 %v13211_v42, %v9436_v41  ;;  %1654 = vmatpush.bf16.msrb.mxu1 %v9581_v43  ;;  %1620 = vmatmul.bf16.vlgmr.msra.gmra.mxu2 %v14564_v0  ;;  %v8881_v42 = vor.u32 %v13069_v34, %v8878_v35  ;;  %v9054_v34 = vld [vmem:[#allocation2 + $0x1d0] sm:$0xf0] }
  0x50   :  { %v9692_v47 = vld [vmem:[#allocation2 + $0x6c0] sm:$0xf]  ;;  %v13275_v49 = vld [vmem:[#allocation2 + $0x6cc] sm:$0xf0]  ;;  %1668 = vmatpush.bf16.msrb.mxu2 %v9709_v44  ;;  %v9565_v59 = vor.u32 %v13243_v46, %v9564_v45  ;;  %1634 = vmatmul.bf16.vlgmr.msra.gmra.mxu3 %v14583_v23  ;;  %v13065_v46 = vld [vmem:[#allocation2 + $0x44] sm:$0xf] }
  0x51   :  { %v8800_v52 = vld [vmem:[%s14946_s25] sm:$0xf]  ;;  %v9693_v60 = vor.u32 %v13275_v49, %v9692_v47  ;;  %v13207_v61 = vld [vmem:[#allocation2 + $0x4ac] sm:$0xf0]  ;;  %1682 = vmatpush.bf16.msrb.mxu3 %v8945_v48  ;;  %v8862_v47 = vld [vmem:[#allocation2 + $0x50] sm:$0xf0] }
  0x52   :  { %v9420_v56 = vld [vmem:[#allocation2 + $0x4a0] sm:$0xf]  ;;  %v14559_v57 = vor.u32 %v13053_v53, %v8800_v52  ;;  %v13239_v63 = vld [vmem:[#allocation2 + $0x5ac] sm:$0xf0]  ;;  %1641 = vmatpush.bf16.msrb.mxu0 %v9437_v55  ;;  %v8865_v54 = vor.u32 %v13065_v46, %v8862_v47  ;;  %v13145_v35 = vld [vmem:[#allocation2 + $0x2c4] sm:$0xf] }
  0x53   :  { %v9548_v62 = vld [vmem:[#allocation2 + $0x5a0] sm:$0xf]  ;;  %v13271_v3 = vld [vmem:[#allocation2 + $0x6ac] sm:$0xf0]  ;;  %v9421_v8 = vor.u32 %v13207_v61, %v9420_v56  ;;  %1655 = vmatpush.bf16.msrb.mxu1 %v9565_v59  ;;  %v13061_v59 = vld [vmem:[#allocation2 + $0x24] sm:$0xf] }
  0x54   :  { %v9676_v2 = vld [vmem:[#allocation2 + $0x6a0] sm:$0xf]  ;;  %1592 = vmatmul.bf16.vlgmr.msra.gmra.mxu0 %v14559_v57  ;;  %v13203_v10 = vld [vmem:[#allocation2 + $0x48c] sm:$0xf0]  ;;  %1669 = vmatpush.bf16.msrb.mxu2 %v9693_v60  ;;  %v9549_v12 = vor.u32 %v13239_v63, %v9548_v62  ;;  %v8846_v60 = vld [vmem:[#allocation2 + $0x30] sm:$0xf0] }
  0x55   :  { %v8802_v7 = vld [vmem:[%s14946_s25 + $0x1c] sm:$0xf0]  ;;  %v9677_v13 = vor.u32 %v13271_v3, %v9676_v2  ;;  %v13235_v15 = vld [vmem:[#allocation2 + $0x58c] sm:$0xf0]  ;;  %1683 = vmatpush.bf16.msrb.mxu3 %v8929_v1 }
  0x56   :  { %v9404_v9 = vld [vmem:[#allocation2 + $0x480] sm:$0xf]  ;;  %v14574_v11 = vor.u32 %v13050_v6, %v8802_v7  ;;  %v13267_v18 = vld [vmem:[#allocation2 + $0x68c] sm:$0xf0]  ;;  %1642 = vmatpush.bf16.msrb.mxu0 %v9421_v8  ;;  %v13057_v7 = vld [vmem:[#allocation2 + $0x4] sm:$0xf]  ;;  %v8849_v8 = vor.u32 %v13061_v59, %v8846_v60 }
  0x57   :  { %v9532_v14 = vld [vmem:[#allocation2 + $0x580] sm:$0xf]  ;;  %v9405_v24 = vor.u32 %v13203_v10, %v9404_v9  ;;  %1656 = vmatpush.bf16.msrb.mxu1 %v9549_v12  ;;  %v13199_v28 = vld [vmem:[#allocation2 + $0x46c] sm:$0xf0]  ;;  %v8830_v9 = vld [vmem:[#allocation2 + $0x10] sm:$0xf0] }
  0x58   :  { %v9660_v16 = vld [vmem:[#allocation2 + $0x680] sm:$0xf]  ;;  %1606 = vmatmul.bf16.vlgmr.msra.gmra.mxu1 %v14574_v11  ;;  %1670 = vmatpush.bf16.msrb.mxu2 %v9677_v13  ;;  %v9533_v25 = vor.u32 %v13235_v15, %v9532_v14  ;;  %v13231_v31 = vld [vmem:[#allocation2 + $0x56c] sm:$0xf0]  ;;  %v13117_v10 = vld [vmem:[#allocation2 + $0x1e4] sm:$0xf] }
  0x59   :  { %v9661_v26 = vor.u32 %v13267_v18, %v9660_v16  ;;  %v9388_v27 = vld [vmem:[#allocation2 + $0x460] sm:$0xf]  ;;  %1684 = vmatpush.bf16.msrb.mxu3 %v8913_v17  ;;  %v13263_v33 = vld [vmem:[#allocation2 + $0x66c] sm:$0xf0]  ;;  %v9070_v12 = vld [vmem:[#allocation2 + $0x1f0] sm:$0xf0] }
  0x5a   :  { %v9516_v29 = vld [vmem:[#allocation2 + $0x560] sm:$0xf]  ;;  %1643 = vmatpush.bf16.msrb.mxu0 %v9405_v24  ;;  %v9389_v36 = vor.u32 %v13199_v28, %v9388_v27  ;;  %v13195_v40 = vld [vmem:[#allocation2 + $0x44c] sm:$0xf0]  ;;  %v13149_v13 = vld [vmem:[#allocation2 + $0x2e4] sm:$0xf]  ;;  %v9073_v27 = vor.u32 %v13117_v10, %v9070_v12 }
  0x5b   :  { %v9644_v32 = vld [vmem:[#allocation2 + $0x660] sm:$0xf]  ;;  %1657 = vmatpush.bf16.msrb.mxu1 %v9533_v25  ;;  %v9517_v37 = vor.u32 %v13231_v31, %v9516_v29  ;;  %v13227_v43 = vld [vmem:[#allocation2 + $0x54c] sm:$0xf0]  ;;  %v9198_v14 = vld [vmem:[#allocation2 + $0x2f0] sm:$0xf0] }
  0x5c   :  { %1671 = vmatpush.bf16.msrb.mxu2 %v9661_v26  ;;  %v9645_v38 = vor.u32 %v13263_v33, %v9644_v32  ;;  %v9372_v39 = vld [vmem:[#allocation2 + $0x440] sm:$0xf]  ;;  %v13259_v45 = vld [vmem:[#allocation2 + $0x64c] sm:$0xf0]  ;;  %v13181_v15 = vld [vmem:[#allocation2 + $0x3e4] sm:$0xf]  ;;  %v8833_v26 = vor.u32 %v13057_v7, %v8830_v9  ;;  %v9201_v31 = vor.u32 %v13149_v13, %v9198_v14 }
  0x5d   :  { %v9500_v41 = vld [vmem:[#allocation2 + $0x540] sm:$0xf]  ;;  %1685 = vmatpush.bf16.msrb.mxu3 %v8897_v30  ;;  %v9373_v48 = vor.u32 %v13195_v40, %v9372_v39  ;;  %v13191_v52 = vld [vmem:[#allocation2 + $0x42c] sm:$0xf0]  ;;  %v9326_v17 = vld [vmem:[#allocation2 + $0x3f0] sm:$0xf0] }
  0x5e   :  { %v9628_v44 = vld [vmem:[#allocation2 + $0x640] sm:$0xf]  ;;  %1644 = vmatpush.bf16.msrb.mxu0 %v9389_v36  ;;  %v9501_v49 = vor.u32 %v13227_v43, %v9500_v41  ;;  %v13223_v55 = vld [vmem:[#allocation2 + $0x52c] sm:$0xf0]  ;;  %v13213_v18 = vld [vmem:[#allocation2 + $0x4e4] sm:$0xf]  ;;  %v9329_v32 = vor.u32 %v13181_v15, %v9326_v17 }
  0x5f   :  { %1658 = vmatpush.bf16.msrb.mxu1 %v9517_v37  ;;  %v9629_v50 = vor.u32 %v13259_v45, %v9628_v44  ;;  %v9356_v51 = vld [vmem:[#allocation2 + $0x420] sm:$0xf]  ;;  %v13255_v58 = vld [vmem:[#allocation2 + $0x62c] sm:$0xf0]  ;;  %v13055_v24 = vld [vmem:[%s14946_s25 + $0x28] sm:$0xf0]  ;;  %v9457_v36 = vor.u32 %v13213_v18, %v9454_v19 }
  0x60   :  { %1672 = vmatpush.bf16.msrb.mxu2 %v9645_v38  ;;  %v9484_v53 = vld [vmem:[#allocation2 + $0x520] sm:$0xf]  ;;  %v9357_v62 = vor.u32 %v13191_v52, %v9356_v51  ;;  %v13187_v63 = vld [vmem:[#allocation2 + $0x40c] sm:$0xf0]  ;;  %v8824_v25 = vld [vmem:[%s14946_s25 + $0x18] sm:$0xf] }
  0x61   :  { %1686 = vmatpush.bf16.msrb.mxu3 %v8881_v42  ;;  %v9612_v56 = vld [vmem:[#allocation2 + $0x620] sm:$0xf]  ;;  %v13219_v2 = vld [vmem:[#allocation2 + $0x50c] sm:$0xf0]  ;;  %v9485_v3 = vor.u32 %v13223_v55, %v9484_v53  ;;  %v13056_v28 = vld [vmem:[%s14946_s25 + $0x30] sm:$0xf0] }
  0x62   :  { %v9340_v61 = vld [vmem:[#allocation2 + $0x400] sm:$0xf]  ;;  %1645 = vmatpush.bf16.msrb.mxu0 %v9373_v48  ;;  %v9613_v4 = vor.u32 %v13255_v58, %v9612_v56  ;;  %v13251_v6 = vld [vmem:[#allocation2 + $0x60c] sm:$0xf0]  ;;  %v13052_v29 = vld [vmem:[%s14946_s25 + $0x14] sm:$0xf]  ;;  %v14606_v41 = vor.u32 %v13056_v28, %v8824_v25 }
  0x63   :  { %v9468_v1 = vld [vmem:[#allocation2 + $0x500] sm:$0xf]  ;;  %1659 = vmatpush.bf16.msrb.mxu1 %v9501_v49  ;;  %v9341_v16 = vor.u32 %v13187_v63, %v9340_v61  ;;  %v8816_v22 = vld [vmem:[%s14946_s25 + $0x10] sm:$0xf]  ;;  %v13113_v33 = vld [vmem:[#allocation2 + $0x1c4] sm:$0xf] }
  0x64   :  { %1673 = vmatpush.bf16.msrb.mxu2 %v9629_v50  ;;  %v9596_v5 = vld [vmem:[#allocation2 + $0x600] sm:$0xf]  ;;  %v9469_v20 = vor.u32 %v13219_v2, %v9468_v1  ;;  %v8818_v30 = vld [vmem:[%s14946_s25 + $0x2c] sm:$0xf0]  ;;  %v14604_v37 = vor.u32 %v13055_v24, %v8816_v22  ;;  %v9182_v38 = vld [vmem:[#allocation2 + $0x2d0] sm:$0xf0]  ;;  %v9057_v45 = vor.u32 %v13113_v33, %v9054_v34 }
  0x65   :  { %1687 = vmatpush.bf16.msrb.mxu3 %v8865_v54  ;;  %v9597_v21 = vor.u32 %v13251_v6, %v9596_v5  ;;  %v13177_v39 = vld [vmem:[#allocation2 + $0x3c4] sm:$0xf]  ;;  %v9310_v40 = vld [vmem:[#allocation2 + $0x3d0] sm:$0xf0]  ;;  %v14608_v42 = vor.u32 %v13052_v29, %v8818_v30  ;;  %v9185_v46 = vor.u32 %v13145_v35, %v9182_v38 }
  0x66   :  { %1646 = vmatpush.bf16.msrb.mxu0 %v9357_v62  ;;  %v13209_v43 = vld [vmem:[#allocation2 + $0x4c4] sm:$0xf]  ;;  %v9438_v44 = vld [vmem:[#allocation2 + $0x4d0] sm:$0xf0]  ;;  %v9313_v47 = vor.u32 %v13177_v39, %v9310_v40 }
  0x67   :  { %1660 = vmatpush.bf16.msrb.mxu1 %v9485_v3  ;;  %v13109_v48 = vld [vmem:[#allocation2 + $0x1a4] sm:$0xf]  ;;  %v9038_v49 = vld [vmem:[#allocation2 + $0x1b0] sm:$0xf0]  ;;  %v9441_v51 = vor.u32 %v13209_v43, %v9438_v44 }
  0x68   :  { %1674 = vmatpush.bf16.msrb.mxu2 %v9613_v4  ;;  %v13141_v50 = vld [vmem:[#allocation2 + $0x2a4] sm:$0xf]  ;;  %v9166_v52 = vld [vmem:[#allocation2 + $0x2b0] sm:$0xf0]  ;;  %v9041_v58 = vor.u32 %v13109_v48, %v9038_v49 }
  0x69   :  { %1688 = vmatpush.bf16.msrb.mxu3 %v8849_v8  ;;  %v13173_v53 = vld [vmem:[#allocation2 + $0x3a4] sm:$0xf]  ;;  %v9294_v54 = vld [vmem:[#allocation2 + $0x3b0] sm:$0xf0]  ;;  %v9169_v59 = vor.u32 %v13141_v50, %v9166_v52 }
  0x6a   :  { %1647 = vmatpush.bf16.msrb.mxu0 %v9341_v16  ;;  %v13205_v55 = vld [vmem:[#allocation2 + $0x4a4] sm:$0xf]  ;;  %v9422_v56 = vld [vmem:[#allocation2 + $0x4b0] sm:$0xf0]  ;;  %v9297_v60 = vor.u32 %v13173_v53, %v9294_v54 }
  0x6b   :  { %1661 = vmatpush.bf16.msrb.mxu1 %v9469_v20  ;;  %v13105_v61 = vld [vmem:[#allocation2 + $0x184] sm:$0xf]  ;;  %v9022_v62 = vld [vmem:[#allocation2 + $0x190] sm:$0xf0]  ;;  %v9425_v1 = vor.u32 %v13205_v55, %v9422_v56 }
  0x6c   :  { %1675 = vmatpush.bf16.msrb.mxu2 %v9597_v21  ;;  %v13137_v63 = vld [vmem:[#allocation2 + $0x284] sm:$0xf]  ;;  %v9150_v2 = vld [vmem:[#allocation2 + $0x290] sm:$0xf0]  ;;  %v9025_v7 = vor.u32 %v13105_v61, %v9022_v62 }
  0x6d   :  { %1689 = vmatpush.bf16.msrb.mxu3 %v8833_v26  ;;  %1648 = vmatmul.bf16.vlgmr.msrb.gmra.mxu0 %v14604_v37  ;;  %v13169_v3 = vld [vmem:[#allocation2 + $0x384] sm:$0xf]  ;;  %v9278_v4 = vld [vmem:[#allocation2 + $0x390] sm:$0xf0]  ;;  %v9153_v8 = vor.u32 %v13137_v63, %v9150_v2 }
  0x6e   :  { %1696 = vmatpush.bf16.msra.mxu0 %v9073_v27  ;;  %1662 = vmatmul.bf16.vlgmr.msrb.gmra.mxu1 %v14608_v42  ;;  %v13201_v5 = vld [vmem:[#allocation2 + $0x484] sm:$0xf]  ;;  %v9406_v6 = vld [vmem:[#allocation2 + $0x490] sm:$0xf0]  ;;  %v9281_v9 = vor.u32 %v13169_v3, %v9278_v4  ;;  %v8948_v3 = vld [vmem:[#allocation2 + $0xe8] sm:$0xf] }
  0x6f   :  { %1710 = vmatpush.bf16.msra.mxu1 %v9201_v31  ;;  %1676 = vmatmul.bf16.vlgmr.msrb.gmra.mxu2 %v14606_v41  ;;  %v13101_v10 = vld [vmem:[#allocation2 + $0x164] sm:$0xf]  ;;  %v9006_v12 = vld [vmem:[#allocation2 + $0x170] sm:$0xf0]  ;;  %v9409_v14 = vor.u32 %v13201_v5, %v9406_v6  ;;  %v13088_v4 = vld [vmem:[#allocation2 + $0xf4] sm:$0xf0] }
  0x70   :  { %1724 = vmatpush.bf16.msra.mxu2 %v9329_v32  ;;  %1690 = vmatmul.bf16.vlgmr.msrb.gmra.mxu3 %v14559_v57  ;;  %v13133_v13 = vld [vmem:[#allocation2 + $0x264] sm:$0xf]  ;;  %v9134_v15 = vld [vmem:[#allocation2 + $0x270] sm:$0xf0]  ;;  %v9009_v20 = vor.u32 %v13101_v10, %v9006_v12 }
  0x71   :  { %1738 = vmatpush.bf16.msra.mxu3 %v9457_v36  ;;  %v13165_v16 = vld [vmem:[#allocation2 + $0x364] sm:$0xf]  ;;  %v9262_v17 = vld [vmem:[#allocation2 + $0x370] sm:$0xf0]  ;;  %v9137_v21 = vor.u32 %v13133_v13, %v9134_v15  ;;  %v8949_v13 = vor.u32 %v13088_v4, %v8948_v3 }
  0x72   :  { %1697 = vmatpush.bf16.msra.mxu0 %v9057_v45  ;;  %v13197_v18 = vld [vmem:[#allocation2 + $0x464] sm:$0xf]  ;;  %v9390_v19 = vld [vmem:[#allocation2 + $0x470] sm:$0xf0]  ;;  %v9265_v22 = vor.u32 %v13165_v16, %v9262_v17 }
  0x73   :  { %1711 = vmatpush.bf16.msra.mxu1 %v9185_v46  ;;  %v13097_v24 = vld [vmem:[#allocation2 + $0x144] sm:$0xf]  ;;  %v8990_v25 = vld [vmem:[#allocation2 + $0x150] sm:$0xf0]  ;;  %v9393_v27 = vor.u32 %v13197_v18, %v9390_v19  ;;  %v8932_v19 = vld [vmem:[#allocation2 + $0xc8] sm:$0xf] }
  0x74   :  { %1725 = vmatpush.bf16.msra.mxu2 %v9313_v47  ;;  %v13129_v26 = vld [vmem:[#allocation2 + $0x244] sm:$0xf]  ;;  %v9118_v28 = vld [vmem:[#allocation2 + $0x250] sm:$0xf0]  ;;  %v8993_v33 = vor.u32 %v13097_v24, %v8990_v25 }
  0x75   :  { %1739 = vmatpush.bf16.msra.mxu3 %v9441_v51  ;;  %v13161_v29 = vld [vmem:[#allocation2 + $0x344] sm:$0xf]  ;;  %v9246_v30 = vld [vmem:[#allocation2 + $0x350] sm:$0xf0]  ;;  %v9121_v34 = vor.u32 %v13129_v26, %v9118_v28 }
  0x76   :  { %1698 = vmatpush.bf16.msra.mxu0 %v9041_v58  ;;  %v13193_v31 = vld [vmem:[#allocation2 + $0x444] sm:$0xf]  ;;  %v9374_v32 = vld [vmem:[#allocation2 + $0x450] sm:$0xf0]  ;;  %v9249_v35 = vor.u32 %v13161_v29, %v9246_v30 }
  0x77   :  { %1712 = vmatpush.bf16.msra.mxu1 %v9169_v59  ;;  %v13093_v36 = vld [vmem:[#allocation2 + $0x124] sm:$0xf]  ;;  %v8974_v38 = vld [vmem:[#allocation2 + $0x130] sm:$0xf0]  ;;  %v9377_v40 = vor.u32 %v13193_v31, %v9374_v32  ;;  %v8916_v32 = vld [vmem:[#allocation2 + $0xa8] sm:$0xf] }
  0x78   :  { %1726 = vmatpush.bf16.msra.mxu2 %v9297_v60  ;;  %v13125_v39 = vld [vmem:[#allocation2 + $0x224] sm:$0xf]  ;;  %v9102_v43 = vld [vmem:[#allocation2 + $0x230] sm:$0xf0]  ;;  %v8977_v48 = vor.u32 %v13093_v36, %v8974_v38 }
  0x79   :  { %1740 = vmatpush.bf16.msra.mxu3 %v9425_v1  ;;  %v13157_v44 = vld [vmem:[#allocation2 + $0x324] sm:$0xf]  ;;  %v9230_v45 = vld [vmem:[#allocation2 + $0x330] sm:$0xf0]  ;;  %v9105_v51 = vor.u32 %v13125_v39, %v9102_v43 }
  0x7a   :  { %1699 = vmatpush.bf16.msra.mxu0 %v9025_v7  ;;  %v13189_v46 = vld [vmem:[#allocation2 + $0x424] sm:$0xf]  ;;  %v9358_v47 = vld [vmem:[#allocation2 + $0x430] sm:$0xf0]  ;;  %v9233_v52 = vor.u32 %v13157_v44, %v9230_v45  ;;  %v9076_v7 = vld [vmem:[#allocation2 + $0x1e8] sm:$0xf] }
  0x7b   :  { %1713 = vmatpush.bf16.msra.mxu1 %v9153_v8  ;;  %v13089_v49 = vld [vmem:[#allocation2 + $0x104] sm:$0xf]  ;;  %v8958_v50 = vld [vmem:[#allocation2 + $0x110] sm:$0xf0]  ;;  %v9361_v56 = vor.u32 %v13189_v46, %v9358_v47  ;;  %v13120_v8 = vld [vmem:[#allocation2 + $0x1f4] sm:$0xf0] }
  0x7c   :  { %1727 = vmatpush.bf16.msra.mxu2 %v9281_v9  ;;  %v13121_v53 = vld [vmem:[#allocation2 + $0x204] sm:$0xf]  ;;  %v9086_v54 = vld [vmem:[#allocation2 + $0x210] sm:$0xf0]  ;;  %v8961_v1 = vor.u32 %v13089_v49, %v8958_v50  ;;  %v9077_v17 = vor.u32 %v13120_v8, %v9076_v7  ;;  %v8900_v47 = vld [vmem:[#allocation2 + $0x88] sm:$0xf] }
  0x7d   :  { %1741 = vmatpush.bf16.msra.mxu3 %v9409_v14  ;;  %v13153_v55 = vld [vmem:[#allocation2 + $0x304] sm:$0xf]  ;;  %v9214_v58 = vld [vmem:[#allocation2 + $0x310] sm:$0xf0]  ;;  %v9089_v5 = vor.u32 %v13121_v53, %v9086_v54  ;;  %v9028_v49 = vld [vmem:[#allocation2 + $0x188] sm:$0xf] }
  0x7e   :  { %1700 = vmatpush.bf16.msra.mxu0 %v9009_v20  ;;  %v13185_v59 = vld [vmem:[#allocation2 + $0x404] sm:$0xf]  ;;  %v9342_v60 = vld [vmem:[#allocation2 + $0x410] sm:$0xf0]  ;;  %v9217_v6 = vor.u32 %v13153_v55, %v9214_v58  ;;  %v13084_v20 = vld [vmem:[#allocation2 + $0xd4] sm:$0xf0] }
  0x7f   :  { %1714 = vmatpush.bf16.msra.mxu1 %v9137_v21  ;;  %v13245_v61 = vld [vmem:[#allocation2 + $0x5e4] sm:$0xf]  ;;  %v9582_v62 = vld [vmem:[#allocation2 + $0x5f0] sm:$0xf0]  ;;  %v9345_v9 = vor.u32 %v13185_v59, %v9342_v60  ;;  %v9060_v21 = vld [vmem:[#allocation2 + $0x1c8] sm:$0xf]  ;;  %v8933_v26 = vor.u32 %v13084_v20, %v8932_v19 }
  0x80   :  { %1728 = vmatpush.bf16.msra.mxu2 %v9265_v22  ;;  %v13277_v63 = vld [vmem:[#allocation2 + $0x6e4] sm:$0xf]  ;;  %v9710_v2 = vld [vmem:[#allocation2 + $0x6f0] sm:$0xf0]  ;;  %v9585_v10 = vor.u32 %v13245_v61, %v9582_v62  ;;  %v13116_v22 = vld [vmem:[#allocation2 + $0x1d4] sm:$0xf0] }
  0x81   :  { %1742 = vmatpush.bf16.msra.mxu3 %v9393_v27  ;;  %v9713_v12 = vor.u32 %v13277_v63, %v9710_v2  ;;  %v13241_v14 = vld [vmem:[#allocation2 + $0x5c4] sm:$0xf]  ;;  %v9566_v15 = vld [vmem:[#allocation2 + $0x5d0] sm:$0xf0]  ;;  %v9061_v30 = vor.u32 %v13116_v22, %v9060_v21  ;;  %v13108_v50 = vld [vmem:[#allocation2 + $0x194] sm:$0xf0] }
  0x82   :  { %1701 = vmatpush.bf16.msra.mxu0 %v8993_v33  ;;  %v13273_v16 = vld [vmem:[#allocation2 + $0x6c4] sm:$0xf]  ;;  %v9694_v18 = vld [vmem:[#allocation2 + $0x6d0] sm:$0xf0]  ;;  %v9569_v24 = vor.u32 %v13241_v14, %v9566_v15  ;;  %v13080_v33 = vld [vmem:[#allocation2 + $0xb4] sm:$0xf0]  ;;  %v9029_v58 = vor.u32 %v13108_v50, %v9028_v49 }
  0x83   :  { %1715 = vmatpush.bf16.msra.mxu1 %v9121_v34  ;;  %v9697_v25 = vor.u32 %v13273_v16, %v9694_v18  ;;  %v13237_v27 = vld [vmem:[#allocation2 + $0x5a4] sm:$0xf]  ;;  %v9550_v28 = vld [vmem:[#allocation2 + $0x5b0] sm:$0xf0]  ;;  %v9044_v34 = vld [vmem:[#allocation2 + $0x1a8] sm:$0xf]  ;;  %v8917_v39 = vor.u32 %v13080_v33, %v8916_v32 }
  0x84   :  { %1729 = vmatpush.bf16.msra.mxu2 %v9249_v35  ;;  %v13269_v29 = vld [vmem:[#allocation2 + $0x6a4] sm:$0xf]  ;;  %v9678_v31 = vld [vmem:[#allocation2 + $0x6b0] sm:$0xf0]  ;;  %v13112_v35 = vld [vmem:[#allocation2 + $0x1b4] sm:$0xf0]  ;;  %v9553_v36 = vor.u32 %v13237_v27, %v9550_v28 }
  0x85   :  { %1743 = vmatpush.bf16.msra.mxu3 %v9377_v40  ;;  %v9681_v38 = vor.u32 %v13269_v29, %v9678_v31  ;;  %v13233_v40 = vld [vmem:[#allocation2 + $0x584] sm:$0xf]  ;;  %v9534_v43 = vld [vmem:[#allocation2 + $0x590] sm:$0xf0]  ;;  %v9045_v45 = vor.u32 %v13112_v35, %v9044_v34  ;;  %v8884_v60 = vld [vmem:[#allocation2 + $0x68] sm:$0xf] }
  0x86   :  { %1702 = vmatpush.bf16.msra.mxu0 %v8977_v48  ;;  %v13265_v44 = vld [vmem:[#allocation2 + $0x684] sm:$0xf]  ;;  %v9662_v46 = vld [vmem:[#allocation2 + $0x690] sm:$0xf0]  ;;  %v13076_v48 = vld [vmem:[#allocation2 + $0x94] sm:$0xf0] }
  0x87   :  { %1716 = vmatpush.bf16.msra.mxu1 %v9105_v51  ;;  %v9537_v51 = vor.u32 %v13233_v40, %v9534_v43  ;;  %v8901_v53 = vor.u32 %v13076_v48, %v8900_v47  ;;  %v13229_v54 = vld [vmem:[#allocation2 + $0x564] sm:$0xf]  ;;  %v9518_v55 = vld [vmem:[#allocation2 + $0x570] sm:$0xf0]  ;;  %v13072_v61 = vld [vmem:[#allocation2 + $0x74] sm:$0xf0] }
  0x88   :  { %1730 = vmatpush.bf16.msra.mxu2 %v9233_v52  ;;  %v9665_v52 = vor.u32 %v13265_v44, %v9662_v46  ;;  %v9646_v59 = vld [vmem:[#allocation2 + $0x670] sm:$0xf0]  ;;  %v9012_v62 = vld [vmem:[#allocation2 + $0x168] sm:$0xf]  ;;  %v13104_v63 = vld [vmem:[#allocation2 + $0x174] sm:$0xf0]  ;;  %v8885_v3 = vor.u32 %v13072_v61, %v8884_v60 }
  0x89   :  { %1744 = vmatpush.bf16.msra.mxu3 %v9361_v56  ;;  %v13261_v56 = vld [vmem:[#allocation2 + $0x664] sm:$0xf]  ;;  %v9013_v7 = vor.u32 %v13104_v63, %v9012_v62  ;;  %v9630_v8 = vld [vmem:[#allocation2 + $0x650] sm:$0xf0]  ;;  %v8852_v22 = vld [vmem:[#allocation2 + $0x28] sm:$0xf] }
  0x8a   :  { %1703 = vmatpush.bf16.msra.mxu0 %v8961_v1  ;;  %v9521_v1 = vor.u32 %v13229_v54, %v9518_v55  ;;  %v9649_v2 = vor.u32 %v13261_v56, %v9646_v59  ;;  %v13225_v4 = vld [vmem:[#allocation2 + $0x544] sm:$0xf]  ;;  %v9486_v18 = vld [vmem:[#allocation2 + $0x530] sm:$0xf0]  ;;  %v8836_v34 = vld [vmem:[#allocation2 + $0x8] sm:$0xf] }
  0x8b   :  { %1717 = vmatpush.bf16.msra.mxu1 %v9089_v5  ;;  %v9502_v5 = vld [vmem:[#allocation2 + $0x550] sm:$0xf0]  ;;  %v13253_v19 = vld [vmem:[#allocation2 + $0x624] sm:$0xf]  ;;  %v9204_v40 = vld [vmem:[#allocation2 + $0x2e8] sm:$0xf] }
  0x8c   :  { %1731 = vmatpush.bf16.msra.mxu2 %v9217_v6  ;;  %v13257_v6 = vld [vmem:[#allocation2 + $0x644] sm:$0xf]  ;;  %v9505_v14 = vor.u32 %v13225_v4, %v9502_v5  ;;  %v9614_v21 = vld [vmem:[#allocation2 + $0x630] sm:$0xf0]  ;;  %v13152_v43 = vld [vmem:[#allocation2 + $0x2f4] sm:$0xf0] }
  0x8d   :  { %1745 = vmatpush.bf16.msra.mxu3 %v9345_v9  ;;  %1704 = vmatmul.bf16.vlgmr.msra.gmra.mxu0 %v14574_v11  ;;  %v8868_v9 = vld [vmem:[#allocation2 + $0x48] sm:$0xf]  ;;  %v9633_v15 = vor.u32 %v13257_v6, %v9630_v8  ;;  %v13217_v28 = vld [vmem:[#allocation2 + $0x504] sm:$0xf]  ;;  %v9470_v29 = vld [vmem:[#allocation2 + $0x510] sm:$0xf0]  ;;  %v9205_v54 = vor.u32 %v13152_v43, %v9204_v40 }
  0x8e   :  { %1752 = vmatpush.bf16.msrb.mxu0 %v9585_v10  ;;  %1718 = vmatmul.bf16.vlgmr.msra.gmra.mxu1 %v14564_v0  ;;  %v13068_v10 = vld [vmem:[#allocation2 + $0x54] sm:$0xf0]  ;;  %v13249_v32 = vld [vmem:[#allocation2 + $0x604] sm:$0xf]  ;;  %v9598_v33 = vld [vmem:[#allocation2 + $0x610] sm:$0xf0] }
  0x8f   :  { %1766 = vmatpush.bf16.msrb.mxu1 %v9713_v12  ;;  %1732 = vmatmul.bf16.vlgmr.msra.gmra.mxu2 %v14583_v23  ;;  %v8996_v12 = vld [vmem:[#allocation2 + $0x148] sm:$0xf]  ;;  %v8869_v16 = vor.u32 %v13068_v10, %v8868_v9  ;;  %v13184_v46 = vld [vmem:[#allocation2 + $0x3f4] sm:$0xf0]  ;;  %v9601_v49 = vor.u32 %v13249_v32, %v9598_v33 }
  0x90   :  { %1780 = vmatpush.bf16.msrb.mxu2 %v8949_v13  ;;  %1746 = vmatmul.bf16.vlgmr.msra.gmra.mxu3 %v14604_v37  ;;  %v13100_v13 = vld [vmem:[#allocation2 + $0x154] sm:$0xf0]  ;;  %v9332_v44 = vld [vmem:[#allocation2 + $0x3e8] sm:$0xf] }
  0x91   :  { %1794 = vmatpush.bf16.msrb.mxu3 %v9077_v17  ;;  %v13221_v17 = vld [vmem:[#allocation2 + $0x524] sm:$0xf]  ;;  %v8997_v20 = vor.u32 %v13100_v13, %v8996_v12  ;;  %v9460_v47 = vld [vmem:[#allocation2 + $0x4e8] sm:$0xf]  ;;  %v13216_v48 = vld [vmem:[#allocation2 + $0x4f4] sm:$0xf0]  ;;  %v9333_v55 = vor.u32 %v13184_v46, %v9332_v44 }
  0x92   :  { %1753 = vmatpush.bf16.msrb.mxu0 %v9569_v24  ;;  %v13064_v24 = vld [vmem:[#allocation2 + $0x34] sm:$0xf0]  ;;  %v9489_v27 = vor.u32 %v13221_v17, %v9486_v18  ;;  %v9461_v56 = vor.u32 %v13216_v48, %v9460_v47  ;;  %v9316_v60 = vld [vmem:[#allocation2 + $0x3c8] sm:$0xf] }
  0x93   :  { %1767 = vmatpush.bf16.msrb.mxu1 %v9697_v25  ;;  %v8980_v25 = vld [vmem:[#allocation2 + $0x128] sm:$0xf]  ;;  %v8853_v31 = vor.u32 %v13064_v24, %v8852_v22  ;;  %v13148_v59 = vld [vmem:[#allocation2 + $0x2d4] sm:$0xf0] }
  0x94   :  { %1781 = vmatpush.bf16.msrb.mxu2 %v8933_v26  ;;  %v13096_v26 = vld [vmem:[#allocation2 + $0x134] sm:$0xf0]  ;;  %v9444_v63 = vld [vmem:[#allocation2 + $0x4c8] sm:$0xf] }
  0x95   :  { %1795 = vmatpush.bf16.msrb.mxu3 %v9061_v30  ;;  %v9617_v30 = vor.u32 %v13253_v19, %v9614_v21  ;;  %v8981_v35 = vor.u32 %v13096_v26, %v8980_v25  ;;  %v13180_v62 = vld [vmem:[#allocation2 + $0x3d4] sm:$0xf0]  ;;  %v9300_v9 = vld [vmem:[#allocation2 + $0x3a8] sm:$0xf] }
  0x96   :  { %1754 = vmatpush.bf16.msrb.mxu0 %v9553_v36  ;;  %v13060_v36 = vld [vmem:[#allocation2 + $0x14] sm:$0xf0]  ;;  %v9317_v5 = vor.u32 %v13180_v62, %v9316_v60  ;;  %v9428_v13 = vld [vmem:[#allocation2 + $0x4a8] sm:$0xf] }
  0x97   :  { %1768 = vmatpush.bf16.msrb.mxu1 %v9681_v38  ;;  %v8964_v38 = vld [vmem:[#allocation2 + $0x108] sm:$0xf]  ;;  %v8837_v50 = vor.u32 %v13060_v36, %v8836_v34  ;;  %v13144_v8 = vld [vmem:[#allocation2 + $0x2b4] sm:$0xf0] }
  0x98   :  { %1782 = vmatpush.bf16.msrb.mxu2 %v8917_v39  ;;  %v13092_v39 = vld [vmem:[#allocation2 + $0x114] sm:$0xf0]  ;;  %v9284_v22 = vld [vmem:[#allocation2 + $0x388] sm:$0xf] }
  0x99   :  { %1796 = vmatpush.bf16.msrb.mxu3 %v9045_v45  ;;  %v9473_v45 = vor.u32 %v13217_v28, %v9470_v29  ;;  %v13176_v12 = vld [vmem:[#allocation2 + $0x3b4] sm:$0xf0]  ;;  %v9412_v26 = vld [vmem:[#allocation2 + $0x488] sm:$0xf] }
  0x9a   :  { %1755 = vmatpush.bf16.msrb.mxu0 %v9537_v51  ;;  %v9588_v51 = vld [vmem:[#allocation2 + $0x5e8] sm:$0xf]  ;;  %v9301_v18 = vor.u32 %v13176_v12, %v9300_v9  ;;  %v13140_v21 = vld [vmem:[#allocation2 + $0x294] sm:$0xf0] }
  0x9b   :  { %1769 = vmatpush.bf16.msrb.mxu1 %v9665_v52  ;;  %v13248_v52 = vld [vmem:[#allocation2 + $0x5f4] sm:$0xf0]  ;;  %v9540_v28 = vld [vmem:[#allocation2 + $0x588] sm:$0xf] }
  0x9c   :  { %1783 = vmatpush.bf16.msrb.mxu2 %v8901_v53  ;;  %v8965_v53 = vor.u32 %v13092_v39, %v8964_v38  ;;  %v9589_v61 = vor.u32 %v13248_v52, %v9588_v51  ;;  %v13172_v25 = vld [vmem:[#allocation2 + $0x394] sm:$0xf0]  ;;  %v9140_v33 = vld [vmem:[#allocation2 + $0x268] sm:$0xf] }
  0x9d   :  { %1797 = vmatpush.bf16.msrb.mxu3 %v9029_v58  ;;  %v9188_v58 = vld [vmem:[#allocation2 + $0x2c8] sm:$0xf]  ;;  %v13236_v29 = vld [vmem:[#allocation2 + $0x594] sm:$0xf0] }
  0x9e   :  { %1756 = vmatpush.bf16.msrb.mxu0 %v9521_v1  ;;  %v13212_v1 = vld [vmem:[#allocation2 + $0x4d4] sm:$0xf0]  ;;  %v9189_v4 = vor.u32 %v13148_v59, %v9188_v58  ;;  %v9541_v36 = vor.u32 %v13236_v29, %v9540_v28  ;;  %v9396_v39 = vld [vmem:[#allocation2 + $0x468] sm:$0xf] }
  0x9f   :  { %1770 = vmatpush.bf16.msrb.mxu1 %v9649_v2  ;;  %v9572_v2 = vld [vmem:[#allocation2 + $0x5c8] sm:$0xf]  ;;  %v9445_v6 = vor.u32 %v13212_v1, %v9444_v63  ;;  %v13136_v34 = vld [vmem:[#allocation2 + $0x274] sm:$0xf0] }
  0xa0   :  { %1784 = vmatpush.bf16.msrb.mxu2 %v8885_v3  ;;  %v13244_v3 = vld [vmem:[#allocation2 + $0x5d4] sm:$0xf0]  ;;  %v9524_v43 = vld [vmem:[#allocation2 + $0x568] sm:$0xf] }
  0xa1   :  { %1798 = vmatpush.bf16.msrb.mxu3 %v9013_v7  ;;  %v9172_v7 = vld [vmem:[#allocation2 + $0x2a8] sm:$0xf]  ;;  %v9573_v10 = vor.u32 %v13244_v3, %v9572_v2  ;;  %v13168_v38 = vld [vmem:[#allocation2 + $0x374] sm:$0xf0] }
  0xa2   :  { %1757 = vmatpush.bf16.msrb.mxu0 %v9505_v14  ;;  %v13208_v14 = vld [vmem:[#allocation2 + $0x4b4] sm:$0xf0]  ;;  %v9173_v17 = vor.u32 %v13144_v8, %v9172_v7  ;;  %v9124_v48 = vld [vmem:[#allocation2 + $0x248] sm:$0xf] }
  0xa3   :  { %1771 = vmatpush.bf16.msrb.mxu1 %v9633_v15  ;;  %v9556_v15 = vld [vmem:[#allocation2 + $0x5a8] sm:$0xf]  ;;  %v9429_v19 = vor.u32 %v13208_v14, %v9428_v13  ;;  %v13200_v40 = vld [vmem:[#allocation2 + $0x474] sm:$0xf0] }
  0xa4   :  { %1785 = vmatpush.bf16.msrb.mxu2 %v8869_v16  ;;  %v13240_v16 = vld [vmem:[#allocation2 + $0x5b4] sm:$0xf0]  ;;  %v9397_v47 = vor.u32 %v13200_v40, %v9396_v39  ;;  %v9236_v63 = vld [vmem:[#allocation2 + $0x328] sm:$0xf]  ;;  %v13082_v39 = vld [vmem:[#allocation2 + $0xcc] sm:$0xf] }
  0xa5   :  { %1799 = vmatpush.bf16.msrb.mxu3 %v8997_v20  ;;  %v9156_v20 = vld [vmem:[#allocation2 + $0x288] sm:$0xf]  ;;  %v9557_v24 = vor.u32 %v13240_v16, %v9556_v15  ;;  %v13232_v44 = vld [vmem:[#allocation2 + $0x574] sm:$0xf0] }
  0xa6   :  { %1758 = vmatpush.bf16.msrb.mxu0 %v9489_v27  ;;  %v13204_v27 = vld [vmem:[#allocation2 + $0x494] sm:$0xf0]  ;;  %v9525_v51 = vor.u32 %v13232_v44, %v9524_v43  ;;  %v9364_v3 = vld [vmem:[#allocation2 + $0x428] sm:$0xf]  ;;  %v8934_v43 = vld [vmem:[#allocation2 + $0xd8] sm:$0xf0] }
  0xa7   :  { %1772 = vmatpush.bf16.msrb.mxu1 %v9617_v30  ;;  %v9157_v30 = vor.u32 %v13140_v21, %v9156_v20  ;;  %v9413_v32 = vor.u32 %v13204_v27, %v9412_v26  ;;  %v13164_v52 = vld [vmem:[#allocation2 + $0x354] sm:$0xf0]  ;;  %v9092_v8 = vld [vmem:[#allocation2 + $0x208] sm:$0xf]  ;;  %v13118_v26 = vld [vmem:[#allocation2 + $0x1ec] sm:$0xf] }
  0xa8   :  { %1786 = vmatpush.bf16.msrb.mxu2 %v8853_v31  ;;  %v9285_v31 = vor.u32 %v13172_v25, %v9284_v22  ;;  %v13128_v62 = vld [vmem:[#allocation2 + $0x234] sm:$0xf0]  ;;  %v9220_v13 = vld [vmem:[#allocation2 + $0x308] sm:$0xf]  ;;  %v13086_v22 = vld [vmem:[#allocation2 + $0xec] sm:$0xf] }
  0xa9   :  { %1800 = vmatpush.bf16.msrb.mxu3 %v8981_v35  ;;  %v9268_v35 = vld [vmem:[#allocation2 + $0x368] sm:$0xf]  ;;  %v13160_v2 = vld [vmem:[#allocation2 + $0x334] sm:$0xf0]  ;;  %v8950_v25 = vld [vmem:[#allocation2 + $0xf8] sm:$0xf0] }
  0xaa   :  { %1759 = vmatpush.bf16.msrb.mxu0 %v9473_v45  ;;  %v9141_v45 = vor.u32 %v13136_v34, %v9140_v33  ;;  %v9269_v46 = vor.u32 %v13168_v38, %v9268_v35  ;;  %v13124_v9 = vld [vmem:[#allocation2 + $0x214] sm:$0xf0]  ;;  %v9348_v15 = vld [vmem:[#allocation2 + $0x408] sm:$0xf]  ;;  %v9078_v27 = vld [vmem:[#allocation2 + $0x1f8] sm:$0xf0]  ;;  %v8953_v34 = vor.u32 %v13086_v22, %v8950_v25 }
  0xab   :  { %1773 = vmatpush.bf16.msrb.mxu1 %v9601_v49  ;;  %v13132_v49 = vld [vmem:[#allocation2 + $0x254] sm:$0xf0]  ;;  %v9716_v20 = vld [vmem:[#allocation2 + $0x6e8] sm:$0xf]  ;;  %v9081_v35 = vor.u32 %v13118_v26, %v9078_v27  ;;  %v13114_v44 = vld [vmem:[#allocation2 + $0x1cc] sm:$0xf] }
  0xac   :  { %1787 = vmatpush.bf16.msrb.mxu2 %v8837_v50  ;;  %v9252_v50 = vld [vmem:[#allocation2 + $0x348] sm:$0xf]  ;;  %v9125_v58 = vor.u32 %v13132_v49, %v9124_v48  ;;  %v13156_v14 = vld [vmem:[#allocation2 + $0x314] sm:$0xf0]  ;;  %v8937_v49 = vor.u32 %v13082_v39, %v8934_v43  ;;  %v9142_v22 = vld [vmem:[#allocation2 + $0x278] sm:$0xf0] }
  0xad   :  { %1801 = vmatpush.bf16.msrb.mxu3 %v8965_v53  ;;  %1760 = vmatmul.bf16.vlgmr.msrb.gmra.mxu0 %v14608_v42  ;;  %v9380_v53 = vld [vmem:[#allocation2 + $0x448] sm:$0xf]  ;;  %v9253_v59 = vor.u32 %v13164_v52, %v9252_v50  ;;  %v13280_v21 = vld [vmem:[#allocation2 + $0x6f4] sm:$0xf0]  ;;  %v9221_v28 = vor.u32 %v13156_v14, %v9220_v13 }
  0xae   :  { %1808 = vmatpush.bf16.msra.mxu0 %v9205_v54  ;;  %1774 = vmatmul.bf16.vlgmr.msrb.gmra.mxu1 %v14606_v41  ;;  %v13196_v54 = vld [vmem:[#allocation2 + $0x454] sm:$0xf0]  ;;  %v9717_v33 = vor.u32 %v13280_v21, %v9716_v20  ;;  %v9652_v14 = vld [vmem:[#allocation2 + $0x668] sm:$0xf]  ;;  %v9014_v20 = vld [vmem:[#allocation2 + $0x178] sm:$0xf0] }
  0xaf   :  { %1822 = vmatpush.bf16.msra.mxu1 %v9333_v55  ;;  %1788 = vmatmul.bf16.vlgmr.msrb.gmra.mxu2 %v14559_v57  ;;  %v9508_v55 = vld [vmem:[#allocation2 + $0x548] sm:$0xf]  ;;  %v9381_v60 = vor.u32 %v13196_v54, %v9380_v53  ;;  %v13276_v38 = vld [vmem:[#allocation2 + $0x6d4] sm:$0xf0]  ;;  %v13078_v53 = vld [vmem:[#allocation2 + $0xac] sm:$0xf] }
  0xb0   :  { %1836 = vmatpush.bf16.msra.mxu2 %v9461_v56  ;;  %1802 = vmatmul.bf16.vlgmr.msrb.gmra.mxu3 %v14574_v11  ;;  %v13228_v56 = vld [vmem:[#allocation2 + $0x554] sm:$0xf0]  ;;  %v13134_v21 = vld [vmem:[#allocation2 + $0x26c] sm:$0xf]  ;;  %v9636_v27 = vld [vmem:[#allocation2 + $0x648] sm:$0xf] }
  0xb1   :  { %1850 = vmatpush.bf16.msra.mxu3 %v9589_v61  ;;  %v9108_v61 = vld [vmem:[#allocation2 + $0x228] sm:$0xf]  ;;  %v9509_v1 = vor.u32 %v13228_v56, %v9508_v55  ;;  %v13272_v52 = vld [vmem:[#allocation2 + $0x6b4] sm:$0xf0]  ;;  %v8918_v55 = vld [vmem:[#allocation2 + $0xb8] sm:$0xf0] }
  0xb2   :  { %1809 = vmatpush.bf16.msra.mxu0 %v9189_v4  ;;  %v13192_v4 = vld [vmem:[#allocation2 + $0x434] sm:$0xf0]  ;;  %v9109_v7 = vor.u32 %v13128_v62, %v9108_v61  ;;  %v13110_v56 = vld [vmem:[#allocation2 + $0x1ac] sm:$0xf]  ;;  %v8921_v62 = vor.u32 %v13078_v53, %v8918_v55 }
  0xb3   :  { %1823 = vmatpush.bf16.msra.mxu1 %v9317_v5  ;;  %v9492_v5 = vld [vmem:[#allocation2 + $0x528] sm:$0xf]  ;;  %v9365_v12 = vor.u32 %v13192_v4, %v9364_v3  ;;  %v13074_v3 = vld [vmem:[#allocation2 + $0x8c] sm:$0xf]  ;;  %v13256_v43 = vld [vmem:[#allocation2 + $0x634] sm:$0xf0] }
  0xb4   :  { %1837 = vmatpush.bf16.msra.mxu2 %v9445_v6  ;;  %v13224_v6 = vld [vmem:[#allocation2 + $0x534] sm:$0xf0] }
  0xb5   :  { %1851 = vmatpush.bf16.msra.mxu3 %v9573_v10  ;;  %v9237_v10 = vor.u32 %v13160_v2, %v9236_v63  ;;  %v9493_v16 = vor.u32 %v13224_v6, %v9492_v5  ;;  %v13268_v2 = vld [vmem:[#allocation2 + $0x694] sm:$0xf0]  ;;  %v8902_v5 = vld [vmem:[#allocation2 + $0x98] sm:$0xf0]  ;;  %v13106_v6 = vld [vmem:[#allocation2 + $0x18c] sm:$0xf] }
  0xb6   :  { %1810 = vmatpush.bf16.msra.mxu0 %v9173_v17  ;;  %v13188_v17 = vld [vmem:[#allocation2 + $0x414] sm:$0xf0] }
  0xb7   :  { %1824 = vmatpush.bf16.msra.mxu1 %v9301_v18  ;;  %v9476_v18 = vld [vmem:[#allocation2 + $0x508] sm:$0xf]  ;;  %v9349_v29 = vor.u32 %v13188_v17, %v9348_v15  ;;  %v13264_v15 = vld [vmem:[#allocation2 + $0x674] sm:$0xf0] }
  0xb8   :  { %1838 = vmatpush.bf16.msra.mxu2 %v9429_v19  ;;  %v13220_v19 = vld [vmem:[#allocation2 + $0x514] sm:$0xf0] }
  0xb9   :  { %1852 = vmatpush.bf16.msra.mxu3 %v9557_v24  ;;  %v9093_v24 = vor.u32 %v13124_v9, %v9092_v8  ;;  %v13138_v8 = vld [vmem:[#allocation2 + $0x28c] sm:$0xf]  ;;  %v9158_v9 = vld [vmem:[#allocation2 + $0x298] sm:$0xf0]  ;;  %v13252_v53 = vld [vmem:[#allocation2 + $0x614] sm:$0xf0] }
  0xba   :  { %1811 = vmatpush.bf16.msra.mxu0 %v9157_v30  ;;  %v13150_v30 = vld [vmem:[#allocation2 + $0x2ec] sm:$0xf]  ;;  %v9161_v17 = vor.u32 %v13138_v8, %v9158_v9 }
  0xbb   :  { %1825 = vmatpush.bf16.msra.mxu1 %v9285_v31  ;;  %v9206_v31 = vld [vmem:[#allocation2 + $0x2f8] sm:$0xf0] }
  0xbc   :  { %1839 = vmatpush.bf16.msra.mxu2 %v9413_v32  ;;  %v9477_v32 = vor.u32 %v13220_v19, %v9476_v18  ;;  %v9209_v40 = vor.u32 %v13150_v30, %v9206_v31  ;;  %v8886_v18 = vld [vmem:[#allocation2 + $0x78] sm:$0xf0]  ;;  %v13102_v19 = vld [vmem:[#allocation2 + $0x16c] sm:$0xf]  ;;  %v9145_v30 = vor.u32 %v13134_v21, %v9142_v22 }
  0xbd   :  { %1853 = vmatpush.bf16.msra.mxu3 %v9541_v36  ;;  %v9700_v36 = vld [vmem:[#allocation2 + $0x6c8] sm:$0xf]  ;;  %v9017_v26 = vor.u32 %v13102_v19, %v9014_v20  ;;  %v8870_v31 = vld [vmem:[#allocation2 + $0x58] sm:$0xf0]  ;;  %v13210_v19 = vld [vmem:[#allocation2 + $0x4cc] sm:$0xf] }
  0xbe   :  { %1812 = vmatpush.bf16.msra.mxu0 %v9141_v45  ;;  %v9062_v45 = vld [vmem:[#allocation2 + $0x1d8] sm:$0xf0]  ;;  %v9701_v48 = vor.u32 %v13276_v38, %v9700_v36  ;;  %v13242_v22 = vld [vmem:[#allocation2 + $0x5cc] sm:$0xf] }
  0xbf   :  { %1826 = vmatpush.bf16.msra.mxu1 %v9269_v46  ;;  %v13146_v46 = vld [vmem:[#allocation2 + $0x2cc] sm:$0xf]  ;;  %v9065_v50 = vor.u32 %v13114_v44, %v9062_v45  ;;  %v9446_v21 = vld [vmem:[#allocation2 + $0x4d8] sm:$0xf0] }
  0xc0   :  { %1840 = vmatpush.bf16.msra.mxu2 %v9397_v47  ;;  %v9190_v47 = vld [vmem:[#allocation2 + $0x2d8] sm:$0xf0]  ;;  %v13062_v44 = vld [vmem:[#allocation2 + $0x2c] sm:$0xf] }
  0xc1   :  { %1854 = vmatpush.bf16.msra.mxu3 %v9525_v51  ;;  %v9684_v51 = vld [vmem:[#allocation2 + $0x6a8] sm:$0xf]  ;;  %v9193_v54 = vor.u32 %v13146_v46, %v9190_v47  ;;  %v8854_v46 = vld [vmem:[#allocation2 + $0x38] sm:$0xf0]  ;;  %v13094_v47 = vld [vmem:[#allocation2 + $0x12c] sm:$0xf] }
  0xc2   :  { %1813 = vmatpush.bf16.msra.mxu0 %v9125_v58  ;;  %v9046_v58 = vld [vmem:[#allocation2 + $0x1b8] sm:$0xf0]  ;;  %v9685_v61 = vor.u32 %v13272_v52, %v9684_v51  ;;  %v9604_v52 = vld [vmem:[#allocation2 + $0x608] sm:$0xf] }
  0xc3   :  { %1827 = vmatpush.bf16.msra.mxu1 %v9253_v59  ;;  %v13142_v59 = vld [vmem:[#allocation2 + $0x2ac] sm:$0xf]  ;;  %v9049_v63 = vor.u32 %v13110_v56, %v9046_v58  ;;  %v8838_v58 = vld [vmem:[#allocation2 + $0x18] sm:$0xf0] }
  0xc4   :  { %1841 = vmatpush.bf16.msra.mxu2 %v9381_v60  ;;  %v9174_v60 = vld [vmem:[#allocation2 + $0x2b8] sm:$0xf0]  ;;  %v13058_v56 = vld [vmem:[#allocation2 + $0xc] sm:$0xf] }
  0xc5   :  { %1855 = vmatpush.bf16.msra.mxu3 %v9509_v1  ;;  %v9668_v1 = vld [vmem:[#allocation2 + $0x688] sm:$0xf]  ;;  %v9177_v4 = vor.u32 %v13142_v59, %v9174_v60  ;;  %v13090_v59 = vld [vmem:[#allocation2 + $0x10c] sm:$0xf]  ;;  %v8841_v8 = vor.u32 %v13058_v56, %v8838_v58  ;;  %v9270_v56 = vld [vmem:[#allocation2 + $0x378] sm:$0xf0] }
  0xc6   :  { %1814 = vmatpush.bf16.msra.mxu0 %v9109_v7  ;;  %v9030_v7 = vld [vmem:[#allocation2 + $0x198] sm:$0xf0]  ;;  %v13198_v58 = vld [vmem:[#allocation2 + $0x46c] sm:$0xf] }
  0xc7   :  { %1828 = vmatpush.bf16.msra.mxu1 %v9237_v10  ;;  %v9669_v10 = vor.u32 %v13268_v2, %v9668_v1  ;;  %v9033_v13 = vor.u32 %v13106_v6, %v9030_v7  ;;  %v13182_v1 = vld [vmem:[#allocation2 + $0x3ec] sm:$0xf]  ;;  %v9334_v2 = vld [vmem:[#allocation2 + $0x3f8] sm:$0xf0] }
  0xc8   :  { %1842 = vmatpush.bf16.msra.mxu2 %v9365_v12  ;;  %v8905_v12 = vor.u32 %v13074_v3, %v8902_v5  ;;  %v13214_v3 = vld [vmem:[#allocation2 + $0x4ec] sm:$0xf]  ;;  %v9462_v5 = vld [vmem:[#allocation2 + $0x4f8] sm:$0xf0] }
  0xc9   :  { %1856 = vmatpush.bf16.msra.mxu3 %v9493_v16  ;;  %v13070_v16 = vld [vmem:[#allocation2 + $0x6c] sm:$0xf]  ;;  %v9590_v7 = vld [vmem:[#allocation2 + $0x5f8] sm:$0xf0] }
  0xca   :  { %1815 = vmatpush.bf16.msra.mxu0 %v9093_v24  ;;  %v9653_v24 = vor.u32 %v13264_v15, %v9652_v14  ;;  %v8889_v25 = vor.u32 %v13070_v16, %v8886_v18  ;;  %v13246_v6 = vld [vmem:[#allocation2 + $0x5ec] sm:$0xf]  ;;  %v9337_v14 = vor.u32 %v13182_v1, %v9334_v2  ;;  %v9465_v15 = vor.u32 %v13214_v3, %v9462_v5  ;;  %v9318_v18 = vld [vmem:[#allocation2 + $0x3d8] sm:$0xf0] }
  0xcb   :  { %1829 = vmatpush.bf16.msra.mxu1 %v9221_v28  ;;  %v13260_v28 = vld [vmem:[#allocation2 + $0x654] sm:$0xf0]  ;;  %v9593_v16 = vor.u32 %v13246_v6, %v9590_v7  ;;  %v13262_v1 = vld [vmem:[#allocation2 + $0x66c] sm:$0xf]  ;;  %v9654_v2 = vld [vmem:[#allocation2 + $0x678] sm:$0xf0] }
  0xcc   :  { %1843 = vmatpush.bf16.msra.mxu2 %v9349_v29  ;;  %v13066_v29 = vld [vmem:[#allocation2 + $0x4c] sm:$0xf]  ;;  %v9637_v36 = vor.u32 %v13260_v28, %v9636_v27  ;;  %v9449_v28 = vor.u32 %v13210_v19, %v9446_v21 }
  0xcd   :  { %1857 = vmatpush.bf16.msra.mxu3 %v9477_v32  ;;  %1816 = vmatmul.bf16.vlgmr.msra.gmra.mxu0 %v14564_v0  ;;  %v13098_v32 = vld [vmem:[#allocation2 + $0x14c] sm:$0xf]  ;;  %v8873_v38 = vor.u32 %v13066_v29, %v8870_v31  ;;  %v9302_v31 = vld [vmem:[#allocation2 + $0x3b8] sm:$0xf0] }
  0xce   :  { %1864 = vmatpush.bf16.msrb.mxu0 %v9717_v33  ;;  %1830 = vmatmul.bf16.vlgmr.msra.gmra.mxu1 %v14583_v23  ;;  %v8998_v33 = vld [vmem:[#allocation2 + $0x158] sm:$0xf0]  ;;  %v13162_v7 = vld [vmem:[#allocation2 + $0x34c] sm:$0xf] }
  0xcf   :  { %1878 = vmatpush.bf16.msrb.mxu1 %v8953_v34  ;;  %1844 = vmatmul.bf16.vlgmr.msra.gmra.mxu2 %v14604_v37  ;;  %v13130_v34 = vld [vmem:[#allocation2 + $0x24c] sm:$0xf]  ;;  %v9001_v39 = vor.u32 %v13098_v32, %v8998_v33 }
  0xd0   :  { %1892 = vmatpush.bf16.msrb.mxu2 %v9081_v35  ;;  %1858 = vmatmul.bf16.vlgmr.msra.gmra.mxu3 %v14608_v42  ;;  %v9126_v35 = vld [vmem:[#allocation2 + $0x258] sm:$0xf0]  ;;  %v13206_v32 = vld [vmem:[#allocation2 + $0x4ac] sm:$0xf] }
  0xd1   :  { %1906 = vmatpush.bf16.msrb.mxu3 %v9209_v40  ;;  %v9620_v40 = vld [vmem:[#allocation2 + $0x628] sm:$0xf]  ;;  %v9129_v45 = vor.u32 %v13130_v34, %v9126_v35  ;;  %v9430_v34 = vld [vmem:[#allocation2 + $0x4b8] sm:$0xf0]  ;;  %v13238_v35 = vld [vmem:[#allocation2 + $0x5ac] sm:$0xf] }
  0xd2   :  { %1865 = vmatpush.bf16.msrb.mxu0 %v9701_v48  ;;  %v8982_v48 = vld [vmem:[#allocation2 + $0x138] sm:$0xf0]  ;;  %v9621_v51 = vor.u32 %v13256_v43, %v9620_v40  ;;  %v9433_v43 = vor.u32 %v13206_v32, %v9430_v34  ;;  %v13154_v34 = vld [vmem:[#allocation2 + $0x30c] sm:$0xf] }
  0xd3   :  { %1879 = vmatpush.bf16.msrb.mxu1 %v8937_v49  ;;  %v13126_v49 = vld [vmem:[#allocation2 + $0x22c] sm:$0xf]  ;;  %v8985_v55 = vor.u32 %v13094_v47, %v8982_v48 }
  0xd4   :  { %1893 = vmatpush.bf16.msrb.mxu2 %v9065_v50  ;;  %v9110_v50 = vld [vmem:[#allocation2 + $0x238] sm:$0xf0]  ;;  %v13202_v47 = vld [vmem:[#allocation2 + $0x48c] sm:$0xf] }
  0xd5   :  { %1907 = vmatpush.bf16.msrb.mxu3 %v9193_v54  ;;  %v8857_v54 = vor.u32 %v13062_v44, %v8854_v46  ;;  %v9113_v60 = vor.u32 %v13126_v49, %v9110_v50  ;;  %v9286_v46 = vld [vmem:[#allocation2 + $0x398] sm:$0xf0]  ;;  %v13234_v50 = vld [vmem:[#allocation2 + $0x58c] sm:$0xf] }
  0xd6   :  { %1866 = vmatpush.bf16.msrb.mxu0 %v9685_v61  ;;  %v8966_v61 = vld [vmem:[#allocation2 + $0x118] sm:$0xf0] }
  0xd7   :  { %1880 = vmatpush.bf16.msrb.mxu1 %v8921_v62  ;;  %v13122_v62 = vld [vmem:[#allocation2 + $0x20c] sm:$0xf]  ;;  %v8969_v9 = vor.u32 %v13090_v59, %v8966_v61  ;;  %v9414_v49 = vld [vmem:[#allocation2 + $0x498] sm:$0xf0] }
  0xd8   :  { %1894 = vmatpush.bf16.msrb.mxu2 %v9049_v63  ;;  %v9094_v63 = vld [vmem:[#allocation2 + $0x218] sm:$0xf0]  ;;  %v13230_v61 = vld [vmem:[#allocation2 + $0x56c] sm:$0xf] }
  0xd9   :  { %1908 = vmatpush.bf16.msrb.mxu3 %v9177_v4  ;;  %v9605_v4 = vor.u32 %v13252_v53, %v9604_v52  ;;  %v13266_v52 = vld [vmem:[#allocation2 + $0x68c] sm:$0xf] }
  0xda   :  { %1867 = vmatpush.bf16.msrb.mxu0 %v9669_v10  ;;  %v13278_v10 = vld [vmem:[#allocation2 + $0x6ec] sm:$0xf] }
  0xdb   :  { %1881 = vmatpush.bf16.msrb.mxu1 %v8905_v12  ;;  %v9718_v12 = vld [vmem:[#allocation2 + $0x6f8] sm:$0xf0] }
  0xdc   :  { %1895 = vmatpush.bf16.msrb.mxu2 %v9033_v13  ;;  %v9097_v13 = vor.u32 %v13122_v62, %v9094_v63  ;;  %v9721_v20 = vor.u32 %v13278_v10, %v9718_v12  ;;  %v9526_v62 = vld [vmem:[#allocation2 + $0x578] sm:$0xf0]  ;;  %v14632_v63 = vpop.f32.mrf.mxu1  ;;  %v9657_v10 = vor.u32 %v13262_v1, %v9654_v2  ;;  %v9820_v1 = vld [vmem:[#allocation4 + $0xc0] sm:$0xf]  ;;  %v13307_v2 = vld [vmem:[#allocation4 + $0xcc] sm:$0xf0] }
  0xdd   :  { %1909 = vmatpush.bf16.msrb.mxu3 %v9161_v17  ;;  %v13178_v17 = vld [vmem:[#allocation2 + $0x3cc] sm:$0xf]  ;;  %v9529_v6 = vor.u32 %v13230_v61, %v9526_v62  ;;  %v9382_v12 = vld [vmem:[#allocation2 + $0x458] sm:$0xf0] }
  0xde   :  { %1868 = vmatpush.bf16.msrb.mxu0 %v9653_v24  ;;  %v9574_v24 = vld [vmem:[#allocation2 + $0x5d8] sm:$0xf0]  ;;  %v9321_v27 = vor.u32 %v13178_v17, %v9318_v18  ;;  %v14639_v17 = vld [vmem:[%s14947_s29] sm:$0xf] }
  0xdf   :  { %1882 = vmatpush.bf16.msrb.mxu1 %v8889_v25  ;;  %v13274_v25 = vld [vmem:[#allocation2 + $0x6cc] sm:$0xf]  ;;  %v9577_v29 = vor.u32 %v13242_v22, %v9574_v24  ;;  %v9238_v24 = vld [vmem:[#allocation2 + $0x338] sm:$0xf0]  ;;  %v420_v32 = vperm.slane %v14639_v17, 0 }
  0xe0   :  { %1896 = vmatpush.bf16.msrb.mxu2 %v9017_v26  ;;  %v9702_v26 = vld [vmem:[#allocation2 + $0x6d8] sm:$0xf0]  ;;  %v13158_v22 = vld [vmem:[#allocation2 + $0x32c] sm:$0xf] }
  0xe1   :  { %1910 = vmatpush.bf16.msrb.mxu3 %v9145_v30  ;;  %v13174_v30 = vld [vmem:[#allocation2 + $0x3ac] sm:$0xf]  ;;  %v9705_v33 = vor.u32 %v13274_v25, %v9702_v26 }
  0xe2   :  { %1869 = vmatpush.bf16.msrb.mxu0 %v9637_v36  ;;  %v9558_v36 = vld [vmem:[#allocation2 + $0x5b8] sm:$0xf0]  ;;  %v9305_v40 = vor.u32 %v13174_v30, %v9302_v31  ;;  %v13190_v25 = vld [vmem:[#allocation2 + $0x42c] sm:$0xf] }
  0xe3   :  { %1883 = vmatpush.bf16.msrb.mxu1 %v8873_v38  ;;  %v13270_v38 = vld [vmem:[#allocation2 + $0x6ac] sm:$0xf]  ;;  %v9561_v44 = vor.u32 %v13238_v35, %v9558_v36  ;;  %v9622_v31 = vld [vmem:[#allocation2 + $0x638] sm:$0xf0] }
  0xe4   :  { %1897 = vmatpush.bf16.msrb.mxu2 %v9001_v39  ;;  %v9686_v39 = vld [vmem:[#allocation2 + $0x6b8] sm:$0xf0]  ;;  %v13254_v30 = vld [vmem:[#allocation2 + $0x62c] sm:$0xf]  ;;  %v1609_v35 = vpop.f32.mrf.mxu1 }
  0xe5   :  { %1911 = vmatpush.bf16.msrb.mxu3 %v9129_v45  ;;  %v13170_v45 = vld [vmem:[#allocation2 + $0x38c] sm:$0xf]  ;;  %v9689_v48 = vor.u32 %v13270_v38, %v9686_v39  ;;  %v9222_v39 = vld [vmem:[#allocation2 + $0x318] sm:$0xf0] }
  0xe6   :  { %1870 = vmatpush.bf16.msrb.mxu0 %v9621_v51  ;;  %v14630_v51 = vpop.f32.mrf.mxu0  ;;  %v9289_v53 = vor.u32 %v13170_v45, %v9286_v46  ;;  %v13218_v45 = vld [vmem:[#allocation2 + $0x50c] sm:$0xf]  ;;  %v9478_v46 = vld [vmem:[#allocation2 + $0x518] sm:$0xf0] }
  0xe7   :  { %1884 = vmatpush.bf16.msrb.mxu1 %v8857_v54 }
  0xe8   :  { %1898 = vmatpush.bf16.msrb.mxu2 %v8985_v55  ;;  %v13166_v55 = vld [vmem:[#allocation2 + $0x36c] sm:$0xf] }
  0xe9   :  { %1912 = vmatpush.bf16.msrb.mxu3 %v9113_v60  ;;  %v9398_v60 = vld [vmem:[#allocation2 + $0x478] sm:$0xf0]  ;;  %v9273_v3 = vor.u32 %v13166_v55, %v9270_v56  ;;  %v1594_v55 = vadd.f32 %v14630_v51, %v420_v32  ;;  %v9821_v51 = vor.u32 %v13307_v2, %v9820_v1  ;;  %v13315_v1 = vld [vmem:[#allocation4 + $0x10c] sm:$0xf0]  ;;  %v13309_v2 = vld [vmem:[#allocation4 + $0xe4] sm:$0xf] }
  0xea   :  { %1871 = vmatpush.bf16.msrb.mxu0 %v9605_v4  ;;  %v14634_v4 = vpop.f32.mrf.mxu2  ;;  %v9401_v5 = vor.u32 %v13198_v58, %v9398_v60  ;;  %v9481_v58 = vor.u32 %v13218_v45, %v9478_v46 }
  0xeb   :  { %1885 = vmatpush.bf16.msrb.mxu1 %v8841_v8  ;;  %v9254_v8 = vld [vmem:[#allocation2 + $0x358] sm:$0xf0] }
  0xec   :  { %1899 = vmatpush.bf16.msrb.mxu2 %v8969_v9  ;;  %v13194_v9 = vld [vmem:[#allocation2 + $0x44c] sm:$0xf]  ;;  %v9257_v18 = vor.u32 %v13162_v7, %v9254_v8  ;;  %v1608_v7 = vadd.f32 %v14632_v63, %v1594_v55  ;;  %v1663_v8 = vpop.f32.mrf.mxu1 }
  0xed   :  { %1913 = vmatpush.bf16.msrb.mxu3 %v9097_v13  ;;  %1872 = vmatmul.bf16.vlgmr.msrb.gmra.mxu0 %v14606_v41  ;;  %v13226_v13 = vld [vmem:[#allocation2 + $0x54c] sm:$0xf] }
  0xee   :  { %1920 = vmatpush.bf16.msra.mxu0 %v9337_v14  ;;  %1886 = vmatmul.bf16.vlgmr.msrb.gmra.mxu1 %v14559_v57  ;;  %v9417_v57 = vor.u32 %v13202_v47, %v9414_v49  ;;  %v9510_v14 = vld [vmem:[#allocation2 + $0x558] sm:$0xf0]  ;;  %v1595_v19 = vpop.f32.mrf.mxu0  ;;  %v13250_v47 = vld [vmem:[#allocation2 + $0x60c] sm:$0xf]  ;;  %v1635_v49 = vpop.f32.mrf.mxu3  ;;  %v1622_v63 = vadd.f32 %v14634_v4, %v1608_v7  ;;  %v9772_v4 = vld [vmem:[#allocation4 + $0x60] sm:$0xf] }
  0xef   :  { %1934 = vmatpush.bf16.msra.mxu1 %v9465_v15  ;;  %1900 = vmatmul.bf16.vlgmr.msrb.gmra.mxu2 %v14574_v11  ;;  %v9542_v11 = vld [vmem:[#allocation2 + $0x598] sm:$0xf0]  ;;  %v13258_v15 = vld [vmem:[#allocation2 + $0x64c] sm:$0xf]  ;;  %v9513_v21 = vor.u32 %v13226_v13, %v9510_v14  ;;  %v9932_v14 = vld [vmem:[#allocation4 + $0x1a0] sm:$0xf] }
  0xf0   :  { %1948 = vmatpush.bf16.msra.mxu2 %v9593_v16  ;;  %1914 = vmatmul.bf16.vlgmr.msrb.gmra.mxu3 %v14564_v0  ;;  %v9670_v0 = vld [vmem:[#allocation2 + $0x698] sm:$0xf0]  ;;  %v9545_v54 = vor.u32 %v13234_v50, %v9542_v11  ;;  %v9836_v11 = vld [vmem:[#allocation4 + $0xe0] sm:$0xf]  ;;  %v13375_v7 = vld [vmem:[#allocation4 + $0x2ec] sm:$0xf0] }
  0xf1   :  { %1962 = vmatpush.bf16.msra.mxu3 %v9721_v20  ;;  %v9673_v59 = vor.u32 %v13266_v52, %v9670_v0  ;;  %v9638_v16 = vld [vmem:[#allocation2 + $0x658] sm:$0xf0]  ;;  %v9385_v20 = vor.u32 %v13194_v9, %v9382_v12  ;;  %v13311_v52 = vld [vmem:[#allocation4 + $0xec] sm:$0xf0]  ;;  %v1596_v0 = vadd.f32 %v1595_v19, %v420_v32 }
  0xf2   :  { %1921 = vmatpush.bf16.msra.mxu0 %v9321_v27  ;;  %v9641_v26 = vor.u32 %v13258_v15, %v9638_v16  ;;  %v9366_v27 = vld [vmem:[#allocation2 + $0x438] sm:$0xf0]  ;;  %v9837_v60 = vor.u32 %v13311_v52, %v9836_v11  ;;  %v13303_v12 = vld [vmem:[#allocation4 + $0xac] sm:$0xf0]  ;;  %v421_v11 = vperm.slane %v14639_v17, 1 }
  0xf3   :  { %1935 = vmatpush.bf16.msra.mxu1 %v9449_v28  ;;  %v13222_v28 = vld [vmem:[#allocation2 + $0x52c] sm:$0xf]  ;;  %v9369_v36 = vor.u32 %v13190_v25, %v9366_v27  ;;  %v9606_v50 = vld [vmem:[#allocation2 + $0x618] sm:$0xf0]  ;;  %v13335_v15 = vld [vmem:[#allocation4 + $0x1ac] sm:$0xf0] }
  0xf4   :  { %1949 = vmatpush.bf16.msra.mxu2 %v9577_v29  ;;  %v9494_v29 = vld [vmem:[#allocation2 + $0x538] sm:$0xf0]  ;;  %v13331_v25 = vld [vmem:[#allocation4 + $0x18c] sm:$0xf0]  ;;  %v1665_v32 = vpop.f32.mrf.mxu1  ;;  %v9868_v52 = vld [vmem:[#allocation4 + $0x120] sm:$0xf] }
  0xf5   :  { %1963 = vmatpush.bf16.msra.mxu3 %v9705_v33  ;;  %v9241_v33 = vor.u32 %v13158_v22, %v9238_v24  ;;  %v9497_v38 = vor.u32 %v13222_v28, %v9494_v29  ;;  %v9916_v24 = vld [vmem:[#allocation4 + $0x180] sm:$0xf]  ;;  %v13295_v28 = vld [vmem:[#allocation4 + $0x6c] sm:$0xf0] }
  0xf6   :  { %1922 = vmatpush.bf16.msra.mxu0 %v9305_v40  ;;  %v13186_v40 = vld [vmem:[#allocation2 + $0x40c] sm:$0xf]  ;;  %v1649_v61 = vpop.f32.mrf.mxu0  ;;  %v1637_v16 = vpop.f32.mrf.mxu3  ;;  %v9917_v27 = vor.u32 %v13331_v25, %v9916_v24  ;;  %v10076_v24 = vld [vmem:[#allocation4 + $0x2c0] sm:$0xf]  ;;  %v13371_v25 = vld [vmem:[#allocation4 + $0x2cc] sm:$0xf0] }
  0xf7   :  { %1936 = vmatpush.bf16.msra.mxu1 %v9433_v43  ;;  %v9350_v43 = vld [vmem:[#allocation2 + $0x418] sm:$0xf0] }
  0xf8   :  { %1950 = vmatpush.bf16.msra.mxu2 %v9561_v44  ;;  %v9625_v44 = vor.u32 %v13254_v30, %v9622_v31  ;;  %v9353_v56 = vor.u32 %v13186_v40, %v9350_v43  ;;  %v9900_v30 = vld [vmem:[#allocation4 + $0x160] sm:$0xf] }
  0xf9   :  { %1964 = vmatpush.bf16.msra.mxu3 %v9689_v48  ;;  %v1623_v48 = vpop.f32.mrf.mxu2  ;;  %v9884_v43 = vld [vmem:[#allocation4 + $0x140] sm:$0xf] }
  0xfa   :  { %1923 = vmatpush.bf16.msra.mxu0 %v9289_v53  ;;  %v9225_v53 = vor.u32 %v13154_v34, %v9222_v39  ;;  %v9773_v34 = vor.u32 %v13295_v28, %v9772_v4  ;;  %v13291_v39 = vld [vmem:[#allocation4 + $0x4c] sm:$0xf0] }
  0xfb   :  { %1937 = vmatpush.bf16.msra.mxu1 %v9417_v57  ;;  %v9964_v57 = vld [vmem:[#allocation4 + $0x1e0] sm:$0xf] }
  0xfc   :  { %1951 = vmatpush.bf16.msra.mxu2 %v9545_v54  ;;  %v13343_v54 = vld [vmem:[#allocation4 + $0x1ec] sm:$0xf0] }
  0xfd   :  { %1965 = vmatpush.bf16.msra.mxu3 %v9673_v59  ;;  %v9609_v59 = vor.u32 %v13250_v47, %v9606_v50  ;;  %v9965_v62 = vor.u32 %v13343_v54, %v9964_v57  ;;  %v13287_v50 = vld [vmem:[#allocation4 + $0x2c] sm:$0xf0] }
  0xfe   :  { %1924 = vmatpush.bf16.msra.mxu0 %v9273_v3  ;;  %v1610_v3 = vadd.f32 %v1609_v35, %v1596_v0  ;;  %v13319_v0 = vld [vmem:[#allocation4 + $0x12c] sm:$0xf0] }
  0xff   :  { %1938 = vmatpush.bf16.msra.mxu1 %v9401_v5  ;;  %v9948_v5 = vld [vmem:[#allocation4 + $0x1c0] sm:$0xf] }
 0x100   :  { %1952 = vmatpush.bf16.msra.mxu2 %v9529_v6  ;;  %v13339_v6 = vld [vmem:[#allocation4 + $0x1cc] sm:$0xf0]  ;;  %v1624_v13 = vadd.f32 %v1623_v48, %v1610_v3 }
 0x101   :  { %1966 = vmatpush.bf16.msra.mxu3 %v9657_v10  ;;  %v9949_v9 = vor.u32 %v13339_v6, %v9948_v5  ;;  %v9804_v10 = vld [vmem:[#allocation4 + $0xa0] sm:$0xf]  ;;  %v9838_v5 = vld [vmem:[#allocation4 + $0xf0] sm:$0xf0] }
 0x102   :  { %1925 = vmatpush.bf16.msra.mxu0 %v9257_v18  ;;  %v1677_v18 = vpop.f32.mrf.mxu2  ;;  %v9805_v19 = vor.u32 %v13303_v12, %v9804_v10  ;;  %v1638_v22 = vadd.f32 %v1637_v16, %v1624_v13  ;;  %v10092_v6 = vld [vmem:[#allocation4 + $0x2e0] sm:$0xf] }
 0x103   :  { %1939 = vmatpush.bf16.msra.mxu1 %v9385_v20  ;;  %v9788_v20 = vld [vmem:[#allocation4 + $0x80] sm:$0xf]  ;;  %v10093_v10 = vor.u32 %v13375_v7, %v10092_v6 }
 0x104   :  { %1953 = vmatpush.bf16.msra.mxu2 %v9513_v21  ;;  %v13299_v21 = vld [vmem:[#allocation4 + $0x8c] sm:$0xf0] }
 0x105   :  { %1967 = vmatpush.bf16.msra.mxu3 %v9641_v26  ;;  %v1651_v26 = vpop.f32.mrf.mxu0 }
 0x106   :  { %1926 = vmatpush.bf16.msra.mxu0 %v9241_v33  ;;  %v1652_v29 = vadd.f32 %v1651_v26, %v1638_v22  ;;  %v1691_v33 = vpop.f32.mrf.mxu3  ;;  %v9950_v22 = vld [vmem:[#allocation4 + $0x1d0] sm:$0xf0] }
 0x107   :  { %1940 = vmatpush.bf16.msra.mxu1 %v9369_v36  ;;  %v1692_v3 = vadd.f32 %v1691_v33, %v421_v11 }
 0x108   :  { %1954 = vmatpush.bf16.msra.mxu2 %v9497_v38  ;;  %v9756_v38 = vld [vmem:[#allocation4 + $0x40] sm:$0xf]  ;;  %v1666_v40 = vadd.f32 %v1665_v32, %v1652_v29  ;;  %v13333_v32 = vld [vmem:[#allocation4 + $0x1a4] sm:$0xf] }
 0x109   :  { %1968 = vmatpush.bf16.msra.mxu3 %v9625_v44  ;;  %v13323_v44 = vld [vmem:[#allocation4 + $0x14c] sm:$0xf0]  ;;  %v9757_v47 = vor.u32 %v13291_v39, %v9756_v38 }
 0x10a   :  { %1927 = vmatpush.bf16.msra.mxu0 %v9225_v53  ;;  %v1679_v35 = vpop.f32.mrf.mxu2  ;;  %v9885_v48 = vor.u32 %v13323_v44, %v9884_v43 }
 0x10b   :  { %1941 = vmatpush.bf16.msra.mxu1 %v9353_v56  ;;  %v1680_v46 = vadd.f32 %v1679_v35, %v1666_v40  ;;  %v1719_v55 = vpop.f32.mrf.mxu1  ;;  %v10060_v35 = vld [vmem:[#allocation4 + $0x2a0] sm:$0xf] }
 0x10c   :  { %1955 = vmatpush.bf16.msra.mxu2 %v9481_v58  ;;  %v9724_v58 = vld [vmem:[#allocation4] sm:$0xf] }
 0x10d   :  { %1969 = vmatpush.bf16.msra.mxu3 %v9609_v59  ;;  %1928 = vmatmul.bf16.vlgmr.msra.gmra.mxu0 %v14583_v23  ;;  %v9933_v23 = vor.u32 %v13335_v15, %v9932_v14  ;;  %v1705_v57 = vpop.f32.mrf.mxu0  ;;  %v1980_v54 = vmul.f32 0.01, %v1680_v46  ;;  %v13283_v59 = vld [vmem:[#allocation4 + $0xc] sm:$0xf0]  ;;  %v9841_v15 = vor.u32 %v13309_v2, %v9838_v5 }
 0x10e   :  { %2774 = vmatpush.bf16.msrb.mxu0 %v9837_v60  ;;  %1942 = vmatmul.bf16.vlgmr.msra.gmra.mxu1 %v14604_v37  ;;  %v1636_v37 = vadd.f32 %v1635_v49, %v1622_v63  ;;  %v9740_v49 = vld [vmem:[#allocation4 + $0x20] sm:$0xf]  ;;  %v1693_v60 = vpop.f32.mrf.mxu3  ;;  %v9725_v12 = vor.u32 %v13283_v59, %v9724_v58  ;;  %v1706_v63 = vadd.f32 %v1705_v57, %v1692_v3  ;;  %v13293_v58 = vld [vmem:[#allocation4 + $0x64] sm:$0xf]  ;;  %v9774_v59 = vld [vmem:[#allocation4 + $0x70] sm:$0xf0] }
 0x10f   :  { %2788 = vmatpush.bf16.msrb.mxu1 %v9965_v62  ;;  %1956 = vmatmul.bf16.vlgmr.msra.gmra.mxu2 %v14608_v42  ;;  %v9789_v42 = vor.u32 %v13299_v21, %v9788_v20  ;;  %v9741_v56 = vor.u32 %v13287_v50, %v9740_v49  ;;  %v9852_v62 = vld [vmem:[#allocation4 + $0x100] sm:$0xf]  ;;  %v1988_v13 = vmax.f32 %v1680_v46, %v1980_v54  ;;  %v9790_v46 = vld [vmem:[#allocation4 + $0x90] sm:$0xf0]  ;;  %v13363_v50 = vld [vmem:[#allocation4 + $0x28c] sm:$0xf0] }
 0x110   :  { %1970 = vmatmul.bf16.vlgmr.msra.gmra.mxu3 %v14606_v41  ;;  %v13327_v41 = vld [vmem:[#allocation4 + $0x16c] sm:$0xf0]  ;;  %v1650_v31 = vadd.f32 %v1649_v61, %v1636_v37  ;;  %v9869_v61 = vor.u32 %v13319_v0, %v9868_v52  ;;  %v9853_v14 = vor.u32 %v13315_v1, %v9852_v62  ;;  %2802 = vmatpush.bf16.msrb.mxu2 %v10093_v10  ;;  %v10044_v49 = vld [vmem:[#allocation4 + $0x280] sm:$0xf]  ;;  %v13321_v10 = vld [vmem:[#allocation4 + $0x144] sm:$0xf] }
 0x111   :  { %v9901_v36 = vor.u32 %v13327_v41, %v9900_v30  ;;  %v10077_v37 = vor.u32 %v13371_v25, %v10076_v24  ;;  %v1694_v4 = vadd.f32 %v1693_v60, %v421_v11  ;;  %v1720_v28 = vadd.f32 %v1719_v55, %v1706_v63  ;;  %v13301_v41 = vld [vmem:[#allocation4 + $0xa4] sm:$0xf]  ;;  %v10028_v62 = vld [vmem:[#allocation4 + $0x260] sm:$0xf]  ;;  %v13359_v1 = vld [vmem:[#allocation4 + $0x26c] sm:$0xf0] }
 0x112   :  { %2775 = vmatpush.bf16.msrb.mxu0 %v9821_v51  ;;  %v1664_v45 = vadd.f32 %v1663_v8, %v1650_v31  ;;  %v13341_v8 = vld [vmem:[#allocation4 + $0x1e4] sm:$0xf]  ;;  %v1733_v21 = vpop.f32.mrf.mxu2  ;;  %v9806_v31 = vld [vmem:[#allocation4 + $0xb0] sm:$0xf0]  ;;  %v10045_v11 = vor.u32 %v13363_v50, %v10044_v49  ;;  %v10029_v5 = vor.u32 %v13359_v1, %v10028_v62  ;;  %v9777_v7 = vor.u32 %v13293_v58, %v9774_v59  ;;  %v13340_v58 = vld [vmem:[#allocation4 + $0x1d4] sm:$0xf0] }
 0x113   :  { %2789 = vmatpush.bf16.msrb.mxu1 %v9949_v9  ;;  %v9966_v9 = vld [vmem:[#allocation4 + $0x1f0] sm:$0xf0]  ;;  %v1721_v29 = vpop.f32.mrf.mxu1  ;;  %v9809_v39 = vor.u32 %v13301_v41, %v9806_v31  ;;  %v1734_v40 = vadd.f32 %v1733_v21, %v1720_v28  ;;  %v13325_v60 = vld [vmem:[#allocation4 + $0x164] sm:$0xf]  ;;  %v9812_v1 = vld [vmem:[#allocation4 + $0xa8] sm:$0xf] }
 0x114   :  { %v1678_v53 = vadd.f32 %v1677_v18, %v1664_v45  ;;  %v9969_v16 = vor.u32 %v13341_v8, %v9966_v9  ;;  %v13305_v18 = vld [vmem:[#allocation4 + $0xc4] sm:$0xf]  ;;  %2803 = vmatpush.bf16.msrb.mxu2 %v10077_v37  ;;  %v9758_v9 = vld [vmem:[#allocation4 + $0x50] sm:$0xf0] }
 0x115   :  { %v13297_v45 = vld [vmem:[#allocation4 + $0x84] sm:$0xf]  ;;  %v9742_v24 = vld [vmem:[#allocation4 + $0x30] sm:$0xf0] }
 0x116   :  { %2776 = vmatpush.bf16.msrb.mxu0 %v9805_v19  ;;  %v1976_v51 = vmul.f32 0.01, %v1678_v53  ;;  %v9822_v19 = vld [vmem:[#allocation4 + $0xd0] sm:$0xf0]  ;;  %v1747_v33 = vpop.f32.mrf.mxu3  ;;  %v13289_v8 = vld [vmem:[#allocation4 + $0x44] sm:$0xf] }
 0x117   :  { %2790 = vmatpush.bf16.msrb.mxu1 %v9933_v23  ;;  %v13337_v23 = vld [vmem:[#allocation4 + $0x1c4] sm:$0xf]  ;;  %v1748_v57 = vadd.f32 %v1747_v33, %v1734_v40  ;;  %v9870_v37 = vld [vmem:[#allocation4 + $0x130] sm:$0xf0]  ;;  %v9980_v40 = vld [vmem:[#allocation4 + $0x200] sm:$0xf] }
 0x118   :  { %v1984_v20 = vmax.f32 %v1678_v53, %v1976_v51  ;;  %v9953_v30 = vor.u32 %v13337_v23, %v9950_v22  ;;  %v9793_v53 = vor.u32 %v13297_v45, %v9790_v46  ;;  %v13285_v22 = vld [vmem:[#allocation4 + $0x24] sm:$0xf]  ;;  %v9726_v31 = vld [vmem:[#allocation4 + $0x10] sm:$0xf0]  ;;  %v13344_v46 = vld [vmem:[#allocation4 + $0x1f4] sm:$0xf0] }
 0x119   :  { %v13317_v25 = vld [vmem:[#allocation4 + $0x124] sm:$0xf]  ;;  %v9745_v41 = vor.u32 %v13285_v22, %v9742_v24  ;;  %v9854_v33 = vld [vmem:[#allocation4 + $0x110] sm:$0xf0] }
 0x11a   :  { %2777 = vmatpush.bf16.msrb.mxu0 %v9789_v42  ;;  %v14650_v26 = vpack.c.bf16 %v1988_v13, %v1984_v20  ;;  %v1707_v42 = vpop.f32.mrf.mxu0  ;;  %v1735_v52 = vpop.f32.mrf.mxu2  ;;  %v10012_v13 = vld [vmem:[#allocation4 + $0x240] sm:$0xf]  ;;  %v10094_v49 = vld [vmem:[#allocation4 + $0x2f0] sm:$0xf0]  ;;  %v13369_v59 = vld [vmem:[#allocation4 + $0x2c4] sm:$0xf] }
 0x11b   :  { %2791 = vmatpush.bf16.msrb.mxu1 %v9917_v27  ;;  %v9825_v27 = vor.u32 %v13305_v18, %v9822_v19  ;;  %v1708_v43 = vadd.f32 %v1707_v42, %v1694_v4  ;;  %v9761_v19 = vor.u32 %v13289_v8, %v9758_v9  ;;  %v9996_v42 = vld [vmem:[#allocation4 + $0x220] sm:$0xf]  ;;  %v13365_v8 = vld [vmem:[#allocation4 + $0x2a4] sm:$0xf]  ;;  %v10046_v22 = vld [vmem:[#allocation4 + $0x290] sm:$0xf0] }
 0x11d   :  { %v1722_v54 = vadd.f32 %v1721_v29, %v1708_v43  ;;  %v13281_v29 = vld [vmem:[#allocation4 + $0x4] sm:$0xf]  ;;  %v13347_v43 = vld [vmem:[#allocation4 + $0x20c] sm:$0xf0] }
 0x11e   :  { %2778 = vmatpush.bf16.msrb.mxu0 %v9773_v34  ;;  %v9934_v34 = vld [vmem:[#allocation4 + $0x1b0] sm:$0xf0]  ;;  %v1749_v6 = vpop.f32.mrf.mxu3  ;;  %v9729_v50 = vor.u32 %v13281_v29, %v9726_v31  ;;  %v13328_v29 = vld [vmem:[#allocation4 + $0x174] sm:$0xf0]  ;;  %v13357_v31 = vld [vmem:[#allocation4 + $0x264] sm:$0xf] }
 0x11f   :  { %2792 = vmatpush.bf16.msrb.mxu1 %v9901_v36  ;;  %v13367_v36 = vld [vmem:[#allocation4 + $0x2ac] sm:$0xf0]  ;;  %v9937_v44 = vor.u32 %v13333_v32, %v9934_v34  ;;  %v1736_v2 = vadd.f32 %v1735_v52, %v1722_v54  ;;  %v13313_v32 = vld [vmem:[#allocation4 + $0x104] sm:$0xf]  ;;  %v9828_v54 = vld [vmem:[#allocation4 + $0xc8] sm:$0xf] }
 0x120   :  { %v10061_v38 = vor.u32 %v13367_v36, %v10060_v35  ;;  %v9873_v35 = vor.u32 %v13317_v25, %v9870_v37  ;;  %v9844_v36 = vld [vmem:[#allocation4 + $0xe8] sm:$0xf] }
 0x121   :  { %v9780_v25 = vld [vmem:[#allocation4 + $0x68] sm:$0xf] }
 0x122   :  { %2779 = vmatpush.bf16.msrb.mxu0 %v9757_v47  ;;  %v13329_v47 = vld [vmem:[#allocation4 + $0x184] sm:$0xf]  ;;  %2804 = vmatpush.bf16.msrb.mxu2 %v10061_v38  ;;  %v13312_v38 = vld [vmem:[#allocation4 + $0xf4] sm:$0xf0] }
 0x123   :  { %2793 = vmatpush.bf16.msrb.mxu1 %v9885_v48  ;;  %v9918_v48 = vld [vmem:[#allocation4 + $0x190] sm:$0xf0] }
 0x126   :  { %2780 = vmatpush.bf16.msrb.mxu0 %v9741_v56  ;;  %v9921_v56 = vor.u32 %v13329_v47, %v9918_v48  ;;  %2805 = vmatpush.bf16.msrb.mxu2 %v10045_v11  ;;  %v9981_v47 = vor.u32 %v13347_v43, %v9980_v40  ;;  %v13373_v48 = vld [vmem:[#allocation4 + $0x2e4] sm:$0xf]  ;;  %v13292_v40 = vld [vmem:[#allocation4 + $0x54] sm:$0xf0]  ;;  %v9892_v43 = vld [vmem:[#allocation4 + $0x148] sm:$0xf] }
 0x127   :  { %2794 = vmatpush.bf16.msrb.mxu1 %v9869_v61  ;;  %v9902_v61 = vld [vmem:[#allocation4 + $0x170] sm:$0xf0]  ;;  %v10097_v11 = vor.u32 %v13373_v48, %v10094_v49 }
 0x128   :  { %v9905_v51 = vor.u32 %v13325_v60, %v9902_v61  ;;  %v10078_v60 = vld [vmem:[#allocation4 + $0x2d0] sm:$0xf0] }
 0x129   :  { %v10081_v61 = vor.u32 %v13369_v59, %v10078_v60  ;;  %v10014_v49 = vld [vmem:[#allocation4 + $0x250] sm:$0xf0]  ;;  %v13391_v59 = vld [vmem:[#allocation4 + $0x36c] sm:$0xf0]  ;;  %v13349_v60 = vld [vmem:[#allocation4 + $0x224] sm:$0xf] }
 0x12a   :  { %2781 = vmatpush.bf16.msrb.mxu0 %v9725_v12  ;;  %v1761_v0 = vpop.f32.mrf.mxu0  ;;  %2806 = vmatpush.bf16.msrb.mxu2 %v10029_v5  ;;  %v9886_v12 = vld [vmem:[#allocation4 + $0x150] sm:$0xf0]  ;;  %v9940_v5 = vld [vmem:[#allocation4 + $0x1a8] sm:$0xf] }
 0x12b   :  { %2795 = vmatpush.bf16.msrb.mxu1 %v9853_v14  ;;  %v1775_v55 = vpop.f32.mrf.mxu1  ;;  %v1762_v3 = vadd.f32 %v1761_v0, %v1748_v57  ;;  %v13355_v14 = vld [vmem:[#allocation4 + $0x24c] sm:$0xf0]  ;;  %v9889_v21 = vor.u32 %v13321_v10, %v9886_v12  ;;  %v9857_v0 = vor.u32 %v13313_v32, %v9854_v33  ;;  %v10062_v10 = vld [vmem:[#allocation4 + $0x2b0] sm:$0xf0] }
 0x12c   :  { %v10030_v33 = vld [vmem:[#allocation4 + $0x270] sm:$0xf0] }
 0x12d   :  { %2782 = vmatmul.bf16.vlgmr.msrb.gmra.mxu0 %v14650_v26  ;;  %v1776_v63 = vadd.f32 %v1775_v55, %v1762_v3  ;;  %v13308_v55 = vld [vmem:[#allocation4 + $0xd4] sm:$0xf0] }
 0x12e   :  { %2830 = vmatpush.bf16.msra.mxu0 %v9841_v15  ;;  %v1750_v15 = vadd.f32 %v1749_v6, %v1736_v2  ;;  %v9829_v62 = vor.u32 %v13308_v55, %v9828_v54  ;;  %v13304_v3 = vld [vmem:[#allocation4 + $0xb4] sm:$0xf0]  ;;  %v9876_v55 = vld [vmem:[#allocation4 + $0x128] sm:$0xf] }
 0x12f   :  { %2844 = vmatpush.bf16.msra.mxu1 %v9969_v16  ;;  %v10013_v16 = vor.u32 %v13355_v14, %v10012_v13  ;;  %v1977_v4 = vmul.f32 0.01, %v1776_v63  ;;  %v13336_v6 = vld [vmem:[#allocation4 + $0x1b4] sm:$0xf0]  ;;  %v9813_v12 = vor.u32 %v13304_v3, %v9812_v1  ;;  %v9796_v13 = vld [vmem:[#allocation4 + $0x88] sm:$0xf]  ;;  %v10065_v14 = vor.u32 %v13365_v8, %v10062_v10 }
 0x130   :  { %v13288_v54 = vld [vmem:[#allocation4 + $0x34] sm:$0xf0]  ;;  %v9998_v1 = vld [vmem:[#allocation4 + $0x230] sm:$0xf0]  ;;  %v9846_v10 = vld [vmem:[#allocation4 + $0xf8] sm:$0xf0] }
 0x131   :  { %2807 = vmatpush.bf16.msrb.mxu2 %v10013_v16  ;;  %v9924_v16 = vld [vmem:[#allocation4 + $0x188] sm:$0xf]  ;;  %v13284_v3 = vld [vmem:[#allocation4 + $0x14] sm:$0xf0] }
 0x132   :  { %2831 = vmatpush.bf16.msra.mxu0 %v9825_v27  ;;  %v1763_v18 = vpop.f32.mrf.mxu0  ;;  %v13351_v27 = vld [vmem:[#allocation4 + $0x22c] sm:$0xf0]  ;;  %v13316_v8 = vld [vmem:[#allocation4 + $0x114] sm:$0xf0] }
 0x133   :  { %2845 = vmatpush.bf16.msra.mxu1 %v9953_v30  ;;  %v1764_v23 = vadd.f32 %v1763_v18, %v1750_v15  ;;  %v1777_v20 = vpop.f32.mrf.mxu1  ;;  %v9997_v30 = vor.u32 %v13351_v27, %v9996_v42  ;;  %v9941_v15 = vor.u32 %v13336_v6, %v9940_v5  ;;  %v13332_v18 = vld [vmem:[#allocation4 + $0x194] sm:$0xf0]  ;;  %v1789_v42 = vpop.f32.mrf.mxu2  ;;  %v9860_v5 = vld [vmem:[#allocation4 + $0x108] sm:$0xf]  ;;  %v10001_v6 = vor.u32 %v13349_v60, %v9998_v1  ;;  %v13401_v60 = vld [vmem:[#allocation4 + $0x3c4] sm:$0xf] }
 0x134   :  { %v9925_v27 = vor.u32 %v13332_v18, %v9924_v16  ;;  %v9974_v16 = vld [vmem:[#allocation4 + $0x1f8] sm:$0xf0] }
 0x135   :  { %v1778_v28 = vadd.f32 %v1777_v20, %v1764_v23  ;;  %2808 = vmatpush.bf16.msrb.mxu2 %v9997_v30  ;;  %v13403_v23 = vld [vmem:[#allocation4 + $0x3cc] sm:$0xf0]  ;;  %v13361_v20 = vld [vmem:[#allocation4 + $0x284] sm:$0xf]  ;;  %v10188_v30 = vld [vmem:[#allocation4 + $0x3a0] sm:$0xf] }
 0x136   :  { %2832 = vmatpush.bf16.msra.mxu0 %v9809_v39  ;;  %v9972_v39 = vld [vmem:[#allocation4 + $0x1e8] sm:$0xf]  ;;  %v10049_v37 = vor.u32 %v13361_v20, %v10046_v22  ;;  %v9861_v22 = vor.u32 %v13316_v8, %v9860_v5 }
 0x137   :  { %2846 = vmatpush.bf16.msra.mxu1 %v9937_v44  ;;  %v1981_v34 = vmul.f32 0.01, %v1778_v28  ;;  %v1985_v44 = vmax.f32 %v1776_v63, %v1977_v4  ;;  %v9973_v57 = vor.u32 %v13344_v46, %v9972_v39  ;;  %v13300_v63 = vld [vmem:[#allocation4 + $0x94] sm:$0xf0]  ;;  %v13395_v46 = vld [vmem:[#allocation4 + $0x38c] sm:$0xf0] }
 0x138   :  { %v9797_v24 = vor.u32 %v13300_v63, %v9796_v13  ;;  %v13296_v4 = vld [vmem:[#allocation4 + $0x74] sm:$0xf0]  ;;  %v13342_v13 = vld [vmem:[#allocation4 + $0x1ec] sm:$0xf] }
 0x139   :  { %v1989_v45 = vmax.f32 %v1778_v28, %v1981_v34  ;;  %2809 = vmatpush.bf16.msrb.mxu2 %v9981_v47  ;;  %v9908_v28 = vld [vmem:[#allocation4 + $0x168] sm:$0xf]  ;;  %v9781_v34 = vor.u32 %v13296_v4, %v9780_v25  ;;  %v13353_v47 = vld [vmem:[#allocation4 + $0x244] sm:$0xf]  ;;  %v13306_v25 = vld [vmem:[#allocation4 + $0xcc] sm:$0xf] }
 0x13a   :  { %2833 = vmatpush.bf16.msra.mxu0 %v9793_v53  ;;  %v9845_v53 = vor.u32 %v13312_v38, %v9844_v36  ;;  %v10033_v36 = vor.u32 %v13357_v31, %v10030_v33  ;;  %v14657_v38 = vpop.f32.mrf.mxu3  ;;  %v9909_v39 = vor.u32 %v13328_v29, %v9908_v28  ;;  %v10124_v4 = vld [vmem:[#allocation4 + $0x320] sm:$0xf]  ;;  %v13383_v28 = vld [vmem:[#allocation4 + $0x32c] sm:$0xf0] }
 0x13b   :  { %2847 = vmatpush.bf16.msra.mxu1 %v9921_v56  ;;  %v14653_v52 = vpack.c.bf16 %v1989_v45, %v1985_v44  ;;  %v9956_v56 = vld [vmem:[#allocation4 + $0x1c8] sm:$0xf]  ;;  %v13324_v44 = vld [vmem:[#allocation4 + $0x154] sm:$0xf0]  ;;  %v10172_v45 = vld [vmem:[#allocation4 + $0x380] sm:$0xf]  ;;  %v10125_v31 = vor.u32 %v13383_v28, %v10124_v4 }
 0x13c   :  { %v9957_v2 = vor.u32 %v13340_v58, %v9956_v56  ;;  %v10173_v48 = vor.u32 %v13395_v46, %v10172_v45  ;;  %v13320_v56 = vld [vmem:[#allocation4 + $0x134] sm:$0xf0]  ;;  %v10156_v58 = vld [vmem:[#allocation4 + $0x360] sm:$0xf]  ;;  %v10222_v46 = vld [vmem:[#allocation4 + $0x3f0] sm:$0xf0] }
 0x13d   :  { %2858 = vmatpush.bf16.msra.mxu2 %v10097_v11  ;;  %2796 = vmatmul.bf16.vlgmr.msrb.gmra.mxu1 %v14653_v52 }
 0x13e   :  { %2834 = vmatpush.bf16.msra.mxu0 %v9777_v7  ;;  %v10220_v7 = vld [vmem:[#allocation4 + $0x3e0] sm:$0xf] }
 0x13f   :  { %2848 = vmatpush.bf16.msra.mxu1 %v9905_v51  ;;  %v13407_v51 = vld [vmem:[#allocation4 + $0x3ec] sm:$0xf0] }
 0x140   :  { %v10221_v9 = vor.u32 %v13407_v51, %v10220_v7  ;;  %v9877_v51 = vor.u32 %v13320_v56, %v9876_v55  ;;  %v13298_v55 = vld [vmem:[#allocation4 + $0x8c] sm:$0xf]  ;;  %v9798_v56 = vld [vmem:[#allocation4 + $0x98] sm:$0xf0] }
 0x141   :  { %2859 = vmatpush.bf16.msra.mxu2 %v10081_v61  ;;  %v1791_v61 = vpop.f32.mrf.mxu2 }
 0x142   :  { %2835 = vmatpush.bf16.msra.mxu0 %v9761_v19  ;;  %2816 = vmatpush.bf16.msrb.mxu3 %v10221_v9  ;;  %v10204_v19 = vld [vmem:[#allocation4 + $0x3c0] sm:$0xf]  ;;  %v13310_v9 = vld [vmem:[#allocation4 + $0xec] sm:$0xf]  ;;  %v1805_v63 = vpop.f32.mrf.mxu3 }
 0x143   :  { %2849 = vmatpush.bf16.msra.mxu1 %v9889_v21  ;;  %v10205_v21 = vor.u32 %v13403_v23, %v10204_v19  ;;  %v13345_v19 = vld [vmem:[#allocation4 + $0x204] sm:$0xf]  ;;  %v9982_v23 = vld [vmem:[#allocation4 + $0x210] sm:$0xf0] }
 0x145   :  { %2860 = vmatpush.bf16.msra.mxu2 %v10065_v14  ;;  %v10140_v14 = vld [vmem:[#allocation4 + $0x340] sm:$0xf] }
 0x146   :  { %2836 = vmatpush.bf16.msra.mxu0 %v9745_v41  ;;  %2817 = vmatpush.bf16.msrb.mxu3 %v10205_v21  ;;  %v13399_v41 = vld [vmem:[#allocation4 + $0x3ac] sm:$0xf0]  ;;  %v9985_v21 = vor.u32 %v13345_v19, %v9982_v23  ;;  %v13290_v23 = vld [vmem:[#allocation4 + $0x4c] sm:$0xf] }
 0x147   :  { %2850 = vmatpush.bf16.msra.mxu1 %v9873_v35  ;;  %v10189_v32 = vor.u32 %v13399_v41, %v10188_v30  ;;  %v9764_v35 = vld [vmem:[#allocation4 + $0x48] sm:$0xf]  ;;  %v13338_v30 = vld [vmem:[#allocation4 + $0x1cc] sm:$0xf]  ;;  %v9958_v41 = vld [vmem:[#allocation4 + $0x1d8] sm:$0xf0] }
 0x148   :  { %v9765_v11 = vor.u32 %v13292_v40, %v9764_v35  ;;  %v10108_v35 = vld [vmem:[#allocation4 + $0x300] sm:$0xf] }
 0x149   :  { %2861 = vmatpush.bf16.msra.mxu2 %v10049_v37 }
 0x14a   :  { %2837 = vmatpush.bf16.msra.mxu0 %v9729_v50  ;;  %2818 = vmatpush.bf16.msrb.mxu3 %v10189_v32  ;;  %v422_v50 = vperm.slane %v14639_v17, 2  ;;  %v9732_v17 = vld [vmem:[#allocation4 + $0x8] sm:$0xf]  ;;  %v1817_v7 = vpop.f32.mrf.mxu0 }
 0x14b   :  { %2851 = vmatpush.bf16.msra.mxu1 %v9857_v0  ;;  %v9748_v0 = vld [vmem:[#allocation4 + $0x28] sm:$0xf]  ;;  %v9733_v20 = vor.u32 %v13284_v3, %v9732_v17  ;;  %v1831_v29 = vpop.f32.mrf.mxu1  ;;  %v9801_v17 = vor.u32 %v13298_v55, %v9798_v56 }
 0x14c   :  { %v1792_v32 = vadd.f32 %v1791_v61, %v422_v50  ;;  %v10206_v61 = vld [vmem:[#allocation4 + $0x3d0] sm:$0xf0] }
 0x14d   :  { %2838 = vmatmul.bf16.vlgmr.msra.gmra.mxu0 %v14650_v26  ;;  %2862 = vmatpush.bf16.msra.mxu2 %v10033_v36  ;;  %v13379_v36 = vld [vmem:[#allocation4 + $0x30c] sm:$0xf0]  ;;  %v10209_v1 = vor.u32 %v13401_v60, %v10206_v61  ;;  %v10084_v61 = vld [vmem:[#allocation4 + $0x2c8] sm:$0xf] }
 0x14e   :  { %2886 = vmatpush.bf16.msrb.mxu0 %v9845_v53  ;;  %2852 = vmatmul.bf16.vlgmr.msra.gmra.mxu1 %v14653_v52  ;;  %v10017_v53 = vor.u32 %v13353_v47, %v10014_v49  ;;  %v10109_v45 = vor.u32 %v13379_v36, %v10108_v35  ;;  %v9942_v49 = vld [vmem:[#allocation4 + $0x1b8] sm:$0xf0]  ;;  %v10158_v35 = vld [vmem:[#allocation4 + $0x370] sm:$0xf0] }
 0x14f   :  { %2900 = vmatpush.bf16.msrb.mxu1 %v9973_v57  ;;  %v9893_v57 = vor.u32 %v13324_v44, %v9892_v43  ;;  %2819 = vmatpush.bf16.msrb.mxu3 %v10173_v48  ;;  %v13302_v43 = vld [vmem:[#allocation4 + $0xac] sm:$0xf]  ;;  %v9814_v44 = vld [vmem:[#allocation4 + $0xb8] sm:$0xf0] }
 0x150   :  { %v13334_v48 = vld [vmem:[#allocation4 + $0x1ac] sm:$0xf] }
 0x151   :  { %2863 = vmatpush.bf16.msra.mxu2 %v10017_v53  ;;  %v9817_v53 = vor.u32 %v13302_v43, %v9814_v44  ;;  %v10100_v43 = vld [vmem:[#allocation4 + $0x2e8] sm:$0xf]  ;;  %v13376_v44 = vld [vmem:[#allocation4 + $0x2f4] sm:$0xf0] }
 0x152   :  { %2887 = vmatpush.bf16.msrb.mxu0 %v9829_v62  ;;  %v10157_v62 = vor.u32 %v13391_v59, %v10156_v58  ;;  %v1845_v33 = vpop.f32.mrf.mxu2  ;;  %v1819_v47 = vpop.f32.mrf.mxu0  ;;  %v13330_v58 = vld [vmem:[#allocation4 + $0x18c] sm:$0xf]  ;;  %v9926_v59 = vld [vmem:[#allocation4 + $0x198] sm:$0xf0]  ;;  %v10101_v56 = vor.u32 %v13376_v44, %v10100_v43  ;;  %v9988_v43 = vld [vmem:[#allocation4 + $0x208] sm:$0xf] }
 0x153   :  { %2901 = vmatpush.bf16.msrb.mxu1 %v9957_v2  ;;  %v9749_v2 = vor.u32 %v13288_v54, %v9748_v0  ;;  %v1859_v0 = vpop.f32.mrf.mxu3  ;;  %v9945_v54 = vor.u32 %v13334_v48, %v9942_v49  ;;  %v9929_v5 = vor.u32 %v13330_v58, %v9926_v59  ;;  %v9734_v48 = vld [vmem:[#allocation4 + $0x18] sm:$0xf0]  ;;  %v13314_v49 = vld [vmem:[#allocation4 + $0x10c] sm:$0xf]  ;;  %v13348_v44 = vld [vmem:[#allocation4 + $0x214] sm:$0xf0] }
 0x154   :  { %2820 = vmatpush.bf16.msrb.mxu3 %v10157_v62 }
 0x155   :  { %2864 = vmatpush.bf16.msra.mxu2 %v10001_v6  ;;  %v13294_v6 = vld [vmem:[#allocation4 + $0x6c] sm:$0xf] }
 0x156   :  { %2888 = vmatpush.bf16.msrb.mxu0 %v9813_v12  ;;  %v1790_v12 = vadd.f32 %v1789_v42, %v422_v50  ;;  %v9977_v42 = vor.u32 %v13342_v13, %v9974_v16  ;;  %v10190_v13 = vld [vmem:[#allocation4 + $0x3b0] sm:$0xf0] }
 0x157   :  { %2902 = vmatpush.bf16.msrb.mxu1 %v9941_v15  ;;  %v13387_v15 = vld [vmem:[#allocation4 + $0x34c] sm:$0xf0] }
 0x158   :  { %v10141_v18 = vor.u32 %v13387_v15, %v10140_v14  ;;  %v1804_v37 = vadd.f32 %v14657_v38, %v1790_v12  ;;  %v9961_v38 = vor.u32 %v13338_v30, %v9958_v41  ;;  %v13397_v12 = vld [vmem:[#allocation4 + $0x3a4] sm:$0xf]  ;;  %v13286_v30 = vld [vmem:[#allocation4 + $0x2c] sm:$0xf]  ;;  %v9750_v41 = vld [vmem:[#allocation4 + $0x38] sm:$0xf0] }
 0x159   :  { %2865 = vmatpush.bf16.msra.mxu2 %v9985_v21  ;;  %v10193_v15 = vor.u32 %v13397_v12, %v10190_v13  ;;  %v13322_v21 = vld [vmem:[#allocation4 + $0x14c] sm:$0xf]  ;;  %v10110_v12 = vld [vmem:[#allocation4 + $0x310] sm:$0xf0] }
 0x15a   :  { %2889 = vmatpush.bf16.msrb.mxu0 %v9797_v24  ;;  %v9849_v24 = vor.u32 %v13310_v9, %v9846_v10  ;;  %2821 = vmatpush.bf16.msrb.mxu3 %v10141_v18  ;;  %v1818_v40 = vadd.f32 %v1817_v7, %v1804_v37  ;;  %v9782_v7 = vld [vmem:[#allocation4 + $0x78] sm:$0xf0]  ;;  %v1847_v8 = vpop.f32.mrf.mxu2  ;;  %v10174_v37 = vld [vmem:[#allocation4 + $0x390] sm:$0xf0] }
 0x15b   :  { %2903 = vmatpush.bf16.msrb.mxu1 %v9925_v27  ;;  %v9830_v27 = vld [vmem:[#allocation4 + $0xd8] sm:$0xf0] }
 0x15c   :  { %v9910_v10 = vld [vmem:[#allocation4 + $0x178] sm:$0xf0] }
 0x15e   :  { %2890 = vmatpush.bf16.msrb.mxu0 %v9781_v34  ;;  %v9833_v34 = vor.u32 %v13306_v25, %v9830_v27  ;;  %2822 = vmatpush.bf16.msrb.mxu3 %v10125_v31  ;;  %v13393_v25 = vld [vmem:[#allocation4 + $0x384] sm:$0xf]  ;;  %v13318_v31 = vld [vmem:[#allocation4 + $0x12c] sm:$0xf] }
 0x15f   :  { %2904 = vmatpush.bf16.msrb.mxu1 %v9909_v39  ;;  %v13405_v39 = vld [vmem:[#allocation4 + $0x3e4] sm:$0xf]  ;;  %v10177_v27 = vor.u32 %v13393_v25, %v10174_v37 }
 0x160   :  { %v10225_v50 = vor.u32 %v13405_v39, %v10222_v46 }
 0x162   :  { %2891 = vmatpush.bf16.msrb.mxu0 %v9765_v11  ;;  %v1806_v11 = vadd.f32 %v1805_v63, %v1792_v32  ;;  %2823 = vmatpush.bf16.msrb.mxu3 %v10109_v45  ;;  %v9785_v63 = vor.u32 %v13294_v6, %v9782_v7  ;;  %v13282_v45 = vld [vmem:[#allocation4 + $0xc] sm:$0xf]  ;;  %v14191_v6 = vld [vmem:[%s14947_s29] sm:$0xf] }
 0x163   :  { %2905 = vmatpush.bf16.msrb.mxu1 %v9893_v57  ;;  %v1832_v57 = vadd.f32 %v1831_v29, %v1818_v40  ;;  %v9737_v58 = vor.u32 %v13282_v45, %v9734_v48  ;;  %v423_v7 = vperm.slane %v14191_v6, 3  ;;  %v13374_v45 = vld [vmem:[#allocation4 + $0x2ec] sm:$0xf]  ;;  %v9989_v48 = vor.u32 %v13348_v44, %v9988_v43  ;;  %v10230_v43 = vld [vmem:[#allocation4 + $0x3f8] sm:$0xf0] }
 0x164   :  { %v1820_v62 = vadd.f32 %v1819_v47, %v1806_v11  ;;  %v13385_v11 = vld [vmem:[#allocation4 + $0x344] sm:$0xf] }
 0x165   :  { %v1846_v3 = vadd.f32 %v1845_v33, %v1832_v57  ;;  %v9878_v33 = vld [vmem:[#allocation4 + $0x138] sm:$0xf0] }
 0x166   :  { %2892 = vmatpush.bf16.msrb.mxu0 %v9749_v2  ;;  %2872 = vmatpush.bf16.msra.mxu3 %v10225_v50  ;;  %v1833_v2 = vpop.f32.mrf.mxu1  ;;  %v9881_v47 = vor.u32 %v13318_v31, %v9878_v33  ;;  %v9862_v50 = vld [vmem:[#allocation4 + $0x118] sm:$0xf0]  ;;  %v13352_v31 = vld [vmem:[#allocation4 + $0x234] sm:$0xf0] }
 0x167   :  { %2906 = vmatpush.bf16.msrb.mxu1 %v9877_v51  ;;  %v13326_v51 = vld [vmem:[#allocation4 + $0x16c] sm:$0xf]  ;;  %v1834_v14 = vadd.f32 %v1833_v2, %v1820_v62  ;;  %v1860_v16 = vadd.f32 %v1859_v0, %v1846_v3  ;;  %v10142_v0 = vld [vmem:[#allocation4 + $0x350] sm:$0xf0]  ;;  %v9865_v60 = vor.u32 %v13314_v49, %v9862_v50  ;;  %v13372_v62 = vld [vmem:[#allocation4 + $0x2d4] sm:$0xf0] }
 0x168   :  { %v9913_v19 = vor.u32 %v13326_v51, %v9910_v10  ;;  %v10126_v2 = vld [vmem:[#allocation4 + $0x330] sm:$0xf0]  ;;  %v13377_v10 = vld [vmem:[#allocation4 + $0x304] sm:$0xf] }
 0x169   :  { %v1848_v18 = vadd.f32 %v1847_v8, %v1834_v14  ;;  %v10068_v8 = vld [vmem:[#allocation4 + $0x2a8] sm:$0xf]  ;;  %v10113_v13 = vor.u32 %v13377_v10, %v10110_v12  ;;  %v13404_v12 = vld [vmem:[#allocation4 + $0x3d4] sm:$0xf0] }
 0x16a   :  { %2893 = vmatpush.bf16.msrb.mxu0 %v9733_v20  ;;  %v1873_v9 = vpop.f32.mrf.mxu0  ;;  %2873 = vmatpush.bf16.msra.mxu3 %v10209_v1  ;;  %v9766_v20 = vld [vmem:[#allocation4 + $0x58] sm:$0xf0]  ;;  %v13381_v1 = vld [vmem:[#allocation4 + $0x324] sm:$0xf]  ;;  %v10212_v10 = vld [vmem:[#allocation4 + $0x3c8] sm:$0xf] }
 0x16b   :  { %2907 = vmatpush.bf16.msrb.mxu1 %v9861_v22  ;;  %v1861_v22 = vpop.f32.mrf.mxu3  ;;  %v9769_v4 = vor.u32 %v13290_v23, %v9766_v20  ;;  %v10036_v20 = vld [vmem:[#allocation4 + $0x268] sm:$0xf] }
 0x16c   :  { %v1862_v28 = vadd.f32 %v1861_v22, %v1848_v18 }
 0x16d   :  { %2894 = vmatmul.bf16.vlgmr.msrb.gmra.mxu0 %v14650_v26 }
 0x16e   :  { %2942 = vmatpush.bf16.msra.mxu0 %v9849_v24  ;;  %2908 = vmatmul.bf16.vlgmr.msrb.gmra.mxu1 %v14653_v52  ;;  %v9894_v24 = vld [vmem:[#allocation4 + $0x158] sm:$0xf0]  ;;  %v1887_v55 = vpop.f32.mrf.mxu1 }
 0x16f   :  { %2956 = vmatpush.bf16.msra.mxu1 %v9977_v42  ;;  %2874 = vmatpush.bf16.msra.mxu3 %v10193_v15  ;;  %v1874_v42 = vadd.f32 %v1873_v9, %v1860_v16  ;;  %v9897_v29 = vor.u32 %v13322_v21, %v9894_v24  ;;  %v13368_v9 = vld [vmem:[#allocation4 + $0x2b4] sm:$0xf0]  ;;  %v1888_v15 = vadd.f32 %v1887_v55, %v423_v7 }
 0x170   :  { %v10069_v14 = vor.u32 %v13368_v9, %v10068_v8  ;;  %v13364_v16 = vld [vmem:[#allocation4 + $0x294] sm:$0xf0]  ;;  %v10054_v8 = vld [vmem:[#allocation4 + $0x298] sm:$0xf0] }
 0x171   :  { %v1978_v36 = vmul.f32 0.01, %v1874_v42  ;;  %v13360_v21 = vld [vmem:[#allocation4 + $0x274] sm:$0xf0] }
 0x172   :  { %2943 = vmatpush.bf16.msra.mxu0 %v9833_v34  ;;  %v1875_v32 = vpop.f32.mrf.mxu0  ;;  %v13389_v34 = vld [vmem:[#allocation4 + $0x364] sm:$0xf]  ;;  %v1901_v3 = vpop.f32.mrf.mxu2 }
 0x173   :  { %2957 = vmatpush.bf16.msra.mxu1 %v9961_v38  ;;  %2875 = vmatpush.bf16.msra.mxu3 %v10177_v27  ;;  %v1876_v39 = vadd.f32 %v1875_v32, %v1862_v28  ;;  %v10161_v40 = vor.u32 %v13389_v34, %v10158_v35  ;;  %v9753_v38 = vor.u32 %v13286_v30, %v9750_v41  ;;  %v1915_v51 = vpop.f32.mrf.mxu3  ;;  %v10020_v27 = vld [vmem:[#allocation4 + $0x248] sm:$0xf] }
 0x174   :  { %v1902_v23 = vadd.f32 %v1901_v3, %v1888_v15  ;;  %v10004_v41 = vld [vmem:[#allocation4 + $0x228] sm:$0xf]  ;;  %v13358_v15 = vld [vmem:[#allocation4 + $0x26c] sm:$0xf] }
 0x175   :  { %v1982_v46 = vmul.f32 0.01, %v1876_v39 }
 0x176   :  { %2944 = vmatpush.bf16.msra.mxu0 %v9817_v53  ;;  %v1986_v53 = vmax.f32 %v1874_v42, %v1978_v36  ;;  %v1889_v18 = vpop.f32.mrf.mxu1  ;;  %v1916_v42 = vadd.f32 %v1915_v51, %v1902_v23  ;;  %v13362_v51 = vld [vmem:[#allocation4 + $0x28c] sm:$0xf] }
 0x177   :  { %2958 = vmatpush.bf16.msra.mxu1 %v9945_v54  ;;  %2876 = vmatpush.bf16.msra.mxu3 %v10161_v40  ;;  %v1990_v57 = vmax.f32 %v1876_v39, %v1982_v46  ;;  %v10145_v54 = vor.u32 %v13385_v11, %v10142_v0  ;;  %v1890_v24 = vadd.f32 %v1889_v18, %v423_v7  ;;  %v10102_v46 = vld [vmem:[#allocation4 + $0x2f8] sm:$0xf0]  ;;  %v13400_v18 = vld [vmem:[#allocation4 + $0x3b4] sm:$0xf0] }
 0x178   :  { %v10005_v39 = vor.u32 %v13352_v31, %v10004_v41  ;;  %v10105_v11 = vor.u32 %v13374_v45, %v10102_v46  ;;  %v10148_v41 = vld [vmem:[#allocation4 + $0x348] sm:$0xf]  ;;  %v13388_v31 = vld [vmem:[#allocation4 + $0x354] sm:$0xf0]  ;;  %v13402_v46 = vld [vmem:[#allocation4 + $0x3cc] sm:$0xf] }
 0x179   :  { %v14664_v59 = vpack.c.bf16 %v1990_v57, %v1986_v53  ;;  %v13370_v53 = vld [vmem:[#allocation4 + $0x2cc] sm:$0xf]  ;;  %v10086_v57 = vld [vmem:[#allocation4 + $0x2d8] sm:$0xf0] }
 0x17a   :  { %2945 = vmatpush.bf16.msra.mxu0 %v9801_v17  ;;  %v10129_v17 = vor.u32 %v13381_v1, %v10126_v2  ;;  %v1903_v22 = vpop.f32.mrf.mxu2  ;;  %v10228_v2 = vld [vmem:[#allocation4 + $0x3e8] sm:$0xf] }
 0x17b   :  { %2959 = vmatpush.bf16.msra.mxu1 %v9929_v5  ;;  %2877 = vmatpush.bf16.msra.mxu3 %v10145_v54  ;;  %v10085_v5 = vor.u32 %v13372_v62, %v10084_v61  ;;  %v1917_v25 = vpop.f32.mrf.mxu3  ;;  %v1904_v28 = vadd.f32 %v1903_v22, %v1890_v24  ;;  %v13366_v61 = vld [vmem:[#allocation4 + $0x2ac] sm:$0xf]  ;;  %v10070_v62 = vld [vmem:[#allocation4 + $0x2b8] sm:$0xf0]  ;;  %v10180_v22 = vld [vmem:[#allocation4 + $0x388] sm:$0xf] }
 0x17c   :  { %2810 = vmatmul.bf16.vlgmr.msrb.gmra.mxu2 %v14664_v59  ;;  %v10073_v6 = vor.u32 %v13366_v61, %v10070_v62  ;;  %v13396_v24 = vld [vmem:[#allocation4 + $0x394] sm:$0xf0]  ;;  %v13386_v61 = vld [vmem:[#allocation4 + $0x34c] sm:$0xf]  ;;  %v10150_v62 = vld [vmem:[#allocation4 + $0x358] sm:$0xf0] }
 0x17d   :  { %2914 = vmatpush.bf16.msrb.mxu2 %v10101_v56  ;;  %v1918_v33 = vadd.f32 %v1917_v25, %v1904_v28 }
 0x17e   :  { %2946 = vmatpush.bf16.msra.mxu0 %v9785_v63  ;;  %v10052_v63 = vld [vmem:[#allocation4 + $0x288] sm:$0xf] }
 0x17f   :  { %2960 = vmatpush.bf16.msra.mxu1 %v9913_v19  ;;  %2878 = vmatpush.bf16.msra.mxu3 %v10129_v17  ;;  %v10053_v19 = vor.u32 %v13364_v16, %v10052_v63  ;;  %v13408_v17 = vld [vmem:[#allocation4 + $0x3f4] sm:$0xf0]  ;;  %v10038_v63 = vld [vmem:[#allocation4 + $0x278] sm:$0xf0]  ;;  %v10196_v16 = vld [vmem:[#allocation4 + $0x3a8] sm:$0xf] }
 0x180   :  { %v10229_v7 = vor.u32 %v13408_v17, %v10228_v2  ;;  %v10197_v23 = vor.u32 %v13400_v18, %v10196_v16  ;;  %v13382_v2 = vld [vmem:[#allocation4 + $0x32c] sm:$0xf]  ;;  %v10134_v17 = vld [vmem:[#allocation4 + $0x338] sm:$0xf0]  ;;  %v10284_v18 = vld [vmem:[#allocation6 + $0x60] sm:$0xf] }
 0x181   :  { %2915 = vmatpush.bf16.msrb.mxu2 %v10085_v5 }
 0x182   :  { %2947 = vmatpush.bf16.msra.mxu0 %v9769_v4 }
 0x183   :  { %2961 = vmatpush.bf16.msra.mxu1 %v9897_v29  ;;  %2879 = vmatpush.bf16.msra.mxu3 %v10113_v13  ;;  %v10057_v13 = vor.u32 %v13362_v51, %v10054_v8  ;;  %v10332_v51 = vld [vmem:[#allocation6 + $0xc0] sm:$0xf]  ;;  %v13435_v8 = vld [vmem:[#allocation6 + $0xcc] sm:$0xf0] }
 0x185   :  { %2916 = vmatpush.bf16.msrb.mxu2 %v10069_v14  ;;  %v10213_v14 = vor.u32 %v13404_v12, %v10212_v10  ;;  %v10333_v10 = vor.u32 %v13435_v8, %v10332_v51  ;;  %v10316_v12 = vld [vmem:[#allocation6 + $0xa0] sm:$0xf]  ;;  %v13443_v51 = vld [vmem:[#allocation6 + $0x10c] sm:$0xf0] }
 0x186   :  { %2948 = vmatpush.bf16.msra.mxu0 %v9753_v38  ;;  %v10556_v8 = vld [vmem:[#allocation6 + $0x280] sm:$0xf] }
 0x187   :  { %2962 = vmatpush.bf16.msra.mxu1 %v9881_v47 }
 0x189   :  { %2917 = vmatpush.bf16.msrb.mxu2 %v10053_v19  ;;  %v10041_v19 = vor.u32 %v13358_v15, %v10038_v63  ;;  %v10300_v15 = vld [vmem:[#allocation6 + $0x80] sm:$0xf]  ;;  %v13427_v63 = vld [vmem:[#allocation6 + $0x8c] sm:$0xf0] }
 0x18a   :  { %2949 = vmatpush.bf16.msra.mxu0 %v9737_v58  ;;  %v1929_v37 = vpop.f32.mrf.mxu0  ;;  %v10301_v16 = vor.u32 %v13427_v63, %v10300_v15 }
 0x18b   :  { %2963 = vmatpush.bf16.msra.mxu1 %v9865_v60  ;;  %v1943_v4 = vpop.f32.mrf.mxu1  ;;  %v1930_v29 = vadd.f32 %v1929_v37, %v1916_v42  ;;  %v10089_v60 = vor.u32 %v13370_v53, %v10086_v57  ;;  %v10181_v37 = vor.u32 %v13396_v24, %v10180_v22  ;;  %v10006_v42 = vld [vmem:[#allocation4 + $0x238] sm:$0xf0]  ;;  %v13390_v57 = vld [vmem:[#allocation4 + $0x36c] sm:$0xf]  ;;  %v10268_v24 = vld [vmem:[#allocation6 + $0x40] sm:$0xf] }
 0x18c   :  { %2866 = vmatmul.bf16.vlgmr.msra.gmra.mxu2 %v14664_v59  ;;  %v10182_v53 = vld [vmem:[#allocation4 + $0x398] sm:$0xf0] }
 0x18d   :  { %2950 = vmatmul.bf16.vlgmr.msra.gmra.mxu0 %v14650_v26  ;;  %v10037_v26 = vor.u32 %v13360_v21, %v10036_v20  ;;  %v1944_v34 = vadd.f32 %v1943_v4, %v1930_v29  ;;  %v13354_v20 = vld [vmem:[#allocation4 + $0x24c] sm:$0xf]  ;;  %v10022_v21 = vld [vmem:[#allocation4 + $0x258] sm:$0xf0] }
 0x18e   :  { %2964 = vmatmul.bf16.vlgmr.msra.gmra.mxu1 %v14653_v52  ;;  %v13356_v52 = vld [vmem:[#allocation4 + $0x254] sm:$0xf0]  ;;  %v10025_v25 = vor.u32 %v13354_v20, %v10022_v21  ;;  %v13346_v29 = vld [vmem:[#allocation4 + $0x20c] sm:$0xf]  ;;  %v13471_v21 = vld [vmem:[#allocation6 + $0x1ec] sm:$0xf0] }
 0x18f   :  { %2918 = vmatpush.bf16.msrb.mxu2 %v10037_v26  ;;  %v10021_v30 = vor.u32 %v13356_v52, %v10020_v27  ;;  %v13350_v26 = vld [vmem:[#allocation4 + $0x22c] sm:$0xf]  ;;  %v10164_v27 = vld [vmem:[#allocation4 + $0x368] sm:$0xf]  ;;  %v13392_v52 = vld [vmem:[#allocation4 + $0x374] sm:$0xf0] }
 0x190   :  { %v10009_v4 = vor.u32 %v13350_v26, %v10006_v42  ;;  %v10165_v28 = vor.u32 %v13392_v52, %v10164_v27  ;;  %v13467_v26 = vld [vmem:[#allocation6 + $0x1cc] sm:$0xf0]  ;;  %v10252_v27 = vld [vmem:[#allocation6 + $0x20] sm:$0xf] }
 0x191   :  { %v13415_v52 = vld [vmem:[#allocation6 + $0x2c] sm:$0xf0] }
 0x192   :  { %v1957_v32 = vpop.f32.mrf.mxu2  ;;  %v1931_v36 = vpop.f32.mrf.mxu0 }
 0x193   :  { %v1971_v35 = vpop.f32.mrf.mxu3  ;;  %2919 = vmatpush.bf16.msrb.mxu2 %v10021_v30  ;;  %v1958_v40 = vadd.f32 %v1957_v32, %v1944_v34  ;;  %v1932_v38 = vadd.f32 %v1931_v36, %v1918_v33  ;;  %v1945_v47 = vpop.f32.mrf.mxu1  ;;  %v9990_v30 = vld [vmem:[#allocation4 + $0x218] sm:$0xf0]  ;;  %v10149_v33 = vor.u32 %v13388_v31, %v10148_v41  ;;  %v10132_v34 = vld [vmem:[#allocation4 + $0x328] sm:$0xf]  ;;  %v10236_v41 = vld [vmem:[#allocation6] sm:$0xf] }
 0x194   :  { %v9993_v32 = vor.u32 %v13346_v29, %v9990_v30  ;;  %v13463_v29 = vld [vmem:[#allocation6 + $0x1ac] sm:$0xf0] }
 0x195   :  { %v1972_v49 = vadd.f32 %v1971_v35, %v1958_v40  ;;  %v1946_v50 = vadd.f32 %v1945_v47, %v1932_v38  ;;  %v13384_v35 = vld [vmem:[#allocation4 + $0x334] sm:$0xf0]  ;;  %v13406_v38 = vld [vmem:[#allocation4 + $0x3ec] sm:$0xf]  ;;  %v10214_v47 = vld [vmem:[#allocation4 + $0x3d8] sm:$0xf0] }
 0x196   :  { %v10133_v36 = vor.u32 %v13384_v35, %v10132_v34  ;;  %v13380_v40 = vld [vmem:[#allocation4 + $0x314] sm:$0xf0]  ;;  %v10233_v45 = vor.u32 %v13406_v38, %v10230_v43  ;;  %v13411_v31 = vld [vmem:[#allocation6 + $0xc] sm:$0xf0]  ;;  %v13437_v35 = vld [vmem:[#allocation6 + $0xe4] sm:$0xf] }
 0x197   :  { %2920 = vmatpush.bf16.msrb.mxu2 %v10005_v39  ;;  %v1979_v56 = vmul.f32 0.01, %v1972_v49  ;;  %v10116_v39 = vld [vmem:[#allocation4 + $0x308] sm:$0xf]  ;;  %v13459_v34 = vld [vmem:[#allocation6 + $0x18c] sm:$0xf0] }
 0x198   :  { %v10117_v44 = vor.u32 %v13380_v40, %v10116_v39  ;;  %v10412_v38 = vld [vmem:[#allocation6 + $0x160] sm:$0xf]  ;;  %v13455_v43 = vld [vmem:[#allocation6 + $0x16c] sm:$0xf0] }
 0x199   :  { %v1987_v3 = vmax.f32 %v1972_v49, %v1979_v56  ;;  %v13398_v49 = vld [vmem:[#allocation4 + $0x3ac] sm:$0xf]  ;;  %v13439_v56 = vld [vmem:[#allocation6 + $0xec] sm:$0xf0] }
 0x19a   :  { %v1959_v0 = vpop.f32.mrf.mxu2 }
 0x19b   :  { %v1960_v54 = vadd.f32 %v1959_v0, %v1946_v50  ;;  %v1973_v55 = vpop.f32.mrf.mxu3  ;;  %2921 = vmatpush.bf16.msrb.mxu2 %v9989_v48  ;;  %v10217_v48 = vor.u32 %v13402_v46, %v10214_v47  ;;  %v10198_v50 = vld [vmem:[#allocation4 + $0x3b8] sm:$0xf0]  ;;  %v13394_v0 = vld [vmem:[#allocation4 + $0x38c] sm:$0xf]  ;;  %v13433_v46 = vld [vmem:[#allocation6 + $0xc4] sm:$0xf] }
 0x19c   :  { %v10334_v47 = vld [vmem:[#allocation6 + $0xd0] sm:$0xf0] }
 0x19d   :  { %v1974_v58 = vadd.f32 %v1973_v55, %v1960_v54  ;;  %v10166_v54 = vld [vmem:[#allocation4 + $0x378] sm:$0xf0]  ;;  %v10348_v55 = vld [vmem:[#allocation6 + $0xe0] sm:$0xf] }
 0x19e   :  { %2922 = vmatmul.bf16.vlgmr.msrb.gmra.mxu2 %v14664_v59 }
 0x19f   :  { %2970 = vmatpush.bf16.msra.mxu2 %v10105_v11  ;;  %v1983_v1 = vmul.f32 0.01, %v1974_v58  ;;  %v10201_v11 = vor.u32 %v13398_v49, %v10198_v50  ;;  %v10337_v50 = vor.u32 %v13433_v46, %v10334_v47  ;;  %v10492_v46 = vld [vmem:[#allocation6 + $0x200] sm:$0xf]  ;;  %v13475_v47 = vld [vmem:[#allocation6 + $0x20c] sm:$0xf0] }
 0x1a1   :  { %v1991_v5 = vmax.f32 %v1974_v58, %v1983_v1  ;;  %v10169_v58 = vor.u32 %v13390_v57, %v10166_v54  ;;  %v10153_v1 = vor.u32 %v13386_v61, %v10150_v62  ;;  %v13499_v57 = vld [vmem:[#allocation6 + $0x2cc] sm:$0xf0]  ;;  %v13429_v54 = vld [vmem:[#allocation6 + $0xa4] sm:$0xf]  ;;  %v10572_v62 = vld [vmem:[#allocation6 + $0x2a0] sm:$0xf] }
 0x1a2   :  { %v13447_v61 = vld [vmem:[#allocation6 + $0x12c] sm:$0xf0] }
 0x1a3   :  { %2971 = vmatpush.bf16.msra.mxu2 %v10089_v60  ;;  %v14674_v9 = vpack.c.bf16 %v1991_v5, %v1987_v3  ;;  %v10349_v60 = vor.u32 %v13439_v56, %v10348_v55  ;;  %v10137_v3 = vor.u32 %v13382_v2, %v10134_v17  ;;  %v13378_v5 = vld [vmem:[#allocation4 + $0x30c] sm:$0xf]  ;;  %v10318_v55 = vld [vmem:[#allocation6 + $0xb0] sm:$0xf0] }
 0x1a5   :  { %2824 = vmatmul.bf16.vlgmr.msrb.gmra.mxu3 %v14674_v9  ;;  %3796 = vmatpush.bf16.msrb.mxu0 %v10349_v60  ;;  %v10380_v60 = vld [vmem:[#allocation6 + $0x120] sm:$0xf] }
 0x1a6   :  { %2928 = vmatpush.bf16.msrb.mxu3 %v10229_v7  ;;  %v10381_v2 = vor.u32 %v13447_v61, %v10380_v60  ;;  %v13531_v60 = vld [vmem:[#allocation6 + $0x3cc] sm:$0xf0] }
 0x1a7   :  { %2972 = vmatpush.bf16.msra.mxu2 %v10073_v6  ;;  %v10118_v6 = vld [vmem:[#allocation4 + $0x318] sm:$0xf0] }
 0x1a8   :  { %v10121_v7 = vor.u32 %v13378_v5, %v10118_v6  ;;  %v10302_v5 = vld [vmem:[#allocation6 + $0x90] sm:$0xf0] }
 0x1a9   :  { %3797 = vmatpush.bf16.msrb.mxu0 %v10333_v10 }
 0x1aa   :  { %2929 = vmatpush.bf16.msrb.mxu3 %v10213_v14 }
 0x1ab   :  { %2973 = vmatpush.bf16.msra.mxu2 %v10057_v13  ;;  %v13431_v13 = vld [vmem:[#allocation6 + $0xac] sm:$0xf0] }
 0x1ac   :  { %v10317_v14 = vor.u32 %v13431_v13, %v10316_v12  ;;  %v13491_v12 = vld [vmem:[#allocation6 + $0x28c] sm:$0xf0]  ;;  %v13421_v13 = vld [vmem:[#allocation6 + $0x64] sm:$0xf] }
 0x1ad   :  { %v10557_v15 = vor.u32 %v13491_v12, %v10556_v8 }
 0x1ae   :  { %2930 = vmatpush.bf16.msrb.mxu3 %v10197_v23  ;;  %3798 = vmatpush.bf16.msrb.mxu0 %v10317_v14  ;;  %v10476_v23 = vld [vmem:[#allocation6 + $0x1e0] sm:$0xf]  ;;  %v10286_v14 = vld [vmem:[#allocation6 + $0x70] sm:$0xf0] }
 0x1af   :  { %2974 = vmatpush.bf16.msra.mxu2 %v10041_v19  ;;  %v13423_v19 = vld [vmem:[#allocation6 + $0x6c] sm:$0xf0]  ;;  %v10477_v22 = vor.u32 %v13471_v21, %v10476_v23  ;;  %v10289_v63 = vor.u32 %v13421_v13, %v10286_v14  ;;  %v10540_v23 = vld [vmem:[#allocation6 + $0x260] sm:$0xf]  ;;  %v13445_v13 = vld [vmem:[#allocation6 + $0x124] sm:$0xf] }
 0x1b0   :  { %v10285_v20 = vor.u32 %v13423_v19, %v10284_v18  ;;  %v10478_v18 = vld [vmem:[#allocation6 + $0x1f0] sm:$0xf0] }
 0x1b1   :  { %3810 = vmatpush.bf16.msrb.mxu1 %v10477_v22  ;;  %v13417_v22 = vld [vmem:[#allocation6 + $0x44] sm:$0xf]  ;;  %v10382_v14 = vld [vmem:[#allocation6 + $0x130] sm:$0xf0] }
 0x1b2   :  { %2931 = vmatpush.bf16.msrb.mxu3 %v10181_v37  ;;  %3799 = vmatpush.bf16.msrb.mxu0 %v10301_v16  ;;  %v13469_v16 = vld [vmem:[#allocation6 + $0x1e4] sm:$0xf] }
 0x1b3   :  { %2975 = vmatpush.bf16.msra.mxu2 %v10025_v25  ;;  %v10460_v25 = vld [vmem:[#allocation6 + $0x1c0] sm:$0xf]  ;;  %v10481_v19 = vor.u32 %v13469_v16, %v10478_v18  ;;  %v10385_v16 = vor.u32 %v13445_v13, %v10382_v14  ;;  %v10574_v18 = vld [vmem:[#allocation6 + $0x2b0] sm:$0xf0]  ;;  %v13533_v13 = vld [vmem:[#allocation6 + $0x3e4] sm:$0xf] }
 0x1b4   :  { %v10461_v42 = vor.u32 %v13467_v26, %v10460_v25 }
 0x1b5   :  { %2880 = vmatmul.bf16.vlgmr.msra.gmra.mxu3 %v14674_v9 }
 0x1b6   :  { %2932 = vmatpush.bf16.msrb.mxu3 %v10165_v28  ;;  %3800 = vmatpush.bf16.msrb.mxu0 %v10285_v20  ;;  %v10253_v28 = vor.u32 %v13415_v52, %v10252_v27  ;;  %v13487_v20 = vld [vmem:[#allocation6 + $0x26c] sm:$0xf0] }
 0x1b7   :  { %2976 = vmatpush.bf16.msra.mxu2 %v10009_v4  ;;  %v10444_v4 = vld [vmem:[#allocation6 + $0x1a0] sm:$0xf]  ;;  %3811 = vmatpush.bf16.msrb.mxu1 %v10461_v42  ;;  %v10541_v21 = vor.u32 %v13487_v20, %v10540_v23  ;;  %v13483_v27 = vld [vmem:[#allocation6 + $0x24c] sm:$0xf0] }
 0x1b8   :  { %v10445_v30 = vor.u32 %v13463_v29, %v10444_v4  ;;  %v10524_v42 = vld [vmem:[#allocation6 + $0x240] sm:$0xf]  ;;  %v13413_v4 = vld [vmem:[#allocation6 + $0x24] sm:$0xf] }
 0x1b9   :  { %v10525_v52 = vor.u32 %v13483_v27, %v10524_v42  ;;  %v13461_v29 = vld [vmem:[#allocation6 + $0x1a4] sm:$0xf]  ;;  %v10684_v20 = vld [vmem:[#allocation6 + $0x380] sm:$0xf]  ;;  %v10558_v42 = vld [vmem:[#allocation6 + $0x290] sm:$0xf0] }
 0x1ba   :  { %2933 = vmatpush.bf16.msrb.mxu3 %v10149_v33  ;;  %v10237_v33 = vor.u32 %v13411_v31, %v10236_v41  ;;  %v10446_v41 = vld [vmem:[#allocation6 + $0x1b0] sm:$0xf0] }
 0x1bb   :  { %2977 = vmatpush.bf16.msra.mxu2 %v9993_v32  ;;  %3812 = vmatpush.bf16.msrb.mxu1 %v10445_v30  ;;  %v10428_v32 = vld [vmem:[#allocation6 + $0x180] sm:$0xf]  ;;  %v10449_v31 = vor.u32 %v13461_v29, %v10446_v41  ;;  %v13519_v29 = vld [vmem:[#allocation6 + $0x36c] sm:$0xf0] }
 0x1bc   :  { %v10429_v39 = vor.u32 %v13459_v34, %v10428_v32  ;;  %v10508_v32 = vld [vmem:[#allocation6 + $0x220] sm:$0xf] }
 0x1be   :  { %2978 = vmatmul.bf16.vlgmr.msra.gmra.mxu2 %v14664_v59  ;;  %2934 = vmatpush.bf16.msrb.mxu3 %v10133_v36  ;;  %v10185_v59 = vor.u32 %v13394_v0, %v10182_v53  ;;  %v10350_v36 = vld [vmem:[#allocation6 + $0xf0] sm:$0xf0]  ;;  %v13451_v0 = vld [vmem:[#allocation6 + $0x14c] sm:$0xf0]  ;;  %v10588_v53 = vld [vmem:[#allocation6 + $0x2c0] sm:$0xf] }
 0x1bf   :  { %v10353_v40 = vor.u32 %v13437_v35, %v10350_v36  ;;  %3813 = vmatpush.bf16.msrb.mxu1 %v10429_v39  ;;  %v10589_v56 = vor.u32 %v13499_v57, %v10588_v53  ;;  %v13409_v35 = vld [vmem:[#allocation6 + $0x4] sm:$0xf]  ;;  %v10238_v36 = vld [vmem:[#allocation6 + $0x10] sm:$0xf0] }
 0x1c0   :  { %v13457_v39 = vld [vmem:[#allocation6 + $0x184] sm:$0xf]  ;;  %v10414_v53 = vld [vmem:[#allocation6 + $0x170] sm:$0xf0] }
 0x1c2   :  { %2935 = vmatpush.bf16.msrb.mxu3 %v10117_v44  ;;  %v10604_v44 = vld [vmem:[#allocation6 + $0x2e0] sm:$0xf] }
 0x1c5   :  { %2936 = vmatmul.bf16.vlgmr.msrb.gmra.mxu3 %v14674_v9 }
 0x1c6   :  { %2984 = vmatpush.bf16.msra.mxu3 %v10233_v45  ;;  %v13503_v45 = vld [vmem:[#allocation6 + $0x2ec] sm:$0xf0] }
 0x1c7   :  { %v10605_v49 = vor.u32 %v13503_v45, %v10604_v44  ;;  %v2797_v44 = vpop.f32.mrf.mxu1 }
 0x1c9   :  { %3824 = vmatpush.bf16.msrb.mxu2 %v10605_v49 }
 0x1ca   :  { %2985 = vmatpush.bf16.msra.mxu3 %v10217_v48  ;;  %v10413_v48 = vor.u32 %v13455_v43, %v10412_v38  ;;  %v10430_v38 = vld [vmem:[#allocation6 + $0x190] sm:$0xf0]  ;;  %v2783_v43 = vpop.f32.mrf.mxu0 }
 0x1cb   :  { %v10433_v45 = vor.u32 %v13457_v39, %v10430_v38  ;;  %v10652_v38 = vld [vmem:[#allocation6 + $0x340] sm:$0xf] }
 0x1cc   :  { %3814 = vmatpush.bf16.msrb.mxu1 %v10413_v48  ;;  %v10732_v48 = vld [vmem:[#allocation6 + $0x3e0] sm:$0xf] }
 0x1cd   :  { %3825 = vmatpush.bf16.msrb.mxu2 %v10589_v56 }
 0x1ce   :  { %2986 = vmatpush.bf16.msra.mxu3 %v10201_v11  ;;  %v10396_v11 = vld [vmem:[#allocation6 + $0x140] sm:$0xf] }
 0x1d2   :  { %2987 = vmatpush.bf16.msra.mxu3 %v10185_v59  ;;  %v10397_v59 = vor.u32 %v13451_v0, %v10396_v11  ;;  %v13535_v11 = vld [vmem:[#allocation6 + $0x3ec] sm:$0xf0]  ;;  %v13453_v0 = vld [vmem:[#allocation6 + $0x164] sm:$0xf]  ;;  %v2785_v8 = vpop.f32.mrf.mxu0 }
 0x1d3   :  { %v10417_v57 = vor.u32 %v13453_v0, %v10414_v53 }
 0x1d4   :  { %3815 = vmatpush.bf16.msrb.mxu1 %v10397_v59  ;;  %v10733_v59 = vor.u32 %v13535_v11, %v10732_v48 }
 0x1d6   :  { %2988 = vmatpush.bf16.msra.mxu3 %v10169_v58  ;;  %v10321_v58 = vor.u32 %v13429_v54, %v10318_v55  ;;  %v13501_v54 = vld [vmem:[#allocation6 + $0x2e4] sm:$0xf]  ;;  %v10606_v55 = vld [vmem:[#allocation6 + $0x2f0] sm:$0xf0] }
 0x1d7   :  { %v10609_v56 = vor.u32 %v13501_v54, %v10606_v55  ;;  %v13477_v55 = vld [vmem:[#allocation6 + $0x224] sm:$0xf] }
 0x1d8   :  { %3816 = vmatpush.bf16.msrb.mxu1 %v10381_v2  ;;  %v13497_v2 = vld [vmem:[#allocation6 + $0x2c4] sm:$0xf] }
 0x1da   :  { %2989 = vmatpush.bf16.msra.mxu3 %v10153_v1  ;;  %v13495_v1 = vld [vmem:[#allocation6 + $0x2ac] sm:$0xf0] }
 0x1db   :  { %v10573_v17 = vor.u32 %v13495_v1, %v10572_v62  ;;  %v13449_v62 = vld [vmem:[#allocation6 + $0x144] sm:$0xf]  ;;  %v10398_v1 = vld [vmem:[#allocation6 + $0x150] sm:$0xf0] }
 0x1dd   :  { %3826 = vmatpush.bf16.msrb.mxu2 %v10573_v17  ;;  %v10401_v17 = vor.u32 %v13449_v62, %v10398_v1 }
 0x1de   :  { %2990 = vmatpush.bf16.msra.mxu3 %v10137_v3  ;;  %v13425_v3 = vld [vmem:[#allocation6 + $0x84] sm:$0xf] }
 0x1df   :  { %v10305_v6 = vor.u32 %v13425_v3, %v10302_v5  ;;  %v10590_v3 = vld [vmem:[#allocation6 + $0x2d0] sm:$0xf0]  ;;  %v14686_v5 = vld [vmem:[%s14922_s5] sm:$0xf] }
 0x1e1   :  { %3827 = vmatpush.bf16.msrb.mxu2 %v10557_v15  ;;  %v13493_v15 = vld [vmem:[#allocation6 + $0x2a4] sm:$0xf] }
 0x1e2   :  { %2991 = vmatpush.bf16.msra.mxu3 %v10121_v7  ;;  %v10364_v7 = vld [vmem:[#allocation6 + $0x100] sm:$0xf]  ;;  %v10577_v23 = vor.u32 %v13493_v15, %v10574_v18 }
 0x1e3   :  { %v10365_v10 = vor.u32 %v13443_v51, %v10364_v7  ;;  %v10700_v7 = vld [vmem:[#allocation6 + $0x3a0] sm:$0xf]  ;;  %v13527_v51 = vld [vmem:[#allocation6 + $0x3ac] sm:$0xf0] }
 0x1e4   :  { %v10701_v12 = vor.u32 %v13527_v51, %v10700_v7 }
 0x1e5   :  { %2992 = vmatmul.bf16.vlgmr.msra.gmra.mxu3 %v14674_v9  ;;  %v13419_v9 = vld [vmem:[#allocation6 + $0x4c] sm:$0xf0]  ;;  %3817 = vmatpush.bf16.msrb.mxu1 %v10365_v10  ;;  %v2799_v10 = vpop.f32.mrf.mxu1 }
 0x1e6   :  { %v10269_v37 = vor.u32 %v13419_v9, %v10268_v24  ;;  %v10270_v24 = vld [vmem:[#allocation6 + $0x50] sm:$0xf0]  ;;  %v13465_v9 = vld [vmem:[#allocation6 + $0x1c4] sm:$0xf]  ;;  %3828 = vmatpush.bf16.msrb.mxu2 %v10541_v21  ;;  %3838 = vmatpush.bf16.msrb.mxu3 %v10733_v59  ;;  %v13523_v21 = vld [vmem:[#allocation6 + $0x38c] sm:$0xf0] }
 0x1e7   :  { %v10273_v25 = vor.u32 %v13417_v22, %v10270_v24  ;;  %v10685_v22 = vor.u32 %v13523_v21, %v10684_v20  ;;  %v13441_v24 = vld [vmem:[#allocation6 + $0x104] sm:$0xf]  ;;  %v10636_v59 = vld [vmem:[#allocation6 + $0x320] sm:$0xf] }
 0x1e8   :  { %3801 = vmatpush.bf16.msrb.mxu0 %v10269_v37  ;;  %v10462_v37 = vld [vmem:[#allocation6 + $0x1d0] sm:$0xf0] }
 0x1e9   :  { %3866 = vmatpush.bf16.msra.mxu1 %v10481_v19  ;;  %v10465_v26 = vor.u32 %v13465_v9, %v10462_v37  ;;  %v10366_v9 = vld [vmem:[#allocation6 + $0x110] sm:$0xf0] }
 0x1ea   :  { %3829 = vmatpush.bf16.msrb.mxu2 %v10525_v52 }
 0x1ec   :  { %3802 = vmatpush.bf16.msrb.mxu0 %v10253_v28  ;;  %v10254_v28 = vld [vmem:[#allocation6 + $0x30] sm:$0xf0] }
 0x1ed   :  { %3867 = vmatpush.bf16.msra.mxu1 %v10465_v26  ;;  %v10257_v30 = vor.u32 %v13413_v4, %v10254_v28  ;;  %v10369_v26 = vor.u32 %v13441_v24, %v10366_v9  ;;  %v10668_v28 = vld [vmem:[#allocation6 + $0x360] sm:$0xf]  ;;  %v10324_v9 = vld [vmem:[#allocation6 + $0xa8] sm:$0xf] }
 0x1ee   :  { %v10669_v41 = vor.u32 %v13519_v29, %v10668_v28 }
 0x1f0   :  { %3803 = vmatpush.bf16.msrb.mxu0 %v10237_v33  ;;  %v13479_v33 = vld [vmem:[#allocation6 + $0x22c] sm:$0xf0] }
 0x1f1   :  { %3868 = vmatpush.bf16.msra.mxu1 %v10449_v31  ;;  %v10509_v34 = vor.u32 %v13479_v33, %v10508_v32  ;;  %v13485_v31 = vld [vmem:[#allocation6 + $0x264] sm:$0xf]  ;;  %v10542_v32 = vld [vmem:[#allocation6 + $0x270] sm:$0xf0] }
 0x1f3   :  { %3830 = vmatpush.bf16.msrb.mxu2 %v10509_v34 }
 0x1f4   :  { %3852 = vmatpush.bf16.msra.mxu0 %v10353_v40  ;;  %v10241_v40 = vor.u32 %v13409_v35, %v10238_v36  ;;  %v10545_v35 = vor.u32 %v13485_v31, %v10542_v32  ;;  %v2853_v36 = vpop.f32.mrf.mxu1  ;;  %v13428_v32 = vld [vmem:[#allocation6 + $0x94] sm:$0xf0] }
 0x1f5   :  { %3869 = vmatpush.bf16.msra.mxu1 %v10433_v45 }
 0x1f8   :  { %3853 = vmatpush.bf16.msra.mxu0 %v10337_v50  ;;  %v10493_v50 = vor.u32 %v13475_v47, %v10492_v46  ;;  %v13481_v46 = vld [vmem:[#allocation6 + $0x244] sm:$0xf]  ;;  %v10526_v47 = vld [vmem:[#allocation6 + $0x250] sm:$0xf0] }
 0x1f9   :  { %3870 = vmatpush.bf16.msra.mxu1 %v10417_v57  ;;  %v2127_v57 = vperm.slane %v14686_v5, 1 }
 0x1fa   :  { %3831 = vmatpush.bf16.msrb.mxu2 %v10493_v50  ;;  %v10529_v50 = vor.u32 %v13481_v46, %v10526_v47  ;;  %v13424_v47 = vld [vmem:[#allocation6 + $0x74] sm:$0xf0] }
 0x1fc   :  { %3854 = vmatpush.bf16.msra.mxu0 %v10321_v58  ;;  %v10716_v58 = vld [vmem:[#allocation6 + $0x3c0] sm:$0xf]  ;;  %v2855_v7 = vpop.f32.mrf.mxu1 }
 0x1fd   :  { %v10717_v61 = vor.u32 %v13531_v60, %v10716_v58  ;;  %3871 = vmatpush.bf16.msra.mxu1 %v10401_v17  ;;  %v10356_v60 = vld [vmem:[#allocation6 + $0xe8] sm:$0xf] }
 0x1fe   :  { %3880 = vmatpush.bf16.msra.mxu2 %v10609_v56  ;;  %v10510_v56 = vld [vmem:[#allocation6 + $0x230] sm:$0xf0] }
 0x1ff   :  { %v14681_v49 = vpop.f32.mrf.mxu2  ;;  %3839 = vmatpush.bf16.msrb.mxu3 %v10717_v61  ;;  %v13440_v61 = vld [vmem:[#allocation6 + $0xf4] sm:$0xf0]  ;;  %v10513_v62 = vor.u32 %v13477_v55, %v10510_v56 }
 0x200   :  { %3855 = vmatpush.bf16.msra.mxu0 %v10305_v6  ;;  %v10593_v6 = vor.u32 %v13497_v2, %v10590_v3  ;;  %v10620_v3 = vld [vmem:[#allocation6 + $0x300] sm:$0xf]  ;;  %v10357_v51 = vor.u32 %v13440_v61, %v10356_v60  ;;  %v10276_v60 = vld [vmem:[#allocation6 + $0x48] sm:$0xf]  ;;  %v13420_v61 = vld [vmem:[#allocation6 + $0x54] sm:$0xf0] }
 0x201   :  { %3872 = vmatpush.bf16.msra.mxu1 %v10385_v16  ;;  %v13436_v16 = vld [vmem:[#allocation6 + $0xd4] sm:$0xf0] }
 0x202   :  { %3881 = vmatpush.bf16.msra.mxu2 %v10593_v6  ;;  %v13507_v6 = vld [vmem:[#allocation6 + $0x30c] sm:$0xf0] }
 0x203   :  { %3840 = vmatpush.bf16.msrb.mxu3 %v10701_v12  ;;  %v10494_v12 = vld [vmem:[#allocation6 + $0x210] sm:$0xf0] }
 0x204   :  { %3856 = vmatpush.bf16.msra.mxu0 %v10289_v63  ;;  %v2126_v63 = vperm.slane %v14686_v5, 0 }
 0x205   :  { %3873 = vmatpush.bf16.msra.mxu1 %v10369_v26  ;;  %v13432_v26 = vld [vmem:[#allocation6 + $0xb4] sm:$0xf0] }
 0x206   :  { %3882 = vmatpush.bf16.msra.mxu2 %v10577_v23  ;;  %v2784_v37 = vadd.f32 %v2783_v43, %v2126_v63  ;;  %v2786_v33 = vadd.f32 %v2785_v8, %v2126_v63  ;;  %v13515_v43 = vld [vmem:[#allocation6 + $0x34c] sm:$0xf0]  ;;  %v10621_v8 = vor.u32 %v13507_v6, %v10620_v3  ;;  %v10340_v63 = vld [vmem:[#allocation6 + $0xc8] sm:$0xf]  ;;  %v10670_v3 = vld [vmem:[#allocation6 + $0x370] sm:$0xf0] }
 0x207   :  { %v2813_v19 = vpop.f32.mrf.mxu2  ;;  %3841 = vmatpush.bf16.msrb.mxu3 %v10685_v22  ;;  %v10653_v45 = vor.u32 %v13515_v43, %v10652_v38  ;;  %v10341_v24 = vor.u32 %v13436_v16, %v10340_v63  ;;  %v13416_v63 = vld [vmem:[#allocation6 + $0x34] sm:$0xf0]  ;;  %v10452_v16 = vld [vmem:[#allocation6 + $0x1a8] sm:$0xf] }
 0x208   :  { %3857 = vmatpush.bf16.msra.mxu0 %v10273_v25  ;;  %v13489_v25 = vld [vmem:[#allocation6 + $0x284] sm:$0xf]  ;;  %v2798_v4 = vadd.f32 %v2797_v44, %v2784_v37  ;;  %v2800_v39 = vadd.f32 %v2799_v10, %v2786_v33 }
 0x209   :  { %v10561_v52 = vor.u32 %v13489_v25, %v10558_v42  ;;  %v13473_v10 = vld [vmem:[#allocation6 + $0x204] sm:$0xf] }
 0x20a   :  { %v2812_v34 = vadd.f32 %v14681_v49, %v2798_v4  ;;  %v2814_v48 = vadd.f32 %v2813_v19, %v2800_v39  ;;  %v13511_v49 = vld [vmem:[#allocation6 + $0x32c] sm:$0xf0]  ;;  %v10497_v18 = vor.u32 %v13473_v10, %v10494_v12  ;;  %v10734_v19 = vld [vmem:[#allocation6 + $0x3f0] sm:$0xf0]  ;;  %v13529_v42 = vld [vmem:[#allocation6 + $0x3c4] sm:$0xf]  ;;  %v10277_v12 = vor.u32 %v13420_v61, %v10276_v60 }
 0x20b   :  { %3883 = vmatpush.bf16.msra.mxu2 %v10561_v52  ;;  %3842 = vmatpush.bf16.msrb.mxu3 %v10669_v41  ;;  %v10637_v54 = vor.u32 %v13511_v49, %v10636_v59  ;;  %v10737_v21 = vor.u32 %v13533_v13, %v10734_v19  ;;  %v10308_v41 = vld [vmem:[#allocation6 + $0x88] sm:$0xf]  ;;  %v13525_v33 = vld [vmem:[#allocation6 + $0x3a4] sm:$0xf]  ;;  %v13464_v19 = vld [vmem:[#allocation6 + $0x1b4] sm:$0xf0] }
 0x20c   :  { %3858 = vmatpush.bf16.msra.mxu0 %v10257_v30  ;;  %v2839_v30 = vpop.f32.mrf.mxu0  ;;  %v10309_v46 = vor.u32 %v13428_v32, %v10308_v41  ;;  %v13438_v41 = vld [vmem:[#allocation6 + $0xec] sm:$0xf]  ;;  %v13500_v60 = vld [vmem:[#allocation6 + $0x2d4] sm:$0xf0] }
 0x20d   :  { %v2840_v14 = vadd.f32 %v2839_v30, %v2127_v57  ;;  %v10325_v30 = vor.u32 %v13432_v26, %v10324_v9  ;;  %v10244_v26 = vld [vmem:[#allocation6 + $0x8] sm:$0xf]  ;;  %v13430_v61 = vld [vmem:[#allocation6 + $0xac] sm:$0xf] }
 0x20f   :  { %v2867_v44 = vpop.f32.mrf.mxu2  ;;  %3884 = vmatpush.bf16.msra.mxu2 %v10545_v35  ;;  %3843 = vmatpush.bf16.msrb.mxu3 %v10653_v45  ;;  %v2854_v22 = vadd.f32 %v2853_v36, %v2840_v14  ;;  %v2909_v35 = vpop.f32.mrf.mxu1  ;;  %v10260_v14 = vld [vmem:[#allocation6 + $0x28] sm:$0xf] }
 0x210   :  { %3859 = vmatpush.bf16.msra.mxu0 %v10241_v40 }
 0x211   :  { %v2868_v37 = vadd.f32 %v2867_v44, %v2854_v22  ;;  %v10292_v44 = vld [vmem:[#allocation6 + $0x68] sm:$0xf] }
 0x212   :  { %v10293_v56 = vor.u32 %v13424_v47, %v10292_v44  ;;  %v13504_v47 = vld [vmem:[#allocation6 + $0x2f4] sm:$0xf0] }
 0x213   :  { %3885 = vmatpush.bf16.msra.mxu2 %v10529_v50  ;;  %3844 = vmatpush.bf16.msrb.mxu3 %v10637_v54  ;;  %v13472_v50 = vld [vmem:[#allocation6 + $0x1f4] sm:$0xf0] }
 0x214   :  { %v2841_v1 = vpop.f32.mrf.mxu0 }
 0x215   :  { %v2842_v25 = vadd.f32 %v2841_v1, %v2127_v57 }
 0x217   :  { %3886 = vmatpush.bf16.msra.mxu2 %v10513_v62  ;;  %v2869_v23 = vpop.f32.mrf.mxu2  ;;  %3845 = vmatpush.bf16.msrb.mxu3 %v10621_v8  ;;  %v2856_v28 = vadd.f32 %v2855_v7, %v2842_v25  ;;  %v10468_v62 = vld [vmem:[#allocation6 + $0x1c8] sm:$0xf]  ;;  %v2911_v10 = vpop.f32.mrf.mxu1  ;;  %v10261_v25 = vor.u32 %v13416_v63, %v10260_v14  ;;  %v2129_v63 = vperm.slane %v14686_v5, 3 }
 0x219   :  { %v2870_v31 = vadd.f32 %v2869_v23, %v2856_v28  ;;  %v13513_v23 = vld [vmem:[#allocation6 + $0x344] sm:$0xf] }
 0x21a   :  { %v13509_v28 = vld [vmem:[#allocation6 + $0x324] sm:$0xf] }
 0x21b   :  { %3887 = vmatpush.bf16.msra.mxu2 %v10497_v18  ;;  %3894 = vmatpush.bf16.msra.mxu3 %v10737_v21 }
 0x21c   :  { %v2895_v52 = vpop.f32.mrf.mxu0 }
 0x21f   :  { %v2965_v14 = vpop.f32.mrf.mxu1 }
 0x221   :  { %v2923_v45 = vpop.f32.mrf.mxu2 }
 0x224   :  { %v2897_v55 = vpop.f32.mrf.mxu0 }
 0x228   :  { %v2825_v27 = vpop.f32.mrf.mxu3 }
 0x229   :  { %v2826_v40 = vadd.f32 %v2825_v27, %v2812_v34  ;;  %v10718_v27 = vld [vmem:[#allocation6 + $0x3d0] sm:$0xf0]  ;;  %v2925_v21 = vpop.f32.mrf.mxu2 }
 0x22a   :  { %v10721_v4 = vor.u32 %v13529_v42, %v10718_v27  ;;  %v10702_v34 = vld [vmem:[#allocation6 + $0x3b0] sm:$0xf0]  ;;  %v13412_v42 = vld [vmem:[#allocation6 + $0x14] sm:$0xf0]  ;;  %v10436_v27 = vld [vmem:[#allocation6 + $0x188] sm:$0xf] }
 0x22b   :  { %v2998_v0 = vmul.f32 0.01, %v2826_v40  ;;  %v10705_v39 = vor.u32 %v13525_v33, %v10702_v34 }
 0x22c   :  { %3895 = vmatpush.bf16.msra.mxu3 %v10721_v4  ;;  %v13460_v4 = vld [vmem:[#allocation6 + $0x194] sm:$0xf0] }
 0x22d   :  { %v3006_v2 = vmax.f32 %v2826_v40, %v2998_v0  ;;  %v2128_v40 = vperm.slane %v14686_v5, 2  ;;  %v13521_v0 = vld [vmem:[#allocation6 + $0x384] sm:$0xf] }
 0x22f   :  { %v2896_v49 = vadd.f32 %v2895_v52, %v2128_v40  ;;  %v2898_v8 = vadd.f32 %v2897_v55, %v2128_v40  ;;  %v13456_v40 = vld [vmem:[#allocation6 + $0x174] sm:$0xf0]  ;;  %v10404_v55 = vld [vmem:[#allocation6 + $0x148] sm:$0xf] }
 0x230   :  { %v2827_v11 = vpop.f32.mrf.mxu3  ;;  %3896 = vmatpush.bf16.msra.mxu3 %v10705_v39  ;;  %v10420_v39 = vld [vmem:[#allocation6 + $0x168] sm:$0xf] }
 0x231   :  { %v2828_v53 = vadd.f32 %v2827_v11, %v2814_v48  ;;  %v10484_v48 = vld [vmem:[#allocation6 + $0x1e8] sm:$0xf] }
 0x233   :  { %v3002_v58 = vmul.f32 0.01, %v2828_v53 }
 0x235   :  { %v3010_v17 = vmax.f32 %v2828_v53, %v3002_v58  ;;  %v10686_v53 = vld [vmem:[#allocation6 + $0x390] sm:$0xf0]  ;;  %v10485_v58 = vor.u32 %v13472_v50, %v10484_v48  ;;  %v13434_v48 = vld [vmem:[#allocation6 + $0xcc] sm:$0xf]  ;;  %v10342_v50 = vld [vmem:[#allocation6 + $0xd8] sm:$0xf0] }
 0x236   :  { %v10689_v59 = vor.u32 %v13521_v0, %v10686_v53 }
 0x237   :  { %v14691_v15 = vpack.c.bf16 %v3010_v17, %v3006_v2  ;;  %v13468_v2 = vld [vmem:[#allocation6 + $0x1d4] sm:$0xf0]  ;;  %v13517_v17 = vld [vmem:[#allocation6 + $0x364] sm:$0xf] }
 0x238   :  { %v2881_v20 = vpop.f32.mrf.mxu3  ;;  %3897 = vmatpush.bf16.msra.mxu3 %v10689_v59  ;;  %v10673_v7 = vor.u32 %v13517_v17, %v10670_v3  ;;  %v10469_v13 = vor.u32 %v13468_v2, %v10468_v62  ;;  %v10421_v59 = vor.u32 %v13456_v40, %v10420_v39  ;;  %v10326_v62 = vld [vmem:[#allocation6 + $0xb8] sm:$0xf0]  ;;  %v2951_v2 = vpop.f32.mrf.mxu0 }
 0x239   :  { %3804 = vmatmul.bf16.vlgmr.msrb.gmra.mxu0 %v14691_v15  ;;  %v2882_v29 = vadd.f32 %v2881_v20, %v2868_v37  ;;  %v10654_v20 = vld [vmem:[#allocation6 + $0x350] sm:$0xf0]  ;;  %v10453_v37 = vor.u32 %v13464_v19, %v10452_v16  ;;  %v2967_v39 = vpop.f32.mrf.mxu1 }
 0x23a   :  { %3908 = vmatpush.bf16.msrb.mxu0 %v10357_v51  ;;  %v2910_v51 = vadd.f32 %v2909_v35, %v2896_v49  ;;  %v10657_v22 = vor.u32 %v13513_v23, %v10654_v20  ;;  %v10245_v35 = vor.u32 %v13412_v42, %v10244_v26  ;;  %v10372_v20 = vld [vmem:[#allocation6 + $0x108] sm:$0xf]  ;;  %v10486_v26 = vld [vmem:[#allocation6 + $0x1f8] sm:$0xf0]  ;;  %v2952_v42 = vadd.f32 %v2951_v2, %v2129_v63 }
 0x23b   :  { %v2999_v38 = vmul.f32 0.01, %v2882_v29 }
 0x23c   :  { %v2924_v18 = vadd.f32 %v2923_v45, %v2910_v51  ;;  %3898 = vmatpush.bf16.msra.mxu3 %v10673_v7  ;;  %v13505_v45 = vld [vmem:[#allocation6 + $0x304] sm:$0xf]  ;;  %v10388_v7 = vld [vmem:[#allocation6 + $0x128] sm:$0xf]  ;;  %v13448_v51 = vld [vmem:[#allocation6 + $0x134] sm:$0xf0] }
 0x23d   :  { %v3007_v57 = vmax.f32 %v2882_v29, %v2999_v38  ;;  %v10638_v29 = vld [vmem:[#allocation6 + $0x330] sm:$0xf0]  ;;  %v10612_v38 = vld [vmem:[#allocation6 + $0x2e8] sm:$0xf]  ;;  %v10389_v16 = vor.u32 %v13448_v51, %v10388_v7 }
 0x23e   :  { %3909 = vmatpush.bf16.msrb.mxu0 %v10341_v24  ;;  %v2912_v24 = vadd.f32 %v2911_v10, %v2898_v8  ;;  %v10641_v32 = vor.u32 %v13509_v28, %v10638_v29  ;;  %v10580_v8 = vld [vmem:[#allocation6 + $0x2a8] sm:$0xf]  ;;  %v13496_v10 = vld [vmem:[#allocation6 + $0x2b4] sm:$0xf0] }
 0x23f   :  { %v10581_v19 = vor.u32 %v13496_v10, %v10580_v8  ;;  %v10548_v28 = vld [vmem:[#allocation6 + $0x268] sm:$0xf] }
 0x240   :  { %v2883_v36 = vpop.f32.mrf.mxu3  ;;  %v2926_v52 = vadd.f32 %v2925_v21, %v2912_v24  ;;  %3899 = vmatpush.bf16.msra.mxu3 %v10657_v22  ;;  %v13444_v21 = vld [vmem:[#allocation6 + $0x114] sm:$0xf0]  ;;  %v10564_v22 = vld [vmem:[#allocation6 + $0x288] sm:$0xf] }
 0x241   :  { %v2884_v43 = vadd.f32 %v2883_v36, %v2870_v31  ;;  %v10358_v31 = vld [vmem:[#allocation6 + $0xf8] sm:$0xf0]  ;;  %v10437_v36 = vor.u32 %v13460_v4, %v10436_v27  ;;  %v13492_v24 = vld [vmem:[#allocation6 + $0x294] sm:$0xf0]  ;;  %v10373_v27 = vor.u32 %v13444_v21, %v10372_v20  ;;  %v10500_v10 = vld [vmem:[#allocation6 + $0x208] sm:$0xf] }
 0x242   :  { %3910 = vmatpush.bf16.msrb.mxu0 %v10325_v30  ;;  %v10361_v44 = vor.u32 %v13438_v41, %v10358_v31  ;;  %v10565_v5 = vor.u32 %v13492_v24, %v10564_v22  ;;  %v13418_v41 = vld [vmem:[#allocation6 + $0x4c] sm:$0xf]  ;;  %v10278_v31 = vld [vmem:[#allocation6 + $0x58] sm:$0xf0] }
 0x243   :  { %v3003_v11 = vmul.f32 0.01, %v2884_v43  ;;  %v10614_v20 = vld [vmem:[#allocation6 + $0x2f8] sm:$0xf0] }
 0x244   :  { %3900 = vmatpush.bf16.msra.mxu3 %v10641_v32 }
 0x245   :  { %v3011_v54 = vmax.f32 %v2884_v43, %v3003_v11 }
 0x246   :  { %3911 = vmatpush.bf16.msrb.mxu0 %v10309_v46  ;;  %v10622_v46 = vld [vmem:[#allocation6 + $0x310] sm:$0xf0] }
 0x247   :  { %v14695_v1 = vpack.c.bf16 %v3011_v54, %v3007_v57  ;;  %v10625_v11 = vor.u32 %v13505_v45, %v10622_v46  ;;  %v10613_v57 = vor.u32 %v13504_v47, %v10612_v38  ;;  %v10345_v54 = vor.u32 %v13434_v48, %v10342_v50  ;;  %v13484_v46 = vld [vmem:[#allocation6 + $0x254] sm:$0xf0]  ;;  %v13414_v47 = vld [vmem:[#allocation6 + $0x2c] sm:$0xf]  ;;  %v10262_v48 = vld [vmem:[#allocation6 + $0x38] sm:$0xf0] }
 0x248   :  { %v2937_v6 = vpop.f32.mrf.mxu3  ;;  %v10281_v38 = vor.u32 %v13418_v41, %v10278_v31  ;;  %v10708_v31 = vld [vmem:[#allocation6 + $0x3a8] sm:$0xf] }
 0x249   :  { %3818 = vmatmul.bf16.vlgmr.msrb.gmra.mxu1 %v14695_v1  ;;  %3860 = vmatmul.bf16.vlgmr.msra.gmra.mxu0 %v14691_v15  ;;  %v2938_v9 = vadd.f32 %v2937_v6, %v2924_v18  ;;  %v10329_v6 = vor.u32 %v13430_v61, %v10326_v62  ;;  %v2979_v18 = vpop.f32.mrf.mxu2  ;;  %v13410_v61 = vld [vmem:[#allocation6 + $0xc] sm:$0xf]  ;;  %v10246_v62 = vld [vmem:[#allocation6 + $0x18] sm:$0xf0] }
 0x24a   :  { %3912 = vmatpush.bf16.msrb.mxu0 %v10293_v56  ;;  %3922 = vmatpush.bf16.msrb.mxu1 %v10485_v58  ;;  %v13452_v56 = vld [vmem:[#allocation6 + $0x154] sm:$0xf0]  ;;  %v10596_v58 = vld [vmem:[#allocation6 + $0x2c8] sm:$0xf]  ;;  %v10249_v8 = vor.u32 %v13410_v61, %v10246_v62  ;;  %v10534_v61 = vld [vmem:[#allocation6 + $0x258] sm:$0xf0] }
 0x24b   :  { %v3000_v33 = vmul.f32 0.01, %v2938_v9  ;;  %3901 = vmatpush.bf16.msra.mxu3 %v10625_v11  ;;  %v10405_v17 = vor.u32 %v13452_v56, %v10404_v55  ;;  %v10597_v3 = vor.u32 %v13500_v60, %v10596_v58  ;;  %v13462_v11 = vld [vmem:[#allocation6 + $0x1ac] sm:$0xf]  ;;  %v10516_v55 = vld [vmem:[#allocation6 + $0x228] sm:$0xf] }
 0x24c   :  { %v13480_v60 = vld [vmem:[#allocation6 + $0x234] sm:$0xf0] }
 0x24d   :  { %v3008_v0 = vmax.f32 %v2938_v9, %v3000_v33  ;;  %v13422_v9 = vld [vmem:[#allocation6 + $0x6c] sm:$0xf]  ;;  %v10517_v51 = vor.u32 %v13480_v60, %v10516_v55 }
 0x24e   :  { %3913 = vmatpush.bf16.msrb.mxu0 %v10277_v12  ;;  %3923 = vmatpush.bf16.msrb.mxu1 %v10469_v13  ;;  %v13426_v12 = vld [vmem:[#allocation6 + $0x8c] sm:$0xf]  ;;  %v10310_v13 = vld [vmem:[#allocation6 + $0x98] sm:$0xf0] }
 0x24f   :  { %v10313_v23 = vor.u32 %v13426_v12, %v10310_v13  ;;  %v13466_v33 = vld [vmem:[#allocation6 + $0x1cc] sm:$0xf]  ;;  %v13476_v12 = vld [vmem:[#allocation6 + $0x214] sm:$0xf0]  ;;  %v10740_v13 = vld [vmem:[#allocation6 + $0x3e8] sm:$0xf] }
 0x250   :  { %v2939_v30 = vpop.f32.mrf.mxu3  ;;  %v10501_v24 = vor.u32 %v13476_v12, %v10500_v10  ;;  %v13482_v60 = vld [vmem:[#allocation6 + $0x24c] sm:$0xf]  ;;  %v10628_v10 = vld [vmem:[#allocation6 + $0x308] sm:$0xf]  ;;  %v13508_v12 = vld [vmem:[#allocation6 + $0x314] sm:$0xf0] }
 0x251   :  { %v2940_v34 = vadd.f32 %v2939_v30, %v2926_v52  ;;  %v2953_v52 = vpop.f32.mrf.mxu0  ;;  %v13488_v30 = vld [vmem:[#allocation6 + $0x274] sm:$0xf0]  ;;  %v2981_v50 = vpop.f32.mrf.mxu2 }
 0x252   :  { %3914 = vmatpush.bf16.msrb.mxu0 %v10261_v25  ;;  %3924 = vmatpush.bf16.msrb.mxu1 %v10453_v37  ;;  %v10294_v25 = vld [vmem:[#allocation6 + $0x78] sm:$0xf0]  ;;  %v13470_v37 = vld [vmem:[#allocation6 + $0x1ec] sm:$0xf]  ;;  %v10549_v40 = vor.u32 %v13488_v30, %v10548_v28 }
 0x253   :  { %v3004_v43 = vmul.f32 0.01, %v2940_v34  ;;  %v10297_v4 = vor.u32 %v13422_v9, %v10294_v25  ;;  %v10489_v29 = vor.u32 %v13470_v37, %v10486_v26  ;;  %v10598_v28 = vld [vmem:[#allocation6 + $0x2d8] sm:$0xf0] }
 0x255   :  { %v3012_v53 = vmax.f32 %v2940_v34, %v3004_v43  ;;  %v10470_v34 = vld [vmem:[#allocation6 + $0x1d8] sm:$0xf0]  ;;  %v10532_v43 = vld [vmem:[#allocation6 + $0x248] sm:$0xf] }
 0x256   :  { %3915 = vmatpush.bf16.msrb.mxu0 %v10245_v35  ;;  %3925 = vmatpush.bf16.msrb.mxu1 %v10437_v36  ;;  %v2966_v35 = vadd.f32 %v2965_v14, %v2952_v42  ;;  %v2954_v36 = vadd.f32 %v2953_v52, %v2129_v63  ;;  %v10473_v45 = vor.u32 %v13466_v33, %v10470_v34  ;;  %v10724_v42 = vld [vmem:[#allocation6 + $0x3c8] sm:$0xf]  ;;  %v13450_v52 = vld [vmem:[#allocation6 + $0x14c] sm:$0xf]  ;;  %v10390_v34 = vld [vmem:[#allocation6 + $0x138] sm:$0xf0] }
 0x257   :  { %v14699_v49 = vpack.c.bf16 %v3012_v53, %v3008_v0  ;;  %v10454_v0 = vld [vmem:[#allocation6 + $0x1b8] sm:$0xf0]  ;;  %v13446_v33 = vld [vmem:[#allocation6 + $0x12c] sm:$0xf] }
 0x258   :  { %v2968_v53 = vadd.f32 %v2967_v39, %v2954_v36  ;;  %v10457_v58 = vor.u32 %v13462_v11, %v10454_v0  ;;  %v10582_v36 = vld [vmem:[#allocation6 + $0x2b8] sm:$0xf0]  ;;  %v10676_v0 = vld [vmem:[#allocation6 + $0x368] sm:$0xf] }
 0x259   :  { %3832 = vmatmul.bf16.vlgmr.msrb.gmra.mxu2 %v14699_v49  ;;  %3874 = vmatmul.bf16.vlgmr.msra.gmra.mxu1 %v14695_v1 }
 0x25a   :  { %3964 = vmatpush.bf16.msra.mxu0 %v10361_v44  ;;  %3926 = vmatpush.bf16.msrb.mxu1 %v10421_v59  ;;  %v2980_v44 = vadd.f32 %v2979_v18, %v2966_v35  ;;  %v2982_v56 = vadd.f32 %v2981_v50, %v2968_v53  ;;  %v13454_v18 = vld [vmem:[#allocation6 + $0x16c] sm:$0xf]  ;;  %v13520_v53 = vld [vmem:[#allocation6 + $0x374] sm:$0xf0] }
 0x25b   :  { %3916 = vmatmul.bf16.vlgmr.msrb.gmra.mxu0 %v14691_v15  ;;  %3936 = vmatpush.bf16.msrb.mxu2 %v10613_v57  ;;  %v10533_v57 = vor.u32 %v13484_v46, %v10532_v43  ;;  %v13494_v35 = vld [vmem:[#allocation6 + $0x2ac] sm:$0xf]  ;;  %v13524_v43 = vld [vmem:[#allocation6 + $0x394] sm:$0xf0] }
 0x25c   :  { %v13490_v46 = vld [vmem:[#allocation6 + $0x28c] sm:$0xf] }
 0x25e   :  { %3965 = vmatpush.bf16.msra.mxu0 %v10345_v54  ;;  %3927 = vmatpush.bf16.msrb.mxu1 %v10405_v17  ;;  %v10265_v54 = vor.u32 %v13414_v47, %v10262_v48  ;;  %v13458_v17 = vld [vmem:[#allocation6 + $0x18c] sm:$0xf]  ;;  %v10566_v47 = vld [vmem:[#allocation6 + $0x298] sm:$0xf0] }
 0x25f   :  { %3937 = vmatpush.bf16.msrb.mxu2 %v10597_v3  ;;  %v10438_v3 = vld [vmem:[#allocation6 + $0x198] sm:$0xf0]  ;;  %v10569_v11 = vor.u32 %v13490_v46, %v10566_v47  ;;  %v13546_v46 = vld [vmem:[#allocation7 + $0x44] sm:$0xf0] }
 0x260   :  { %v10441_v63 = vor.u32 %v13458_v17, %v10438_v3  ;;  %v10644_v17 = vld [vmem:[#allocation6 + $0x328] sm:$0xf]  ;;  %v13512_v3 = vld [vmem:[#allocation6 + $0x334] sm:$0xf0] }
 0x262   :  { %3966 = vmatpush.bf16.msra.mxu0 %v10329_v6  ;;  %3928 = vmatpush.bf16.msrb.mxu1 %v10389_v16  ;;  %v13536_v16 = vld [vmem:[#allocation6 + $0x3f4] sm:$0xf0] }
 0x263   :  { %3938 = vmatpush.bf16.msrb.mxu2 %v10581_v19  ;;  %v10422_v19 = vld [vmem:[#allocation6 + $0x178] sm:$0xf0]  ;;  %v10741_v9 = vor.u32 %v13536_v16, %v10740_v13  ;;  %v13474_v13 = vld [vmem:[#allocation6 + $0x20c] sm:$0xf] }
 0x264   :  { %v10425_v37 = vor.u32 %v13454_v18, %v10422_v19  ;;  %v10742_v16 = vld [vmem:[#allocation6 + $0x3f8] sm:$0xf0]  ;;  %v10629_v18 = vor.u32 %v13508_v12, %v10628_v10  ;;  %v13562_v10 = vld [vmem:[#allocation7 + $0xc4] sm:$0xf0]  ;;  %v13551_v12 = vld [vmem:[#allocation7 + $0x74] sm:$0xf] }
 0x266   :  { %3967 = vmatpush.bf16.msra.mxu0 %v10313_v23  ;;  %3929 = vmatpush.bf16.msrb.mxu1 %v10373_v27  ;;  %v13502_v23 = vld [vmem:[#allocation6 + $0x2ec] sm:$0xf]  ;;  %v13532_v27 = vld [vmem:[#allocation6 + $0x3d4] sm:$0xf0] }
 0x267   :  { %3939 = vmatpush.bf16.msrb.mxu2 %v10565_v5  ;;  %v10617_v26 = vor.u32 %v13502_v23, %v10614_v20  ;;  %v10406_v5 = vld [vmem:[#allocation6 + $0x158] sm:$0xf0]  ;;  %v13530_v23 = vld [vmem:[#allocation6 + $0x3cc] sm:$0xf] }
 0x268   :  { %v2993_v32 = vpop.f32.mrf.mxu3  ;;  %v10409_v30 = vor.u32 %v13450_v52, %v10406_v5  ;;  %v10726_v20 = vld [vmem:[#allocation6 + $0x3d8] sm:$0xf0] }
 0x269   :  { %3888 = vmatmul.bf16.vlgmr.msra.gmra.mxu2 %v14699_v49  ;;  %3930 = vmatmul.bf16.vlgmr.msrb.gmra.mxu1 %v14695_v1  ;;  %v2994_v59 = vadd.f32 %v2993_v32, %v2980_v44  ;;  %v13528_v32 = vld [vmem:[#allocation6 + $0x3b4] sm:$0xf0]  ;;  %v13442_v44 = vld [vmem:[#allocation6 + $0x10c] sm:$0xf]  ;;  %v10678_v52 = vld [vmem:[#allocation6 + $0x378] sm:$0xf0] }
 0x26a   :  { %3968 = vmatpush.bf16.msra.mxu0 %v10297_v4  ;;  %3978 = vmatpush.bf16.msra.mxu1 %v10489_v29  ;;  %v13498_v4 = vld [vmem:[#allocation6 + $0x2cc] sm:$0xf]  ;;  %v10725_v29 = vor.u32 %v13532_v27, %v10724_v42  ;;  %v10709_v39 = vor.u32 %v13528_v32, %v10708_v31 }
 0x26b   :  { %3940 = vmatpush.bf16.msrb.mxu2 %v10549_v40  ;;  %v3001_v6 = vmul.f32 0.01, %v2994_v59  ;;  %v10601_v41 = vor.u32 %v13498_v4, %v10598_v28  ;;  %v10585_v40 = vor.u32 %v13494_v35, %v10582_v36  ;;  %v13518_v27 = vld [vmem:[#allocation6 + $0x36c] sm:$0xf]  ;;  %v10662_v28 = vld [vmem:[#allocation6 + $0x358] sm:$0xf0] }
 0x26c   :  { %v10681_v5 = vor.u32 %v13518_v27, %v10678_v52  ;;  %v13514_v4 = vld [vmem:[#allocation6 + $0x34c] sm:$0xf]  ;;  %v13552_v35 = vld [vmem:[#allocation7 + $0x74] sm:$0xf0]  ;;  %v13582_v27 = vld [vmem:[#allocation7 + $0x164] sm:$0xf0] }
 0x26d   :  { %v3009_v21 = vmax.f32 %v2994_v59, %v3001_v6  ;;  %v13486_v59 = vld [vmem:[#allocation6 + $0x26c] sm:$0xf]  ;;  %v13547_v52 = vld [vmem:[#allocation7 + $0x54] sm:$0xf] }
 0x26e   :  { %3969 = vmatpush.bf16.msra.mxu0 %v10281_v38  ;;  %3979 = vmatpush.bf16.msra.mxu1 %v10473_v45  ;;  %v10692_v38 = vld [vmem:[#allocation6 + $0x388] sm:$0xf]  ;;  %v10374_v45 = vld [vmem:[#allocation6 + $0x118] sm:$0xf0]  ;;  %v13478_v6 = vld [vmem:[#allocation6 + $0x22c] sm:$0xf] }
 0x26f   :  { %3941 = vmatpush.bf16.msrb.mxu2 %v10533_v57  ;;  %v10693_v48 = vor.u32 %v13524_v43, %v10692_v38  ;;  %v10377_v50 = vor.u32 %v13442_v44, %v10374_v45  ;;  %v10550_v57 = vld [vmem:[#allocation6 + $0x278] sm:$0xf0]  ;;  %v13506_v32 = vld [vmem:[#allocation6 + $0x30c] sm:$0xf]  ;;  %v10788_v38 = vld [vmem:[#allocation7 + $0x50] sm:$0xf] }
 0x270   :  { %v2995_v2 = vpop.f32.mrf.mxu3  ;;  %v10553_v55 = vor.u32 %v13486_v59, %v10550_v57  ;;  %v13548_v43 = vld [vmem:[#allocation7 + $0x54] sm:$0xf0]  ;;  %v10780_v45 = vld [vmem:[#allocation7 + $0x40] sm:$0xf]  ;;  %v13542_v57 = vld [vmem:[#allocation7 + $0x24] sm:$0xf0] }
 0x271   :  { %v2996_v7 = vadd.f32 %v2995_v2, %v2982_v56  ;;  %v10660_v56 = vld [vmem:[#allocation6 + $0x348] sm:$0xf]  ;;  %v10537_v2 = vor.u32 %v13482_v60, %v10534_v61  ;;  %v10789_v44 = vor.u32 %v13548_v43, %v10788_v38  ;;  %v10781_v47 = vor.u32 %v13546_v46, %v10780_v45  ;;  %v10764_v59 = vld [vmem:[#allocation7 + $0x20] sm:$0xf]  ;;  %v10756_v60 = vld [vmem:[#allocation7 + $0x10] sm:$0xf] }
 0x272   :  { %3970 = vmatpush.bf16.msra.mxu0 %v10265_v54  ;;  %3980 = vmatpush.bf16.msra.mxu1 %v10457_v58  ;;  %v10677_v54 = vor.u32 %v13520_v53, %v10676_v0  ;;  %v13516_v58 = vld [vmem:[#allocation6 + $0x354] sm:$0xf0]  ;;  %v13543_v45 = vld [vmem:[#allocation7 + $0x34] sm:$0xf]  ;;  %v10774_v46 = vld [vmem:[#allocation7 + $0x38] sm:$0xf0] }
 0x273   :  { %v3005_v14 = vmul.f32 0.01, %v2996_v7  ;;  %3942 = vmatpush.bf16.msrb.mxu2 %v10517_v51  ;;  %v10661_v62 = vor.u32 %v13516_v58, %v10660_v56  ;;  %v10645_v51 = vor.u32 %v13512_v3, %v10644_v17  ;;  %v13568_v0 = vld [vmem:[#allocation7 + $0xf4] sm:$0xf0]  ;;  %v13566_v56 = vld [vmem:[#allocation7 + $0xe4] sm:$0xf0] }
 0x274   :  { %v13540_v61 = vld [vmem:[#allocation7 + $0x14] sm:$0xf0] }
 0x275   :  { %v3013_v22 = vmax.f32 %v2996_v7, %v3005_v14  ;;  %v10518_v7 = vld [vmem:[#allocation6 + $0x238] sm:$0xf0]  ;;  %v13564_v17 = vld [vmem:[#allocation7 + $0xd4] sm:$0xf0] }
 0x276   :  { %3971 = vmatpush.bf16.msra.mxu0 %v10249_v8  ;;  %3981 = vmatpush.bf16.msra.mxu1 %v10441_v63  ;;  %v10521_v8 = vor.u32 %v13478_v6, %v10518_v7  ;;  %v10502_v14 = vld [vmem:[#allocation6 + $0x218] sm:$0xf0]  ;;  %v13534_v63 = vld [vmem:[#allocation6 + $0x3ec] sm:$0xf]  ;;  %v10748_v6 = vld [vmem:[#allocation7] sm:$0xf] }
 0x277   :  { %v14707_v25 = vpack.c.bf16 %v3013_v22, %v3009_v21  ;;  %3943 = vmatpush.bf16.msrb.mxu2 %v10501_v24  ;;  %v10745_v19 = vor.u32 %v13534_v63, %v10742_v16  ;;  %v10729_v21 = vor.u32 %v13530_v23, %v10726_v20  ;;  %v13526_v22 = vld [vmem:[#allocation6 + $0x3ac] sm:$0xf]  ;;  %v10710_v24 = vld [vmem:[#allocation6 + $0x3b8] sm:$0xf0]  ;;  %v13538_v7 = vld [vmem:[#allocation7 + $0x4] sm:$0xf0] }
 0x278   :  { %v10836_v16 = vld [vmem:[#allocation7 + $0xb0] sm:$0xf]  ;;  %v13584_v23 = vld [vmem:[#allocation7 + $0x174] sm:$0xf0]  ;;  %v13549_v20 = vld [vmem:[#allocation7 + $0x64] sm:$0xf] }
 0x279   :  { %3846 = vmatmul.bf16.vlgmr.msrb.gmra.mxu3 %v14707_v25  ;;  %3972 = vmatmul.bf16.vlgmr.msra.gmra.mxu0 %v14691_v15  ;;  %v10393_v15 = vor.u32 %v13446_v33, %v10390_v34  ;;  %v10804_v34 = vld [vmem:[#allocation7 + $0x70] sm:$0xf] }
 0x27a   :  { %3950 = vmatpush.bf16.msrb.mxu3 %v10741_v9  ;;  %3982 = vmatpush.bf16.msra.mxu1 %v10425_v37  ;;  %v10713_v9 = vor.u32 %v13526_v22, %v10710_v24  ;;  %v13522_v37 = vld [vmem:[#allocation6 + $0x38c] sm:$0xf]  ;;  %v10805_v36 = vor.u32 %v13552_v35, %v10804_v34 }
 0x27b   :  { %3992 = vmatpush.bf16.msra.mxu2 %v10617_v26  ;;  %v10694_v26 = vld [vmem:[#allocation6 + $0x398] sm:$0xf0] }
 0x27c   :  { %3944 = vmatmul.bf16.vlgmr.msrb.gmra.mxu2 %v14699_v49  ;;  %v10697_v42 = vor.u32 %v13522_v37, %v10694_v26  ;;  %4430 = vmatpush.bf16.msrb.mxu0 %v10805_v36  ;;  %v13558_v37 = vld [vmem:[#allocation7 + $0xa4] sm:$0xf0]  ;;  %v10924_v26 = vld [vmem:[#allocation7 + $0x160] sm:$0xf] }
 0x27e   :  { %3951 = vmatpush.bf16.msrb.mxu3 %v10725_v29  ;;  %3983 = vmatpush.bf16.msra.mxu1 %v10409_v30  ;;  %v10665_v29 = vor.u32 %v13514_v4, %v10662_v28  ;;  %v13510_v30 = vld [vmem:[#allocation6 + $0x32c] sm:$0xf]  ;;  %v10925_v4 = vor.u32 %v13582_v27, %v10924_v26  ;;  %v10876_v26 = vld [vmem:[#allocation7 + $0x100] sm:$0xf]  ;;  %v10996_v27 = vld [vmem:[#allocation7 + $0x1f0] sm:$0xf] }
 0x27f   :  { %3993 = vmatpush.bf16.msra.mxu2 %v10601_v41  ;;  %v10646_v41 = vld [vmem:[#allocation6 + $0x338] sm:$0xf0] }
 0x280   :  { %v10649_v31 = vor.u32 %v13510_v30, %v10646_v41  ;;  %v13556_v30 = vld [vmem:[#allocation7 + $0x94] sm:$0xf0]  ;;  %v10916_v41 = vld [vmem:[#allocation7 + $0x150] sm:$0xf] }
 0x282   :  { %3952 = vmatpush.bf16.msrb.mxu3 %v10709_v39  ;;  %3984 = vmatpush.bf16.msra.mxu1 %v10393_v15  ;;  %v10796_v39 = vld [vmem:[#allocation7 + $0x60] sm:$0xf]  ;;  %v13550_v15 = vld [vmem:[#allocation7 + $0x64] sm:$0xf0] }
 0x283   :  { %3994 = vmatpush.bf16.msra.mxu2 %v10585_v40  ;;  %v10797_v40 = vor.u32 %v13550_v15, %v10796_v39  ;;  %v10812_v39 = vld [vmem:[#allocation7 + $0x80] sm:$0xf]  ;;  %v13554_v15 = vld [vmem:[#allocation7 + $0x84] sm:$0xf0] }
 0x284   :  { %v10813_v43 = vor.u32 %v13554_v15, %v10812_v39  ;;  %v10988_v39 = vld [vmem:[#allocation7 + $0x1e0] sm:$0xf]  ;;  %v13598_v15 = vld [vmem:[#allocation7 + $0x1e4] sm:$0xf0] }
 0x285   :  { %4431 = vmatpush.bf16.msrb.mxu0 %v10797_v40  ;;  %v10908_v40 = vld [vmem:[#allocation7 + $0x140] sm:$0xf] }
 0x286   :  { %3953 = vmatpush.bf16.msrb.mxu3 %v10693_v48  ;;  %3985 = vmatpush.bf16.msra.mxu1 %v10377_v50  ;;  %v10772_v48 = vld [vmem:[#allocation7 + $0x30] sm:$0xf]  ;;  %v13544_v50 = vld [vmem:[#allocation7 + $0x34] sm:$0xf0] }
 0x287   :  { %3995 = vmatpush.bf16.msra.mxu2 %v10569_v11  ;;  %v10868_v11 = vld [vmem:[#allocation7 + $0xf0] sm:$0xf] }
 0x288   :  { %v10869_v53 = vor.u32 %v13568_v0, %v10868_v11  ;;  %v10870_v11 = vld [vmem:[#allocation7 + $0xf8] sm:$0xf0] }
 0x289   :  { %3902 = vmatmul.bf16.vlgmr.msra.gmra.mxu3 %v14707_v25  ;;  %3986 = vmatmul.bf16.vlgmr.msra.gmra.mxu1 %v14695_v1  ;;  %v10505_v1 = vor.u32 %v13474_v13, %v10502_v14  ;;  %v10806_v13 = vld [vmem:[#allocation7 + $0x78] sm:$0xf0] }
 0x28a   :  { %3954 = vmatpush.bf16.msrb.mxu3 %v10677_v54  ;;  %4432 = vmatpush.bf16.msrb.mxu0 %v10789_v44  ;;  %v10860_v54 = vld [vmem:[#allocation7 + $0xe0] sm:$0xf]  ;;  %v10809_v63 = vor.u32 %v13551_v12, %v10806_v13  ;;  %v13578_v44 = vld [vmem:[#allocation7 + $0x144] sm:$0xf0]  ;;  %v10854_v12 = vld [vmem:[#allocation7 + $0xd8] sm:$0xf0] }
 0x28b   :  { %3996 = vmatpush.bf16.msra.mxu2 %v10553_v55  ;;  %4444 = vmatpush.bf16.msrb.mxu1 %v10869_v53  ;;  %v10765_v55 = vor.u32 %v13542_v57, %v10764_v59  ;;  %v10861_v58 = vor.u32 %v13566_v56, %v10860_v54  ;;  %v10900_v53 = vld [vmem:[#allocation7 + $0x130] sm:$0xf]  ;;  %v13576_v59 = vld [vmem:[#allocation7 + $0x134] sm:$0xf0]  ;;  %v13541_v54 = vld [vmem:[#allocation7 + $0x24] sm:$0xf] }
 0x28c   :  { %v10901_v57 = vor.u32 %v13576_v59, %v10900_v53  ;;  %v13565_v56 = vld [vmem:[#allocation7 + $0xe4] sm:$0xf]  ;;  %v13596_v59 = vld [vmem:[#allocation7 + $0x1d4] sm:$0xf0] }
 0x28e   :  { %3955 = vmatpush.bf16.msrb.mxu3 %v10661_v62  ;;  %4433 = vmatpush.bf16.msrb.mxu0 %v10781_v47  ;;  %v10852_v62 = vld [vmem:[#allocation7 + $0xd0] sm:$0xf]  ;;  %v10909_v47 = vor.u32 %v13578_v44, %v10908_v40  ;;  %v13557_v44 = vld [vmem:[#allocation7 + $0xa4] sm:$0xf] }
 0x28f   :  { %3997 = vmatpush.bf16.msra.mxu2 %v10537_v2  ;;  %4445 = vmatpush.bf16.msrb.mxu1 %v10861_v58  ;;  %v10757_v2 = vor.u32 %v13540_v61, %v10756_v60  ;;  %v10853_v3 = vor.u32 %v13564_v17, %v10852_v62  ;;  %v10862_v60 = vld [vmem:[#allocation7 + $0xe8] sm:$0xf0]  ;;  %v14724_v62 = vld [vmem:[%s14924_s7] sm:$0xf]  ;;  %v13574_v17 = vld [vmem:[#allocation7 + $0x124] sm:$0xf0] }
 0x290   :  { %v10865_v61 = vor.u32 %v13565_v56, %v10862_v60  ;;  %v10822_v56 = vld [vmem:[#allocation7 + $0x98] sm:$0xf0] }
 0x292   :  { %3956 = vmatpush.bf16.msrb.mxu3 %v10645_v51  ;;  %v10844_v51 = vld [vmem:[#allocation7 + $0xc0] sm:$0xf] }
 0x293   :  { %3998 = vmatpush.bf16.msra.mxu2 %v10521_v8  ;;  %4446 = vmatpush.bf16.msrb.mxu1 %v10853_v3  ;;  %v10749_v8 = vor.u32 %v13538_v7, %v10748_v6  ;;  %v10845_v14 = vor.u32 %v13562_v10, %v10844_v51  ;;  %v13539_v7 = vld [vmem:[#allocation7 + $0x14] sm:$0xf]  ;;  %v10758_v51 = vld [vmem:[#allocation7 + $0x18] sm:$0xf0] }
 0x294   :  { %v10761_v10 = vor.u32 %v13539_v7, %v10758_v51  ;;  %v10972_v51 = vld [vmem:[#allocation7 + $0x1c0] sm:$0xf] }
 0x296   :  { %3957 = vmatpush.bf16.msrb.mxu3 %v10629_v18  ;;  %v13560_v18 = vld [vmem:[#allocation7 + $0xb4] sm:$0xf0] }
 0x297   :  { %3999 = vmatpush.bf16.msra.mxu2 %v10505_v1  ;;  %4447 = vmatpush.bf16.msrb.mxu1 %v10845_v14  ;;  %v10932_v1 = vld [vmem:[#allocation7 + $0x170] sm:$0xf] }
 0x298   :  { %v10933_v22 = vor.u32 %v13584_v23, %v10932_v1  ;;  %v13537_v23 = vld [vmem:[#allocation7 + $0x4] sm:$0xf] }
 0x299   :  { %3958 = vmatmul.bf16.vlgmr.msrb.gmra.mxu3 %v14707_v25 }
 0x29a   :  { %4006 = vmatpush.bf16.msra.mxu3 %v10745_v19  ;;  %4000 = vmatmul.bf16.vlgmr.msra.gmra.mxu2 %v14699_v49  ;;  %v10630_v49 = vld [vmem:[#allocation6 + $0x318] sm:$0xf0]  ;;  %v10837_v19 = vor.u32 %v13560_v18, %v10836_v16  ;;  %v10884_v16 = vld [vmem:[#allocation7 + $0x110] sm:$0xf]  ;;  %v13572_v18 = vld [vmem:[#allocation7 + $0x114] sm:$0xf0] }
 0x29b   :  { %v10633_v33 = vor.u32 %v13506_v32, %v10630_v49  ;;  %4458 = vmatpush.bf16.msrb.mxu2 %v10933_v22  ;;  %v13580_v32 = vld [vmem:[#allocation7 + $0x154] sm:$0xf0]  ;;  %v13545_v49 = vld [vmem:[#allocation7 + $0x44] sm:$0xf] }
 0x29c   :  { %4448 = vmatpush.bf16.msrb.mxu1 %v10837_v19  ;;  %v10917_v34 = vor.u32 %v13580_v32, %v10916_v41  ;;  %v10885_v19 = vor.u32 %v13572_v18, %v10884_v16  ;;  %v13583_v32 = vld [vmem:[#allocation7 + $0x174] sm:$0xf] }
 0x29e   :  { %4007 = vmatpush.bf16.msra.mxu3 %v10729_v21  ;;  %v10798_v21 = vld [vmem:[#allocation7 + $0x68] sm:$0xf0] }
 0x29f   :  { %v10801_v24 = vor.u32 %v13549_v20, %v10798_v21  ;;  %4459 = vmatpush.bf16.msrb.mxu2 %v10925_v4  ;;  %v10750_v20 = vld [vmem:[#allocation7 + $0x8] sm:$0xf0]  ;;  %v13561_v21 = vld [vmem:[#allocation7 + $0xc4] sm:$0xf]  ;;  %v13600_v4 = vld [vmem:[#allocation7 + $0x1f4] sm:$0xf0] }
 0x2a0   :  { %v10753_v22 = vor.u32 %v13537_v23, %v10750_v20  ;;  %v10997_v41 = vor.u32 %v13600_v4, %v10996_v27  ;;  %v13575_v27 = vld [vmem:[#allocation7 + $0x134] sm:$0xf] }
 0x2a2   :  { %4008 = vmatpush.bf16.msra.mxu3 %v10713_v9  ;;  %v10828_v9 = vld [vmem:[#allocation7 + $0xa0] sm:$0xf] }
 0x2a3   :  { %4460 = vmatpush.bf16.msrb.mxu2 %v10917_v34 }
 0x2a6   :  { %4009 = vmatpush.bf16.msra.mxu3 %v10697_v42  ;;  %v10829_v42 = vor.u32 %v13558_v37, %v10828_v9 }
 0x2a7   :  { %4461 = vmatpush.bf16.msrb.mxu2 %v10909_v47 }
 0x2a8   :  { %4449 = vmatpush.bf16.msrb.mxu1 %v10829_v42  ;;  %v13570_v42 = vld [vmem:[#allocation7 + $0x104] sm:$0xf0] }
 0x2aa   :  { %4010 = vmatpush.bf16.msra.mxu3 %v10681_v5  ;;  %v10790_v5 = vld [vmem:[#allocation7 + $0x58] sm:$0xf0] }
 0x2ab   :  { %v10793_v28 = vor.u32 %v13547_v52, %v10790_v5  ;;  %4462 = vmatpush.bf16.msrb.mxu2 %v10901_v57  ;;  %v10877_v5 = vor.u32 %v13570_v42, %v10876_v26 }
 0x2ae   :  { %4011 = vmatpush.bf16.msra.mxu3 %v10665_v29  ;;  %v10820_v29 = vld [vmem:[#allocation7 + $0x90] sm:$0xf] }
 0x2b2   :  { %4012 = vmatpush.bf16.msra.mxu3 %v10649_v31  ;;  %v10821_v31 = vor.u32 %v13556_v30, %v10820_v29  ;;  %v10838_v29 = vld [vmem:[#allocation7 + $0xb8] sm:$0xf0] }
 0x2b4   :  { %4450 = vmatpush.bf16.msrb.mxu1 %v10821_v31 }
 0x2b6   :  { %4013 = vmatpush.bf16.msra.mxu3 %v10633_v33  ;;  %v10782_v33 = vld [vmem:[#allocation7 + $0x48] sm:$0xf0]  ;;  %v3805_v36 = vpop.f32.mrf.mxu0 }
 0x2b7   :  { %v10785_v35 = vor.u32 %v13545_v49, %v10782_v33  ;;  %v10934_v49 = vld [vmem:[#allocation7 + $0x178] sm:$0xf0] }
 0x2b8   :  { %4451 = vmatpush.bf16.msrb.mxu1 %v10813_v43  ;;  %v10937_v34 = vor.u32 %v13583_v32, %v10934_v49  ;;  %v10989_v43 = vor.u32 %v13598_v15, %v10988_v39  ;;  %v13571_v15 = vld [vmem:[#allocation7 + $0x114] sm:$0xf] }
 0x2b9   :  { %4014 = vmatmul.bf16.vlgmr.msra.gmra.mxu3 %v14707_v25  ;;  %v10773_v25 = vor.u32 %v13544_v50, %v10772_v48  ;;  %v10777_v48 = vor.u32 %v13543_v45, %v10774_v46  ;;  %v13567_v50 = vld [vmem:[#allocation7 + $0xf4] sm:$0xf]  ;;  %v10830_v45 = vld [vmem:[#allocation7 + $0xa8] sm:$0xf0] }
 0x2ba   :  { %v10873_v0 = vor.u32 %v13567_v50, %v10870_v11  ;;  %4472 = vmatpush.bf16.msrb.mxu3 %v10997_v41  ;;  %v10926_v50 = vld [vmem:[#allocation7 + $0x168] sm:$0xf0] }
 0x2bb   :  { %4434 = vmatpush.bf16.msrb.mxu0 %v10773_v25  ;;  %v10894_v41 = vld [vmem:[#allocation7 + $0x128] sm:$0xf0] }
 0x2bc   :  { %4500 = vmatpush.bf16.msra.mxu1 %v10873_v0 }
 0x2be   :  { %v3807_v3 = vpop.f32.mrf.mxu0  ;;  %4473 = vmatpush.bf16.msrb.mxu3 %v10989_v43  ;;  %v10886_v43 = vld [vmem:[#allocation7 + $0x118] sm:$0xf0] }
 0x2bf   :  { %4435 = vmatpush.bf16.msrb.mxu0 %v10765_v55  ;;  %v10766_v55 = vld [vmem:[#allocation7 + $0x28] sm:$0xf0] }
 0x2c0   :  { %v10769_v58 = vor.u32 %v13541_v54, %v10766_v55  ;;  %4501 = vmatpush.bf16.msra.mxu1 %v10865_v61  ;;  %v13555_v55 = vld [vmem:[#allocation7 + $0x94] sm:$0xf] }
 0x2c3   :  { %4436 = vmatpush.bf16.msrb.mxu0 %v10757_v2  ;;  %v10892_v2 = vld [vmem:[#allocation7 + $0x120] sm:$0xf] }
 0x2c4   :  { %v10893_v6 = vor.u32 %v13574_v17, %v10892_v2  ;;  %v10825_v2 = vor.u32 %v13555_v55, %v10822_v56  ;;  %v10918_v17 = vld [vmem:[#allocation7 + $0x158] sm:$0xf0]  ;;  %v10878_v55 = vld [vmem:[#allocation7 + $0x108] sm:$0xf0]  ;;  %v13599_v56 = vld [vmem:[#allocation7 + $0x1f4] sm:$0xf] }
 0x2c6   :  { %v14717_v38 = vpop.f32.mrf.mxu1  ;;  %4463 = vmatpush.bf16.msrb.mxu2 %v10893_v6  ;;  %v3861_v33 = vpop.f32.mrf.mxu0 }
 0x2c7   :  { %4437 = vmatpush.bf16.msrb.mxu0 %v10749_v8  ;;  %v13563_v8 = vld [vmem:[#allocation7 + $0xd4] sm:$0xf] }
 0x2c8   :  { %v10857_v14 = vor.u32 %v13563_v8, %v10854_v12  ;;  %v13594_v8 = vld [vmem:[#allocation7 + $0x1c4] sm:$0xf0] }
 0x2c9   :  { %v10973_v12 = vor.u32 %v13594_v8, %v10972_v51  ;;  %v13597_v8 = vld [vmem:[#allocation7 + $0x1e4] sm:$0xf] }
 0x2ca   :  { %4502 = vmatpush.bf16.msra.mxu1 %v10857_v14  ;;  %4464 = vmatpush.bf16.msrb.mxu2 %v10885_v19  ;;  %v10814_v14 = vld [vmem:[#allocation7 + $0x88] sm:$0xf0] }
 0x2cb   :  { %4486 = vmatpush.bf16.msra.mxu0 %v10809_v63  ;;  %v3148_v63 = vperm.slane %v14724_v62, 0  ;;  %v10910_v19 = vld [vmem:[#allocation7 + $0x148] sm:$0xf0] }
 0x2cd   :  { %v3806_v37 = vadd.f32 %v3805_v36, %v3148_v63 }
 0x2ce   :  { %v3821_v13 = vpop.f32.mrf.mxu1  ;;  %4465 = vmatpush.bf16.msrb.mxu2 %v10877_v5 }
 0x2cf   :  { %4487 = vmatpush.bf16.msra.mxu0 %v10801_v24  ;;  %v10846_v24 = vld [vmem:[#allocation7 + $0xc8] sm:$0xf0]  ;;  %v3820_v30 = vadd.f32 %v14717_v38, %v3806_v37  ;;  %v13581_v38 = vld [vmem:[#allocation7 + $0x164] sm:$0xf] }
 0x2d0   :  { %v10849_v9 = vor.u32 %v13561_v21, %v10846_v24  ;;  %v10929_v0 = vor.u32 %v13581_v38, %v10926_v50  ;;  %v10964_v24 = vld [vmem:[#allocation7 + $0x1b0] sm:$0xf] }
 0x2d2   :  { %4503 = vmatpush.bf16.msra.mxu1 %v10849_v9  ;;  %4514 = vmatpush.bf16.msra.mxu2 %v10937_v34  ;;  %v13592_v9 = vld [vmem:[#allocation7 + $0x1b4] sm:$0xf0]  ;;  %v10948_v34 = vld [vmem:[#allocation7 + $0x190] sm:$0xf] }
 0x2d3   :  { %4488 = vmatpush.bf16.msra.mxu0 %v10793_v28  ;;  %v13559_v28 = vld [vmem:[#allocation7 + $0xb4] sm:$0xf]  ;;  %v10965_v42 = vor.u32 %v13592_v9, %v10964_v24 }
 0x2d4   :  { %v10841_v31 = vor.u32 %v13559_v28, %v10838_v29  ;;  %v10956_v28 = vld [vmem:[#allocation7 + $0x1a0] sm:$0xf]  ;;  %v13590_v29 = vld [vmem:[#allocation7 + $0x1a4] sm:$0xf0] }
 0x2d5   :  { %v10957_v49 = vor.u32 %v13590_v29, %v10956_v28 }
 0x2d6   :  { %v3875_v40 = vpop.f32.mrf.mxu1  ;;  %4504 = vmatpush.bf16.msra.mxu1 %v10841_v31  ;;  %4515 = vmatpush.bf16.msra.mxu2 %v10929_v0 }
 0x2d7   :  { %4489 = vmatpush.bf16.msra.mxu0 %v10785_v35  ;;  %v3808_v35 = vadd.f32 %v3807_v3, %v3148_v63  ;;  %v3149_v3 = vperm.slane %v14724_v62, 1  ;;  %v13577_v63 = vld [vmem:[#allocation7 + $0x144] sm:$0xf] }
 0x2d8   :  { %v10913_v20 = vor.u32 %v13577_v63, %v10910_v19  ;;  %v10982_v19 = vld [vmem:[#allocation7 + $0x1d8] sm:$0xf0] }
 0x2d9   :  { %v3822_v46 = vadd.f32 %v3821_v13, %v3808_v35  ;;  %v13553_v13 = vld [vmem:[#allocation7 + $0x84] sm:$0xf]  ;;  %v3862_v21 = vadd.f32 %v3861_v33, %v3149_v3  ;;  %v13588_v35 = vld [vmem:[#allocation7 + $0x194] sm:$0xf0] }
 0x2db   :  { %4490 = vmatpush.bf16.msra.mxu0 %v10777_v48  ;;  %v10833_v48 = vor.u32 %v13557_v44, %v10830_v45  ;;  %v3876_v5 = vadd.f32 %v3875_v40, %v3862_v21  ;;  %v10949_v45 = vor.u32 %v13588_v35, %v10948_v34  ;;  %v10950_v34 = vld [vmem:[#allocation7 + $0x198] sm:$0xf0] }
 0x2dc   :  { %v14719_v25 = vpop.f32.mrf.mxu2 }
 0x2dd   :  { %v3834_v36 = vadd.f32 %v14719_v25, %v3820_v30  ;;  %v10980_v25 = vld [vmem:[#allocation7 + $0x1d0] sm:$0xf]  ;;  %4505 = vmatpush.bf16.msra.mxu1 %v10833_v48  ;;  %v13573_v30 = vld [vmem:[#allocation7 + $0x124] sm:$0xf] }
 0x2de   :  { %v10981_v54 = vor.u32 %v13596_v59, %v10980_v25  ;;  %v3877_v23 = vpop.f32.mrf.mxu1  ;;  %v10897_v33 = vor.u32 %v13573_v30, %v10894_v41  ;;  %v10940_v25 = vld [vmem:[#allocation7 + $0x180] sm:$0xf]  ;;  %v13586_v59 = vld [vmem:[#allocation7 + $0x184] sm:$0xf0]  ;;  %v13589_v41 = vld [vmem:[#allocation7 + $0x1a4] sm:$0xf] }
 0x2df   :  { %4491 = vmatpush.bf16.msra.mxu0 %v10769_v58  ;;  %v13579_v58 = vld [vmem:[#allocation7 + $0x154] sm:$0xf] }
 0x2e0   :  { %v10921_v6 = vor.u32 %v13579_v58, %v10918_v17  ;;  %4474 = vmatpush.bf16.msrb.mxu3 %v10981_v54  ;;  %v13569_v54 = vld [vmem:[#allocation7 + $0x104] sm:$0xf] }
 0x2e1   :  { %4506 = vmatpush.bf16.msra.mxu1 %v10825_v2  ;;  %v10998_v2 = vld [vmem:[#allocation7 + $0x1f8] sm:$0xf0] }
 0x2e2   :  { %4516 = vmatpush.bf16.msra.mxu2 %v10921_v6  ;;  %v11001_v17 = vor.u32 %v13599_v56, %v10998_v2  ;;  %v11116_v2 = vld [vmem:[#allocation9 + $0xe0] sm:$0xf] }
 0x2e3   :  { %4492 = vmatpush.bf16.msra.mxu0 %v10761_v10  ;;  %v3863_v10 = vpop.f32.mrf.mxu0 }
 0x2e4   :  { %v3835_v1 = vpop.f32.mrf.mxu2  ;;  %4475 = vmatpush.bf16.msrb.mxu3 %v10973_v12  ;;  %v3864_v31 = vadd.f32 %v3863_v10, %v3149_v3  ;;  %v10990_v10 = vld [vmem:[#allocation7 + $0x1e8] sm:$0xf0] }
 0x2e5   :  { %v3836_v53 = vadd.f32 %v3835_v1, %v3822_v46  ;;  %v10817_v1 = vor.u32 %v13553_v13, %v10814_v14  ;;  %v10993_v13 = vor.u32 %v13597_v8, %v10990_v10  ;;  %v13632_v8 = vld [vmem:[#allocation9 + $0xf4] sm:$0xf0] }
 0x2e6   :  { %4517 = vmatpush.bf16.msra.mxu2 %v10913_v20  ;;  %v3931_v38 = vpop.f32.mrf.mxu1 }
 0x2e7   :  { %4493 = vmatpush.bf16.msra.mxu0 %v10753_v22  ;;  %4507 = vmatpush.bf16.msra.mxu1 %v10817_v1  ;;  %v13595_v1 = vld [vmem:[#allocation7 + $0x1d4] sm:$0xf] }
 0x2e8   :  { %4476 = vmatpush.bf16.msrb.mxu3 %v10965_v42  ;;  %v10985_v21 = vor.u32 %v13595_v1, %v10982_v19  ;;  %v13625_v1 = vld [vmem:[#allocation9 + $0xc4] sm:$0xf] }
 0x2eb   :  { %v3917_v40 = vpop.f32.mrf.mxu0 }
 0x2ec   :  { %v3889_v11 = vpop.f32.mrf.mxu2  ;;  %4477 = vmatpush.bf16.msrb.mxu3 %v10957_v49 }
 0x2ed   :  { %v3890_v32 = vadd.f32 %v3889_v11, %v3876_v5  ;;  %v3150_v11 = vperm.slane %v14724_v62, 2  ;;  %v13591_v5 = vld [vmem:[#allocation7 + $0x1b4] sm:$0xf] }
 0x2ee   :  { %v3933_v14 = vpop.f32.mrf.mxu1 }
 0x2ef   :  { %v3918_v3 = vadd.f32 %v3917_v40, %v3150_v11 }
 0x2f0   :  { %4478 = vmatpush.bf16.msrb.mxu3 %v10949_v45 }
 0x2f1   :  { %v3932_v12 = vadd.f32 %v3931_v38, %v3918_v3  ;;  %v13629_v3 = vld [vmem:[#allocation9 + $0xe4] sm:$0xf] }
 0x2f4   :  { %v3891_v37 = vpop.f32.mrf.mxu2 }
 0x2fc   :  { %v3847_v52 = vpop.f32.mrf.mxu3 }
 0x2fd   :  { %v3848_v47 = vadd.f32 %v3847_v52, %v3834_v36  ;;  %v10902_v52 = vld [vmem:[#allocation7 + $0x138] sm:$0xf0]  ;;  %v3878_v36 = vadd.f32 %v3877_v23, %v3864_v31  ;;  %v10958_v31 = vld [vmem:[#allocation7 + $0x1a8] sm:$0xf0] }
 0x2fe   :  { %v10905_v4 = vor.u32 %v13575_v27, %v10902_v52  ;;  %v10961_v49 = vor.u32 %v13589_v41, %v10958_v31  ;;  %v14739_v41 = vld [vmem:[%s14926_s9] sm:$0x3] }
 0x2ff   :  { %v4020_v60 = vmul.f32 0.01, %v3848_v47  ;;  %v3892_v44 = vadd.f32 %v3891_v37, %v3878_v36  ;;  %v3945_v0 = vpop.f32.mrf.mxu2  ;;  %v13593_v37 = vld [vmem:[#allocation7 + $0x1c4] sm:$0xf] }
 0x300   :  { %4518 = vmatpush.bf16.msra.mxu2 %v10905_v4  ;;  %v10966_v4 = vld [vmem:[#allocation7 + $0x1b8] sm:$0xf0] }
 0x301   :  { %v4028_v16 = vmax.f32 %v3848_v47, %v4020_v60  ;;  %v10889_v47 = vor.u32 %v13571_v15, %v10886_v43  ;;  %v10969_v30 = vor.u32 %v13591_v5, %v10966_v4  ;;  %v13585_v15 = vld [vmem:[#allocation7 + $0x184] sm:$0xf]  ;;  %v10942_v43 = vld [vmem:[#allocation7 + $0x188] sm:$0xf0] }
 0x302   :  { %v10945_v45 = vor.u32 %v13585_v15, %v10942_v43  ;;  %v13621_v5 = vld [vmem:[#allocation9 + $0xa4] sm:$0xf]  ;;  %v13619_v15 = vld [vmem:[#allocation9 + $0x8c] sm:$0xf0] }
 0x303   :  { %v13617_v43 = vld [vmem:[#allocation9 + $0x84] sm:$0xf] }
 0x304   :  { %v3849_v57 = vpop.f32.mrf.mxu3  ;;  %4519 = vmatpush.bf16.msra.mxu2 %v10897_v33  ;;  %v13587_v33 = vld [vmem:[#allocation7 + $0x194] sm:$0xf] }
 0x305   :  { %v3850_v61 = vadd.f32 %v3849_v57, %v3836_v53  ;;  %v10941_v57 = vor.u32 %v13586_v59, %v10940_v25  ;;  %v10953_v36 = vor.u32 %v13587_v33, %v10950_v34  ;;  %v13622_v33 = vld [vmem:[#allocation9 + $0xac] sm:$0xf]  ;;  %v11094_v34 = vld [vmem:[#allocation9 + $0xb8] sm:$0xf0] }
 0x307   :  { %v4024_v7 = vmul.f32 0.01, %v3850_v61  ;;  %4479 = vmatpush.bf16.msrb.mxu3 %v10941_v57 }
 0x308   :  { %4520 = vmatpush.bf16.msra.mxu2 %v10889_v47 }
 0x309   :  { %v4032_v18 = vmax.f32 %v3850_v61, %v4024_v7  ;;  %v10881_v61 = vor.u32 %v13569_v54, %v10878_v55  ;;  %v3919_v7 = vpop.f32.mrf.mxu0 }
 0x30a   :  { %v3920_v63 = vadd.f32 %v3919_v7, %v3150_v11  ;;  %v11118_v7 = vld [vmem:[#allocation9 + $0xf0] sm:$0xf0] }
 0x30b   :  { %v14730_v22 = vpack.c.bf16 %v4032_v18, %v4028_v16  ;;  %4528 = vmatpush.bf16.msra.mxu3 %v11001_v17  ;;  %v3946_v16 = vadd.f32 %v3945_v0, %v3932_v12  ;;  %v3947_v18 = vpop.f32.mrf.mxu2  ;;  %v13631_v17 = vld [vmem:[#allocation9 + $0xec] sm:$0xf0]  ;;  %v11121_v10 = vor.u32 %v13629_v3, %v11118_v7 }
 0x30c   :  { %v3903_v26 = vpop.f32.mrf.mxu3  ;;  %4521 = vmatpush.bf16.msra.mxu2 %v10881_v61  ;;  %v3934_v23 = vadd.f32 %v3933_v14, %v3920_v63  ;;  %v11126_v14 = vld [vmem:[#allocation9 + $0xf8] sm:$0xf0] }
 0x30d   :  { %4438 = vmatmul.bf16.vlgmr.msrb.gmra.mxu0 %v14730_v22  ;;  %v3904_v39 = vadd.f32 %v3903_v26, %v3890_v32  ;;  %v10974_v26 = vld [vmem:[#allocation7 + $0x1c8] sm:$0xf0] }
 0x30e   :  { %v3948_v24 = vadd.f32 %v3947_v18, %v3934_v23  ;;  %v10977_v52 = vor.u32 %v13593_v37, %v10974_v26  ;;  %v13627_v18 = vld [vmem:[#allocation9 + $0xcc] sm:$0xf0]  ;;  %v11102_v23 = vld [vmem:[#allocation9 + $0xd0] sm:$0xf0]  ;;  %v13626_v37 = vld [vmem:[#allocation9 + $0xcc] sm:$0xf] }
 0x30f   :  { %v4021_v48 = vmul.f32 0.01, %v3904_v39  ;;  %4529 = vmatpush.bf16.msra.mxu3 %v10993_v13  ;;  %v13630_v13 = vld [vmem:[#allocation9 + $0xec] sm:$0xf]  ;;  %v11110_v26 = vld [vmem:[#allocation9 + $0xd8] sm:$0xf0] }
 0x310   :  { %v11129_v63 = vor.u32 %v13630_v13, %v11126_v14  ;;  %v11038_v14 = vld [vmem:[#allocation9 + $0x50] sm:$0xf0] }
 0x311   :  { %v4029_v58 = vmax.f32 %v3904_v39, %v4021_v48  ;;  %v3973_v35 = vpop.f32.mrf.mxu0  ;;  %v3987_v39 = vpop.f32.mrf.mxu1 }
 0x313   :  { %4530 = vmatpush.bf16.msra.mxu3 %v10985_v21  ;;  %v13628_v21 = vld [vmem:[#allocation9 + $0xd4] sm:$0xf0] }
 0x314   :  { %v3905_v46 = vpop.f32.mrf.mxu3 }
 0x315   :  { %v3906_v50 = vadd.f32 %v3905_v46, %v3892_v44  ;;  %v3151_v44 = vperm.slane %v14724_v62, 3 }
 0x317   :  { %v4025_v53 = vmul.f32 0.01, %v3906_v50  ;;  %4531 = vmatpush.bf16.msra.mxu3 %v10977_v52  ;;  %v3974_v38 = vadd.f32 %v3973_v35, %v3151_v44  ;;  %v11084_v52 = vld [vmem:[#allocation9 + $0xa0] sm:$0xf]  ;;  %v11097_v35 = vor.u32 %v13622_v33, %v11094_v34 }
 0x319   :  { %v4033_v60 = vmax.f32 %v3906_v50, %v4025_v53  ;;  %v3975_v46 = vpop.f32.mrf.mxu0  ;;  %v3988_v48 = vadd.f32 %v3987_v39, %v3974_v38  ;;  %v3989_v50 = vpop.f32.mrf.mxu1  ;;  %v11068_v39 = vld [vmem:[#allocation9 + $0x80] sm:$0xf]  ;;  %v11076_v38 = vld [vmem:[#allocation9 + $0x88] sm:$0xf] }
 0x31a   :  { %v3976_v11 = vadd.f32 %v3975_v46, %v3151_v44  ;;  %v11069_v44 = vor.u32 %v13619_v15, %v11068_v39  ;;  %v13601_v39 = vld [vmem:[#allocation9 + $0x4] sm:$0xf] }
 0x31b   :  { %v4037_v6 = vpack.c.bf16 %v4033_v60, %v4029_v58  ;;  %4532 = vmatpush.bf16.msra.mxu3 %v10969_v30  ;;  %v13624_v30 = vld [vmem:[#allocation9 + $0xb4] sm:$0xf0] }
 0x31c   :  { %v3959_v51 = vpop.f32.mrf.mxu3  ;;  %v3990_v25 = vadd.f32 %v3989_v50, %v3976_v11  ;;  %v11078_v50 = vld [vmem:[#allocation9 + $0x98] sm:$0xf0] }
 0x31d   :  { %4452 = vmatmul.bf16.vlgmr.msrb.gmra.mxu1 %v4037_v6  ;;  %4494 = vmatmul.bf16.vlgmr.msra.gmra.mxu0 %v14730_v22  ;;  %v3960_v20 = vadd.f32 %v3959_v51, %v3946_v16  ;;  %v4001_v40 = vpop.f32.mrf.mxu2  ;;  %v11124_v51 = vld [vmem:[#allocation9 + $0xe8] sm:$0xf]  ;;  %v11100_v16 = vld [vmem:[#allocation9 + $0xc0] sm:$0xf] }
 0x31e   :  { %v4002_v0 = vadd.f32 %v4001_v40, %v3988_v48  ;;  %v11125_v12 = vor.u32 %v13632_v8, %v11124_v51  ;;  %4777 = vmatpush.bf16.msrb.mxu1 %v11121_v10  ;;  %v11101_v19 = vor.u32 %v13627_v18, %v11100_v16  ;;  %v4106_v40 = vperm.slane %v14739_v41, 0  ;;  %v13618_v48 = vld [vmem:[#allocation9 + $0x8c] sm:$0xf]  ;;  %v11036_v51 = vld [vmem:[#allocation9 + $0x40] sm:$0xf] }
 0x31f   :  { %v4022_v42 = vmul.f32 0.01, %v3960_v20  ;;  %4533 = vmatpush.bf16.msra.mxu3 %v10961_v49  ;;  %v13611_v8 = vld [vmem:[#allocation9 + $0x4c] sm:$0xf0]  ;;  %v13609_v10 = vld [vmem:[#allocation9 + $0x44] sm:$0xf] }
 0x320   :  { %v11037_v13 = vor.u32 %v13611_v8, %v11036_v51  ;;  %v13612_v16 = vld [vmem:[#allocation9 + $0x54] sm:$0xf0] }
 0x321   :  { %v4030_v28 = vmax.f32 %v3960_v20, %v4022_v42  ;;  %v11108_v20 = vld [vmem:[#allocation9 + $0xc8] sm:$0xf]  ;;  %v11113_v42 = vor.u32 %v13626_v37, %v11110_v26  ;;  %v11020_v37 = vld [vmem:[#allocation9 + $0x20] sm:$0xf]  ;;  %v13607_v26 = vld [vmem:[#allocation9 + $0x2c] sm:$0xf0] }
 0x323   :  { %4534 = vmatpush.bf16.msra.mxu3 %v10953_v36 }
 0x324   :  { %v3961_v9 = vpop.f32.mrf.mxu3 }
 0x325   :  { %v3962_v27 = vadd.f32 %v3961_v9, %v3948_v24  ;;  %v4003_v53 = vpop.f32.mrf.mxu2  ;;  %v11105_v24 = vor.u32 %v13625_v1, %v11102_v23  ;;  %v11109_v9 = vor.u32 %v13628_v21, %v11108_v20  ;;  %v13610_v20 = vld [vmem:[#allocation9 + $0x4c] sm:$0xf]  ;;  %v11046_v21 = vld [vmem:[#allocation9 + $0x58] sm:$0xf0] }
 0x326   :  { %v4004_v57 = vadd.f32 %v4003_v53, %v3990_v25  ;;  %v11052_v53 = vld [vmem:[#allocation9 + $0x60] sm:$0xf]  ;;  %v13615_v25 = vld [vmem:[#allocation9 + $0x6c] sm:$0xf0] }
 0x327   :  { %v4026_v22 = vmul.f32 0.01, %v3962_v27  ;;  %4535 = vmatpush.bf16.msra.mxu3 %v10945_v45  ;;  %4778 = vmatpush.bf16.msrb.mxu1 %v11105_v24  ;;  %v11070_v45 = vld [vmem:[#allocation9 + $0x90] sm:$0xf0] }
 0x328   :  { %v11073_v46 = vor.u32 %v13617_v43, %v11070_v45  ;;  %v13604_v45 = vld [vmem:[#allocation9 + $0x14] sm:$0xf0] }
 0x329   :  { %v4034_v29 = vmax.f32 %v3962_v27, %v4026_v22  ;;  %v13623_v22 = vld [vmem:[#allocation9 + $0xac] sm:$0xf0] }
 0x32a   :  { %v11085_v4 = vor.u32 %v13623_v22, %v11084_v52  ;;  %v11021_v52 = vor.u32 %v13607_v26, %v11020_v37  ;;  %v11022_v22 = vld [vmem:[#allocation9 + $0x30] sm:$0xf0]  ;;  %v11484_v37 = vld [vmem:[#allocation10 + $0x2c0] sm:$0xf]  ;;  %v13723_v26 = vld [vmem:[#allocation10 + $0x2cc] sm:$0xf0] }
 0x32b   :  { %v4038_v32 = vpack.c.bf16 %v4034_v29, %v4030_v28  ;;  %v11086_v28 = vld [vmem:[#allocation9 + $0xb0] sm:$0xf0]  ;;  %v11092_v29 = vld [vmem:[#allocation9 + $0xa8] sm:$0xf] }
 0x32c   :  { %v11093_v49 = vor.u32 %v13624_v30, %v11092_v29  ;;  %v13606_v30 = vld [vmem:[#allocation9 + $0x2c] sm:$0xf] }
 0x32d   :  { %4466 = vmatmul.bf16.vlgmr.msrb.gmra.mxu2 %v4038_v32  ;;  %4508 = vmatmul.bf16.vlgmr.msra.gmra.mxu1 %v4037_v6  ;;  %v11117_v6 = vor.u32 %v13631_v17, %v11116_v2  ;;  %v13614_v2 = vld [vmem:[#allocation9 + $0x6c] sm:$0xf]  ;;  %v11062_v17 = vld [vmem:[#allocation9 + $0x78] sm:$0xf0] }
 0x32e   :  { %4791 = vmatpush.bf16.msrb.mxu2 %v11125_v12 }
 0x32f   :  { %4763 = vmatpush.bf16.msrb.mxu0 %v11117_v6  ;;  %v11065_v6 = vor.u32 %v13614_v2, %v11062_v17 }
 0x332   :  { %4792 = vmatpush.bf16.msrb.mxu2 %v11109_v9  ;;  %v11049_v9 = vor.u32 %v13610_v20, %v11046_v21  ;;  %v11340_v20 = vld [vmem:[#allocation10 + $0x1a0] sm:$0xf] }
 0x333   :  { %4764 = vmatpush.bf16.msrb.mxu0 %v11101_v19  ;;  %v11041_v19 = vor.u32 %v13609_v10, %v11038_v14  ;;  %v13759_v14 = vld [vmem:[#allocation10 + $0x3ec] sm:$0xf0] }
 0x336   :  { %4793 = vmatpush.bf16.msrb.mxu2 %v11093_v49 }
 0x337   :  { %4765 = vmatpush.bf16.msrb.mxu0 %v11085_v4  ;;  %v13608_v4 = vld [vmem:[#allocation9 + $0x34] sm:$0xf0] }
 0x33b   :  { %4766 = vmatpush.bf16.msrb.mxu0 %v11069_v44  ;;  %v11012_v44 = vld [vmem:[#allocation9 + $0x8] sm:$0xf] }
 0x33c   :  { %v4015_v47 = vpop.f32.mrf.mxu3 }
 0x33d   :  { %4522 = vmatmul.bf16.vlgmr.msra.gmra.mxu2 %v4038_v32  ;;  %v4016_v59 = vadd.f32 %v4015_v47, %v4002_v0  ;;  %v11089_v32 = vor.u32 %v13621_v5, %v11086_v28  ;;  %v13620_v47 = vld [vmem:[#allocation9 + $0x94] sm:$0xf0]  ;;  %v11081_v0 = vor.u32 %v13618_v48, %v11078_v50  ;;  %v11028_v5 = vld [vmem:[#allocation9 + $0x28] sm:$0xf]  ;;  %v11013_v48 = vor.u32 %v13604_v45, %v11012_v44  ;;  %v13602_v50 = vld [vmem:[#allocation9 + $0xc] sm:$0xf] }
 0x33e   :  { %v11077_v11 = vor.u32 %v13620_v47, %v11076_v38  ;;  %v11029_v29 = vor.u32 %v13608_v4, %v11028_v5  ;;  %v13755_v5 = vld [vmem:[#allocation10 + $0x3cc] sm:$0xf0] }
 0x33f   :  { %v4023_v55 = vmul.f32 0.01, %v4016_v59  ;;  %4779 = vmatpush.bf16.msrb.mxu1 %v11089_v32  ;;  %v4107_v32 = vperm.slane %v14739_v41, 1 }
 0x340   :  { %4794 = vmatpush.bf16.msrb.mxu2 %v11077_v11  ;;  %v11014_v11 = vld [vmem:[#allocation9 + $0x18] sm:$0xf0] }
 0x341   :  { %v4031_v62 = vmax.f32 %v4016_v59, %v4023_v55  ;;  %v13613_v59 = vld [vmem:[#allocation9 + $0x64] sm:$0xf]  ;;  %v11054_v55 = vld [vmem:[#allocation9 + $0x70] sm:$0xf0] }
 0x343   :  { %4780 = vmatpush.bf16.msrb.mxu1 %v11073_v46 }
 0x344   :  { %v4017_v54 = vpop.f32.mrf.mxu3 }
 0x345   :  { %v4018_v56 = vadd.f32 %v4017_v54, %v4004_v57  ;;  %v11053_v54 = vor.u32 %v13615_v25, %v11052_v53  ;;  %v11017_v53 = vor.u32 %v13602_v50, %v11014_v11 }
 0x347   :  { %v4027_v58 = vmul.f32 0.01, %v4018_v56  ;;  %4767 = vmatpush.bf16.msrb.mxu0 %v11053_v54  ;;  %v11244_v54 = vld [vmem:[#allocation10 + $0xe0] sm:$0xf] }
 0x349   :  { %v4035_v60 = vmax.f32 %v4018_v56, %v4027_v58  ;;  %v11060_v56 = vld [vmem:[#allocation9 + $0x68] sm:$0xf]  ;;  %v13616_v58 = vld [vmem:[#allocation9 + $0x74] sm:$0xf0] }
 0x34b   :  { %v4039_v61 = vpack.c.bf16 %v4035_v60, %v4031_v62  ;;  %v11057_v60 = vor.u32 %v13613_v59, %v11054_v55  ;;  %4768 = vmatpush.bf16.msrb.mxu0 %v11037_v13  ;;  %v13663_v55 = vld [vmem:[#allocation10 + $0xec] sm:$0xf0]  ;;  %v11628_v13 = vld [vmem:[#allocation10 + $0x3e0] sm:$0xf] }
 0x34d   :  { %4480 = vmatmul.bf16.vlgmr.msrb.gmra.mxu3 %v4039_v61  ;;  %4781 = vmatpush.bf16.msrb.mxu1 %v11057_v60  ;;  %v11228_v60 = vld [vmem:[#allocation10 + $0xc0] sm:$0xf] }
 0x34e   :  { %4805 = vmatpush.bf16.msrb.mxu3 %v11129_v63  ;;  %v11044_v63 = vld [vmem:[#allocation9 + $0x48] sm:$0xf] }
 0x34f   :  { %v11045_v23 = vor.u32 %v13612_v16, %v11044_v63  ;;  %4769 = vmatpush.bf16.msrb.mxu0 %v11021_v52  ;;  %v11485_v52 = vor.u32 %v13723_v26, %v11484_v37  ;;  %v13639_v37 = vld [vmem:[#allocation10 + $0x2c] sm:$0xf0] }
 0x351   :  { %4782 = vmatpush.bf16.msrb.mxu1 %v11041_v19  ;;  %v11212_v19 = vld [vmem:[#allocation10 + $0xa0] sm:$0xf] }
 0x352   :  { %4806 = vmatpush.bf16.msrb.mxu3 %v11113_v42  ;;  %v13605_v42 = vld [vmem:[#allocation9 + $0x24] sm:$0xf] }
 0x353   :  { %v11025_v28 = vor.u32 %v13605_v42, %v11022_v22  ;;  %v11612_v22 = vld [vmem:[#allocation10 + $0x3c0] sm:$0xf] }
 0x355   :  { %4783 = vmatpush.bf16.msrb.mxu1 %v11025_v28 }
 0x356   :  { %4807 = vmatpush.bf16.msrb.mxu3 %v11097_v35  ;;  %v11004_v35 = vld [vmem:[#allocation9] sm:$0xf] }
 0x35a   :  { %4808 = vmatpush.bf16.msrb.mxu3 %v11081_v0 }
 0x35d   :  { %4536 = vmatmul.bf16.vlgmr.msra.gmra.mxu3 %v4039_v61  ;;  %v11061_v61 = vor.u32 %v13616_v58, %v11060_v56  ;;  %v11372_v56 = vld [vmem:[#allocation10 + $0x1e0] sm:$0xf]  ;;  %v11245_v58 = vor.u32 %v13663_v55, %v11244_v54  ;;  %v13679_v54 = vld [vmem:[#allocation10 + $0x16c] sm:$0xf0] }
 0x35e   :  { %4809 = vmatpush.bf16.msrb.mxu3 %v11065_v6  ;;  %v13691_v6 = vld [vmem:[#allocation10 + $0x1cc] sm:$0xf0]  ;;  %v14114_v55 = vld [vmem:[%s14948_s3] sm:$0xff]  }
 0x35f   :  { %4795 = vmatpush.bf16.msrb.mxu2 %v11061_v61  ;;  %v13659_v61 = vld [vmem:[#allocation10 + $0xcc] sm:$0xf0]  ;;  %v14116_v26 = vunpack.c.h.bf16 %v14114_v55 }
 0x360   :  { %v11229_v10 = vor.u32 %v13659_v61, %v11228_v60  ;;  %v11436_v60 = vld [vmem:[#allocation10 + $0x260] sm:$0xf] }
 0x362   :  { %4810 = vmatpush.bf16.msrb.mxu3 %v11049_v9  ;;  %v13687_v9 = vld [vmem:[#allocation10 + $0x1ac] sm:$0xf0] }
 0x363   :  { %4796 = vmatpush.bf16.msrb.mxu2 %v11045_v23  ;;  %v13655_v23 = vld [vmem:[#allocation10 + $0xac] sm:$0xf0]  ;;  %v11341_v41 = vor.u32 %v13687_v9, %v11340_v20  ;;  %v11148_v9 = vld [vmem:[#allocation10 + $0x20] sm:$0xf] }
 0x364   :  { %v11213_v28 = vor.u32 %v13655_v23, %v11212_v19  ;;  %v11548_v19 = vld [vmem:[#allocation10 + $0x340] sm:$0xf]  ;;  %v13739_v23 = vld [vmem:[#allocation10 + $0x34c] sm:$0xf0] }
 0x367   :  { %4797 = vmatpush.bf16.msrb.mxu2 %v11029_v29  ;;  %v11613_v29 = vor.u32 %v13755_v5, %v11612_v22  ;;  %v11549_v22 = vor.u32 %v13739_v23, %v11548_v19  ;;  %v11404_v5 = vld [vmem:[#allocation10 + $0x220] sm:$0xf] }
 0x36b   :  { %4798 = vmatpush.bf16.msrb.mxu2 %v11013_v48  ;;  %v13715_v48 = vld [vmem:[#allocation10 + $0x28c] sm:$0xf0] }
 0x38a   :  { %v4439_v27 = vpop.f32.mrf.mxu0 }
 0x38b   :  { %v4440_v57 = vadd.f32 %v4439_v27, %v4106_v40 }
 0x392   :  { %v4441_v62 = vpop.f32.mrf.mxu0 }
 0x393   :  { %v4442_v27 = vadd.f32 %v4441_v62, %v4106_v40  ;;  %v11006_v40 = vld [vmem:[#allocation9 + $0x10] sm:$0xf0]  ;;  %v13695_v62 = vld [vmem:[#allocation10 + $0x1ec] sm:$0xf0] }
 0x394   :  { %v11009_v47 = vor.u32 %v13601_v39, %v11006_v40  ;;  %v11373_v17 = vor.u32 %v13695_v62, %v11372_v56  ;;  %v13751_v39 = vld [vmem:[#allocation10 + $0x3ac] sm:$0xf0] }
 0x396   :  { %4784 = vmatpush.bf16.msrb.mxu1 %v11009_v47  ;;  %v11452_v47 = vld [vmem:[#allocation10 + $0x280] sm:$0xf] }
 0x39a   :  { %v4453_v31 = vpop.f32.mrf.mxu1  ;;  %v4495_v34 = vpop.f32.mrf.mxu0  ;;  %5631 = vmatpush.bf16.msra.mxu1 %v11373_v17  ;;  %v11564_v17 = vld [vmem:[#allocation10 + $0x360] sm:$0xf] }
 0x39b   :  { %v4454_v3 = vadd.f32 %v4453_v31, %v4440_v57  ;;  %v11030_v31 = vld [vmem:[#allocation9 + $0x38] sm:$0xf0]  ;;  %v4496_v59 = vadd.f32 %v4495_v34, %v4107_v32  ;;  %v11468_v34 = vld [vmem:[#allocation10 + $0x2a0] sm:$0xf] }
 0x39c   :  { %v11033_v33 = vor.u32 %v13606_v30, %v11030_v31  ;;  %v11196_v30 = vld [vmem:[#allocation10 + $0x80] sm:$0xf]  ;;  %v13651_v31 = vld [vmem:[#allocation10 + $0x8c] sm:$0xf0] }
 0x39e   :  { %4811 = vmatpush.bf16.msrb.mxu3 %v11033_v33  ;;  %v13683_v33 = vld [vmem:[#allocation10 + $0x18c] sm:$0xf0] }
 0x3a2   :  { %v4455_v7 = vpop.f32.mrf.mxu1  ;;  %4812 = vmatpush.bf16.msrb.mxu3 %v11017_v53  ;;  %v4497_v51 = vpop.f32.mrf.mxu0  ;;  %v13647_v53 = vld [vmem:[#allocation10 + $0x6c] sm:$0xf0] }
 0x3a3   :  { %v4456_v49 = vadd.f32 %v4455_v7, %v4442_v27  ;;  %v11500_v7 = vld [vmem:[#allocation10 + $0x2e0] sm:$0xf]  ;;  %v4498_v42 = vadd.f32 %v4497_v51, %v4107_v32 }
 0x3a4   :  { %v11324_v32 = vld [vmem:[#allocation10 + $0x180] sm:$0xf] }
 0x3a5   :  { %v11325_v11 = vor.u32 %v13683_v33, %v11324_v32  ;;  %v11164_v51 = vld [vmem:[#allocation10 + $0x40] sm:$0xf] }
 0x3a6   :  { %v11132_v32 = vld [vmem:[#allocation10] sm:$0xf] }
 0x3aa   :  { %v4509_v38 = vpop.f32.mrf.mxu1 }
 0x3ab   :  { %v4510_v57 = vadd.f32 %v4509_v38, %v4496_v59  ;;  %v11197_v38 = vor.u32 %v13651_v31, %v11196_v30  ;;  %v13747_v59 = vld [vmem:[#allocation10 + $0x38c] sm:$0xf0]  ;;  %v11532_v30 = vld [vmem:[#allocation10 + $0x320] sm:$0xf] }
 0x3ac   :  { %v13735_v31 = vld [vmem:[#allocation10 + $0x32c] sm:$0xf0] }
 0x3b0   :  { %v4467_v36 = vpop.f32.mrf.mxu2 }
 0x3b1   :  { %v4468_v12 = vadd.f32 %v4467_v36, %v4454_v3  ;;  %v13603_v36 = vld [vmem:[#allocation9 + $0xc] sm:$0xf0]  ;;  %v11356_v3 = vld [vmem:[#allocation10 + $0x1c0] sm:$0xf] }
 0x3b2   :  { %v11005_v43 = vor.u32 %v13603_v36, %v11004_v35  ;;  %v11357_v16 = vor.u32 %v13691_v6, %v11356_v3  ;;  %v4511_v21 = vpop.f32.mrf.mxu1  ;;  %v13719_v35 = vld [vmem:[#allocation10 + $0x2ac] sm:$0xf0]  ;;  %v11596_v36 = vld [vmem:[#allocation10 + $0x3a0] sm:$0xf] }
 0x3b3   :  { %v11469_v40 = vor.u32 %v13719_v35, %v11468_v34  ;;  %v11597_v44 = vor.u32 %v13751_v39, %v11596_v36  ;;  %v13743_v3 = vld [vmem:[#allocation10 + $0x36c] sm:$0xf0]  ;;  %v11260_v35 = vld [vmem:[#allocation10 + $0x100] sm:$0xf]  ;;  %v13661_v39 = vld [vmem:[#allocation10 + $0xe4] sm:$0xf] }
 0x3b4   :  { %4770 = vmatpush.bf16.msrb.mxu0 %v11005_v43  ;;  %5632 = vmatpush.bf16.msra.mxu1 %v11357_v16  ;;  %v14115_v16 = vunpack.c.l.bf16 %v14114_v55  ;;  %v13635_v34 = vld [vmem:[#allocation10 + $0xc] sm:$0xf0]  ;;  %v13757_v55 = vld [vmem:[#allocation10 + $0x3e4] sm:$0xf] }
 0x3b5   :  { %v13667_v36 = vld [vmem:[#allocation10 + $0x10c] sm:$0xf0] }
 0x3b8   :  { %v4469_v18 = vpop.f32.mrf.mxu2  ;;  %5617 = vmatpush.bf16.msra.mxu0 %v11245_v58  ;;  %5633 = vmatpush.bf16.msra.mxu1 %v11341_v41  ;;  %v11453_v58 = vor.u32 %v13715_v48, %v11452_v47  ;;  %v11388_v47 = vld [vmem:[#allocation10 + $0x200] sm:$0xf]  ;;  %v13699_v48 = vld [vmem:[#allocation10 + $0x20c] sm:$0xf0] }
 0x3b9   :  { %v4470_v15 = vadd.f32 %v4469_v18, %v4456_v49  ;;  %v4512_v49 = vadd.f32 %v4511_v21, %v4498_v42  ;;  %v11276_v42 = vld [vmem:[#allocation10 + $0x120] sm:$0xf] }
 0x3bc   :  { %5618 = vmatpush.bf16.msra.mxu0 %v11229_v10  ;;  %5634 = vmatpush.bf16.msra.mxu1 %v11325_v11  ;;  %v11292_v10 = vld [vmem:[#allocation10 + $0x140] sm:$0xf]  ;;  %v13731_v11 = vld [vmem:[#allocation10 + $0x30c] sm:$0xf0] }
 0x3c0   :  { %v4523_v25 = vpop.f32.mrf.mxu2  ;;  %5619 = vmatpush.bf16.msra.mxu0 %v11213_v28  ;;  %v11149_v28 = vor.u32 %v13639_v37, %v11148_v9  ;;  %v11198_v9 = vld [vmem:[#allocation10 + $0x90] sm:$0xf0]  ;;  %v13681_v37 = vld [vmem:[#allocation10 + $0x184] sm:$0xf] }
 0x3c1   :  { %v4524_v2 = vadd.f32 %v4523_v25, %v4510_v57  ;;  %v11580_v25 = vld [vmem:[#allocation10 + $0x380] sm:$0xf] }
 0x3c2   :  { %v11308_v57 = vld [vmem:[#allocation10 + $0x160] sm:$0xf]  ;;  %v11581_v62 = vor.u32 %v13747_v59, %v11580_v25  ;;  %v11133_v59 = vor.u32 %v13635_v34, %v11132_v32  ;;  %v11310_v32 = vld [vmem:[#allocation10 + $0x170] sm:$0xf0]  ;;  %v13713_v34 = vld [vmem:[#allocation10 + $0x284] sm:$0xf] }
 0x3c4   :  { %5620 = vmatpush.bf16.msra.mxu0 %v11197_v38 }
 0x3c8   :  { %v4525_v4 = vpop.f32.mrf.mxu2 }
 0x3d0   :  { %v4481_v1 = vpop.f32.mrf.mxu3 }
 0x3d1   :  { %v14742_v24 = vadd.f32 %v4481_v1, %v4468_v12  ;;  %v13727_v12 = vld [vmem:[#allocation10 + $0x2ec] sm:$0xf0]  ;;  %v11629_v1 = vor.u32 %v13759_v14, %v11628_v13  ;;  %v11565_v14 = vor.u32 %v13743_v3, %v11564_v17 }
 0x3d2   :  { %v11501_v18 = vor.u32 %v13727_v12, %v11500_v7  ;;  %v11309_v7 = vor.u32 %v13679_v54, %v11308_v57  ;;  %v13675_v12 = vld [vmem:[#allocation10 + $0x14c] sm:$0xf0]  ;;  %v11261_v57 = vor.u32 %v13667_v36, %v11260_v35  ;;  %v11502_v54 = vld [vmem:[#allocation10 + $0x2f0] sm:$0xf0]  ;;  %v13745_v36 = vld [vmem:[#allocation10 + $0x384] sm:$0xf] }
 0x3d3   :  { %4542 = vst [vmem:[%s14936_s19] sm:$0xff] %v14742_v24  ;;  %5659 = vmatpush.bf16.msra.mxu3 %v11629_v1  ;;  %v13707_v1 = vld [vmem:[#allocation10 + $0x24c] sm:$0xf0]  ;;  %v11293_v21 = vor.u32 %v13675_v12, %v11292_v10  ;;  %v11614_v10 = vld [vmem:[#allocation10 + $0x3d0] sm:$0xf0] }
 0x3d4   :  { %5645 = vmatpush.bf16.msra.mxu2 %v11501_v18  ;;  %5635 = vmatpush.bf16.msra.mxu1 %v11309_v7  ;;  %v13721_v7 = vld [vmem:[#allocation10 + $0x2c4] sm:$0xf]  ;;  %v11454_v35 = vld [vmem:[#allocation10 + $0x290] sm:$0xf0] }
 0x3d7   :  { %5660 = vmatpush.bf16.msra.mxu3 %v11613_v29  ;;  %v13703_v29 = vld [vmem:[#allocation10 + $0x22c] sm:$0xf0] }
 0x3d8   :  { %v4483_v46 = vpop.f32.mrf.mxu3  ;;  %5646 = vmatpush.bf16.msra.mxu2 %v11485_v52  ;;  %5636 = vmatpush.bf16.msra.mxu1 %v11293_v21  ;;  %v13649_v21 = vld [vmem:[#allocation10 + $0x84] sm:$0xf] }
 0x3d9   :  { %v14749_v0 = vadd.f32 %v4483_v46, %v4470_v15  ;;  %v4526_v15 = vadd.f32 %v4525_v4, %v4512_v49  ;;  %v11180_v46 = vld [vmem:[#allocation10 + $0x60] sm:$0xf] }
 0x3da   :  { %v11181_v61 = vor.u32 %v13647_v53, %v11180_v46  ;;  %v11374_v46 = vld [vmem:[#allocation10 + $0x1f0] sm:$0xf0]  ;;  %v13725_v53 = vld [vmem:[#allocation10 + $0x2e4] sm:$0xf] }
 0x3db   :  { %4544 = vst [vmem:[%s14936_s19 + $0x10] sm:$0xff] %v14749_v0  ;;  %5661 = vmatpush.bf16.msra.mxu3 %v11597_v44  ;;  %v11533_v44 = vor.u32 %v13735_v31, %v11532_v30  ;;  %v11505_v3 = vor.u32 %v13725_v53, %v11502_v54  ;;  %v13645_v30 = vld [vmem:[#allocation10 + $0x64] sm:$0xf]  ;;  %v11182_v31 = vld [vmem:[#allocation10 + $0x70] sm:$0xf0] }
 0x3dc   :  { %5647 = vmatpush.bf16.msra.mxu2 %v11469_v40  ;;  %5621 = vmatpush.bf16.msra.mxu0 %v11181_v61  ;;  %v11405_v40 = vor.u32 %v13703_v29, %v11404_v5  ;;  %v11358_v61 = vld [vmem:[#allocation10 + $0x1d0] sm:$0xf0] }
 0x3dd   :  { %v11150_v54 = vld [vmem:[#allocation10 + $0x30] sm:$0xf0] }
 0x3df   :  { %5662 = vmatpush.bf16.msra.mxu3 %v11581_v62 }
 0x3e0   :  { %v4537_v8 = vpop.f32.mrf.mxu3  ;;  %5648 = vmatpush.bf16.msra.mxu2 %v11453_v58 }
 0x3e1   :  { %v4538_v63 = vadd.f32 %v4537_v8, %v4524_v2  ;;  %v13711_v2 = vld [vmem:[#allocation10 + $0x26c] sm:$0xf0] }
 0x3e2   :  { %v13643_v8 = vld [vmem:[#allocation10 + $0x4c] sm:$0xf0]  ;;  %v11437_v13 = vor.u32 %v13711_v2, %v11436_v60  ;;  %v13689_v60 = vld [vmem:[#allocation10 + $0x1c4] sm:$0xf]  ;;  %v11389_v2 = vor.u32 %v13699_v48, %v11388_v47 }
 0x3e3   :  { %4543 = vst [vmem:[%s14936_s19 + $0x8] sm:$0xff] %v4538_v63  ;;  %v4546_v27 = vmul.f32 0.5, %v4538_v63  ;;  %v11420_v63 = vld [vmem:[#allocation10 + $0x240] sm:$0xf]  ;;  %v11165_v18 = vor.u32 %v13643_v8, %v11164_v51  ;;  %5663 = vmatpush.bf16.msra.mxu3 %v11565_v14  ;;  %v11486_v51 = vld [vmem:[#allocation10 + $0x2d0] sm:$0xf0] }
 0x3e4   :  { %5649 = vmatpush.bf16.msra.mxu2 %v11437_v13  ;;  %v11421_v52 = vor.u32 %v13707_v1, %v11420_v63  ;;  %v13753_v8 = vld [vmem:[#allocation10 + $0x3c4] sm:$0xf]  ;;  %v11361_v13 = vor.u32 %v13689_v60, %v11358_v61  ;;  %v11214_v63 = vld [vmem:[#allocation10 + $0xb0] sm:$0xf0]  ;;  %v11489_v1 = vor.u32 %v13721_v7, %v11486_v51 }
 0x3e5   :  { %v4548_v43 = vmul.f32 1.442695, %v4546_v27  ;;  %v13671_v27 = vld [vmem:[#allocation10 + $0x12c] sm:$0xf0]  ;;  %5622 = vmatpush.bf16.msra.mxu0 %v11165_v18  ;;  %v13653_v14 = vld [vmem:[#allocation10 + $0xa4] sm:$0xf]  ;;  %v11617_v19 = vor.u32 %v13753_v8, %v11614_v10 }
 0x3e6   :  { %v11277_v41 = vor.u32 %v13671_v27, %v11276_v42  ;;  %v11342_v18 = vld [vmem:[#allocation10 + $0x1b0] sm:$0xf0]  ;;  %v11217_v23 = vor.u32 %v13653_v14, %v11214_v63  ;;  %v13709_v48 = vld [vmem:[#allocation10 + $0x264] sm:$0xf] }
 0x3e7   :  { %14131 = vpow2.f32 %v4548_v43  ;;  %5664 = vmatpush.bf16.msra.mxu3 %v11549_v22  ;;  %v13693_v43 = vld [vmem:[#allocation10 + $0x1e4] sm:$0xf]  ;;  %v11326_v42 = vld [vmem:[#allocation10 + $0x190] sm:$0xf0] }
 0x3e8   :  { %v4539_v45 = vpop.f32.mrf.mxu3  ;;  %5650 = vmatpush.bf16.msra.mxu2 %v11421_v52  ;;  %5637 = vmatpush.bf16.msra.mxu1 %v11277_v41  ;;  %v11377_v62 = vor.u32 %v13693_v43, %v11374_v46  ;;  %v11329_v27 = vor.u32 %v13681_v37, %v11326_v42  ;;  %v13717_v52 = vld [vmem:[#allocation10 + $0x2a4] sm:$0xf]  ;;  %v11470_v22 = vld [vmem:[#allocation10 + $0x2b0] sm:$0xf0]  ;;  %v11185_v41 = vor.u32 %v13645_v30, %v11182_v31  ;;  %v4593_v37 = vld [vmem:[%s14928_s11] sm:$0xf] }
 0x3e9   :  { %v4540_v50 = vadd.f32 %v4539_v45, %v4526_v15  ;;  %v11246_v15 = vld [vmem:[#allocation10 + $0xf0] sm:$0xf0]  ;;  %5623 = vmatpush.bf16.msra.mxu0 %v11149_v28  ;;  %v11473_v5 = vor.u32 %v13717_v52, %v11470_v22  ;;  %v13737_v60 = vld [vmem:[#allocation10 + $0x344] sm:$0xf]  ;;  %v4596_v52 = vperm.slane %v4593_v37, 1  ;;  %v4598_v30 = vperm.slane %v4593_v37, 3 }
 0x3ea   :  { %v11249_v58 = vor.u32 %v13661_v39, %v11246_v15  ;;  %v11598_v28 = vld [vmem:[#allocation10 + $0x3b0] sm:$0xf0]  ;;  %v11457_v39 = vor.u32 %v13713_v34, %v11454_v35  ;;  %v13665_v7 = vld [vmem:[#allocation10 + $0x104] sm:$0xf]  ;;  %v11252_v35 = vld [vmem:[#allocation10 + $0xe8] sm:$0xf] }
 0x3eb   :  { %4545 = vst [vmem:[%s14936_s19 + $0x18] sm:$0xff] %v4540_v50  ;;  %v4547_v56 = vmul.f32 0.5, %v4540_v50  ;;  %v11516_v50 = vld [vmem:[#allocation10 + $0x300] sm:$0xf]  ;;  %5665 = vmatpush.bf16.msra.mxu3 %v11533_v44  ;;  %v11582_v15 = vld [vmem:[#allocation10 + $0x390] sm:$0xf0] }
 0x3ec   :  { %5651 = vmatpush.bf16.msra.mxu2 %v11405_v40  ;;  %v11517_v17 = vor.u32 %v13731_v11, %v11516_v50  ;;  %5638 = vmatpush.bf16.msra.mxu1 %v11261_v57  ;;  %v11585_v43 = vor.u32 %v13745_v36, %v11582_v15  ;;  %v13641_v40 = vld [vmem:[#allocation10 + $0x44] sm:$0xf]  ;;  %v11166_v44 = vld [vmem:[#allocation10 + $0x50] sm:$0xf0]  ;;  %v13664_v36 = vld [vmem:[#allocation10 + $0xf4] sm:$0xf0] }
 0x3ed   :  { %v4550_v6 = vmul.f32 1.442695, %v4547_v56  ;;  %v14132_v20 = vpop.eup %14131  ;;  %v11630_v56 = vld [vmem:[#allocation10 + $0x3f0] sm:$0xf0]  ;;  %5624 = vmatpush.bf16.msra.mxu0 %v11133_v59  ;;  %v13741_v11 = vld [vmem:[#allocation10 + $0x364] sm:$0xf] }
 0x3ee   :  { %v4556_v4 = vmul.f32 %v14132_v20, %v14115_v16  ;;  %v13685_v16 = vld [vmem:[#allocation10 + $0x1a4] sm:$0xf]  ;;  %v11294_v46 = vld [vmem:[#allocation10 + $0x150] sm:$0xf0] }
 0x3ef   :  { %14133 = vpow2.f32 %v4550_v6  ;;  %v11633_v6 = vor.u32 %v13757_v55, %v11630_v56  ;;  %5666 = vmatpush.bf16.msra.mxu3 %v11517_v17  ;;  %v11345_v20 = vor.u32 %v13685_v16, %v11342_v18  ;;  %v11438_v50 = vld [vmem:[#allocation10 + $0x270] sm:$0xf0]  ;;  %v13637_v57 = vld [vmem:[#allocation10 + $0x24] sm:$0xf] }
 0x3f0   :  { %v4558_v45 = vadd.f32 %v4556_v4, %v14742_v24  ;;  %v13657_v24 = vld [vmem:[#allocation10 + $0xc4] sm:$0xf]  ;;  %5652 = vmatpush.bf16.msra.mxu2 %v11389_v2  ;;  %v11441_v53 = vor.u32 %v13709_v48, %v11438_v50  ;;  %v11153_v56 = vor.u32 %v13637_v57, %v11150_v54  ;;  %v11550_v2 = vld [vmem:[#allocation10 + $0x350] sm:$0xf0]  ;;  %v11253_v50 = vor.u32 %v13664_v36, %v11252_v35  ;;  %v11188_v35 = vld [vmem:[#allocation10 + $0x68] sm:$0xf] }
 0x3f1   :  { %v13749_v4 = vld [vmem:[#allocation10 + $0x3a4] sm:$0xf]  ;;  %v11553_v17 = vor.u32 %v13737_v60, %v11550_v2  ;;  %v11262_v8 = vld [vmem:[#allocation10 + $0x110] sm:$0xf0]  ;;  %v13728_v2 = vld [vmem:[#allocation10 + $0x2f4] sm:$0xf0] }
 0x3f2   :  { %v11601_v29 = vor.u32 %v13749_v4, %v11598_v28  ;;  %v13669_v55 = vld [vmem:[#allocation10 + $0x124] sm:$0xf]  ;;  %v11265_v10 = vor.u32 %v13665_v7, %v11262_v8  ;;  %v11534_v63 = vld [vmem:[#allocation10 + $0x330] sm:$0xf0]  ;;  %v13648_v36 = vld [vmem:[#allocation10 + $0x74] sm:$0xf0] }
 0x3f3   :  { %v13733_v14 = vld [vmem:[#allocation10 + $0x324] sm:$0xf] }
 0x3f4   :  { %v11537_v18 = vor.u32 %v13733_v14, %v11534_v63  ;;  %v13688_v14 = vld [vmem:[#allocation10 + $0x1b4] sm:$0xf0] }
 0x3f5   :  { %v14134_v49 = vpop.eup %14133 }
 0x3f6   :  { %v4557_v33 = vmul.f32 %v14134_v49, %v14116_v26  ;;  %v11201_v26 = vor.u32 %v13649_v21, %v11198_v9  ;;  %v13677_v49 = vld [vmem:[#allocation10 + $0x164] sm:$0xf]  ;;  %v11518_v21 = vld [vmem:[#allocation10 + $0x310] sm:$0xf0] }
 0x3f8   :  { %v4559_v38 = vadd.f32 %v4557_v33, %v14749_v0  ;;  %v11230_v0 = vld [vmem:[#allocation10 + $0xd0] sm:$0xf0]  ;;  %v11313_v33 = vor.u32 %v13677_v49, %v11310_v32 }
 0x3f9   :  { %v11233_v12 = vor.u32 %v13657_v24, %v11230_v0  ;;  %v13705_v24 = vld [vmem:[#allocation10 + $0x244] sm:$0xf]  ;;  %v11422_v0 = vld [vmem:[#allocation10 + $0x250] sm:$0xf0] }
 0x3fa   :  { %v4560_v25 = vpack.c.bf16 %v4559_v38, %v4558_v45  ;;  %v11169_v45 = vor.u32 %v13641_v40, %v11166_v44  ;;  %v13673_v38 = vld [vmem:[#allocation10 + $0x144] sm:$0xf]  ;;  %v11425_v61 = vor.u32 %v13705_v24, %v11422_v0  ;;  %v13696_v40 = vld [vmem:[#allocation10 + $0x1f4] sm:$0xf0] }
 0x3fb   :  { %v11297_v47 = vor.u32 %v13673_v38, %v11294_v46 }
 0x3fc   :  { %4771 = vmatmul.bf16.vlgmr.msrb.gmra.mxu0 %v4560_v25  ;;  %4785 = vmatmul.bf16.vlgmr.msrb.gmra.mxu1 %v4560_v25 }
 0x3fd   :  { %4799 = vmatmul.bf16.vlgmr.msrb.gmra.mxu2 %v4560_v25  ;;  %4813 = vmatmul.bf16.vlgmr.msrb.gmra.mxu3 %v4560_v25  ;;  %v11566_v25 = vld [vmem:[#allocation10 + $0x370] sm:$0xf0] }
 0x3fe   :  { %5673 = vmatpush.bf16.msrb.mxu0 %v11249_v58  ;;  %5687 = vmatpush.bf16.msrb.mxu1 %v11377_v62  ;;  %v11569_v59 = vor.u32 %v13741_v11, %v11566_v25  ;;  %v11278_v58 = vld [vmem:[#allocation10 + $0x130] sm:$0xf0] }
 0x3ff   :  { %5701 = vmatpush.bf16.msrb.mxu2 %v11505_v3  ;;  %5715 = vmatpush.bf16.msrb.mxu3 %v11633_v6  ;;  %v11281_v62 = vor.u32 %v13669_v55, %v11278_v58  ;;  %v13633_v3 = vld [vmem:[#allocation10 + $0x4] sm:$0xf]  ;;  %v11134_v6 = vld [vmem:[#allocation10 + $0x10] sm:$0xf0]  ;;  %v13660_v55 = vld [vmem:[#allocation10 + $0xd4] sm:$0xf0] }
 0x400   :  { %v11137_v51 = vor.u32 %v13633_v3, %v11134_v6  ;;  %v13692_v58 = vld [vmem:[#allocation10 + $0x1d4] sm:$0xf0]  ;;  %v11220_v6 = vld [vmem:[#allocation10 + $0xa8] sm:$0xf] }
 0x401   :  { %v13760_v3 = vld [vmem:[#allocation10 + $0x3f4] sm:$0xf0] }
 0x402   :  { %5674 = vmatpush.bf16.msrb.mxu0 %v11233_v12  ;;  %5688 = vmatpush.bf16.msrb.mxu1 %v11361_v13  ;;  %v13701_v12 = vld [vmem:[#allocation10 + $0x224] sm:$0xf]  ;;  %v11406_v13 = vld [vmem:[#allocation10 + $0x230] sm:$0xf0] }
 0x403   :  { %5702 = vmatpush.bf16.msrb.mxu2 %v11489_v1  ;;  %5716 = vmatpush.bf16.msrb.mxu3 %v11617_v19  ;;  %v11409_v16 = vor.u32 %v13701_v12, %v11406_v13  ;;  %v13697_v1 = vld [vmem:[#allocation10 + $0x204] sm:$0xf]  ;;  %v11390_v19 = vld [vmem:[#allocation10 + $0x210] sm:$0xf0]  ;;  %v13656_v12 = vld [vmem:[#allocation10 + $0xb4] sm:$0xf0] }
 0x404   :  { %v11348_v13 = vld [vmem:[#allocation10 + $0x1a8] sm:$0xf] }
 0x406   :  { %5675 = vmatpush.bf16.msrb.mxu0 %v11217_v23  ;;  %5689 = vmatpush.bf16.msrb.mxu1 %v11345_v20  ;;  %v11393_v23 = vor.u32 %v13697_v1, %v11390_v19  ;;  %v13729_v20 = vld [vmem:[#allocation10 + $0x304] sm:$0xf] }
 0x407   :  { %5703 = vmatpush.bf16.msrb.mxu2 %v11473_v5  ;;  %5717 = vmatpush.bf16.msrb.mxu3 %v11601_v29  ;;  %v11521_v9 = vor.u32 %v13729_v20, %v11518_v21  ;;  %v4597_v29 = vperm.slane %v4593_v37, 2  ;;  %v11221_v20 = vor.u32 %v13656_v12, %v11220_v6  ;;  %v11492_v21 = vld [vmem:[#allocation10 + $0x2c8] sm:$0xf]  ;;  %v13740_v12 = vld [vmem:[#allocation10 + $0x354] sm:$0xf0] }
 0x40a   :  { %5676 = vmatpush.bf16.msrb.mxu0 %v11201_v26  ;;  %5690 = vmatpush.bf16.msrb.mxu1 %v11329_v27  ;;  %v4595_v27 = vperm.slane %v4593_v37, 0 }
 0x40b   :  { %5704 = vmatpush.bf16.msrb.mxu2 %v11457_v39  ;;  %5718 = vmatpush.bf16.msrb.mxu3 %v11585_v43  ;;  %v11380_v39 = vld [vmem:[#allocation10 + $0x1e8] sm:$0xf] }
 0x40c   :  { %v11381_v11 = vor.u32 %v13696_v40, %v11380_v39  ;;  %v11316_v39 = vld [vmem:[#allocation10 + $0x168] sm:$0xf] }
 0x40e   :  { %5677 = vmatpush.bf16.msrb.mxu0 %v11185_v41  ;;  %5691 = vmatpush.bf16.msrb.mxu1 %v11313_v33 }
 0x40f   :  { %5705 = vmatpush.bf16.msrb.mxu2 %v11441_v53  ;;  %5719 = vmatpush.bf16.msrb.mxu3 %v11569_v59  ;;  %v11236_v53 = vld [vmem:[#allocation10 + $0xc8] sm:$0xf] }
 0x410   :  { %v11237_v8 = vor.u32 %v13660_v55, %v11236_v53  ;;  %v11300_v53 = vld [vmem:[#allocation10 + $0x148] sm:$0xf] }
 0x412   :  { %5678 = vmatpush.bf16.msrb.mxu0 %v11169_v45  ;;  %5692 = vmatpush.bf16.msrb.mxu1 %v11297_v47 }
 0x413   :  { %5706 = vmatpush.bf16.msrb.mxu2 %v11425_v61  ;;  %5720 = vmatpush.bf16.msrb.mxu3 %v11553_v17  ;;  %v11508_v61 = vld [vmem:[#allocation10 + $0x2e8] sm:$0xf] }
 0x414   :  { %v11636_v17 = vld [vmem:[#allocation10 + $0x3e8] sm:$0xf]  ;;  %v11509_v19 = vor.u32 %v13728_v2, %v11508_v61  ;;  %v13640_v2 = vld [vmem:[#allocation10 + $0x34] sm:$0xf0] }
 0x415   :  { %v11156_v61 = vld [vmem:[#allocation10 + $0x28] sm:$0xf] }
 0x416   :  { %5679 = vmatpush.bf16.msrb.mxu0 %v11153_v56  ;;  %5693 = vmatpush.bf16.msrb.mxu1 %v11281_v62  ;;  %v11364_v56 = vld [vmem:[#allocation10 + $0x1c8] sm:$0xf] }
 0x417   :  { %5707 = vmatpush.bf16.msrb.mxu2 %v11409_v16  ;;  %5721 = vmatpush.bf16.msrb.mxu3 %v11537_v18 }
 0x41a   :  { %5680 = vmatpush.bf16.msrb.mxu0 %v11137_v51  ;;  %5694 = vmatpush.bf16.msrb.mxu1 %v11265_v10  ;;  %v11365_v10 = vor.u32 %v13692_v58, %v11364_v56  ;;  %v11444_v56 = vld [vmem:[#allocation10 + $0x268] sm:$0xf]  ;;  %v13712_v58 = vld [vmem:[#allocation10 + $0x274] sm:$0xf0] }
 0x41b   :  { %5708 = vmatpush.bf16.msrb.mxu2 %v11393_v23  ;;  %5722 = vmatpush.bf16.msrb.mxu3 %v11521_v9  ;;  %v11637_v23 = vor.u32 %v13760_v3, %v11636_v17  ;;  %v13724_v9 = vld [vmem:[#allocation10 + $0x2d4] sm:$0xf0]  ;;  %v11284_v17 = vld [vmem:[#allocation10 + $0x128] sm:$0xf]  ;;  %v11445_v6 = vor.u32 %v13712_v58, %v11444_v56  ;;  %v13722_v56 = vld [vmem:[#allocation10 + $0x2cc] sm:$0xf] }
 0x41c   :  { %v13672_v3 = vld [vmem:[#allocation10 + $0x134] sm:$0xf0]  ;;  %v11494_v58 = vld [vmem:[#allocation10 + $0x2d8] sm:$0xf0] }
 0x479   :  { %v4772_v26 = vpop.f32.mrf.mxu0  ;;  %v4786_v42 = vpop.f32.mrf.mxu1 }
 0x47a   :  { %v4773_v22 = vadd.f32 %v4772_v26, %v4595_v27  ;;  %v4787_v5 = vadd.f32 %v4786_v42, %v4596_v52  ;;  %v11349_v42 = vor.u32 %v13688_v14, %v11348_v13  ;;  %v11157_v13 = vor.u32 %v13640_v2, %v11156_v61  ;;  %v13650_v61 = vld [vmem:[#allocation10 + $0x8c] sm:$0xf]  ;;  %v11206_v2 = vld [vmem:[#allocation10 + $0x98] sm:$0xf0] }
 0x47b   :  { %v11285_v14 = vor.u32 %v13672_v3, %v11284_v17  ;;  %v13682_v17 = vld [vmem:[#allocation10 + $0x18c] sm:$0xf]  ;;  %v11334_v3 = vld [vmem:[#allocation10 + $0x198] sm:$0xf0] }
 0x47c   :  { %v4819_v41 = vmul.f32 0.01, %v4773_v22  ;;  %v4820_v32 = vmul.f32 0.01, %v4787_v5 }
 0x47e   :  { %v4827_v38 = vmax.f32 %v4773_v22, %v4819_v41  ;;  %v4828_v46 = vmax.f32 %v4787_v5, %v4820_v32  ;;  %v11204_v22 = vld [vmem:[#allocation10 + $0x88] sm:$0xf]  ;;  %v13652_v5 = vld [vmem:[#allocation10 + $0x94] sm:$0xf0] }
 0x47f   :  { %v13720_v32 = vld [vmem:[#allocation10 + $0x2b4] sm:$0xf0] }
 0x480   :  { %v4800_v4 = vpop.f32.mrf.mxu2  ;;  %v4814_v28 = vpop.f32.mrf.mxu3 }
 0x481   :  { %v4774_v31 = vpop.f32.mrf.mxu0  ;;  %v4788_v49 = vpop.f32.mrf.mxu1  ;;  %v4801_v44 = vadd.f32 %v4800_v4, %v4597_v29  ;;  %v4815_v45 = vadd.f32 %v4814_v28, %v4598_v30  ;;  %v11332_v4 = vld [vmem:[#allocation10 + $0x188] sm:$0xf]  ;;  %v13684_v28 = vld [vmem:[#allocation10 + $0x194] sm:$0xf0] }
 0x482   :  { %v4775_v33 = vadd.f32 %v4774_v31, %v4595_v27  ;;  %v4789_v34 = vadd.f32 %v4788_v49, %v4596_v52  ;;  %v11620_v27 = vld [vmem:[#allocation10 + $0x3c8] sm:$0xf]  ;;  %v13756_v52 = vld [vmem:[#allocation10 + $0x3d4] sm:$0xf0]  ;;  %v11205_v49 = vor.u32 %v13652_v5, %v11204_v22  ;;  %v11333_v41 = vor.u32 %v13684_v28, %v11332_v4 }
 0x483   :  { %v4821_v62 = vmul.f32 0.01, %v4801_v44  ;;  %v4822_v24 = vmul.f32 0.01, %v4815_v45  ;;  %v11476_v31 = vld [vmem:[#allocation10 + $0x2a8] sm:$0xf] }
 0x484   :  { %v4823_v15 = vmul.f32 0.01, %v4775_v33  ;;  %v4824_v43 = vmul.f32 0.01, %v4789_v34  ;;  %v11540_v22 = vld [vmem:[#allocation10 + $0x328] sm:$0xf] }
 0x485   :  { %v4829_v63 = vmax.f32 %v4801_v44, %v4821_v62  ;;  %v4830_v16 = vmax.f32 %v4815_v45, %v4822_v24  ;;  %v11460_v44 = vld [vmem:[#allocation10 + $0x288] sm:$0xf]  ;;  %v13716_v45 = vld [vmem:[#allocation10 + $0x294] sm:$0xf0] }
 0x486   :  { %v4831_v47 = vmax.f32 %v4775_v33, %v4823_v15  ;;  %v4832_v48 = vmax.f32 %v4789_v34, %v4824_v43  ;;  %v11604_v33 = vld [vmem:[#allocation10 + $0x3a8] sm:$0xf]  ;;  %v13752_v34 = vld [vmem:[#allocation10 + $0x3b4] sm:$0xf0]  ;;  %v11477_v43 = vor.u32 %v13720_v32, %v11476_v31  ;;  %v13658_v31 = vld [vmem:[#allocation10 + $0xcc] sm:$0xf] }
 0x487   :  { %v13680_v15 = vld [vmem:[#allocation10 + $0x174] sm:$0xf0]  ;;  %v11605_v40 = vor.u32 %v13752_v34, %v11604_v33  ;;  %v11572_v62 = vld [vmem:[#allocation10 + $0x368] sm:$0xf]  ;;  %v11366_v34 = vld [vmem:[#allocation10 + $0x1d8] sm:$0xf0] }
 0x488   :  { %v14773_v25 = vpack.c.bf16 %v4831_v47, %v4827_v38  ;;  %v14775_v59 = vpack.c.bf16 %v4832_v48, %v4828_v46  ;;  %v4802_v57 = vpop.f32.mrf.mxu2  ;;  %v4816_v54 = vpop.f32.mrf.mxu3  ;;  %v11588_v38 = vld [vmem:[#allocation10 + $0x388] sm:$0xf]  ;;  %v13748_v46 = vld [vmem:[#allocation10 + $0x394] sm:$0xf0]  ;;  %v11189_v47 = vor.u32 %v13648_v36, %v11188_v35  ;;  %v11317_v48 = vor.u32 %v13680_v15, %v11316_v39 }
 0x489   :  { %v4803_v0 = vadd.f32 %v4802_v57, %v4597_v29  ;;  %v4817_v60 = vadd.f32 %v4816_v54, %v4598_v30  ;;  %v11493_v29 = vor.u32 %v13724_v9, %v11492_v21  ;;  %v11621_v30 = vor.u32 %v13756_v52, %v11620_v27  ;;  %v13676_v57 = vld [vmem:[#allocation10 + $0x154] sm:$0xf0]  ;;  %v13694_v9 = vld [vmem:[#allocation10 + $0x1ec] sm:$0xf]  ;;  %v11412_v27 = vld [vmem:[#allocation10 + $0x228] sm:$0xf] }
 0x48a   :  { %5625 = vmatmul.bf16.vlgmr.msra.gmra.mxu0 %v14773_v25  ;;  %5639 = vmatmul.bf16.vlgmr.msra.gmra.mxu1 %v14775_v59  ;;  %v11461_v54 = vor.u32 %v13716_v45, %v11460_v44  ;;  %v11589_v55 = vor.u32 %v13748_v46, %v11588_v38  ;;  %v13744_v24 = vld [vmem:[#allocation10 + $0x374] sm:$0xf0]  ;;  %v11396_v35 = vld [vmem:[#allocation10 + $0x208] sm:$0xf]  ;;  %v13758_v44 = vld [vmem:[#allocation10 + $0x3ec] sm:$0xf] }
 0x48b   :  { %v4825_v7 = vmul.f32 0.01, %v4803_v0  ;;  %v4826_v51 = vmul.f32 0.01, %v4817_v60  ;;  %5729 = vmatpush.bf16.msra.mxu0 %v11253_v50  ;;  %5743 = vmatpush.bf16.msra.mxu1 %v11381_v11  ;;  %v11172_v50 = vld [vmem:[#allocation10 + $0x48] sm:$0xf] }
 0x48c   :  { %v13644_v11 = vld [vmem:[#allocation10 + $0x54] sm:$0xf0]  ;;  %v11524_v39 = vld [vmem:[#allocation10 + $0x308] sm:$0xf]  ;;  %v11638_v45 = vld [vmem:[#allocation10 + $0x3f8] sm:$0xf0] }
 0x48d   :  { %v4833_v18 = vmax.f32 %v4803_v0, %v4825_v7  ;;  %v4834_v1 = vmax.f32 %v4817_v60, %v4826_v51  ;;  %v11173_v0 = vor.u32 %v13644_v11, %v11172_v50  ;;  %v11301_v60 = vor.u32 %v13676_v57, %v11300_v53  ;;  %v11428_v51 = vld [vmem:[#allocation10 + $0x248] sm:$0xf]  ;;  %v13704_v52 = vld [vmem:[#allocation10 + $0x234] sm:$0xf0]  ;;  %v11222_v11 = vld [vmem:[#allocation10 + $0xb8] sm:$0xf0] }
 0x48e   :  { %v11573_v7 = vor.u32 %v13744_v24, %v11572_v62  ;;  %v13736_v5 = vld [vmem:[#allocation10 + $0x334] sm:$0xf0]  ;;  %v11413_v32 = vor.u32 %v13704_v52, %v11412_v27  ;;  %v13686_v53 = vld [vmem:[#allocation10 + $0x1ac] sm:$0xf]  ;;  %v11350_v57 = vld [vmem:[#allocation10 + $0x1b8] sm:$0xf0] }
 0x48f   :  { %v14779_v37 = vpack.c.bf16 %v4833_v18, %v4829_v63  ;;  %v14781_v26 = vpack.c.bf16 %v4834_v1, %v4830_v16  ;;  %5730 = vmatpush.bf16.msra.mxu0 %v11237_v8  ;;  %5744 = vmatpush.bf16.msra.mxu1 %v11365_v10  ;;  %v13708_v8 = vld [vmem:[#allocation10 + $0x254] sm:$0xf0]  ;;  %v11556_v10 = vld [vmem:[#allocation10 + $0x348] sm:$0xf]  ;;  %v11541_v33 = vor.u32 %v13736_v5, %v11540_v22  ;;  %v13754_v62 = vld [vmem:[#allocation10 + $0x3cc] sm:$0xf] }
 0x490   :  { %v11140_v63 = vld [vmem:[#allocation10 + $0x8] sm:$0xf]  ;;  %v13636_v16 = vld [vmem:[#allocation10 + $0x14] sm:$0xf0]  ;;  %v11557_v21 = vor.u32 %v13740_v12, %v11556_v10  ;;  %v11622_v24 = vld [vmem:[#allocation10 + $0x3d8] sm:$0xf0] }
 0x491   :  { %5653 = vmatmul.bf16.vlgmr.msra.gmra.mxu2 %v14779_v37  ;;  %5667 = vmatmul.bf16.vlgmr.msra.gmra.mxu3 %v14781_v26  ;;  %v11268_v18 = vld [vmem:[#allocation10 + $0x108] sm:$0xf]  ;;  %v13668_v1 = vld [vmem:[#allocation10 + $0x114] sm:$0xf0]  ;;  %v11141_v4 = vor.u32 %v13636_v16, %v11140_v63  ;;  %v13750_v10 = vld [vmem:[#allocation10 + $0x3ac] sm:$0xf] }
 0x492   :  { %5757 = vmatpush.bf16.msra.mxu2 %v11509_v19  ;;  %5771 = vmatpush.bf16.msra.mxu3 %v11637_v23  ;;  %v13662_v19 = vld [vmem:[#allocation10 + $0xec] sm:$0xf]  ;;  %v11254_v23 = vld [vmem:[#allocation10 + $0xf8] sm:$0xf0]  ;;  %v11269_v28 = vor.u32 %v13668_v1, %v11268_v18  ;;  %v13700_v36 = vld [vmem:[#allocation10 + $0x214] sm:$0xf0] }
 0x493   :  { %5731 = vmatpush.bf16.msra.mxu0 %v11221_v20  ;;  %5745 = vmatpush.bf16.msra.mxu1 %v11349_v42  ;;  %v11429_v20 = vor.u32 %v13708_v8, %v11428_v51  ;;  %v11382_v42 = vld [vmem:[#allocation10 + $0x1f8] sm:$0xf0]  ;;  %v13732_v15 = vld [vmem:[#allocation10 + $0x314] sm:$0xf0]  ;;  %v13718_v51 = vld [vmem:[#allocation10 + $0x2ac] sm:$0xf] }
 0x494   :  { %v11525_v50 = vor.u32 %v13732_v15, %v11524_v39  ;;  %v11478_v8 = vld [vmem:[#allocation10 + $0x2b8] sm:$0xf0]  ;;  %v13646_v63 = vld [vmem:[#allocation10 + $0x6c] sm:$0xf] }
 0x495   :  { %v11606_v12 = vld [vmem:[#allocation10 + $0x3b8] sm:$0xf0]  ;;  %v13678_v18 = vld [vmem:[#allocation10 + $0x16c] sm:$0xf] }
 0x496   :  { %5758 = vmatpush.bf16.msra.mxu2 %v11493_v29  ;;  %5772 = vmatpush.bf16.msra.mxu3 %v11621_v30  ;;  %v11257_v29 = vor.u32 %v13662_v19, %v11254_v23  ;;  %v11385_v30 = vor.u32 %v13694_v9, %v11382_v42  ;;  %v11190_v16 = vld [vmem:[#allocation10 + $0x78] sm:$0xf0]  ;;  %v11481_v19 = vor.u32 %v13718_v51, %v11478_v8  ;;  %v13746_v9 = vld [vmem:[#allocation10 + $0x38c] sm:$0xf]  ;;  %v11740_v51 = vld [vmem:[#allocation12 + $0xc0] sm:$0xf] }
 0x497   :  { %5732 = vmatpush.bf16.msra.mxu0 %v11205_v49  ;;  %5746 = vmatpush.bf16.msra.mxu1 %v11333_v41  ;;  %v11238_v49 = vld [vmem:[#allocation10 + $0xd8] sm:$0xf0]  ;;  %v13690_v41 = vld [vmem:[#allocation10 + $0x1cc] sm:$0xf]  ;;  %v11609_v23 = vor.u32 %v13750_v10, %v11606_v12  ;;  %v11193_v27 = vor.u32 %v13646_v63, %v11190_v16  ;;  %v13819_v63 = vld [vmem:[#allocation12 + $0x1cc] sm:$0xf0] }
 0x498   :  { %v11241_v38 = vor.u32 %v13658_v31, %v11238_v49  ;;  %v11369_v46 = vor.u32 %v13690_v41, %v11366_v34  ;;  %v11318_v1 = vld [vmem:[#allocation10 + $0x178] sm:$0xf0]  ;;  %v13642_v22 = vld [vmem:[#allocation10 + $0x4c] sm:$0xf] }
 0x499   :  { %v11590_v42 = vld [vmem:[#allocation10 + $0x398] sm:$0xf0]  ;;  %v11321_v52 = vor.u32 %v13678_v18, %v11318_v1  ;;  %v13710_v31 = vld [vmem:[#allocation10 + $0x26c] sm:$0xf] }
 0x49a   :  { %5759 = vmatpush.bf16.msra.mxu2 %v11477_v43  ;;  %5773 = vmatpush.bf16.msra.mxu3 %v11605_v40  ;;  %v13726_v43 = vld [vmem:[#allocation10 + $0x2ec] sm:$0xf]  ;;  %v11510_v40 = vld [vmem:[#allocation10 + $0x2f8] sm:$0xf0] }
 0x49b   :  { %5681 = vmatmul.bf16.vlgmr.msrb.gmra.mxu0 %v14773_v25  ;;  %5695 = vmatmul.bf16.vlgmr.msrb.gmra.mxu1 %v14775_v59  ;;  %v11174_v5 = vld [vmem:[#allocation10 + $0x58] sm:$0xf0]  ;;  %v13742_v41 = vld [vmem:[#allocation10 + $0x36c] sm:$0xf] }
 0x49c   :  { %5733 = vmatpush.bf16.msra.mxu0 %v11189_v47  ;;  %5747 = vmatpush.bf16.msra.mxu1 %v11317_v48  ;;  %v13654_v47 = vld [vmem:[#allocation10 + $0xac] sm:$0xf]  ;;  %v11397_v48 = vor.u32 %v13700_v36, %v11396_v35  ;;  %v11446_v49 = vld [vmem:[#allocation10 + $0x278] sm:$0xf0] }
 0x49d   :  { %v13638_v35 = vld [vmem:[#allocation10 + $0x2c] sm:$0xf]  ;;  %v11158_v36 = vld [vmem:[#allocation10 + $0x38] sm:$0xf0] }
 0x49e   :  { %5760 = vmatpush.bf16.msra.mxu2 %v11461_v54  ;;  %5774 = vmatpush.bf16.msra.mxu3 %v11589_v55  ;;  %v11513_v54 = vor.u32 %v13726_v43, %v11510_v40  ;;  %v11641_v55 = vor.u32 %v13758_v44, %v11638_v45  ;;  %v13670_v39 = vld [vmem:[#allocation10 + $0x12c] sm:$0xf]  ;;  %v11286_v15 = vld [vmem:[#allocation10 + $0x138] sm:$0xf0]  ;;  %v11449_v43 = vor.u32 %v13710_v31, %v11446_v49  ;;  %v11676_v31 = vld [vmem:[#allocation12 + $0x40] sm:$0xf] }
 0x49f   :  { %v13706_v44 = vld [vmem:[#allocation10 + $0x24c] sm:$0xf]  ;;  %v11430_v45 = vld [vmem:[#allocation10 + $0x258] sm:$0xf0]  ;;  %v13771_v49 = vld [vmem:[#allocation12 + $0x4c] sm:$0xf0] }
 0x4a0   :  { %5734 = vmatpush.bf16.msra.mxu0 %v11173_v0  ;;  %5748 = vmatpush.bf16.msra.mxu1 %v11301_v60  ;;  %v11225_v0 = vor.u32 %v13654_v47, %v11222_v11  ;;  %v11353_v60 = vor.u32 %v13686_v53, %v11350_v57  ;;  %v11161_v47 = vor.u32 %v13638_v35, %v11158_v36  ;;  %v11142_v11 = vld [vmem:[#allocation10 + $0x18] sm:$0xf0]  ;;  %v13666_v53 = vld [vmem:[#allocation10 + $0x10c] sm:$0xf]  ;;  %v11644_v35 = vld [vmem:[#allocation12] sm:$0xf] }
 0x4a1   :  { %5709 = vmatmul.bf16.vlgmr.msrb.gmra.mxu2 %v14779_v37  ;;  %5723 = vmatmul.bf16.vlgmr.msrb.gmra.mxu3 %v14781_v26  ;;  %v11270_v57 = vld [vmem:[#allocation10 + $0x118] sm:$0xf0]  ;;  %v13730_v18 = vld [vmem:[#allocation10 + $0x30c] sm:$0xf]  ;;  %v11836_v36 = vld [vmem:[#allocation12 + $0x180] sm:$0xf] }
 0x4a2   :  { %5761 = vmatpush.bf16.msra.mxu2 %v11445_v6  ;;  %5775 = vmatpush.bf16.msra.mxu3 %v11573_v7  ;;  %v11497_v6 = vor.u32 %v13722_v56, %v11494_v58  ;;  %v11625_v7 = vor.u32 %v13754_v62, %v11622_v24  ;;  %v11433_v56 = vor.u32 %v13706_v44, %v11430_v45  ;;  %v13791_v62 = vld [vmem:[#allocation12 + $0xec] sm:$0xf0]  ;;  %v11884_v24 = vld [vmem:[#allocation12 + $0x1e0] sm:$0xf]  ;;  %v11398_v16 = vld [vmem:[#allocation10 + $0x218] sm:$0xf0] }
 0x4a3   :  { %v11526_v1 = vld [vmem:[#allocation10 + $0x318] sm:$0xf0]  ;;  %v11820_v45 = vld [vmem:[#allocation12 + $0x160] sm:$0xf] }
 0x4a4   :  { %5735 = vmatpush.bf16.msra.mxu0 %v11157_v13  ;;  %5749 = vmatpush.bf16.msra.mxu1 %v11285_v14  ;;  %v11209_v13 = vor.u32 %v13650_v61, %v11206_v2  ;;  %v11337_v14 = vor.u32 %v13682_v17, %v11334_v3  ;;  %v13734_v61 = vld [vmem:[#allocation10 + $0x32c] sm:$0xf]  ;;  %v11542_v2 = vld [vmem:[#allocation10 + $0x338] sm:$0xf0]  ;;  %v11273_v3 = vor.u32 %v13666_v53, %v11270_v57 }
 0x4a5   :  { %v11545_v12 = vor.u32 %v13734_v61, %v11542_v2  ;;  %v11788_v2 = vld [vmem:[#allocation12 + $0x120] sm:$0xf] }
 0x4a6   :  { %5762 = vmatpush.bf16.msra.mxu2 %v11429_v20  ;;  %5776 = vmatpush.bf16.msra.mxu3 %v11557_v21  ;;  %v13714_v20 = vld [vmem:[#allocation10 + $0x28c] sm:$0xf]  ;;  %v11462_v21 = vld [vmem:[#allocation10 + $0x298] sm:$0xf0] }
 0x4a8   :  { %5736 = vmatpush.bf16.msra.mxu0 %v11141_v4  ;;  %5750 = vmatpush.bf16.msra.mxu1 %v11269_v28  ;;  %v13674_v4 = vld [vmem:[#allocation10 + $0x14c] sm:$0xf]  ;;  %v11302_v28 = vld [vmem:[#allocation10 + $0x158] sm:$0xf0] }
 0x4a9   :  { %v11305_v34 = vor.u32 %v13674_v4, %v11302_v28  ;;  %v11708_v4 = vld [vmem:[#allocation12 + $0x80] sm:$0xf]  ;;  %v13779_v28 = vld [vmem:[#allocation12 + $0x8c] sm:$0xf0] }
 0x4aa   :  { %5763 = vmatpush.bf16.msra.mxu2 %v11413_v32  ;;  %5777 = vmatpush.bf16.msra.mxu3 %v11541_v33  ;;  %v11574_v32 = vld [vmem:[#allocation10 + $0x378] sm:$0xf0]  ;;  %v11177_v33 = vor.u32 %v13642_v22, %v11174_v5 }
 0x4ab   :  { %5737 = vmatmul.bf16.vlgmr.msra.gmra.mxu0 %v14773_v25  ;;  %5751 = vmatmul.bf16.vlgmr.msra.gmra.mxu1 %v14775_v59  ;;  %v11577_v40 = vor.u32 %v13742_v41, %v11574_v32  ;;  %v11677_v41 = vor.u32 %v13771_v49, %v11676_v31  ;;  %v11660_v32 = vld [vmem:[#allocation12 + $0x20] sm:$0xf]  ;;  %v13835_v31 = vld [vmem:[#allocation12 + $0x24c] sm:$0xf0] }
 0x4ac   :  { %5785 = vmatpush.bf16.msrb.mxu0 %v11257_v29  ;;  %5799 = vmatpush.bf16.msrb.mxu1 %v11385_v30  ;;  %v11465_v29 = vor.u32 %v13714_v20, %v11462_v21  ;;  %v11593_v30 = vor.u32 %v13746_v9, %v11590_v42  ;;  %v11529_v21 = vor.u32 %v13730_v18, %v11526_v1  ;;  %v11724_v9 = vld [vmem:[#allocation12 + $0xa0] sm:$0xf]  ;;  %v13783_v42 = vld [vmem:[#allocation12 + $0xac] sm:$0xf0]  ;;  %v13773_v1 = vld [vmem:[#allocation12 + $0x64] sm:$0xf] }
 0x4ad   :  { %v11725_v22 = vor.u32 %v13783_v42, %v11724_v9  ;;  %v13843_v18 = vld [vmem:[#allocation12 + $0x28c] sm:$0xf0] }
 0x4ae   :  { %5764 = vmatpush.bf16.msra.mxu2 %v11397_v48  ;;  %5778 = vmatpush.bf16.msra.mxu3 %v11525_v50  ;;  %v11289_v48 = vor.u32 %v13670_v39, %v11286_v15  ;;  %v13634_v50 = vld [vmem:[#allocation10 + $0xc] sm:$0xf]  ;;  %v13811_v39 = vld [vmem:[#allocation12 + $0x18c] sm:$0xf0]  ;;  %v13789_v15 = vld [vmem:[#allocation12 + $0xe4] sm:$0xf] }
 0x4af   :  { %v11145_v17 = vor.u32 %v13634_v50, %v11142_v11  ;;  %v13785_v50 = vld [vmem:[#allocation12 + $0xc4] sm:$0xf]  ;;  %v11742_v11 = vld [vmem:[#allocation12 + $0xd0] sm:$0xf0] }
 0x4b0   :  { %5786 = vmatpush.bf16.msrb.mxu0 %v11241_v38  ;;  %5800 = vmatpush.bf16.msrb.mxu1 %v11369_v46  ;;  %v13738_v38 = vld [vmem:[#allocation10 + $0x34c] sm:$0xf]  ;;  %v11558_v46 = vld [vmem:[#allocation10 + $0x358] sm:$0xf0]  ;;  %v11745_v57 = vor.u32 %v13785_v50, %v11742_v11  ;;  %v12140_v50 = vld [vmem:[#allocation12 + $0x3e0] sm:$0xf] }
 0x4b1   :  { %5765 = vmatmul.bf16.vlgmr.msra.gmra.mxu2 %v14779_v37  ;;  %5779 = vmatmul.bf16.vlgmr.msra.gmra.mxu3 %v14781_v26  ;;  %v11561_v58 = vor.u32 %v13738_v38, %v11558_v46  ;;  %v13807_v38 = vld [vmem:[#allocation12 + $0x16c] sm:$0xf0]  ;;  %v12012_v46 = vld [vmem:[#allocation12 + $0x2e0] sm:$0xf] }
 0x4b2   :  { %5813 = vmatpush.bf16.msrb.mxu2 %v11513_v54  ;;  %5827 = vmatpush.bf16.msrb.mxu3 %v11641_v55  ;;  %v13702_v54 = vld [vmem:[#allocation10 + $0x22c] sm:$0xf]  ;;  %v11756_v55 = vld [vmem:[#allocation12 + $0xe0] sm:$0xf] }
 0x4b4   :  { %5787 = vmatpush.bf16.msrb.mxu0 %v11225_v0  ;;  %5801 = vmatpush.bf16.msrb.mxu1 %v11353_v60  ;;  %v13823_v0 = vld [vmem:[#allocation12 + $0x1ec] sm:$0xf0]  ;;  %v11414_v60 = vld [vmem:[#allocation10 + $0x238] sm:$0xf0] }
 0x4b5   :  { %v11885_v8 = vor.u32 %v13823_v0, %v11884_v24  ;;  %v11417_v10 = vor.u32 %v13702_v54, %v11414_v60  ;;  %v11804_v54 = vld [vmem:[#allocation12 + $0x140] sm:$0xf]  ;;  %v13781_v24 = vld [vmem:[#allocation12 + $0xa4] sm:$0xf]  ;;  %v11726_v0 = vld [vmem:[#allocation12 + $0xb0] sm:$0xf0] }
 0x4b6   :  { %5814 = vmatpush.bf16.msrb.mxu2 %v11497_v6  ;;  %5828 = vmatpush.bf16.msrb.mxu3 %v11625_v7  ;;  %v13698_v6 = vld [vmem:[#allocation10 + $0x20c] sm:$0xf]  ;;  %v11757_v7 = vor.u32 %v13791_v62, %v11756_v55  ;;  %v13803_v55 = vld [vmem:[#allocation12 + $0x14c] sm:$0xf0]  ;;  %v11729_v61 = vor.u32 %v13781_v24, %v11726_v0  ;;  %v14800_v24 = vld [vmem:[%s14930_s13] sm:$0xf] }
 0x4b7   :  { %v11401_v20 = vor.u32 %v13698_v6, %v11398_v16  ;;  %v13851_v62 = vld [vmem:[#allocation12 + $0x2cc] sm:$0xf0] }
 0x4b8   :  { %5788 = vmatpush.bf16.msrb.mxu0 %v11209_v13  ;;  %5802 = vmatpush.bf16.msrb.mxu1 %v11337_v14  ;;  %v13787_v13 = vld [vmem:[#allocation12 + $0xcc] sm:$0xf0]  ;;  %v11868_v14 = vld [vmem:[#allocation12 + $0x1c0] sm:$0xf] }
 0x4ba   :  { %5815 = vmatpush.bf16.msrb.mxu2 %v11481_v19  ;;  %5829 = vmatpush.bf16.msrb.mxu3 %v11609_v23  ;;  %v11741_v19 = vor.u32 %v13787_v13, %v11740_v51  ;;  %v11869_v23 = vor.u32 %v13819_v63, %v11868_v14  ;;  %v13777_v51 = vld [vmem:[#allocation12 + $0x84] sm:$0xf]  ;;  %v11772_v13 = vld [vmem:[#allocation12 + $0x100] sm:$0xf]  ;;  %v13795_v14 = vld [vmem:[#allocation12 + $0x10c] sm:$0xf0] }
 0x4bb   :  { %v11964_v63 = vld [vmem:[#allocation12 + $0x280] sm:$0xf]  ;;  %v11773_v16 = vor.u32 %v13795_v14, %v11772_v13 }
 0x4bc   :  { %5789 = vmatpush.bf16.msrb.mxu0 %v11193_v27  ;;  %5803 = vmatpush.bf16.msrb.mxu1 %v11321_v52  ;;  %v11852_v27 = vld [vmem:[#allocation12 + $0x1a0] sm:$0xf]  ;;  %v13815_v52 = vld [vmem:[#allocation12 + $0x1ac] sm:$0xf0] }
 0x4bd   :  { %v11853_v5 = vor.u32 %v13815_v52, %v11852_v27  ;;  %v11948_v27 = vld [vmem:[#allocation12 + $0x260] sm:$0xf]  ;;  %v13839_v52 = vld [vmem:[#allocation12 + $0x26c] sm:$0xf0] }
 0x4be   :  { %5816 = vmatpush.bf16.msrb.mxu2 %v11465_v29  ;;  %5830 = vmatpush.bf16.msrb.mxu3 %v11593_v30  ;;  %v11709_v29 = vor.u32 %v13779_v28, %v11708_v4  ;;  %v11678_v4 = vld [vmem:[#allocation12 + $0x50] sm:$0xf0]  ;;  %v13817_v28 = vld [vmem:[#allocation12 + $0x1c4] sm:$0xf]  ;;  %v12108_v14 = vld [vmem:[#allocation12 + $0x3a0] sm:$0xf] }
 0x4c0   :  { %5790 = vmatpush.bf16.msrb.mxu0 %v11177_v33  ;;  %5804 = vmatpush.bf16.msrb.mxu1 %v11305_v34  ;;  %v13767_v33 = vld [vmem:[#allocation12 + $0x2c] sm:$0xf0] }
 0x4c1   :  { %v11661_v34 = vor.u32 %v13767_v33, %v11660_v32  ;;  %v11662_v32 = vld [vmem:[#allocation12 + $0x30] sm:$0xf0]  ;;  %v13813_v33 = vld [vmem:[#allocation12 + $0x1a4] sm:$0xf] }
 0x4c2   :  { %5817 = vmatpush.bf16.msrb.mxu2 %v11449_v43  ;;  %5831 = vmatpush.bf16.msrb.mxu3 %v11577_v40  ;;  %v11758_v43 = vld [vmem:[#allocation12 + $0xf0] sm:$0xf0]  ;;  %v11837_v40 = vor.u32 %v13811_v39, %v11836_v36  ;;  %v11916_v36 = vld [vmem:[#allocation12 + $0x220] sm:$0xf] }
 0x4c3   :  { %v11761_v44 = vor.u32 %v13789_v15, %v11758_v43  ;;  %v13761_v15 = vld [vmem:[#allocation12 + $0x4] sm:$0xf]  ;;  %v11646_v43 = vld [vmem:[#allocation12 + $0x10] sm:$0xf0] }
 0x4c4   :  { %5791 = vmatpush.bf16.msrb.mxu0 %v11161_v47  ;;  %5805 = vmatpush.bf16.msrb.mxu1 %v11289_v48  ;;  %v11821_v47 = vor.u32 %v13807_v38, %v11820_v45  ;;  %v13855_v48 = vld [vmem:[#allocation12 + $0x2ec] sm:$0xf0]  ;;  %v11838_v45 = vld [vmem:[#allocation12 + $0x190] sm:$0xf0] }
 0x4c5   :  { %v12013_v53 = vor.u32 %v13855_v48, %v12012_v46  ;;  %v13827_v48 = vld [vmem:[#allocation12 + $0x20c] sm:$0xf0] }
 0x4c6   :  { %5818 = vmatpush.bf16.msrb.mxu2 %v11433_v56  ;;  %5832 = vmatpush.bf16.msrb.mxu3 %v11561_v58  ;;  %v11996_v56 = vld [vmem:[#allocation12 + $0x2c0] sm:$0xf]  ;;  %v11805_v58 = vor.u32 %v13803_v55, %v11804_v54 }
 0x4c7   :  { %v11997_v60 = vor.u32 %v13851_v62, %v11996_v56  ;;  %v11822_v56 = vld [vmem:[#allocation12 + $0x170] sm:$0xf0] }
 0x4c8   :  { %5792 = vmatpush.bf16.msrb.mxu0 %v11145_v17  ;;  %5806 = vmatpush.bf16.msrb.mxu1 %v11273_v3  ;;  %v13799_v17 = vld [vmem:[#allocation12 + $0x12c] sm:$0xf0]  ;;  %v11980_v3 = vld [vmem:[#allocation12 + $0x2a0] sm:$0xf]  ;;  %v12014_v62 = vld [vmem:[#allocation12 + $0x2f0] sm:$0xf0] }
 0x4c9   :  { %v11789_v6 = vor.u32 %v13799_v17, %v11788_v2  ;;  %v13883_v2 = vld [vmem:[#allocation12 + $0x3cc] sm:$0xf0] }
 0x4ca   :  { %5819 = vmatpush.bf16.msrb.mxu2 %v11417_v10  ;;  %5833 = vmatpush.bf16.msrb.mxu3 %v11545_v12 }
 0x4cb   :  { %5793 = vmatmul.bf16.vlgmr.msrb.gmra.mxu0 %v14773_v25  ;;  %5807 = vmatmul.bf16.vlgmr.msrb.gmra.mxu1 %v14775_v59  ;;  %v11692_v25 = vld [vmem:[#allocation12 + $0x60] sm:$0xf]  ;;  %v13775_v59 = vld [vmem:[#allocation12 + $0x6c] sm:$0xf0] }
 0x4cc   :  { %6639 = vmatpush.bf16.msra.mxu0 %v11757_v7  ;;  %6653 = vmatpush.bf16.msra.mxu1 %v11885_v8  ;;  %v11693_v30 = vor.u32 %v13775_v59, %v11692_v25  ;;  %v13847_v7 = vld [vmem:[#allocation12 + $0x2ac] sm:$0xf0]  ;;  %v11710_v8 = vld [vmem:[#allocation12 + $0x90] sm:$0xf0] }
 0x4cd   :  { %v11981_v10 = vor.u32 %v13847_v7, %v11980_v3  ;;  %v11713_v12 = vor.u32 %v13777_v51, %v11710_v8  ;;  %v11870_v25 = vld [vmem:[#allocation12 + $0x1d0] sm:$0xf0]  ;;  %v13801_v3 = vld [vmem:[#allocation12 + $0x144] sm:$0xf]  ;;  %v4969_v51 = vperm.slane %v14800_v24, 0 }
 0x4ce   :  { %5820 = vmatpush.bf16.msrb.mxu2 %v11401_v20  ;;  %5834 = vmatpush.bf16.msrb.mxu3 %v11529_v21  ;;  %v13821_v20 = vld [vmem:[#allocation12 + $0x1e4] sm:$0xf]  ;;  %v11886_v21 = vld [vmem:[#allocation12 + $0x1f0] sm:$0xf0]  ;;  %v11873_v59 = vor.u32 %v13817_v28, %v11870_v25 }
 0x4cf   :  { %v11889_v42 = vor.u32 %v13821_v20, %v11886_v21  ;;  %v13849_v7 = vld [vmem:[#allocation12 + $0x2c4] sm:$0xf]  ;;  %v11982_v21 = vld [vmem:[#allocation12 + $0x2b0] sm:$0xf0] }
 0x4d0   :  { %6640 = vmatpush.bf16.msra.mxu0 %v11741_v19  ;;  %6654 = vmatpush.bf16.msra.mxu1 %v11869_v23  ;;  %v11965_v19 = vor.u32 %v13843_v18, %v11964_v63  ;;  %v11694_v23 = vld [vmem:[#allocation12 + $0x70] sm:$0xf0]  ;;  %v13879_v63 = vld [vmem:[#allocation12 + $0x3ac] sm:$0xf0]  ;;  %v13797_v18 = vld [vmem:[#allocation12 + $0x124] sm:$0xf] }
 0x4d1   :  { %5821 = vmatmul.bf16.vlgmr.msrb.gmra.mxu2 %v14779_v37  ;;  %5835 = vmatmul.bf16.vlgmr.msrb.gmra.mxu3 %v14781_v26  ;;  %v13763_v37 = vld [vmem:[#allocation12 + $0xc] sm:$0xf0]  ;;  %v11697_v9 = vor.u32 %v13773_v1, %v11694_v23  ;;  %v11790_v1 = vld [vmem:[#allocation12 + $0x130] sm:$0xf0]  ;;  %v13793_v28 = vld [vmem:[#allocation12 + $0x104] sm:$0xf] }
 0x4d2   :  { %v11645_v26 = vor.u32 %v13763_v37, %v11644_v35  ;;  %6667 = vmatpush.bf16.msra.mxu2 %v12013_v53  ;;  %v11854_v35 = vld [vmem:[#allocation12 + $0x1b0] sm:$0xf0]  ;;  %v13887_v53 = vld [vmem:[#allocation12 + $0x3ec] sm:$0xf0]  ;;  %v11793_v20 = vor.u32 %v13797_v18, %v11790_v1  ;;  %v13841_v25 = vld [vmem:[#allocation12 + $0x284] sm:$0xf] }
 0x4d3   :  { %v11857_v37 = vor.u32 %v13813_v33, %v11854_v35  ;;  %v12141_v55 = vor.u32 %v13887_v53, %v12140_v50  ;;  %v12076_v33 = vld [vmem:[#allocation12 + $0x360] sm:$0xf]  ;;  %v4970_v50 = vperm.slane %v14800_v24, 1  ;;  %v13825_v1 = vld [vmem:[#allocation12 + $0x204] sm:$0xf] }
 0x4d4   :  { %6641 = vmatpush.bf16.msra.mxu0 %v11725_v22  ;;  %6655 = vmatpush.bf16.msra.mxu1 %v11853_v5  ;;  %v11949_v22 = vor.u32 %v13839_v52, %v11948_v27  ;;  %v13769_v5 = vld [vmem:[#allocation12 + $0x44] sm:$0xf]  ;;  %v12092_v27 = vld [vmem:[#allocation12 + $0x380] sm:$0xf]  ;;  %v13875_v52 = vld [vmem:[#allocation12 + $0x38c] sm:$0xf0] }
 0x4d5   :  { %6681 = vmatpush.bf16.msra.mxu3 %v12141_v55 }
 0x4d6   :  { %6668 = vmatpush.bf16.msra.mxu2 %v11997_v60 }
 0x4d8   :  { %6642 = vmatpush.bf16.msra.mxu0 %v11709_v29  ;;  %6656 = vmatpush.bf16.msra.mxu1 %v11837_v40  ;;  %v11681_v29 = vor.u32 %v13769_v5, %v11678_v4  ;;  %v13809_v40 = vld [vmem:[#allocation12 + $0x184] sm:$0xf]  ;;  %v12093_v4 = vor.u32 %v13875_v52, %v12092_v27  ;;  %v12142_v27 = vld [vmem:[#allocation12 + $0x3f0] sm:$0xf0] }
 0x4d9   :  { %v11841_v38 = vor.u32 %v13809_v40, %v11838_v45  ;;  %v12060_v40 = vld [vmem:[#allocation12 + $0x340] sm:$0xf] }
 0x4da   :  { %6669 = vmatpush.bf16.msra.mxu2 %v11981_v10  ;;  %v11998_v10 = vld [vmem:[#allocation12 + $0x2d0] sm:$0xf0] }
 0x4dc   :  { %6643 = vmatpush.bf16.msra.mxu0 %v11693_v30  ;;  %6657 = vmatpush.bf16.msra.mxu1 %v11821_v47  ;;  %v11932_v30 = vld [vmem:[#allocation12 + $0x240] sm:$0xf] }
 0x4dd   :  { %v11933_v49 = vor.u32 %v13835_v31, %v11932_v30  ;;  %v11900_v47 = vld [vmem:[#allocation12 + $0x200] sm:$0xf]  ;;  %v11966_v31 = vld [vmem:[#allocation12 + $0x290] sm:$0xf0] }
 0x4de   :  { %6670 = vmatpush.bf16.msra.mxu2 %v11965_v19  ;;  %v11901_v11 = vor.u32 %v13827_v48, %v11900_v47  ;;  %v13845_v19 = vld [vmem:[#allocation12 + $0x2a4] sm:$0xf]  ;;  %v11934_v48 = vld [vmem:[#allocation12 + $0x250] sm:$0xf0] }
 0x4df   :  { %v13833_v47 = vld [vmem:[#allocation12 + $0x244] sm:$0xf] }
 0x4e0   :  { %6644 = vmatpush.bf16.msra.mxu0 %v11677_v41  ;;  %6658 = vmatpush.bf16.msra.mxu1 %v11805_v58  ;;  %v13765_v41 = vld [vmem:[#allocation12 + $0x24] sm:$0xf] }
 0x4e1   :  { %v13853_v58 = vld [vmem:[#allocation12 + $0x2e4] sm:$0xf] }
 0x4e2   :  { %6671 = vmatpush.bf16.msra.mxu2 %v11949_v22  ;;  %v12017_v60 = vor.u32 %v13853_v58, %v12014_v62  ;;  %v13863_v58 = vld [vmem:[#allocation12 + $0x32c] sm:$0xf0] }
 0x4e4   :  { %6645 = vmatpush.bf16.msra.mxu0 %v11661_v34  ;;  %6659 = vmatpush.bf16.msra.mxu1 %v11789_v6  ;;  %v11665_v34 = vor.u32 %v13765_v41, %v11662_v32  ;;  %v11806_v6 = vld [vmem:[#allocation12 + $0x150] sm:$0xf0] }
 0x4e5   :  { %v11809_v8 = vor.u32 %v13801_v3, %v11806_v6  ;;  %v11764_v3 = vld [vmem:[#allocation12 + $0xe8] sm:$0xf]  ;;  %v13792_v6 = vld [vmem:[#allocation12 + $0xf4] sm:$0xf0] }
 0x4e6   :  { %6672 = vmatpush.bf16.msra.mxu2 %v11933_v49  ;;  %v11969_v49 = vor.u32 %v13841_v25, %v11966_v31  ;;  %v13784_v25 = vld [vmem:[#allocation12 + $0xb4] sm:$0xf0] }
 0x4e8   :  { %6646 = vmatpush.bf16.msra.mxu0 %v11645_v26  ;;  %6660 = vmatpush.bf16.msra.mxu1 %v11773_v16  ;;  %v13831_v26 = vld [vmem:[#allocation12 + $0x22c] sm:$0xf0]  ;;  %v12109_v16 = vor.u32 %v13879_v63, %v12108_v14  ;;  %v11765_v63 = vor.u32 %v13792_v6, %v11764_v3  ;;  %v11876_v3 = vld [vmem:[#allocation12 + $0x1c8] sm:$0xf] }
 0x4e9   :  { %v11917_v39 = vor.u32 %v13831_v26, %v11916_v36  ;;  %v13837_v36 = vld [vmem:[#allocation12 + $0x264] sm:$0xf]  ;;  %v11950_v26 = vld [vmem:[#allocation12 + $0x270] sm:$0xf0] }
 0x4eb   :  { %6673 = vmatpush.bf16.msra.mxu2 %v11917_v39  ;;  %v11953_v39 = vor.u32 %v13837_v36, %v11950_v26  ;;  %v13780_v26 = vld [vmem:[#allocation12 + $0x94] sm:$0xf0] }
 0x4ec   :  { %6695 = vmatpush.bf16.msrb.mxu0 %v11761_v44  ;;  %6709 = vmatpush.bf16.msrb.mxu1 %v11889_v42  ;;  %v11649_v44 = vor.u32 %v13761_v15, %v11646_v43 }
 0x4ef   :  { %6674 = vmatpush.bf16.msra.mxu2 %v11901_v11 }
 0x4f0   :  { %6696 = vmatpush.bf16.msrb.mxu0 %v11745_v57  ;;  %6710 = vmatpush.bf16.msrb.mxu1 %v11873_v59  ;;  %v13805_v57 = vld [vmem:[#allocation12 + $0x164] sm:$0xf] }
 0x4f1   :  { %v11825_v0 = vor.u32 %v13805_v57, %v11822_v56  ;;  %v11937_v57 = vor.u32 %v13833_v47, %v11934_v48  ;;  %v12044_v56 = vld [vmem:[#allocation12 + $0x320] sm:$0xf]  ;;  %v13776_v47 = vld [vmem:[#allocation12 + $0x74] sm:$0xf0]  ;;  %v11892_v48 = vld [vmem:[#allocation12 + $0x1e8] sm:$0xf] }
 0x4f3   :  { %6723 = vmatpush.bf16.msrb.mxu2 %v12017_v60  ;;  %v13829_v60 = vld [vmem:[#allocation12 + $0x224] sm:$0xf] }
 0x4f4   :  { %6697 = vmatpush.bf16.msrb.mxu0 %v11729_v61  ;;  %6711 = vmatpush.bf16.msrb.mxu1 %v11857_v37  ;;  %v12124_v61 = vld [vmem:[#allocation12 + $0x3c0] sm:$0xf] }
 0x4f5   :  { %v12125_v17 = vor.u32 %v13883_v2, %v12124_v61  ;;  %v11918_v61 = vld [vmem:[#allocation12 + $0x230] sm:$0xf0] }
 0x4f7   :  { %6682 = vmatpush.bf16.msra.mxu3 %v12125_v17 }
 0x4f8   :  { %6698 = vmatpush.bf16.msrb.mxu0 %v11713_v12  ;;  %6712 = vmatpush.bf16.msrb.mxu1 %v11841_v38  ;;  %v12001_v12 = vor.u32 %v13849_v7, %v11998_v10  ;;  %v11921_v7 = vor.u32 %v13829_v60, %v11918_v61  ;;  %v12028_v10 = vld [vmem:[#allocation12 + $0x300] sm:$0xf] }
 0x4fa   :  { %6724 = vmatpush.bf16.msrb.mxu2 %v12001_v12  ;;  %v13859_v12 = vld [vmem:[#allocation12 + $0x30c] sm:$0xf0] }
 0x4fb   :  { %6683 = vmatpush.bf16.msra.mxu3 %v12109_v16  ;;  %v11748_v16 = vld [vmem:[#allocation12 + $0xc8] sm:$0xf]  ;;  %v12029_v18 = vor.u32 %v13859_v12, %v12028_v10  ;;  %v13869_v10 = vld [vmem:[#allocation12 + $0x364] sm:$0xf]  ;;  %v12078_v12 = vld [vmem:[#allocation12 + $0x370] sm:$0xf0] }
 0x4fc   :  { %6699 = vmatpush.bf16.msrb.mxu0 %v11697_v9  ;;  %6713 = vmatpush.bf16.msrb.mxu1 %v11825_v0  ;;  %v11985_v9 = vor.u32 %v13845_v19, %v11982_v21  ;;  %v12045_v0 = vor.u32 %v13863_v58, %v12044_v56  ;;  %v11902_v19 = vld [vmem:[#allocation12 + $0x210] sm:$0xf0]  ;;  %v13788_v21 = vld [vmem:[#allocation12 + $0xd4] sm:$0xf0] }
 0x4fe   :  { %6725 = vmatpush.bf16.msrb.mxu2 %v11985_v9  ;;  %v11905_v9 = vor.u32 %v13825_v1, %v11902_v19  ;;  %v11668_v19 = vld [vmem:[#allocation12 + $0x28] sm:$0xf] }
 0x4ff   :  { %6684 = vmatpush.bf16.msra.mxu3 %v12093_v4 }
 0x500   :  { %6700 = vmatpush.bf16.msrb.mxu0 %v11681_v29  ;;  %6714 = vmatpush.bf16.msrb.mxu1 %v11809_v8  ;;  %v11774_v29 = vld [vmem:[#allocation12 + $0x110] sm:$0xf0] }
 0x501   :  { %v11777_v30 = vor.u32 %v13793_v28, %v11774_v29  ;;  %v11749_v28 = vor.u32 %v13788_v21, %v11748_v16  ;;  %v11732_v29 = vld [vmem:[#allocation12 + $0xa8] sm:$0xf] }
 0x502   :  { %6726 = vmatpush.bf16.msrb.mxu2 %v11969_v49  ;;  %v11860_v21 = vld [vmem:[#allocation12 + $0x1a8] sm:$0xf] }
 0x504   :  { %6701 = vmatpush.bf16.msrb.mxu0 %v11665_v34  ;;  %6715 = vmatpush.bf16.msrb.mxu1 %v11793_v20  ;;  %v13871_v34 = vld [vmem:[#allocation12 + $0x36c] sm:$0xf0] }
 0x505   :  { %v12077_v37 = vor.u32 %v13871_v34, %v12076_v33 }
 0x506   :  { %6727 = vmatpush.bf16.msrb.mxu2 %v11953_v39  ;;  %v13877_v39 = vld [vmem:[#allocation12 + $0x3a4] sm:$0xf] }
 0x507   :  { %v5626_v46 = vpop.f32.mrf.mxu0  ;;  %v5640_v54 = vpop.f32.mrf.mxu1  ;;  %6685 = vmatpush.bf16.msra.mxu3 %v12077_v37  ;;  %v11716_v37 = vld [vmem:[#allocation12 + $0x88] sm:$0xf] }
 0x508   :  { %6702 = vmatpush.bf16.msrb.mxu0 %v11649_v44  ;;  %v5627_v23 = vadd.f32 %v5626_v46, %v4969_v51  ;;  %6716 = vmatpush.bf16.msrb.mxu1 %v11777_v30  ;;  %v13867_v44 = vld [vmem:[#allocation12 + $0x34c] sm:$0xf0]  ;;  %v12126_v30 = vld [vmem:[#allocation12 + $0x3d0] sm:$0xf0] }
 0x509   :  { %v12061_v46 = vor.u32 %v13867_v44, %v12060_v40 }
 0x50a   :  { %v5641_v59 = vadd.f32 %v5640_v54, %v5627_v23  ;;  %6728 = vmatpush.bf16.msrb.mxu2 %v11937_v57  ;;  %v13873_v57 = vld [vmem:[#allocation12 + $0x384] sm:$0xf] }
 0x50b   :  { %6686 = vmatpush.bf16.msra.mxu3 %v12061_v46  ;;  %v11717_v46 = vor.u32 %v13780_v26, %v11716_v37  ;;  %v11828_v26 = vld [vmem:[#allocation12 + $0x168] sm:$0xf] }
 0x50e   :  { %6729 = vmatpush.bf16.msrb.mxu2 %v11921_v7 }
 0x50f   :  { %v5628_v13 = vpop.f32.mrf.mxu0  ;;  %v5642_v42 = vpop.f32.mrf.mxu1  ;;  %6687 = vmatpush.bf16.msra.mxu3 %v12045_v0 }
 0x510   :  { %v5629_v41 = vadd.f32 %v5628_v13, %v4969_v51 }
 0x512   :  { %v5643_v15 = vadd.f32 %v5642_v42, %v5629_v41  ;;  %v13885_v42 = vld [vmem:[#allocation12 + $0x3e4] sm:$0xf]  ;;  %6730 = vmatpush.bf16.msrb.mxu2 %v11905_v9  ;;  %v13816_v9 = vld [vmem:[#allocation12 + $0x1b4] sm:$0xf0] }
 0x513   :  { %v12145_v52 = vor.u32 %v13885_v42, %v12142_v27  ;;  %6688 = vmatpush.bf16.msra.mxu3 %v12029_v18  ;;  %v13865_v42 = vld [vmem:[#allocation12 + $0x344] sm:$0xf]  ;;  %v12062_v27 = vld [vmem:[#allocation12 + $0x350] sm:$0xf0] }
 0x514   :  { %v5654_v22 = vpop.f32.mrf.mxu2  ;;  %v5668_v5 = vpop.f32.mrf.mxu3 }
 0x515   :  { %v5655_v32 = vadd.f32 %v5654_v22, %v5641_v59  ;;  %v13881_v59 = vld [vmem:[#allocation12 + $0x3c4] sm:$0xf] }
 0x516   :  { %v12129_v49 = vor.u32 %v13881_v59, %v12126_v30  ;;  %v13764_v59 = vld [vmem:[#allocation12 + $0x14] sm:$0xf0]  ;;  %v11844_v30 = vld [vmem:[#allocation12 + $0x188] sm:$0xf] }
 0x517   :  { %v5669_v43 = vadd.f32 %v5668_v5, %v5655_v32  ;;  %6737 = vmatpush.bf16.msrb.mxu3 %v12145_v52  ;;  %v12065_v52 = vor.u32 %v13865_v42, %v12062_v27  ;;  %v11780_v42 = vld [vmem:[#allocation12 + $0x108] sm:$0xf]  ;;  %v13796_v27 = vld [vmem:[#allocation12 + $0x114] sm:$0xf0] }
 0x518   :  { %v5682_v35 = vpop.f32.mrf.mxu0  ;;  %v5696_v11 = vpop.f32.mrf.mxu1 }
 0x519   :  { %v5841_v54 = vmul.f32 0.01, %v5669_v43  ;;  %v5683_v2 = vadd.f32 %v5682_v35, %v4970_v50  ;;  %v11733_v35 = vor.u32 %v13784_v25, %v11732_v29  ;;  %v11861_v29 = vor.u32 %v13816_v9, %v11860_v21  ;;  %v11652_v25 = vld [vmem:[#allocation12 + $0x8] sm:$0xf] }
 0x51b   :  { %v5849_v51 = vmax.f32 %v5669_v43, %v5841_v54  ;;  %v5697_v23 = vadd.f32 %v5696_v11, %v5683_v2  ;;  %6738 = vmatpush.bf16.msrb.mxu3 %v12129_v49  ;;  %v4971_v43 = vperm.slane %v14800_v24, 2  ;;  %v12094_v54 = vld [vmem:[#allocation12 + $0x390] sm:$0xf0]  ;;  %v11684_v2 = vld [vmem:[#allocation12 + $0x48] sm:$0xf] }
 0x51c   :  { %v5656_v45 = vpop.f32.mrf.mxu2  ;;  %v5670_v38 = vpop.f32.mrf.mxu3  ;;  %v12097_v56 = vor.u32 %v13873_v57, %v12094_v54  ;;  %v13812_v49 = vld [vmem:[#allocation12 + $0x194] sm:$0xf0] }
 0x51d   :  { %v5657_v53 = vadd.f32 %v5656_v45, %v5643_v15  ;;  %v12110_v15 = vld [vmem:[#allocation12 + $0x3b0] sm:$0xf0] }
 0x51e   :  { %v12113_v40 = vor.u32 %v13877_v39, %v12110_v15 }
 0x51f   :  { %v5671_v55 = vadd.f32 %v5670_v38, %v5657_v53  ;;  %v11700_v38 = vld [vmem:[#allocation12 + $0x68] sm:$0xf] }
 0x520   :  { %v5684_v62 = vpop.f32.mrf.mxu0  ;;  %v5698_v5 = vpop.f32.mrf.mxu1  ;;  %6739 = vmatpush.bf16.msrb.mxu3 %v12113_v40  ;;  %v11701_v60 = vor.u32 %v13776_v47, %v11700_v38  ;;  %v11845_v40 = vor.u32 %v13812_v49, %v11844_v30  ;;  %v13857_v47 = vld [vmem:[#allocation12 + $0x304] sm:$0xf]  ;;  %v11781_v30 = vor.u32 %v13796_v27, %v11780_v42  ;;  %v13854_v42 = vld [vmem:[#allocation12 + $0x2ec] sm:$0xf]  ;;  %v12022_v27 = vld [vmem:[#allocation12 + $0x2f8] sm:$0xf0] }
 0x521   :  { %v5845_v17 = vmul.f32 0.01, %v5671_v55  ;;  %v5685_v22 = vadd.f32 %v5684_v62, %v4970_v50  ;;  %v13824_v50 = vld [vmem:[#allocation12 + $0x1f4] sm:$0xf0] }
 0x522   :  { %v11893_v61 = vor.u32 %v13824_v50, %v11892_v48  ;;  %v12030_v48 = vld [vmem:[#allocation12 + $0x310] sm:$0xf0] }
 0x523   :  { %v5853_v8 = vmax.f32 %v5671_v55, %v5845_v17  ;;  %v5699_v41 = vadd.f32 %v5698_v5, %v5685_v22  ;;  %v13772_v17 = vld [vmem:[#allocation12 + $0x54] sm:$0xf0]  ;;  %v12033_v57 = vor.u32 %v13857_v47, %v12030_v48  ;;  %v13766_v48 = vld [vmem:[#allocation12 + $0x2c] sm:$0xf] }
 0x524   :  { %v5710_v13 = vpop.f32.mrf.mxu2  ;;  %v5724_v14 = vpop.f32.mrf.mxu3  ;;  %6740 = vmatpush.bf16.msrb.mxu3 %v12097_v56  ;;  %v13836_v47 = vld [vmem:[#allocation12 + $0x254] sm:$0xf0] }
 0x525   :  { %v14804_v20 = vpack.c.bf16 %v5853_v8, %v5849_v51  ;;  %v5711_v4 = vadd.f32 %v5710_v13, %v5697_v23  ;;  %v13820_v8 = vld [vmem:[#allocation12 + $0x1d4] sm:$0xf0] }
 0x526   :  { %v11877_v1 = vor.u32 %v13820_v8, %v11876_v3  ;;  %v13768_v23 = vld [vmem:[#allocation12 + $0x34] sm:$0xf0]  ;;  %v4972_v8 = vperm.slane %v14800_v24, 3 }
 0x527   :  { %6647 = vmatmul.bf16.vlgmr.msra.gmra.mxu0 %v14804_v20  ;;  %v5725_v32 = vadd.f32 %v5724_v14, %v5711_v4  ;;  %v12081_v14 = vor.u32 %v13869_v10, %v12078_v12  ;;  %v11669_v5 = vor.u32 %v13768_v23, %v11668_v19  ;;  %v13852_v3 = vld [vmem:[#allocation12 + $0x2d4] sm:$0xf0]  ;;  %v11718_v19 = vld [vmem:[#allocation12 + $0x98] sm:$0xf0] }
 0x528   :  { %6751 = vmatpush.bf16.msra.mxu0 %v11765_v63  ;;  %v5738_v31 = vpop.f32.mrf.mxu0  ;;  %v5752_v11 = vpop.f32.mrf.mxu1  ;;  %v11685_v63 = vor.u32 %v13772_v17, %v11684_v2 }
 0x529   :  { %v5842_v44 = vmul.f32 0.01, %v5725_v32  ;;  %v5739_v55 = vadd.f32 %v5738_v31, %v4971_v43  ;;  %6741 = vmatpush.bf16.msrb.mxu3 %v12081_v14  ;;  %v11796_v14 = vld [vmem:[#allocation12 + $0x128] sm:$0xf] }
 0x52b   :  { %v5850_v58 = vmax.f32 %v5725_v32, %v5842_v44  ;;  %v5753_v13 = vadd.f32 %v5752_v11, %v5739_v55  ;;  %v12046_v32 = vld [vmem:[#allocation12 + $0x330] sm:$0xf0]  ;;  %v13808_v44 = vld [vmem:[#allocation12 + $0x174] sm:$0xf0]  ;;  %v13786_v11 = vld [vmem:[#allocation12 + $0xcc] sm:$0xf] }
 0x52c   :  { %6752 = vmatpush.bf16.msra.mxu0 %v11749_v28  ;;  %v5712_v33 = vpop.f32.mrf.mxu2  ;;  %v5726_v34 = vpop.f32.mrf.mxu3  ;;  %v11829_v56 = vor.u32 %v13808_v44, %v11828_v26  ;;  %v11686_v26 = vld [vmem:[#allocation12 + $0x58] sm:$0xf0] }
 0x52d   :  { %v5713_v36 = vadd.f32 %v5712_v33, %v5699_v41  ;;  %6742 = vmatpush.bf16.msrb.mxu3 %v12065_v52  ;;  %v13861_v41 = vld [vmem:[#allocation12 + $0x324] sm:$0xf]  ;;  %v11972_v52 = vld [vmem:[#allocation12 + $0x288] sm:$0xf] }
 0x52e   :  { %v12049_v37 = vor.u32 %v13861_v41, %v12046_v32 }
 0x52f   :  { %v5727_v45 = vadd.f32 %v5726_v34, %v5713_v36  ;;  %v13790_v34 = vld [vmem:[#allocation12 + $0xec] sm:$0xf] }
 0x530   :  { %6753 = vmatpush.bf16.msra.mxu0 %v11733_v35  ;;  %v5740_v0 = vpop.f32.mrf.mxu0  ;;  %v5754_v22 = vpop.f32.mrf.mxu1  ;;  %v11766_v35 = vld [vmem:[#allocation12 + $0xf8] sm:$0xf0] }
 0x531   :  { %v5846_v53 = vmul.f32 0.01, %v5727_v45  ;;  %v5741_v16 = vadd.f32 %v5740_v0, %v4971_v43  ;;  %v11653_v43 = vor.u32 %v13764_v59, %v11652_v25  ;;  %v11769_v38 = vor.u32 %v13790_v34, %v11766_v35  ;;  %6743 = vmatpush.bf16.msrb.mxu3 %v12049_v37  ;;  %v11812_v0 = vld [vmem:[#allocation12 + $0x148] sm:$0xf]  ;;  %v11894_v25 = vld [vmem:[#allocation12 + $0x1f8] sm:$0xf0] }
 0x532   :  { %v13840_v37 = vld [vmem:[#allocation12 + $0x274] sm:$0xf0] }
 0x533   :  { %v5854_v62 = vmax.f32 %v5727_v45, %v5846_v53  ;;  %v5755_v4 = vadd.f32 %v5754_v22, %v5741_v16  ;;  %v12020_v45 = vld [vmem:[#allocation12 + $0x2e8] sm:$0xf]  ;;  %v11750_v53 = vld [vmem:[#allocation12 + $0xd8] sm:$0xf0] }
 0x534   :  { %6754 = vmatpush.bf16.msra.mxu0 %v11717_v46  ;;  %v5766_v7 = vpop.f32.mrf.mxu2  ;;  %v5780_v51 = vpop.f32.mrf.mxu3  ;;  %v13856_v46 = vld [vmem:[#allocation12 + $0x2f4] sm:$0xf0]  ;;  %v11988_v16 = vld [vmem:[#allocation12 + $0x2a8] sm:$0xf] }
 0x535   :  { %v14808_v6 = vpack.c.bf16 %v5854_v62, %v5850_v58  ;;  %v5767_v18 = vadd.f32 %v5766_v7, %v5753_v13  ;;  %v12021_v58 = vor.u32 %v13856_v46, %v12020_v45  ;;  %v11753_v62 = vor.u32 %v13786_v11, %v11750_v53  ;;  %6744 = vmatpush.bf16.msrb.mxu3 %v12033_v57  ;;  %v13782_v7 = vld [vmem:[#allocation12 + $0xac] sm:$0xf]  ;;  %v11862_v57 = vld [vmem:[#allocation12 + $0x1b8] sm:$0xf0] }
 0x536   :  { %v13814_v53 = vld [vmem:[#allocation12 + $0x1ac] sm:$0xf] }
 0x537   :  { %6661 = vmatmul.bf16.vlgmr.msra.gmra.mxu1 %v14808_v6  ;;  %6703 = vmatmul.bf16.vlgmr.msrb.gmra.mxu0 %v14804_v20  ;;  %v5781_v28 = vadd.f32 %v5780_v51, %v5767_v18  ;;  %v11734_v51 = vld [vmem:[#allocation12 + $0xb8] sm:$0xf0]  ;;  %v13848_v18 = vld [vmem:[#allocation12 + $0x2b4] sm:$0xf0] }
 0x538   :  { %6755 = vmatpush.bf16.msra.mxu0 %v11701_v60  ;;  %6765 = vmatpush.bf16.msra.mxu1 %v11893_v61  ;;  %v13804_v60 = vld [vmem:[#allocation12 + $0x154] sm:$0xf0]  ;;  %v12004_v61 = vld [vmem:[#allocation12 + $0x2c8] sm:$0xf]  ;;  %v11737_v13 = vor.u32 %v13782_v7, %v11734_v51  ;;  %v11989_v24 = vor.u32 %v13848_v18, %v11988_v16  ;;  %v11654_v7 = vld [vmem:[#allocation12 + $0x18] sm:$0xf0] }
 0x539   :  { %v5843_v39 = vmul.f32 0.01, %v5781_v28  ;;  %v11813_v10 = vor.u32 %v13804_v60, %v11812_v0  ;;  %v12005_v12 = vor.u32 %v13852_v3, %v12004_v61  ;;  %v11924_v0 = vld [vmem:[#allocation12 + $0x228] sm:$0xf]  ;;  %v11865_v61 = vor.u32 %v13814_v53, %v11862_v57  ;;  %v13762_v3 = vld [vmem:[#allocation12 + $0xc] sm:$0xf] }
 0x53a   :  { %v11908_v16 = vld [vmem:[#allocation12 + $0x208] sm:$0xf]  ;;  %v13828_v18 = vld [vmem:[#allocation12 + $0x214] sm:$0xf0] }
 0x53b   :  { %v5851_v54 = vmax.f32 %v5781_v28, %v5843_v39  ;;  %v11702_v28 = vld [vmem:[#allocation12 + $0x78] sm:$0xf0]  ;;  %v13818_v39 = vld [vmem:[#allocation12 + $0x1cc] sm:$0xf] }
 0x53c   :  { %6756 = vmatpush.bf16.msra.mxu0 %v11685_v63  ;;  %6766 = vmatpush.bf16.msra.mxu1 %v11877_v1  ;;  %v5768_v31 = vpop.f32.mrf.mxu2  ;;  %v5782_v36 = vpop.f32.mrf.mxu3  ;;  %v13800_v63 = vld [vmem:[#allocation12 + $0x134] sm:$0xf0]  ;;  %v13778_v1 = vld [vmem:[#allocation12 + $0x8c] sm:$0xf] }
 0x53d   :  { %v5769_v33 = vadd.f32 %v5768_v31, %v5755_v4  ;;  %v11797_v23 = vor.u32 %v13800_v63, %v11796_v14  ;;  %v11721_v9 = vor.u32 %v13778_v1, %v11718_v19  ;;  %v13774_v4 = vld [vmem:[#allocation12 + $0x6c] sm:$0xf]  ;;  %v11657_v63 = vor.u32 %v13762_v3, %v11654_v7  ;;  %v12148_v1 = vld [vmem:[#allocation12 + $0x3e8] sm:$0xf]  ;;  %v11942_v3 = vld [vmem:[#allocation12 + $0x258] sm:$0xf0] }
 0x53e   :  { %v11705_v32 = vor.u32 %v13774_v4, %v11702_v28 }
 0x53f   :  { %v5783_v15 = vadd.f32 %v5782_v36, %v5769_v33  ;;  %v11956_v33 = vld [vmem:[#allocation12 + $0x268] sm:$0xf]  ;;  %v13770_v36 = vld [vmem:[#allocation12 + $0x4c] sm:$0xf] }
 0x540   :  { %6757 = vmatpush.bf16.msra.mxu0 %v11669_v5  ;;  %6767 = vmatpush.bf16.msra.mxu1 %v11861_v29  ;;  %v13844_v5 = vld [vmem:[#allocation12 + $0x294] sm:$0xf0]  ;;  %v13822_v29 = vld [vmem:[#allocation12 + $0x1ec] sm:$0xf]  ;;  %v11957_v44 = vor.u32 %v13840_v37, %v11956_v33  ;;  %v11689_v45 = vor.u32 %v13770_v36, %v11686_v26  ;;  %v12116_v37 = vld [vmem:[#allocation12 + $0x3a8] sm:$0xf] }
 0x541   :  { %v5847_v50 = vmul.f32 0.01, %v5783_v15  ;;  %v11973_v41 = vor.u32 %v13844_v5, %v11972_v52  ;;  %v11897_v35 = vor.u32 %v13822_v29, %v11894_v25  ;;  %v11909_v5 = vor.u32 %v13828_v18, %v11908_v16  ;;  %v13880_v36 = vld [vmem:[#allocation12 + $0x3b4] sm:$0xf0]  ;;  %v13798_v26 = vld [vmem:[#allocation12 + $0x12c] sm:$0xf] }
 0x542   :  { %v12025_v25 = vor.u32 %v13854_v42, %v12022_v27  ;;  %v12036_v16 = vld [vmem:[#allocation12 + $0x308] sm:$0xf]  ;;  %v13860_v18 = vld [vmem:[#allocation12 + $0x314] sm:$0xf0]  ;;  %v13882_v42 = vld [vmem:[#allocation12 + $0x3cc] sm:$0xf] }
 0x543   :  { %v5855_v55 = vmax.f32 %v5783_v15, %v5847_v50  ;;  %v11878_v15 = vld [vmem:[#allocation12 + $0x1d8] sm:$0xf0] }
 0x544   :  { %6758 = vmatpush.bf16.msra.mxu0 %v11653_v43  ;;  %6768 = vmatpush.bf16.msra.mxu1 %v11845_v40  ;;  %v11881_v46 = vor.u32 %v13818_v39, %v11878_v15  ;;  %v11670_v50 = vld [vmem:[#allocation12 + $0x38] sm:$0xf0]  ;;  %v13846_v15 = vld [vmem:[#allocation12 + $0x2ac] sm:$0xf] }
 0x545   :  { %v14812_v2 = vpack.c.bf16 %v5855_v55, %v5851_v54  ;;  %v11798_v39 = vld [vmem:[#allocation12 + $0x138] sm:$0xf0] }
 0x546   :  { %v12134_v27 = vld [vmem:[#allocation12 + $0x3d8] sm:$0xf0] }
 0x547   :  { %6717 = vmatmul.bf16.vlgmr.msrb.gmra.mxu1 %v14808_v6  ;;  %6759 = vmatmul.bf16.vlgmr.msra.gmra.mxu0 %v14804_v20 }
 0x548   :  { %6807 = vmatpush.bf16.msrb.mxu0 %v11769_v38  ;;  %v5794_v17 = vpop.f32.mrf.mxu0  ;;  %6675 = vmatmul.bf16.vlgmr.msra.gmra.mxu2 %v14812_v2  ;;  %v5808_v21 = vpop.f32.mrf.mxu1  ;;  %v11940_v38 = vld [vmem:[#allocation12 + $0x248] sm:$0xf] }
 0x549   :  { %6769 = vmatpush.bf16.msra.mxu1 %v11829_v56  ;;  %6779 = vmatpush.bf16.msra.mxu2 %v12021_v58  ;;  %v5795_v22 = vadd.f32 %v5794_v17, %v4972_v8  ;;  %v11941_v58 = vor.u32 %v13836_v47, %v11940_v38  ;;  %v13832_v17 = vld [vmem:[#allocation12 + $0x234] sm:$0xf0]  ;;  %v11782_v47 = vld [vmem:[#allocation12 + $0x118] sm:$0xf0] }
 0x54a   :  { %v11925_v14 = vor.u32 %v13832_v17, %v11924_v0  ;;  %v13876_v38 = vld [vmem:[#allocation12 + $0x394] sm:$0xf0]  ;;  %v13834_v17 = vld [vmem:[#allocation12 + $0x24c] sm:$0xf] }
 0x54b   :  { %v5809_v34 = vadd.f32 %v5808_v21, %v5795_v22  ;;  %v13888_v21 = vld [vmem:[#allocation12 + $0x3f4] sm:$0xf0] }
 0x54c   :  { %6808 = vmatpush.bf16.msrb.mxu0 %v11753_v62  ;;  %v11673_v62 = vor.u32 %v13766_v48, %v11670_v50  ;;  %v12149_v4 = vor.u32 %v13888_v21, %v12148_v1  ;;  %v13842_v48 = vld [vmem:[#allocation12 + $0x28c] sm:$0xf]  ;;  %v11974_v50 = vld [vmem:[#allocation12 + $0x298] sm:$0xf0] }
 0x54d   :  { %6770 = vmatpush.bf16.msra.mxu1 %v11813_v10  ;;  %6780 = vmatpush.bf16.msra.mxu2 %v12005_v12  ;;  %v11846_v10 = vld [vmem:[#allocation12 + $0x198] sm:$0xf0]  ;;  %v11977_v57 = vor.u32 %v13842_v48, %v11974_v50  ;;  %v13826_v1 = vld [vmem:[#allocation12 + $0x20c] sm:$0xf] }
 0x54e   :  { %v12150_v21 = vld [vmem:[#allocation12 + $0x3f8] sm:$0xf0] }
 0x54f   :  { %v13920_v48 = vld [vmem:[#allocation13 + $0xf8] sm:$0xf0] }
 0x550   :  { %6809 = vmatpush.bf16.msrb.mxu0 %v11737_v13  ;;  %v5796_v59 = vpop.f32.mrf.mxu0  ;;  %v5810_v11 = vpop.f32.mrf.mxu1 }
 0x551   :  { %6771 = vmatpush.bf16.msra.mxu1 %v11797_v23  ;;  %6781 = vmatpush.bf16.msra.mxu2 %v11989_v24  ;;  %v5797_v43 = vadd.f32 %v5796_v59, %v4972_v8  ;;  %v13810_v8 = vld [vmem:[#allocation12 + $0x18c] sm:$0xf]  ;;  %v12132_v59 = vld [vmem:[#allocation12 + $0x3c8] sm:$0xf] }
 0x552   :  { %v11849_v23 = vor.u32 %v13810_v8, %v11846_v10  ;;  %v13806_v24 = vld [vmem:[#allocation12 + $0x16c] sm:$0xf]  ;;  %v12052_v8 = vld [vmem:[#allocation12 + $0x328] sm:$0xf]  ;;  %v13864_v10 = vld [vmem:[#allocation12 + $0x334] sm:$0xf0] }
 0x553   :  { %v5811_v54 = vadd.f32 %v5810_v11, %v5797_v43  ;;  %v11990_v43 = vld [vmem:[#allocation12 + $0x2b8] sm:$0xf0] }
 0x554   :  { %v5822_v31 = vpop.f32.mrf.mxu2  ;;  %v5836_v49 = vpop.f32.mrf.mxu3  ;;  %6810 = vmatpush.bf16.msrb.mxu0 %v11721_v9  ;;  %v11830_v9 = vld [vmem:[#allocation12 + $0x178] sm:$0xf0] }
 0x555   :  { %v5823_v40 = vadd.f32 %v5822_v31, %v5809_v34  ;;  %6772 = vmatpush.bf16.msra.mxu1 %v11781_v30  ;;  %6782 = vmatpush.bf16.msra.mxu2 %v11973_v41  ;;  %v11833_v29 = vor.u32 %v13806_v24, %v11830_v9  ;;  %v13884_v30 = vld [vmem:[#allocation12 + $0x3d4] sm:$0xf0]  ;;  %v13802_v31 = vld [vmem:[#allocation12 + $0x14c] sm:$0xf]  ;;  %v12037_v24 = vor.u32 %v13860_v18, %v12036_v16 }
 0x556   :  { %v13850_v41 = vld [vmem:[#allocation12 + $0x2cc] sm:$0xf]  ;;  %v12133_v33 = vor.u32 %v13884_v30, %v12132_v59 }
 0x557   :  { %v5837_v55 = vadd.f32 %v5836_v49, %v5823_v40  ;;  %v11814_v49 = vld [vmem:[#allocation12 + $0x158] sm:$0xf0]  ;;  %v12117_v40 = vor.u32 %v13880_v36, %v12116_v37  ;;  %v13870_v30 = vld [vmem:[#allocation12 + $0x36c] sm:$0xf] }
 0x558   :  { %6811 = vmatpush.bf16.msrb.mxu0 %v11705_v32  ;;  %6773 = vmatmul.bf16.vlgmr.msra.gmra.mxu1 %v14808_v6  ;;  %v12006_v32 = vld [vmem:[#allocation12 + $0x2d8] sm:$0xf0]  ;;  %v11817_v34 = vor.u32 %v13802_v31, %v11814_v49  ;;  %v13858_v36 = vld [vmem:[#allocation12 + $0x30c] sm:$0xf] }
 0x559   :  { %6821 = vmatpush.bf16.msrb.mxu1 %v11897_v35  ;;  %6731 = vmatmul.bf16.vlgmr.msrb.gmra.mxu2 %v14812_v2  ;;  %v5844_v12 = vmul.f32 0.01, %v5837_v55  ;;  %v12009_v35 = vor.u32 %v13850_v41, %v12006_v32  ;;  %v12086_v31 = vld [vmem:[#allocation12 + $0x378] sm:$0xf0]  ;;  %v13866_v41 = vld [vmem:[#allocation12 + $0x34c] sm:$0xf] }
 0x55a   :  { %6783 = vmatpush.bf16.msra.mxu2 %v11957_v44  ;;  %v11993_v44 = vor.u32 %v13846_v15, %v11990_v43  ;;  %v12089_v49 = vor.u32 %v13870_v30, %v12086_v31  ;;  %v12070_v32 = vld [vmem:[#allocation12 + $0x358] sm:$0xf0]  ;;  %v13941_v15 = vld [vmem:[#allocation13 + $0x1a0] sm:$0xf0]  ;;  %v14046_v30 = vld [vmem:[#allocation13 + $0x4e8] sm:$0xf0] }
 0x55b   :  { %v5852_v52 = vmax.f32 %v5837_v55, %v5844_v12  ;;  %v13872_v55 = vld [vmem:[#allocation12 + $0x374] sm:$0xf0]  ;;  %v13830_v12 = vld [vmem:[#allocation12 + $0x22c] sm:$0xf]  ;;  %v13924_v31 = vld [vmem:[#allocation13 + $0x11c] sm:$0xf] }
 0x55c   :  { %v5824_v56 = vpop.f32.mrf.mxu2  ;;  %6812 = vmatpush.bf16.msrb.mxu0 %v11689_v45  ;;  %v5838_v51 = vpop.f32.mrf.mxu3  ;;  %v12100_v45 = vld [vmem:[#allocation12 + $0x388] sm:$0xf] }
 0x55d   :  { %v5825_v60 = vadd.f32 %v5824_v56, %v5811_v54  ;;  %6822 = vmatpush.bf16.msrb.mxu1 %v11881_v46  ;;  %v13794_v46 = vld [vmem:[#allocation12 + $0x10c] sm:$0xf]  ;;  %v12101_v11 = vor.u32 %v13876_v38, %v12100_v45  ;;  %v12084_v54 = vld [vmem:[#allocation12 + $0x368] sm:$0xf]  ;;  %v12296_v45 = vld [vmem:[#allocation13 + $0x118] sm:$0xf] }
 0x55e   :  { %6784 = vmatpush.bf16.msra.mxu2 %v11941_v58  ;;  %v11785_v53 = vor.u32 %v13794_v46, %v11782_v47  ;;  %v13838_v56 = vld [vmem:[#allocation12 + $0x26c] sm:$0xf]  ;;  %v11958_v58 = vld [vmem:[#allocation12 + $0x278] sm:$0xf0]  ;;  %v13927_v38 = vld [vmem:[#allocation13 + $0x130] sm:$0xf0] }
 0x55f   :  { %v5839_v13 = vadd.f32 %v5838_v51, %v5825_v60  ;;  %v11961_v0 = vor.u32 %v13838_v56, %v11958_v58  ;;  %v12068_v60 = vld [vmem:[#allocation12 + $0x348] sm:$0xf]  ;;  %v11945_v51 = vor.u32 %v13834_v17, %v11942_v3  ;;  %v12297_v46 = vor.u32 %v13927_v38, %v12296_v45  ;;  %v12268_v47 = vld [vmem:[#allocation13 + $0xe0] sm:$0xf]  ;;  %v12212_v56 = vld [vmem:[#allocation13 + $0x70] sm:$0xf] }
 0x560   :  { %6813 = vmatpush.bf16.msrb.mxu0 %v11673_v62  ;;  %v12085_v62 = vor.u32 %v13872_v55, %v12084_v54  ;;  %v12269_v50 = vor.u32 %v13920_v48, %v12268_v47  ;;  %v13997_v55 = vld [vmem:[#allocation13 + $0x360] sm:$0xf0]  ;;  %v13906_v58 = vld [vmem:[#allocation13 + $0x88] sm:$0xf0]  ;;  %v12184_v17 = vld [vmem:[#allocation13 + $0x38] sm:$0xf] }
 0x561   :  { %v5848_v19 = vmul.f32 0.01, %v5839_v13  ;;  %6823 = vmatpush.bf16.msrb.mxu1 %v11865_v61  ;;  %v13868_v61 = vld [vmem:[#allocation12 + $0x354] sm:$0xf0]  ;;  %v13899_v3 = vld [vmem:[#allocation13 + $0x50] sm:$0xf0] }
 0x562   :  { %6785 = vmatpush.bf16.msra.mxu2 %v11925_v14  ;;  %v12069_v7 = vor.u32 %v13868_v61, %v12068_v60  ;;  %v12053_v14 = vor.u32 %v13864_v10, %v12052_v8  ;;  %v13990_v60 = vld [vmem:[#allocation13 + $0x328] sm:$0xf0]  ;;  %v13983_v8 = vld [vmem:[#allocation13 + $0x2f0] sm:$0xf0]  ;;  %v12156_v10 = vld [vmem:[#allocation13] sm:$0xf] }
 0x563   :  { %v5856_v22 = vmax.f32 %v5839_v13, %v5848_v19  ;;  %v11926_v13 = vld [vmem:[#allocation12 + $0x238] sm:$0xf0]  ;;  %v13910_v38 = vld [vmem:[#allocation13 + $0xac] sm:$0xf] }
 0x564   :  { %6814 = vmatpush.bf16.msrb.mxu0 %v11657_v63  ;;  %v11929_v63 = vor.u32 %v13830_v12, %v11926_v13  ;;  %v11910_v19 = vld [vmem:[#allocation12 + $0x218] sm:$0xf0] }
 0x565   :  { %v14820_v28 = vpack.c.bf16 %v5856_v22, %v5852_v52  ;;  %6824 = vmatpush.bf16.msrb.mxu1 %v11849_v23  ;;  %v13886_v23 = vld [vmem:[#allocation12 + $0x3ec] sm:$0xf]  ;;  %v12137_v52 = vor.u32 %v13882_v42, %v12134_v27  ;;  %v13892_v12 = vld [vmem:[#allocation13 + $0x18] sm:$0xf0]  ;;  %v14053_v42 = vld [vmem:[#allocation13 + $0x520] sm:$0xf0] }
 0x566   :  { %6786 = vmatpush.bf16.msra.mxu2 %v11909_v5  ;;  %v12153_v9 = vor.u32 %v13886_v23, %v12150_v21  ;;  %v13878_v22 = vld [vmem:[#allocation12 + $0x3ac] sm:$0xf]  ;;  %v12118_v5 = vld [vmem:[#allocation12 + $0x3b8] sm:$0xf0]  ;;  %v12157_v16 = vor.u32 %v13892_v12, %v12156_v10  ;;  %v12464_v21 = vld [vmem:[#allocation13 + $0x268] sm:$0xf] }
 0x567   :  { %6689 = vmatmul.bf16.vlgmr.msra.gmra.mxu3 %v14820_v28  ;;  %6815 = vmatmul.bf16.vlgmr.msrb.gmra.mxu0 %v14804_v20  ;;  %v11801_v20 = vor.u32 %v13798_v26, %v11798_v39  ;;  %v12352_v39 = vld [vmem:[#allocation13 + $0x188] sm:$0xf]  ;;  %v13931_v27 = vld [vmem:[#allocation13 + $0x154] sm:$0xf]  ;;  %v14032_v45 = vld [vmem:[#allocation13 + $0x478] sm:$0xf0] }
 0x568   :  { %6793 = vmatpush.bf16.msra.mxu3 %v12149_v4  ;;  %v12121_v4 = vor.u32 %v13878_v22, %v12118_v5  ;;  %v12353_v43 = vor.u32 %v13941_v15, %v12352_v39  ;;  %v12522_v12 = vld [vmem:[#allocation13 + $0x2f4] sm:$0xf0] }
 0x569   :  { %6825 = vmatpush.bf16.msrb.mxu1 %v11833_v29  ;;  %6787 = vmatmul.bf16.vlgmr.msra.gmra.mxu2 %v14812_v2  ;;  %v13874_v29 = vld [vmem:[#allocation12 + $0x38c] sm:$0xf] }
 0x56a   :  { %6835 = vmatpush.bf16.msrb.mxu2 %v12025_v25  ;;  %v12102_v25 = vld [vmem:[#allocation12 + $0x398] sm:$0xf0]  ;;  %8307 = vmatpush.bf16.msra.mxu0 %v12353_v43  ;;  %v12380_v43 = vld [vmem:[#allocation13 + $0x1c0] sm:$0xf] }
 0x56b   :  { %v12105_v59 = vor.u32 %v13874_v29, %v12102_v25  ;;  %v13962_v29 = vld [vmem:[#allocation13 + $0x248] sm:$0xf0]  ;;  %v12772_v25 = vld [vmem:[#allocation13 + $0x4d0] sm:$0xf] }
 0x56c   :  { %6794 = vmatpush.bf16.msra.mxu3 %v12133_v33  ;;  %v12073_v33 = vor.u32 %v13866_v41, %v12070_v32  ;;  %v12773_v41 = vor.u32 %v14046_v30, %v12772_v25  ;;  %v12466_v25 = vld [vmem:[#allocation13 + $0x284] sm:$0xf0] }
 0x56d   :  { %6826 = vmatpush.bf16.msrb.mxu1 %v11817_v34  ;;  %v13862_v34 = vld [vmem:[#allocation12 + $0x32c] sm:$0xf] }
 0x56e   :  { %6836 = vmatpush.bf16.msrb.mxu2 %v12009_v35  ;;  %v12054_v35 = vld [vmem:[#allocation12 + $0x338] sm:$0xf0] }
 0x56f   :  { %v12057_v37 = vor.u32 %v13862_v34, %v12054_v35  ;;  %v13955_v34 = vld [vmem:[#allocation13 + $0x210] sm:$0xf0]  ;;  %v12744_v35 = vld [vmem:[#allocation13 + $0x498] sm:$0xf] }
 0x570   :  { %6795 = vmatpush.bf16.msra.mxu3 %v12117_v40  ;;  %v12324_v40 = vld [vmem:[#allocation13 + $0x150] sm:$0xf] }
 0x571   :  { %6827 = vmatpush.bf16.msrb.mxu1 %v11801_v20  ;;  %v13934_v20 = vld [vmem:[#allocation13 + $0x168] sm:$0xf0] }
 0x572   :  { %6837 = vmatpush.bf16.msrb.mxu2 %v11993_v44  ;;  %v12325_v44 = vor.u32 %v13934_v20, %v12324_v40  ;;  %v13948_v40 = vld [vmem:[#allocation13 + $0x1d8] sm:$0xf0]  ;;  %v12716_v20 = vld [vmem:[#allocation13 + $0x460] sm:$0xf] }
 0x573   :  { %v12717_v47 = vor.u32 %v14032_v45, %v12716_v20  ;;  %v14095_v20 = vld [vmem:[#allocation13 + $0x670] sm:$0xf0] }
 0x574   :  { %6796 = vmatpush.bf16.msra.mxu3 %v12101_v11  ;;  %8308 = vmatpush.bf16.msra.mxu0 %v12325_v44  ;;  %v12240_v11 = vld [vmem:[#allocation13 + $0xa8] sm:$0xf]  ;;  %v12381_v44 = vor.u32 %v13948_v40, %v12380_v43  ;;  %v12968_v40 = vld [vmem:[#allocation13 + $0x658] sm:$0xf] }
 0x575   :  { %6828 = vmatpush.bf16.msrb.mxu1 %v11785_v53  ;;  %v13913_v53 = vld [vmem:[#allocation13 + $0xc0] sm:$0xf0]  ;;  %v12969_v45 = vor.u32 %v14095_v20, %v12968_v40 }
 0x576   :  { %6838 = vmatpush.bf16.msrb.mxu2 %v11977_v57  ;;  %v12576_v57 = vld [vmem:[#allocation13 + $0x348] sm:$0xf]  ;;  %v12241_v54 = vor.u32 %v13913_v53, %v12240_v11 }
 0x577   :  { %6745 = vmatmul.bf16.vlgmr.msrb.gmra.mxu3 %v14820_v28  ;;  %v12578_v11 = vld [vmem:[#allocation13 + $0x364] sm:$0xf0] }
 0x578   :  { %6797 = vmatpush.bf16.msra.mxu3 %v12085_v62  ;;  %6829 = vmatmul.bf16.vlgmr.msrb.gmra.mxu1 %v14808_v6  ;;  %v11913_v6 = vor.u32 %v13826_v1, %v11910_v19  ;;  %v12577_v62 = vor.u32 %v13997_v55, %v12576_v57  ;;  %v13938_v1 = vld [vmem:[#allocation13 + $0x18c] sm:$0xf]  ;;  %v12354_v19 = vld [vmem:[#allocation13 + $0x1a4] sm:$0xf0] }
 0x579   :  { %8309 = vmatpush.bf16.msra.mxu0 %v12297_v46  ;;  %v12357_v23 = vor.u32 %v13938_v1, %v12354_v19  ;;  %v12242_v46 = vld [vmem:[#allocation13 + $0xc4] sm:$0xf0]  ;;  %v13889_v1 = vld [vmem:[#allocation13 + $0x4] sm:$0xf]  ;;  %v12158_v19 = vld [vmem:[#allocation13 + $0x1c] sm:$0xf0] }
 0x57a   :  { %6839 = vmatpush.bf16.msrb.mxu2 %v11961_v0  ;;  %v12548_v0 = vld [vmem:[#allocation13 + $0x310] sm:$0xf]  ;;  %8321 = vmatpush.bf16.msra.mxu1 %v12577_v62  ;;  %v12245_v48 = vor.u32 %v13910_v38, %v12242_v46  ;;  %v12688_v57 = vld [vmem:[#allocation13 + $0x428] sm:$0xf]  ;;  %v13987_v62 = vld [vmem:[#allocation13 + $0x314] sm:$0xf] }
 0x57b   :  { %v12549_v61 = vor.u32 %v13990_v60, %v12548_v0  ;;  %v12550_v60 = vld [vmem:[#allocation13 + $0x32c] sm:$0xf0]  ;;  %v13952_v38 = vld [vmem:[#allocation13 + $0x1fc] sm:$0xf]  ;;  %v12410_v46 = vld [vmem:[#allocation13 + $0x214] sm:$0xf0] }
 0x57c   :  { %6798 = vmatpush.bf16.msra.mxu3 %v12069_v7  ;;  %v12520_v7 = vld [vmem:[#allocation13 + $0x2d8] sm:$0xf] }
 0x57d   :  { %8310 = vmatpush.bf16.msra.mxu0 %v12269_v50  ;;  %v12521_v13 = vor.u32 %v13983_v8, %v12520_v7  ;;  %v13994_v50 = vld [vmem:[#allocation13 + $0x34c] sm:$0xf]  ;;  %v13896_v7 = vld [vmem:[#allocation13 + $0x3c] sm:$0xf] }
 0x57e   :  { %6840 = vmatpush.bf16.msrb.mxu2 %v11945_v51  ;;  %8322 = vmatpush.bf16.msra.mxu1 %v12549_v61  ;;  %v12185_v51 = vor.u32 %v13899_v3, %v12184_v17  ;;  %v12581_v53 = vor.u32 %v13994_v50, %v12578_v11  ;;  %v12660_v61 = vld [vmem:[#allocation13 + $0x3f0] sm:$0xf]  ;;  %v14018_v17 = vld [vmem:[#allocation13 + $0x408] sm:$0xf0]  ;;  %v13980_v8 = vld [vmem:[#allocation13 + $0x2dc] sm:$0xf]  ;;  %v12413_v50 = vor.u32 %v13952_v38, %v12410_v46 }
 0x57f   :  { %v12661_v3 = vor.u32 %v14018_v17, %v12660_v61  ;;  %v12746_v11 = vld [vmem:[#allocation13 + $0x4b4] sm:$0xf0]  ;;  %v12718_v61 = vld [vmem:[#allocation13 + $0x47c] sm:$0xf0]  ;;  %v14106_v38 = vld [vmem:[#allocation13 + $0x6cc] sm:$0xf] }
 0x580   :  { %6799 = vmatpush.bf16.msra.mxu3 %v12053_v14  ;;  %v12492_v14 = vld [vmem:[#allocation13 + $0x2a0] sm:$0xf] }
 0x581   :  { %8311 = vmatpush.bf16.msra.mxu0 %v12241_v54  ;;  %v14025_v54 = vld [vmem:[#allocation13 + $0x440] sm:$0xf0] }
 0x582   :  { %6841 = vmatpush.bf16.msrb.mxu2 %v11929_v63  ;;  %v13976_v63 = vld [vmem:[#allocation13 + $0x2b8] sm:$0xf0]  ;;  %8323 = vmatpush.bf16.msra.mxu1 %v12521_v13  ;;  %v12689_v55 = vor.u32 %v14025_v54, %v12688_v57  ;;  %v12525_v13 = vor.u32 %v13980_v8, %v12522_v12  ;;  %v12940_v54 = vld [vmem:[#allocation13 + $0x620] sm:$0xf]  ;;  %v14081_v8 = vld [vmem:[#allocation13 + $0x600] sm:$0xf0] }
 0x583   :  { %v12493_v18 = vor.u32 %v13976_v63, %v12492_v14  ;;  %v12632_v14 = vld [vmem:[#allocation13 + $0x3b8] sm:$0xf]  ;;  %v14011_v63 = vld [vmem:[#allocation13 + $0x3d0] sm:$0xf0] }
 0x584   :  { %6800 = vmatpush.bf16.msra.mxu3 %v12037_v24  ;;  %v13969_v24 = vld [vmem:[#allocation13 + $0x280] sm:$0xf0] }
 0x586   :  { %6842 = vmatpush.bf16.msrb.mxu2 %v11913_v6  ;;  %8324 = vmatpush.bf16.msra.mxu1 %v12493_v18  ;;  %v12800_v6 = vld [vmem:[#allocation13 + $0x508] sm:$0xf]  ;;  %v12633_v18 = vor.u32 %v14011_v63, %v12632_v14 }
 0x587   :  { %6801 = vmatmul.bf16.vlgmr.msra.gmra.mxu3 %v14820_v28  ;;  %v12801_v22 = vor.u32 %v14053_v42, %v12800_v6  ;;  %v12604_v42 = vld [vmem:[#allocation13 + $0x380] sm:$0xf]  ;;  %v12690_v14 = vld [vmem:[#allocation13 + $0x444] sm:$0xf0] }
 0x588   :  { %6849 = vmatpush.bf16.msrb.mxu3 %v12153_v9  ;;  %v12465_v9 = vor.u32 %v13969_v24, %v12464_v21  ;;  %v12161_v21 = vor.u32 %v13889_v1, %v12158_v19  ;;  %v12494_v24 = vld [vmem:[#allocation13 + $0x2bc] sm:$0xf0] }
 0x589   :  { %6843 = vmatmul.bf16.vlgmr.msrb.gmra.mxu2 %v14812_v2  ;;  %v12038_v2 = vld [vmem:[#allocation12 + $0x318] sm:$0xf0] }
 0x58a   :  { %v12041_v26 = vor.u32 %v13858_v36, %v12038_v2  ;;  %8325 = vmatpush.bf16.msra.mxu1 %v12465_v9  ;;  %8335 = vmatpush.bf16.msra.mxu2 %v12801_v22  ;;  %v14039_v36 = vld [vmem:[#allocation13 + $0x4b0] sm:$0xf0]  ;;  %v13917_v2 = vld [vmem:[#allocation13 + $0xe4] sm:$0xf] }
 0x58b   :  { %v12745_v39 = vor.u32 %v14039_v36, %v12744_v35  ;;  %v13959_v35 = vld [vmem:[#allocation13 + $0x234] sm:$0xf] }
 0x58c   :  { %6850 = vmatpush.bf16.msrb.mxu3 %v12137_v52  ;;  %v12326_v52 = vld [vmem:[#allocation13 + $0x16c] sm:$0xf0]  ;;  %v14043_v36 = vld [vmem:[#allocation13 + $0x4d4] sm:$0xf] }
 0x58d   :  { %v12329_v5 = vor.u32 %v13931_v27, %v12326_v52  ;;  %v14004_v27 = vld [vmem:[#allocation13 + $0x398] sm:$0xf0]  ;;  %v13024_v52 = vld [vmem:[#allocation13 + $0x6c8] sm:$0xf] }
 0x58e   :  { %8336 = vmatpush.bf16.msra.mxu2 %v12773_v41 }
 0x590   :  { %6851 = vmatpush.bf16.msrb.mxu3 %v12121_v4  ;;  %v12436_v4 = vld [vmem:[#allocation13 + $0x230] sm:$0xf] }
 0x592   :  { %8337 = vmatpush.bf16.msra.mxu2 %v12745_v39  ;;  %v14837_v39 = vld [vmem:[%s14932_s15] sm:$0xf] }
 0x594   :  { %6852 = vmatpush.bf16.msrb.mxu3 %v12105_v59  ;;  %v12437_v59 = vor.u32 %v13962_v29, %v12436_v4  ;;  %v14109_v4 = vld [vmem:[#allocation13 + $0x6e0] sm:$0xf0]  ;;  %v13966_v29 = vld [vmem:[#allocation13 + $0x26c] sm:$0xf] }
 0x595   :  { %v12469_v30 = vor.u32 %v13966_v29, %v12466_v25 }
 0x596   :  { %8326 = vmatpush.bf16.msra.mxu1 %v12437_v59  ;;  %8338 = vmatpush.bf16.msra.mxu2 %v12717_v47  ;;  %v13025_v59 = vor.u32 %v14109_v4, %v13024_v52  ;;  %v14036_v47 = vld [vmem:[#allocation13 + $0x49c] sm:$0xf] }
 0x597   :  { %v12749_v57 = vor.u32 %v14036_v47, %v12746_v11 }
 0x598   :  { %6853 = vmatpush.bf16.msrb.mxu3 %v12089_v49  ;;  %v12298_v49 = vld [vmem:[#allocation13 + $0x134] sm:$0xf0] }
 0x599   :  { %v12301_v32 = vor.u32 %v13924_v31, %v12298_v49  ;;  %v14050_v31 = vld [vmem:[#allocation13 + $0x50c] sm:$0xf]  ;;  %v12802_v49 = vld [vmem:[#allocation13 + $0x524] sm:$0xf0] }
 0x59a   :  { %8339 = vmatpush.bf16.msra.mxu2 %v12689_v55  ;;  %v12805_v41 = vor.u32 %v14050_v31, %v12802_v49  ;;  %v14088_v55 = vld [vmem:[#allocation13 + $0x638] sm:$0xf0] }
 0x59b   :  { %v14008_v49 = vld [vmem:[#allocation13 + $0x3bc] sm:$0xf] }
 0x59c   :  { %6854 = vmatpush.bf16.msrb.mxu3 %v12073_v33  ;;  %v12408_v33 = vld [vmem:[#allocation13 + $0x1f8] sm:$0xf] }
 0x59e   :  { %8340 = vmatpush.bf16.msra.mxu2 %v12661_v3 }
 0x5a0   :  { %6855 = vmatpush.bf16.msrb.mxu3 %v12057_v37  ;;  %v12409_v37 = vor.u32 %v13955_v34, %v12408_v33  ;;  %v14102_v33 = vld [vmem:[#allocation13 + $0x6a8] sm:$0xf0] }
 0x5a2   :  { %8327 = vmatpush.bf16.msra.mxu1 %v12409_v37  ;;  %8341 = vmatpush.bf16.msra.mxu2 %v12633_v18  ;;  %v12438_v37 = vld [vmem:[#allocation13 + $0x24c] sm:$0xf0] }
 0x5a4   :  { %6856 = vmatpush.bf16.msrb.mxu3 %v12041_v26  ;;  %v12270_v26 = vld [vmem:[#allocation13 + $0xfc] sm:$0xf0] }
 0x5a5   :  { %v12273_v15 = vor.u32 %v13917_v2, %v12270_v26  ;;  %v12441_v2 = vor.u32 %v13959_v35, %v12438_v37  ;;  %v12774_v26 = vld [vmem:[#allocation13 + $0x4ec] sm:$0xf0] }
 0x5a6   :  { %8328 = vmatpush.bf16.msra.mxu1 %v12381_v44  ;;  %v12777_v43 = vor.u32 %v14043_v36, %v12774_v26  ;;  %v12828_v26 = vld [vmem:[#allocation13 + $0x540] sm:$0xf] }
 0x5a7   :  { %6857 = vmatmul.bf16.vlgmr.msrb.gmra.mxu3 %v14820_v28  ;;  %v12213_v28 = vor.u32 %v13906_v58, %v12212_v56  ;;  %v13903_v56 = vld [vmem:[#allocation13 + $0x74] sm:$0xf]  ;;  %v12214_v58 = vld [vmem:[#allocation13 + $0x8c] sm:$0xf0] }
 0x5a8   :  { %v12217_v0 = vor.u32 %v13903_v56, %v12214_v58  ;;  %8349 = vmatpush.bf16.msra.mxu3 %v13025_v59  ;;  %v12941_v56 = vor.u32 %v14088_v55, %v12940_v54  ;;  %v13945_v58 = vld [vmem:[#allocation13 + $0x1c4] sm:$0xf]  ;;  %v12856_v59 = vld [vmem:[#allocation13 + $0x578] sm:$0xf] }
 0x5a9   :  { %8312 = vmatpush.bf16.msra.mxu0 %v12213_v28  ;;  %v12553_v28 = vor.u32 %v13987_v62, %v12550_v60  ;;  %v12382_v62 = vld [vmem:[#allocation13 + $0x1dc] sm:$0xf0] }
 0x5aa   :  { %8377 = vmatpush.bf16.msrb.mxu1 %v12581_v53 }
 0x5ad   :  { %8313 = vmatpush.bf16.msra.mxu0 %v12185_v51  ;;  %v12186_v51 = vld [vmem:[#allocation13 + $0x54] sm:$0xf0] }
 0x5ae   :  { %8378 = vmatpush.bf16.msrb.mxu1 %v12553_v28  ;;  %v12189_v10 = vor.u32 %v13896_v7, %v12186_v51  ;;  %v12385_v28 = vor.u32 %v13945_v58, %v12382_v62  ;;  %v12912_v51 = vld [vmem:[#allocation13 + $0x5e8] sm:$0xf]  ;;  %v12304_v62 = vld [vmem:[#allocation13 + $0x120] sm:$0xf] }
 0x5af   :  { %v12913_v12 = vor.u32 %v14081_v8, %v12912_v51 }
 0x5b1   :  { %8314 = vmatpush.bf16.msra.mxu0 %v12157_v16  ;;  %v14830_v16 = vpop.f32.mrf.mxu0 }
 0x5b2   :  { %8379 = vmatpush.bf16.msrb.mxu1 %v12525_v13  ;;  %v14022_v13 = vld [vmem:[#allocation13 + $0x42c] sm:$0xf] }
 0x5b3   :  { %v12693_v1 = vor.u32 %v14022_v13, %v12690_v14  ;;  %v13921_v14 = vld [vmem:[#allocation13 + $0x100] sm:$0xf0] }
 0x5b4   :  { %v6662_v6 = vpop.f32.mrf.mxu1 }
 0x5b5   :  { %8363 = vmatpush.bf16.msrb.mxu0 %v12357_v23  ;;  %v13973_v23 = vld [vmem:[#allocation13 + $0x2a4] sm:$0xf] }
 0x5b6   :  { %v12497_v9 = vor.u32 %v13973_v23, %v12494_v24  ;;  %v14074_v24 = vld [vmem:[#allocation13 + $0x5c8] sm:$0xf0] }
 0x5b8   :  { %8380 = vmatpush.bf16.msrb.mxu1 %v12497_v9 }
 0x5b9   :  { %8364 = vmatpush.bf16.msrb.mxu0 %v12329_v5  ;;  %v12605_v5 = vor.u32 %v14004_v27, %v12604_v42  ;;  %v14015_v42 = vld [vmem:[#allocation13 + $0x3f4] sm:$0xf]  ;;  %v12662_v27 = vld [vmem:[#allocation13 + $0x40c] sm:$0xf0] }
 0x5bb   :  { %8342 = vmatpush.bf16.msra.mxu2 %v12605_v5  ;;  %v12665_v5 = vor.u32 %v14015_v42, %v12662_v27  ;;  %v13914_v27 = vld [vmem:[#allocation13 + $0xc8] sm:$0xf0] }
 0x5bc   :  { %8381 = vmatpush.bf16.msrb.mxu1 %v12469_v30  ;;  %v6664_v44 = vpop.f32.mrf.mxu1  ;;  %v5992_v30 = vperm.slane %v14837_v39, 1 }
 0x5bd   :  { %8365 = vmatpush.bf16.msrb.mxu0 %v12301_v32  ;;  %v12996_v32 = vld [vmem:[#allocation13 + $0x690] sm:$0xf] }
 0x5be   :  { %v12997_v34 = vor.u32 %v14102_v33, %v12996_v32  ;;  %v12360_v33 = vld [vmem:[#allocation13 + $0x190] sm:$0xf] }
 0x5bf   :  { %8391 = vmatpush.bf16.msrb.mxu2 %v12805_v41  ;;  %v12634_v41 = vld [vmem:[#allocation13 + $0x3d4] sm:$0xf0] }
 0x5c0   :  { %8350 = vmatpush.bf16.msra.mxu3 %v12997_v34  ;;  %8382 = vmatpush.bf16.msrb.mxu1 %v12441_v2  ;;  %v13942_v34 = vld [vmem:[#allocation13 + $0x1a8] sm:$0xf0]  ;;  %v12637_v35 = vor.u32 %v14008_v49, %v12634_v41  ;;  %v12220_v41 = vld [vmem:[#allocation13 + $0x78] sm:$0xf] }
 0x5c1   :  { %8366 = vmatpush.bf16.msrb.mxu0 %v12273_v15  ;;  %v6650_v15 = vpop.f32.mrf.mxu0  ;;  %v12361_v40 = vor.u32 %v13942_v34, %v12360_v33  ;;  %v12556_v33 = vld [vmem:[#allocation13 + $0x318] sm:$0xf] }
 0x5c3   :  { %8392 = vmatpush.bf16.msrb.mxu2 %v12777_v43 }
 0x5c4   :  { %8351 = vmatpush.bf16.msra.mxu3 %v12969_v45  ;;  %8383 = vmatpush.bf16.msrb.mxu1 %v12413_v50  ;;  %v6718_v19 = vpop.f32.mrf.mxu1  ;;  %v12606_v45 = vld [vmem:[#allocation13 + $0x39c] sm:$0xf0]  ;;  %v13935_v50 = vld [vmem:[#allocation13 + $0x170] sm:$0xf0] }
 0x5c5   :  { %8367 = vmatpush.bf16.msrb.mxu0 %v12245_v48  ;;  %v5991_v48 = vperm.slane %v14837_v39, 0 }
 0x5c7   :  { %8393 = vmatpush.bf16.msrb.mxu2 %v12749_v57  ;;  %v6649_v60 = vadd.f32 %v14830_v16, %v5991_v48  ;;  %v6651_v63 = vadd.f32 %v6650_v15, %v5991_v48  ;;  %v14060_v15 = vld [vmem:[#allocation13 + $0x558] sm:$0xf0]  ;;  %v12332_v48 = vld [vmem:[#allocation13 + $0x158] sm:$0xf] }
 0x5c8   :  { %8352 = vmatpush.bf16.msra.mxu3 %v12941_v56  ;;  %8384 = vmatpush.bf16.msrb.mxu1 %v12385_v28  ;;  %v12829_v20 = vor.u32 %v14060_v15, %v12828_v26  ;;  %v12333_v58 = vor.u32 %v13935_v50, %v12332_v48  ;;  %v13928_v28 = vld [vmem:[#allocation13 + $0x138] sm:$0xf0]  ;;  %v12528_v48 = vld [vmem:[#allocation13 + $0x2e0] sm:$0xf] }
 0x5c9   :  { %8368 = vmatpush.bf16.msrb.mxu0 %v12217_v0  ;;  %v14029_v0 = vld [vmem:[#allocation13 + $0x464] sm:$0xf]  ;;  %v6663_v7 = vadd.f32 %v6662_v6, %v6649_v60  ;;  %v6665_v16 = vadd.f32 %v6664_v44, %v6651_v63  ;;  %v14092_v63 = vld [vmem:[#allocation13 + $0x65c] sm:$0xf] }
 0x5ca   :  { %v12721_v3 = vor.u32 %v14029_v0, %v12718_v61  ;;  %v14001_v44 = vld [vmem:[#allocation13 + $0x384] sm:$0xf]  ;;  %v14099_v61 = vld [vmem:[#allocation13 + $0x694] sm:$0xf] }
 0x5cb   :  { %v14832_v22 = vpop.f32.mrf.mxu2  ;;  %v12609_v11 = vor.u32 %v14001_v44, %v12606_v45 }
 0x5cc   :  { %8394 = vmatpush.bf16.msrb.mxu2 %v12721_v3  ;;  %v6677_v18 = vadd.f32 %v14832_v22, %v6663_v7  ;;  %8353 = vmatpush.bf16.msra.mxu3 %v12913_v12  ;;  %v14067_v22 = vld [vmem:[#allocation13 + $0x590] sm:$0xf0]  ;;  %v6720_v43 = vpop.f32.mrf.mxu1  ;;  %v12276_v12 = vld [vmem:[#allocation13 + $0xe8] sm:$0xf] }
 0x5cd   :  { %8369 = vmatpush.bf16.msrb.mxu0 %v12189_v10  ;;  %v6704_v10 = vpop.f32.mrf.mxu0  ;;  %v12857_v31 = vor.u32 %v14067_v22, %v12856_v59  ;;  %v12277_v42 = vor.u32 %v13921_v14, %v12276_v12  ;;  %v13939_v12 = vld [vmem:[#allocation13 + $0x194] sm:$0xf] }
 0x5ce   :  { %v6705_v46 = vadd.f32 %v6704_v10, %v5992_v30  ;;  %v12305_v10 = vor.u32 %v13928_v28, %v12304_v62  ;;  %v12164_v28 = vld [vmem:[#allocation13 + $0x8] sm:$0xf] }
 0x5d0   :  { %8395 = vmatpush.bf16.msrb.mxu2 %v12693_v1  ;;  %v6719_v56 = vadd.f32 %v6718_v19, %v6705_v46  ;;  %v13900_v46 = vld [vmem:[#allocation13 + $0x58] sm:$0xf0] }
 0x5d1   :  { %8370 = vmatpush.bf16.msrb.mxu0 %v12161_v21  ;;  %v12884_v21 = vld [vmem:[#allocation13 + $0x5b0] sm:$0xf] }
 0x5d2   :  { %v12885_v9 = vor.u32 %v14074_v24, %v12884_v21 }
 0x5d3   :  { %v6678_v53 = vpop.f32.mrf.mxu2 }
 0x5d4   :  { %v6679_v52 = vadd.f32 %v6678_v53, %v6665_v16  ;;  %8354 = vmatpush.bf16.msra.mxu3 %v12885_v9  ;;  %8396 = vmatpush.bf16.msrb.mxu2 %v12665_v5  ;;  %v13026_v53 = vld [vmem:[#allocation13 + $0x6e4] sm:$0xf0]  ;;  %v13998_v5 = vld [vmem:[#allocation13 + $0x368] sm:$0xf0] }
 0x5d5   :  { %v6706_v37 = vpop.f32.mrf.mxu0  ;;  %v13029_v55 = vor.u32 %v14106_v38, %v13026_v53  ;;  %v6774_v1 = vpop.f32.mrf.mxu1  ;;  %v12192_v38 = vld [vmem:[#allocation13 + $0x40] sm:$0xf]  ;;  %v13984_v53 = vld [vmem:[#allocation13 + $0x2f8] sm:$0xf0] }
 0x5d6   :  { %v6707_v0 = vadd.f32 %v6706_v37, %v5992_v30  ;;  %v13991_v37 = vld [vmem:[#allocation13 + $0x330] sm:$0xf0] }
 0x5d7   :  { %v12557_v45 = vor.u32 %v13991_v37, %v12556_v33  ;;  %v14047_v33 = vld [vmem:[#allocation13 + $0x4f0] sm:$0xf0]  ;;  %v12306_v37 = vld [vmem:[#allocation13 + $0x13c] sm:$0xf0] }
 0x5d8   :  { %8355 = vmatpush.bf16.msra.mxu3 %v12857_v31  ;;  %8397 = vmatpush.bf16.msrb.mxu2 %v12637_v35  ;;  %v6721_v7 = vadd.f32 %v6720_v43, %v6707_v0  ;;  %v12193_v0 = vor.u32 %v13900_v46, %v12192_v38  ;;  %v12278_v38 = vld [vmem:[#allocation13 + $0x104] sm:$0xf0] }
 0x5dc   :  { %v6732_v6 = vpop.f32.mrf.mxu2  ;;  %8356 = vmatpush.bf16.msra.mxu3 %v12829_v20  ;;  %8398 = vmatpush.bf16.msrb.mxu2 %v12609_v11 }
 0x5dd   :  { %v6733_v60 = vadd.f32 %v6732_v6, %v6719_v56  ;;  %v6760_v8 = vpop.f32.mrf.mxu0  ;;  %v12248_v6 = vld [vmem:[#allocation13 + $0xb0] sm:$0xf]  ;;  %v6776_v20 = vpop.f32.mrf.mxu1 }
 0x5de   :  { %v12249_v31 = vor.u32 %v13914_v27, %v12248_v6  ;;  %v14054_v27 = vld [vmem:[#allocation13 + $0x528] sm:$0xf0] }
 0x5e0   :  { %8405 = vmatpush.bf16.msrb.mxu3 %v13029_v55 }
 0x5e4   :  { %v6734_v57 = vpop.f32.mrf.mxu2 }
 0x5e5   :  { %v6735_v13 = vadd.f32 %v6734_v57, %v6721_v7  ;;  %v6762_v26 = vpop.f32.mrf.mxu0  ;;  %v14071_v57 = vld [vmem:[#allocation13 + $0x5b4] sm:$0xf]  ;;  %v13977_v7 = vld [vmem:[#allocation13 + $0x2c0] sm:$0xf0] }
 0x5ea   :  { %v6690_v17 = vpop.f32.mrf.mxu3 }
 0x5eb   :  { %v6691_v23 = vadd.f32 %v6690_v17, %v6677_v18  ;;  %v12998_v17 = vld [vmem:[#allocation13 + $0x6ac] sm:$0xf0]  ;;  %v12970_v18 = vld [vmem:[#allocation13 + $0x674] sm:$0xf0] }
 0x5ec   :  { %v13001_v3 = vor.u32 %v14099_v61, %v12998_v17  ;;  %v12973_v16 = vor.u32 %v14092_v63, %v12970_v18  ;;  %v6788_v9 = vpop.f32.mrf.mxu2  ;;  %v13893_v61 = vld [vmem:[#allocation13 + $0x20] sm:$0xf0]  ;;  %v12500_v17 = vld [vmem:[#allocation13 + $0x2a8] sm:$0xf] }
 0x5ed   :  { %v6863_v29 = vmul.f32 0.01, %v6691_v23 }
 0x5ee   :  { %8406 = vmatpush.bf16.msrb.mxu3 %v13001_v3 }
 0x5ef   :  { %v6871_v36 = vmax.f32 %v6691_v23, %v6863_v29  ;;  %v5993_v23 = vperm.slane %v14837_v39, 2  ;;  %v14085_v29 = vld [vmem:[#allocation13 + $0x624] sm:$0xf] }
 0x5f1   :  { %v6761_v34 = vadd.f32 %v6760_v8, %v5993_v23  ;;  %v6763_v50 = vadd.f32 %v6762_v26, %v5993_v23  ;;  %v12858_v8 = vld [vmem:[#allocation13 + $0x594] sm:$0xf0]  ;;  %v13970_v23 = vld [vmem:[#allocation13 + $0x288] sm:$0xf0] }
 0x5f2   :  { %v6692_v4 = vpop.f32.mrf.mxu3  ;;  %8407 = vmatpush.bf16.msrb.mxu3 %v12973_v16  ;;  %v12472_v16 = vld [vmem:[#allocation13 + $0x270] sm:$0xf] }
 0x5f3   :  { %v6693_v25 = vadd.f32 %v6692_v4, %v6679_v52  ;;  %v12584_v52 = vld [vmem:[#allocation13 + $0x350] sm:$0xf] }
 0x5f4   :  { %v12585_v49 = vor.u32 %v13998_v5, %v12584_v52  ;;  %v6790_v55 = vpop.f32.mrf.mxu2  ;;  %v13932_v52 = vld [vmem:[#allocation13 + $0x15c] sm:$0xf]  ;;  %v12334_v5 = vld [vmem:[#allocation13 + $0x174] sm:$0xf0] }
 0x5f5   :  { %v6867_v32 = vmul.f32 0.01, %v6693_v25  ;;  %v6830_v46 = vpop.f32.mrf.mxu1 }
 0x5f7   :  { %v6875_v2 = vmax.f32 %v6693_v25, %v6867_v32  ;;  %v12942_v25 = vld [vmem:[#allocation13 + $0x63c] sm:$0xf0]  ;;  %v13907_v32 = vld [vmem:[#allocation13 + $0x90] sm:$0xf0] }
 0x5f8   :  { %v12945_v59 = vor.u32 %v14085_v29, %v12942_v25  ;;  %v12221_v44 = vor.u32 %v13907_v32, %v12220_v41  ;;  %v13963_v41 = vld [vmem:[#allocation13 + $0x250] sm:$0xf0]  ;;  %v12780_v32 = vld [vmem:[#allocation13 + $0x4d8] sm:$0xf] }
 0x5f9   :  { %v14843_v47 = vpack.c.bf16 %v6875_v2, %v6871_v36  ;;  %v14078_v36 = vld [vmem:[#allocation13 + $0x5ec] sm:$0xf]  ;;  %v12914_v2 = vld [vmem:[#allocation13 + $0x604] sm:$0xf0]  ;;  %v12781_v26 = vor.u32 %v14047_v33, %v12780_v32 }
 0x5fa   :  { %v6746_v54 = vpop.f32.mrf.mxu3  ;;  %8408 = vmatpush.bf16.msrb.mxu3 %v12945_v59  ;;  %v12917_v43 = vor.u32 %v14078_v36, %v12914_v2  ;;  %v12473_v59 = vor.u32 %v13970_v23, %v12472_v16  ;;  %v6816_v2 = vpop.f32.mrf.mxu0 }
 0x5fb   :  { %8315 = vmatmul.bf16.vlgmr.msra.gmra.mxu0 %v14843_v47  ;;  %v6747_v51 = vadd.f32 %v6746_v54, %v6733_v60  ;;  %v12886_v54 = vld [vmem:[#allocation13 + $0x5cc] sm:$0xf0]  ;;  %v12529_v60 = vor.u32 %v13984_v53, %v12528_v48  ;;  %v5994_v48 = vperm.slane %v14837_v39, 3 }
 0x5fc   :  { %8419 = vmatpush.bf16.msra.mxu0 %v12361_v40  ;;  %v6775_v40 = vadd.f32 %v6774_v1, %v6761_v34  ;;  %v12889_v56 = vor.u32 %v14071_v57, %v12886_v54  ;;  %v12165_v1 = vor.u32 %v13893_v61, %v12164_v28  ;;  %v13925_v34 = vld [vmem:[#allocation13 + $0x124] sm:$0xf]  ;;  %v12388_v54 = vld [vmem:[#allocation13 + $0x1c8] sm:$0xf]  ;;  %v12586_v28 = vld [vmem:[#allocation13 + $0x36c] sm:$0xf0] }
 0x5fd   :  { %v6864_v21 = vmul.f32 0.01, %v6747_v51 }
 0x5fe   :  { %v6789_v11 = vadd.f32 %v6788_v9, %v6775_v40  ;;  %8409 = vmatpush.bf16.msrb.mxu3 %v12917_v43  ;;  %v14057_v9 = vld [vmem:[#allocation13 + $0x544] sm:$0xf]  ;;  %v12416_v43 = vld [vmem:[#allocation13 + $0x200] sm:$0xf]  ;;  %v13956_v40 = vld [vmem:[#allocation13 + $0x218] sm:$0xf0] }
 0x5ff   :  { %v6872_v22 = vmax.f32 %v6747_v51, %v6864_v21  ;;  %v14064_v51 = vld [vmem:[#allocation13 + $0x57c] sm:$0xf]  ;;  %v12808_v21 = vld [vmem:[#allocation13 + $0x510] sm:$0xf] }
 0x600   :  { %8420 = vmatpush.bf16.msra.mxu0 %v12333_v58  ;;  %v6777_v58 = vadd.f32 %v6776_v20, %v6763_v50  ;;  %v12861_v14 = vor.u32 %v14064_v51, %v12858_v8  ;;  %v12752_v20 = vld [vmem:[#allocation13 + $0x4a0] sm:$0xf]  ;;  %v12417_v50 = vor.u32 %v13956_v40, %v12416_v43  ;;  %v14026_v8 = vld [vmem:[#allocation13 + $0x448] sm:$0xf0]  ;;  %v13943_v43 = vld [vmem:[#allocation13 + $0x1b0] sm:$0xf0] }
 0x602   :  { %v6748_v19 = vpop.f32.mrf.mxu3  ;;  %v6791_v3 = vadd.f32 %v6790_v55, %v6777_v58  ;;  %8410 = vmatpush.bf16.msrb.mxu3 %v12889_v56  ;;  %v13949_v55 = vld [vmem:[#allocation13 + $0x1e0] sm:$0xf0]  ;;  %v12724_v56 = vld [vmem:[#allocation13 + $0x468] sm:$0xf] }
 0x603   :  { %v6749_v24 = vadd.f32 %v6748_v19, %v6735_v13  ;;  %v12362_v13 = vld [vmem:[#allocation13 + $0x1ac] sm:$0xf0]  ;;  %v12501_v19 = vor.u32 %v13977_v7, %v12500_v17  ;;  %v14033_v58 = vld [vmem:[#allocation13 + $0x480] sm:$0xf0]  ;;  %v12389_v61 = vor.u32 %v13949_v55, %v12388_v54  ;;  %v6817_v7 = vadd.f32 %v6816_v2, %v5994_v48  ;;  %v13967_v54 = vld [vmem:[#allocation13 + $0x274] sm:$0xf] }
 0x604   :  { %8421 = vmatpush.bf16.msra.mxu0 %v12305_v10  ;;  %v12365_v6 = vor.u32 %v13939_v12, %v12362_v13  ;;  %v12725_v39 = vor.u32 %v14033_v58, %v12724_v56  ;;  %v12222_v12 = vld [vmem:[#allocation13 + $0x94] sm:$0xf0]  ;;  %v6818_v13 = vpop.f32.mrf.mxu0  ;;  %v12474_v55 = vld [vmem:[#allocation13 + $0x28c] sm:$0xf0]  ;;  %v14051_v56 = vld [vmem:[#allocation13 + $0x514] sm:$0xf] }
 0x605   :  { %v6868_v4 = vmul.f32 0.01, %v6749_v24  ;;  %v12810_v58 = vld [vmem:[#allocation13 + $0x52c] sm:$0xf0] }
 0x606   :  { %8411 = vmatpush.bf16.msrb.mxu3 %v12861_v14 }
 0x607   :  { %v6876_v30 = vmax.f32 %v6749_v24, %v6868_v4 }
 0x608   :  { %8422 = vmatpush.bf16.msra.mxu0 %v12277_v42  ;;  %v12830_v42 = vld [vmem:[#allocation13 + $0x55c] sm:$0xf0] }
 0x609   :  { %v14847_v35 = vpack.c.bf16 %v6876_v30, %v6872_v22  ;;  %v12833_v4 = vor.u32 %v14057_v9, %v12830_v42  ;;  %v12809_v30 = vor.u32 %v14054_v27, %v12808_v21  ;;  %v12668_v21 = vld [vmem:[#allocation13 + $0x3f8] sm:$0xf]  ;;  %v14019_v42 = vld [vmem:[#allocation13 + $0x410] sm:$0xf0]  ;;  %v13897_v27 = vld [vmem:[#allocation13 + $0x44] sm:$0xf] }
 0x60a   :  { %v6802_v15 = vpop.f32.mrf.mxu3 }
 0x60b   :  { %8329 = vmatmul.bf16.vlgmr.msra.gmra.mxu1 %v14847_v35  ;;  %8371 = vmatmul.bf16.vlgmr.msrb.gmra.mxu0 %v14843_v47  ;;  %v6803_v62 = vadd.f32 %v6802_v15, %v6789_v11  ;;  %v12309_v15 = vor.u32 %v13925_v34, %v12306_v37  ;;  %v13890_v34 = vld [vmem:[#allocation13 + $0xc] sm:$0xf]  ;;  %v12166_v37 = vld [vmem:[#allocation13 + $0x24] sm:$0xf0] }
 0x60c   :  { %8423 = vmatpush.bf16.msra.mxu0 %v12249_v31  ;;  %8433 = vmatpush.bf16.msra.mxu1 %v12585_v49  ;;  %v12337_v31 = vor.u32 %v13932_v52, %v12334_v5  ;;  %v12444_v49 = vld [vmem:[#allocation13 + $0x238] sm:$0xf]  ;;  %v6844_v11 = vpop.f32.mrf.mxu2  ;;  %v12194_v52 = vld [vmem:[#allocation13 + $0x5c] sm:$0xf0] }
 0x60d   :  { %v6865_v63 = vmul.f32 0.01, %v6803_v62  ;;  %8412 = vmatpush.bf16.msrb.mxu3 %v12833_v4  ;;  %v12445_v36 = vor.u32 %v13963_v41, %v12444_v49  ;;  %v13981_v4 = vld [vmem:[#allocation13 + $0x2e4] sm:$0xf]  ;;  %v12640_v49 = vld [vmem:[#allocation13 + $0x3c0] sm:$0xf] }
 0x60e   :  { %v14012_v41 = vld [vmem:[#allocation13 + $0x3d8] sm:$0xf0] }
 0x60f   :  { %v6873_v29 = vmax.f32 %v6803_v62, %v6865_v63  ;;  %v13911_v62 = vld [vmem:[#allocation13 + $0xb4] sm:$0xf]  ;;  %v13988_v63 = vld [vmem:[#allocation13 + $0x31c] sm:$0xf] }
 0x610   :  { %8424 = vmatpush.bf16.msra.mxu0 %v12221_v44  ;;  %8434 = vmatpush.bf16.msra.mxu1 %v12557_v45  ;;  %v14040_v44 = vld [vmem:[#allocation13 + $0x4b8] sm:$0xf0]  ;;  %v13918_v45 = vld [vmem:[#allocation13 + $0xec] sm:$0xf] }
 0x611   :  { %v12753_v53 = vor.u32 %v14040_v44, %v12752_v20  ;;  %v12281_v57 = vor.u32 %v13918_v45, %v12278_v38  ;;  %v12641_v44 = vor.u32 %v14012_v41, %v12640_v49  ;;  %v12169_v45 = vor.u32 %v13890_v34, %v12166_v37  ;;  %v12612_v38 = vld [vmem:[#allocation13 + $0x388] sm:$0xf]  ;;  %v13946_v49 = vld [vmem:[#allocation13 + $0x1cc] sm:$0xf]  ;;  %v12256_v37 = vld [vmem:[#allocation13 + $0xb8] sm:$0xf] }
 0x612   :  { %v6804_v10 = vpop.f32.mrf.mxu3  ;;  %v12390_v41 = vld [vmem:[#allocation13 + $0x1e4] sm:$0xf0] }
 0x613   :  { %v6805_v18 = vadd.f32 %v6804_v10, %v6791_v3  ;;  %v12696_v3 = vld [vmem:[#allocation13 + $0x430] sm:$0xf]  ;;  %v13904_v10 = vld [vmem:[#allocation13 + $0x7c] sm:$0xf]  ;;  %v12726_v34 = vld [vmem:[#allocation13 + $0x484] sm:$0xf0] }
 0x614   :  { %8425 = vmatpush.bf16.msra.mxu0 %v12193_v0  ;;  %8435 = vmatpush.bf16.msra.mxu1 %v12529_v60  ;;  %v12250_v0 = vld [vmem:[#allocation13 + $0xcc] sm:$0xf0]  ;;  %v13995_v60 = vld [vmem:[#allocation13 + $0x354] sm:$0xf]  ;;  %v12697_v16 = vor.u32 %v14026_v8, %v12696_v3  ;;  %v12225_v23 = vor.u32 %v13904_v10, %v12222_v12  ;;  %v6846_v5 = vpop.f32.mrf.mxu2  ;;  %v12477_v3 = vor.u32 %v13967_v54, %v12474_v55  ;;  %v13960_v10 = vld [vmem:[#allocation13 + $0x23c] sm:$0xf] }
 0x615   :  { %v6869_v24 = vmul.f32 0.01, %v6805_v18  ;;  %v12253_v17 = vor.u32 %v13911_v62, %v12250_v0  ;;  %v12589_v51 = vor.u32 %v13995_v60, %v12586_v28  ;;  %v12340_v60 = vld [vmem:[#allocation13 + $0x160] sm:$0xf]  ;;  %v13936_v28 = vld [vmem:[#allocation13 + $0x178] sm:$0xf0] }
 0x616   :  { %v14103_v8 = vld [vmem:[#allocation13 + $0x6b0] sm:$0xf0]  ;;  %v12341_v12 = vor.u32 %v13936_v28, %v12340_v60  ;;  %v14016_v60 = vld [vmem:[#allocation13 + $0x3fc] sm:$0xf]  ;;  %v12670_v28 = vld [vmem:[#allocation13 + $0x414] sm:$0xf0] }
 0x617   :  { %v6877_v25 = vmax.f32 %v6805_v18, %v6869_v24  ;;  %v12558_v18 = vld [vmem:[#allocation13 + $0x334] sm:$0xf0]  ;;  %v6819_v24 = vadd.f32 %v6818_v13, %v5994_v48  ;;  %v13032_v48 = vld [vmem:[#allocation13 + $0x6d0] sm:$0xf] }
 0x618   :  { %8426 = vmatpush.bf16.msra.mxu0 %v12165_v1  ;;  %8436 = vmatpush.bf16.msra.mxu1 %v12501_v19  ;;  %v6831_v1 = vadd.f32 %v6830_v46, %v6817_v7  ;;  %v6832_v19 = vpop.f32.mrf.mxu1  ;;  %v12561_v9 = vor.u32 %v13988_v63, %v12558_v18  ;;  %v14005_v46 = vld [vmem:[#allocation13 + $0x3a0] sm:$0xf0]  ;;  %v12813_v7 = vor.u32 %v14051_v56, %v12810_v58  ;;  %v12446_v13 = vld [vmem:[#allocation13 + $0x254] sm:$0xf0]  ;;  %v12312_v18 = vld [vmem:[#allocation13 + $0x128] sm:$0xf] }
 0x619   :  { %v14851_v22 = vpack.c.bf16 %v6877_v25, %v6873_v29  ;;  %v12530_v29 = vld [vmem:[#allocation13 + $0x2fc] sm:$0xf0]  ;;  %v6833_v25 = vadd.f32 %v6832_v19, %v6819_v24  ;;  %v12782_v63 = vld [vmem:[#allocation13 + $0x4f4] sm:$0xf0]  ;;  %v14096_v24 = vld [vmem:[#allocation13 + $0x678] sm:$0xf0] }
 0x61a   :  { %v12533_v33 = vor.u32 %v13981_v4, %v12530_v29  ;;  %v13922_v4 = vld [vmem:[#allocation13 + $0x108] sm:$0xf0]  ;;  %v12892_v56 = vld [vmem:[#allocation13 + $0x5b8] sm:$0xf]  ;;  %v14075_v58 = vld [vmem:[#allocation13 + $0x5d0] sm:$0xf0] }
 0x61b   :  { %8343 = vmatmul.bf16.vlgmr.msra.gmra.mxu2 %v14851_v22  ;;  %8385 = vmatmul.bf16.vlgmr.msrb.gmra.mxu1 %v14847_v35  ;;  %v6847_v32 = vadd.f32 %v6846_v5, %v6833_v25  ;;  %v12284_v5 = vld [vmem:[#allocation13 + $0xf0] sm:$0xf]  ;;  %v12948_v25 = vld [vmem:[#allocation13 + $0x628] sm:$0xf] }
 0x61c   :  { %8475 = vmatpush.bf16.msrb.mxu0 %v12365_v6  ;;  %8437 = vmatpush.bf16.msra.mxu1 %v12473_v59  ;;  %v6845_v6 = vadd.f32 %v6844_v11, %v6831_v1  ;;  %v13929_v1 = vld [vmem:[#allocation13 + $0x140] sm:$0xf0] }
 0x61d   :  { %8427 = vmatmul.bf16.vlgmr.msra.gmra.mxu0 %v14843_v47  ;;  %8447 = vmatpush.bf16.msra.mxu2 %v12809_v30  ;;  %v12669_v30 = vor.u32 %v14019_v42, %v12668_v21  ;;  %v12976_v21 = vld [vmem:[#allocation13 + $0x660] sm:$0xf] }
 0x61e   :  { %v12418_v42 = vld [vmem:[#allocation13 + $0x21c] sm:$0xf0]  ;;  %v12977_v29 = vor.u32 %v14096_v24, %v12976_v21  ;;  %v13940_v24 = vld [vmem:[#allocation13 + $0x19c] sm:$0xf] }
 0x620   :  { %8476 = vmatpush.bf16.msrb.mxu0 %v12337_v31  ;;  %8438 = vmatpush.bf16.msra.mxu1 %v12445_v36  ;;  %v12197_v31 = vor.u32 %v13897_v27, %v12194_v52  ;;  %v13974_v36 = vld [vmem:[#allocation13 + $0x2ac] sm:$0xf]  ;;  %v14037_v27 = vld [vmem:[#allocation13 + $0x4a4] sm:$0xf]  ;;  %v12754_v52 = vld [vmem:[#allocation13 + $0x4bc] sm:$0xf0] }
 0x621   :  { %8448 = vmatpush.bf16.msra.mxu2 %v12781_v26  ;;  %v12502_v26 = vld [vmem:[#allocation13 + $0x2c4] sm:$0xf0] }
 0x622   :  { %v12505_v11 = vor.u32 %v13974_v36, %v12502_v26  ;;  %v13915_v36 = vld [vmem:[#allocation13 + $0xd0] sm:$0xf0] }
 0x623   :  { %v13999_v26 = vld [vmem:[#allocation13 + $0x370] sm:$0xf0] }
 0x624   :  { %8477 = vmatpush.bf16.msrb.mxu0 %v12309_v15  ;;  %8439 = vmatpush.bf16.msra.mxu1 %v12417_v50  ;;  %v12368_v15 = vld [vmem:[#allocation13 + $0x198] sm:$0xf] }
 0x625   :  { %8449 = vmatpush.bf16.msra.mxu2 %v12753_v53  ;;  %v12369_v53 = vor.u32 %v13943_v43, %v12368_v15  ;;  %v12393_v43 = vor.u32 %v13946_v49, %v12390_v41  ;;  %v13971_v49 = vld [vmem:[#allocation13 + $0x290] sm:$0xf0]  ;;  %v12816_v41 = vld [vmem:[#allocation13 + $0x518] sm:$0xf] }
 0x628   :  { %8478 = vmatpush.bf16.msrb.mxu0 %v12281_v57  ;;  %8440 = vmatpush.bf16.msra.mxu1 %v12389_v61  ;;  %v14110_v57 = vld [vmem:[#allocation13 + $0x6e8] sm:$0xf0]  ;;  %v12613_v61 = vor.u32 %v14005_v46, %v12612_v38  ;;  %v14023_v46 = vld [vmem:[#allocation13 + $0x434] sm:$0xf] }
 0x629   :  { %8450 = vmatpush.bf16.msra.mxu2 %v12725_v39  ;;  %v13033_v39 = vor.u32 %v14110_v57, %v13032_v48  ;;  %v12698_v48 = vld [vmem:[#allocation13 + $0x44c] sm:$0xf0]  ;;  %v13992_v57 = vld [vmem:[#allocation13 + $0x338] sm:$0xf0] }
 0x62a   :  { %v6858_v14 = vpop.f32.mrf.mxu3  ;;  %v12701_v55 = vor.u32 %v14023_v46, %v12698_v48  ;;  %v14048_v46 = vld [vmem:[#allocation13 + $0x4f8] sm:$0xf0]  ;;  %v13926_v48 = vld [vmem:[#allocation13 + $0x12c] sm:$0xf] }
 0x62b   :  { %8399 = vmatmul.bf16.vlgmr.msrb.gmra.mxu2 %v14851_v22  ;;  %8441 = vmatmul.bf16.vlgmr.msra.gmra.mxu1 %v14847_v35  ;;  %v6859_v59 = vadd.f32 %v6858_v14, %v6845_v6  ;;  %v14044_v14 = vld [vmem:[#allocation13 + $0x4dc] sm:$0xf]  ;;  %v13953_v6 = vld [vmem:[#allocation13 + $0x204] sm:$0xf] }
 0x62c   :  { %8479 = vmatpush.bf16.msrb.mxu0 %v12253_v17  ;;  %8489 = vmatpush.bf16.msrb.mxu1 %v12589_v51  ;;  %v13004_v51 = vld [vmem:[#allocation13 + $0x698] sm:$0xf] }
 0x62d   :  { %8451 = vmatpush.bf16.msra.mxu2 %v12697_v16  ;;  %v6866_v40 = vmul.f32 0.01, %v6859_v59  ;;  %v13005_v19 = vor.u32 %v14103_v8, %v13004_v51  ;;  %v12449_v16 = vor.u32 %v13960_v10, %v12446_v13  ;;  %v12893_v51 = vor.u32 %v14075_v58, %v12892_v56  ;;  %v12864_v10 = vld [vmem:[#allocation13 + $0x580] sm:$0xf]  ;;  %v12424_v58 = vld [vmem:[#allocation13 + $0x208] sm:$0xf] }
 0x62e   :  { %v12673_v8 = vor.u32 %v14016_v60, %v12670_v28  ;;  %v14041_v60 = vld [vmem:[#allocation13 + $0x4c0] sm:$0xf0]  ;;  %v13919_v28 = vld [vmem:[#allocation13 + $0xf4] sm:$0xf] }
 0x62f   :  { %v6874_v62 = vmax.f32 %v6859_v59, %v6866_v40  ;;  %v12421_v59 = vor.u32 %v13953_v6, %v12418_v42  ;;  %v12370_v6 = vld [vmem:[#allocation13 + $0x1b4] sm:$0xf0]  ;;  %v12836_v42 = vld [vmem:[#allocation13 + $0x548] sm:$0xf] }
 0x630   :  { %8480 = vmatpush.bf16.msrb.mxu0 %v12225_v23  ;;  %8490 = vmatpush.bf16.msrb.mxu1 %v12561_v9  ;;  %v12785_v23 = vor.u32 %v14044_v14, %v12782_v63  ;;  %v12313_v9 = vor.u32 %v13929_v1, %v12312_v18  ;;  %v14009_v63 = vld [vmem:[#allocation13 + $0x3c4] sm:$0xf]  ;;  %v12642_v18 = vld [vmem:[#allocation13 + $0x3dc] sm:$0xf0]  ;;  %v12172_v1 = vld [vmem:[#allocation13 + $0x10] sm:$0xf] }
 0x631   :  { %8452 = vmatpush.bf16.msra.mxu2 %v12669_v30  ;;  %v12757_v30 = vor.u32 %v14037_v27, %v12754_v52  ;;  %v14061_v27 = vld [vmem:[#allocation13 + $0x560] sm:$0xf0]  ;;  %v14002_v52 = vld [vmem:[#allocation13 + $0x38c] sm:$0xf] }
 0x632   :  { %v6860_v2 = vpop.f32.mrf.mxu3 }
 0x633   :  { %v6861_v20 = vadd.f32 %v6860_v2, %v6847_v32  ;;  %v12285_v32 = vor.u32 %v13922_v4, %v12284_v5  ;;  %v12592_v2 = vld [vmem:[#allocation13 + $0x358] sm:$0xf] }
 0x634   :  { %8481 = vmatpush.bf16.msrb.mxu0 %v12197_v31  ;;  %8491 = vmatpush.bf16.msrb.mxu1 %v12533_v33  ;;  %v14089_v31 = vld [vmem:[#allocation13 + $0x640] sm:$0xf0]  ;;  %v14030_v33 = vld [vmem:[#allocation13 + $0x46c] sm:$0xf]  ;;  %v12593_v38 = vor.u32 %v13999_v26, %v12592_v2 }
 0x635   :  { %v6870_v50 = vmul.f32 0.01, %v6861_v20  ;;  %8453 = vmatpush.bf16.msra.mxu2 %v12641_v44  ;;  %v12949_v15 = vor.u32 %v14089_v31, %v12948_v25  ;;  %v12729_v40 = vor.u32 %v14030_v33, %v12726_v34  ;;  %v14082_v44 = vld [vmem:[#allocation13 + $0x608] sm:$0xf0]  ;;  %v14107_v25 = vld [vmem:[#allocation13 + $0x6d4] sm:$0xf] }
 0x636   :  { %v12480_v31 = vld [vmem:[#allocation13 + $0x278] sm:$0xf]  ;;  %v14055_v33 = vld [vmem:[#allocation13 + $0x530] sm:$0xf0]  ;;  %v13933_v34 = vld [vmem:[#allocation13 + $0x164] sm:$0xf] }
 0x637   :  { %v6878_v0 = vmax.f32 %v6861_v20, %v6870_v50  ;;  %v12920_v20 = vld [vmem:[#allocation13 + $0x5f0] sm:$0xf]  ;;  %v12228_v50 = vld [vmem:[#allocation13 + $0x80] sm:$0xf]  ;;  %v12481_v26 = vor.u32 %v13971_v49, %v12480_v31  ;;  %v14072_v31 = vld [vmem:[#allocation13 + $0x5bc] sm:$0xf] }
 0x638   :  { %8482 = vmatpush.bf16.msrb.mxu0 %v12169_v45  ;;  %8492 = vmatpush.bf16.msrb.mxu1 %v12505_v11  ;;  %v12257_v45 = vor.u32 %v13915_v36, %v12256_v37  ;;  %v13908_v11 = vld [vmem:[#allocation13 + $0x98] sm:$0xf0]  ;;  %v12921_v54 = vor.u32 %v14082_v44, %v12920_v20  ;;  %v12342_v37 = vld [vmem:[#allocation13 + $0x17c] sm:$0xf0]  ;;  %v12894_v49 = vld [vmem:[#allocation13 + $0x5d4] sm:$0xf0] }
 0x639   :  { %v14859_v17 = vpack.c.bf16 %v6878_v0, %v6874_v62  ;;  %8454 = vmatpush.bf16.msra.mxu2 %v12613_v61  ;;  %v12229_v62 = vor.u32 %v13908_v11, %v12228_v50  ;;  %v12200_v61 = vld [vmem:[#allocation13 + $0x48] sm:$0xf]  ;;  %v12345_v20 = vor.u32 %v13933_v34, %v12342_v37  ;;  %v12452_v44 = vld [vmem:[#allocation13 + $0x240] sm:$0xf]  ;;  %v14020_v37 = vld [vmem:[#allocation13 + $0x418] sm:$0xf0] }
 0x63a   :  { %v12314_v50 = vld [vmem:[#allocation13 + $0x144] sm:$0xf0] }
 0x63b   :  { %8357 = vmatmul.bf16.vlgmr.msra.gmra.mxu3 %v14859_v17  ;;  %8483 = vmatmul.bf16.vlgmr.msrb.gmra.mxu0 %v14843_v47  ;;  %v12317_v56 = vor.u32 %v13926_v48, %v12314_v50  ;;  %v13891_v50 = vld [vmem:[#allocation13 + $0x14] sm:$0xf] }
 0x63c   :  { %8531 = vmatpush.bf16.msra.mxu0 %v12369_v53  ;;  %8461 = vmatpush.bf16.msra.mxu3 %v13033_v39  ;;  %v12564_v53 = vld [vmem:[#allocation13 + $0x320] sm:$0xf]  ;;  %v13901_v39 = vld [vmem:[#allocation13 + $0x60] sm:$0xf0] }
 0x63d   :  { %8493 = vmatpush.bf16.msrb.mxu1 %v12477_v3  ;;  %8503 = vmatpush.bf16.msrb.mxu2 %v12813_v7  ;;  %v12565_v0 = vor.u32 %v13992_v57, %v12564_v53  ;;  %v12536_v3 = vld [vmem:[#allocation13 + $0x2e8] sm:$0xf]  ;;  %v13985_v7 = vld [vmem:[#allocation13 + $0x300] sm:$0xf0]  ;;  %v12201_v13 = vor.u32 %v13901_v39, %v12200_v61  ;;  %v12286_v61 = vld [vmem:[#allocation13 + $0x10c] sm:$0xf0] }
 0x63e   :  { %8455 = vmatmul.bf16.vlgmr.msra.gmra.mxu2 %v14851_v22  ;;  %v12537_v14 = vor.u32 %v13985_v7, %v12536_v3  ;;  %v14093_v57 = vld [vmem:[#allocation13 + $0x664] sm:$0xf]  ;;  %v14086_v7 = vld [vmem:[#allocation13 + $0x62c] sm:$0xf] }
 0x640   :  { %8532 = vmatpush.bf16.msra.mxu0 %v12341_v12  ;;  %8462 = vmatpush.bf16.msra.mxu3 %v13005_v19  ;;  %v14068_v12 = vld [vmem:[#allocation13 + $0x598] sm:$0xf0]  ;;  %v13894_v19 = vld [vmem:[#allocation13 + $0x28] sm:$0xf0] }
 0x641   :  { %8494 = vmatpush.bf16.msrb.mxu1 %v12449_v16  ;;  %8504 = vmatpush.bf16.msrb.mxu2 %v12785_v23  ;;  %v12508_v16 = vld [vmem:[#allocation13 + $0x2b0] sm:$0xf]  ;;  %v13978_v23 = vld [vmem:[#allocation13 + $0x2c8] sm:$0xf0]  ;;  %v12865_v21 = vor.u32 %v14068_v12, %v12864_v10  ;;  %v12173_v5 = vor.u32 %v13894_v19, %v12172_v1  ;;  %v12289_v10 = vor.u32 %v13919_v28, %v12286_v61  ;;  %v12258_v1 = vld [vmem:[#allocation13 + $0xd4] sm:$0xf0] }
 0x642   :  { %v12509_v4 = vor.u32 %v13978_v23, %v12508_v16  ;;  %v12396_v12 = vld [vmem:[#allocation13 + $0x1d0] sm:$0xf]  ;;  %v13996_v16 = vld [vmem:[#allocation13 + $0x35c] sm:$0xf]  ;;  %v12594_v23 = vld [vmem:[#allocation13 + $0x374] sm:$0xf0] }
 0x643   :  { %v13040_v28 = vld [vmem:[#allocation13 + $0x6d8] sm:$0xf]  ;;  %v14111_v61 = vld [vmem:[#allocation13 + $0x6f0] sm:$0xf0] }
 0x644   :  { %8533 = vmatpush.bf16.msra.mxu0 %v12313_v9  ;;  %8463 = vmatpush.bf16.msra.mxu3 %v12977_v29  ;;  %v12645_v9 = vor.u32 %v14009_v63, %v12642_v18  ;;  %v12614_v29 = vld [vmem:[#allocation13 + $0x3a4] sm:$0xf0]  ;;  %v14034_v63 = vld [vmem:[#allocation13 + $0x488] sm:$0xf0]  ;;  %v13912_v18 = vld [vmem:[#allocation13 + $0xbc] sm:$0xf] }
 0x645   :  { %8495 = vmatpush.bf16.msrb.mxu1 %v12421_v59  ;;  %8505 = vmatpush.bf16.msrb.mxu2 %v12757_v30  ;;  %v13034_v59 = vld [vmem:[#allocation13 + $0x6ec] sm:$0xf0]  ;;  %v12373_v30 = vor.u32 %v13940_v24, %v12370_v6  ;;  %v12617_v36 = vor.u32 %v14002_v52, %v12614_v29  ;;  %v14079_v24 = vld [vmem:[#allocation13 + $0x5f4] sm:$0xf]  ;;  %v12597_v52 = vor.u32 %v13996_v16, %v12594_v23  ;;  %v12230_v29 = vld [vmem:[#allocation13 + $0x9c] sm:$0xf0] }
 0x646   :  { %v13037_v2 = vor.u32 %v14107_v25, %v13034_v59  ;;  %v12922_v6 = vld [vmem:[#allocation13 + $0x60c] sm:$0xf0]  ;;  %v13989_v59 = vld [vmem:[#allocation13 + $0x324] sm:$0xf]  ;;  %v13012_v16 = vld [vmem:[#allocation13 + $0x6a0] sm:$0xf] }
 0x647   :  { %v12925_v25 = vor.u32 %v14079_v24, %v12922_v6  ;;  %v14104_v23 = vld [vmem:[#allocation13 + $0x6b8] sm:$0xf0]  ;;  %v13961_v6 = vld [vmem:[#allocation13 + $0x244] sm:$0xf] }
 0x648   :  { %8534 = vmatpush.bf16.msra.mxu0 %v12285_v32  ;;  %8464 = vmatpush.bf16.msra.mxu3 %v12949_v15  ;;  %v12837_v32 = vor.u32 %v14061_v27, %v12836_v42  ;;  %v14100_v15 = vld [vmem:[#allocation13 + $0x69c] sm:$0xf]  ;;  %v12261_v42 = vor.u32 %v13912_v18, %v12258_v1  ;;  %v12704_v27 = vld [vmem:[#allocation13 + $0x438] sm:$0xf]  ;;  %v12348_v18 = vld [vmem:[#allocation13 + $0x168] sm:$0xf] }
 0x649   :  { %8496 = vmatpush.bf16.msrb.mxu1 %v12393_v43  ;;  %8506 = vmatpush.bf16.msrb.mxu2 %v12729_v40  ;;  %v13006_v43 = vld [vmem:[#allocation13 + $0x6b4] sm:$0xf0]  ;;  %v12817_v40 = vor.u32 %v14055_v33, %v12816_v41  ;;  %v12676_v33 = vld [vmem:[#allocation13 + $0x400] sm:$0xf]  ;;  %v13937_v1 = vld [vmem:[#allocation13 + $0x180] sm:$0xf0] }
 0x64a   :  { %v13009_v11 = vor.u32 %v14100_v15, %v13006_v43  ;;  %v13982_v15 = vld [vmem:[#allocation13 + $0x2ec] sm:$0xf]  ;;  %v12538_v43 = vld [vmem:[#allocation13 + $0x304] sm:$0xf0] }
 0x64b   :  { %8413 = vmatmul.bf16.vlgmr.msrb.gmra.mxu3 %v14859_v17  ;;  %v12541_v48 = vor.u32 %v13982_v15, %v12538_v43  ;;  %v14090_v15 = vld [vmem:[#allocation13 + $0x648] sm:$0xf0] }
 0x64c   :  { %8535 = vmatpush.bf16.msra.mxu0 %v12257_v45  ;;  %8465 = vmatpush.bf16.msra.mxu3 %v12921_v54  ;;  %v13964_v45 = vld [vmem:[#allocation13 + $0x258] sm:$0xf0]  ;;  %v12978_v54 = vld [vmem:[#allocation13 + $0x67c] sm:$0xf0] }
 0x64d   :  { %8545 = vmatpush.bf16.msra.mxu1 %v12593_v38  ;;  %8507 = vmatpush.bf16.msrb.mxu2 %v12701_v55  ;;  %v12788_v38 = vld [vmem:[#allocation13 + $0x4e0] sm:$0xf]  ;;  %v12453_v53 = vor.u32 %v13964_v45, %v12452_v44  ;;  %v12981_v39 = vor.u32 %v14093_v57, %v12978_v54  ;;  %v12677_v44 = vor.u32 %v14020_v37, %v12676_v33  ;;  %v12510_v54 = vld [vmem:[#allocation13 + $0x2cc] sm:$0xf0]  ;;  %v14038_v33 = vld [vmem:[#allocation13 + $0x4ac] sm:$0xf] }
 0x64e   :  { %8497 = vmatmul.bf16.vlgmr.msrb.gmra.mxu1 %v14847_v35  ;;  %v12789_v55 = vor.u32 %v14048_v46, %v12788_v38  ;;  %v12648_v38 = vld [vmem:[#allocation13 + $0x3c8] sm:$0xf]  ;;  %v14013_v46 = vld [vmem:[#allocation13 + $0x3e0] sm:$0xf0] }
 0x650   :  { %8536 = vmatpush.bf16.msra.mxu0 %v12229_v62  ;;  %8466 = vmatpush.bf16.msra.mxu3 %v12893_v51  ;;  %v13957_v62 = vld [vmem:[#allocation13 + $0x220] sm:$0xf0]  ;;  %v12950_v51 = vld [vmem:[#allocation13 + $0x644] sm:$0xf0] }
 0x651   :  { %8546 = vmatpush.bf16.msra.mxu1 %v12565_v0  ;;  %8508 = vmatpush.bf16.msrb.mxu2 %v12673_v8  ;;  %v12760_v0 = vld [vmem:[#allocation13 + $0x4a8] sm:$0xf]  ;;  %v12425_v3 = vor.u32 %v13957_v62, %v12424_v58  ;;  %v12953_v19 = vor.u32 %v14086_v7, %v12950_v51  ;;  %v14058_v58 = vld [vmem:[#allocation13 + $0x54c] sm:$0xf]  ;;  %v12620_v7 = vld [vmem:[#allocation13 + $0x390] sm:$0xf] }
 0x652   :  { %v12761_v8 = vor.u32 %v14041_v60, %v12760_v0  ;;  %v12838_v62 = vld [vmem:[#allocation13 + $0x564] sm:$0xf0]  ;;  %v12649_v0 = vor.u32 %v14013_v46, %v12648_v38  ;;  %v14006_v51 = vld [vmem:[#allocation13 + $0x3a8] sm:$0xf0]  ;;  %v14031_v38 = vld [vmem:[#allocation13 + $0x474] sm:$0xf] }
 0x653   :  { %v12734_v46 = vld [vmem:[#allocation13 + $0x48c] sm:$0xf0] }
 0x654   :  { %8537 = vmatpush.bf16.msra.mxu0 %v12201_v13  ;;  %8467 = vmatpush.bf16.msra.mxu3 %v12865_v21  ;;  %v13950_v13 = vld [vmem:[#allocation13 + $0x1e8] sm:$0xf0] }
 0x655   :  { %8547 = vmatpush.bf16.msra.mxu1 %v12537_v14  ;;  %8509 = vmatpush.bf16.msrb.mxu2 %v12645_v9  ;;  %v12732_v14 = vld [vmem:[#allocation13 + $0x470] sm:$0xf]  ;;  %v12397_v21 = vor.u32 %v13950_v13, %v12396_v12  ;;  %v12482_v12 = vld [vmem:[#allocation13 + $0x294] sm:$0xf0]  ;;  %v14052_v13 = vld [vmem:[#allocation13 + $0x51c] sm:$0xf] }
 0x656   :  { %v12733_v9 = vor.u32 %v14034_v63, %v12732_v14  ;;  %v12818_v14 = vld [vmem:[#allocation13 + $0x534] sm:$0xf0]  ;;  %v13041_v63 = vor.u32 %v14111_v61, %v13040_v28  ;;  %v12236_v61 = vld [vmem:[#allocation13 + $0x88] sm:$0xf] }
 0x657   :  { %v12821_v24 = vor.u32 %v14052_v13, %v12818_v14  ;;  %v12706_v28 = vld [vmem:[#allocation13 + $0x454] sm:$0xf0] }
 0x658   :  { %8538 = vmatpush.bf16.msra.mxu0 %v12173_v5  ;;  %8468 = vmatpush.bf16.msra.mxu3 %v12837_v32  ;;  %v14027_v5 = vld [vmem:[#allocation13 + $0x450] sm:$0xf0] }
 0x659   :  { %8548 = vmatpush.bf16.msra.mxu1 %v12509_v4  ;;  %8510 = vmatpush.bf16.msrb.mxu2 %v12617_v36  ;;  %v13905_v4 = vld [vmem:[#allocation13 + $0x84] sm:$0xf]  ;;  %v12705_v41 = vor.u32 %v14027_v5, %v12704_v27  ;;  %v13898_v36 = vld [vmem:[#allocation13 + $0x4c] sm:$0xf]  ;;  %v13013_v5 = vor.u32 %v14104_v23, %v13012_v16  ;;  %v12544_v23 = vld [vmem:[#allocation13 + $0x2f0] sm:$0xf] }
 0x65a   :  { %v12233_v32 = vor.u32 %v13905_v4, %v12230_v29  ;;  %v14045_v27 = vld [vmem:[#allocation13 + $0x4e4] sm:$0xf]  ;;  %v12320_v4 = vld [vmem:[#allocation13 + $0x130] sm:$0xf]  ;;  %v13930_v29 = vld [vmem:[#allocation13 + $0x148] sm:$0xf0] }
 0x65b   :  { %8539 = vmatmul.bf16.vlgmr.msra.gmra.mxu0 %v14843_v47  ;;  %8469 = vmatmul.bf16.vlgmr.msra.gmra.mxu3 %v14859_v17  ;;  %v13902_v16 = vld [vmem:[#allocation13 + $0x68] sm:$0xf0] }
 0x65c   :  { %8587 = vmatpush.bf16.msrb.mxu0 %v12373_v30  ;;  %8517 = vmatpush.bf16.msrb.mxu3 %v13037_v2  ;;  %v12566_v30 = vld [vmem:[#allocation13 + $0x33c] sm:$0xf0]  ;;  %v12202_v2 = vld [vmem:[#allocation13 + $0x64] sm:$0xf0] }
 0x65d   :  { %8549 = vmatpush.bf16.msra.mxu1 %v12481_v26  ;;  %8559 = vmatpush.bf16.msra.mxu2 %v12817_v40  ;;  %v12569_v34 = vor.u32 %v13989_v59, %v12566_v30  ;;  %v12897_v26 = vor.u32 %v14072_v31, %v12894_v49  ;;  %v14065_v40 = vld [vmem:[#allocation13 + $0x584] sm:$0xf]  ;;  %v12205_v45 = vor.u32 %v13898_v36, %v12202_v2  ;;  %v13954_v49 = vld [vmem:[#allocation13 + $0x20c] sm:$0xf]  ;;  %v12292_v36 = vld [vmem:[#allocation13 + $0xf8] sm:$0xf] }
 0x65e   :  { %8511 = vmatmul.bf16.vlgmr.msrb.gmra.mxu2 %v14851_v22  ;;  %v14097_v59 = vld [vmem:[#allocation13 + $0x680] sm:$0xf0]  ;;  %v13923_v2 = vld [vmem:[#allocation13 + $0x110] sm:$0xf0] }
 0x660   :  { %8588 = vmatpush.bf16.msrb.mxu0 %v12345_v20  ;;  %8518 = vmatpush.bf16.msrb.mxu3 %v13009_v11  ;;  %v12866_v20 = vld [vmem:[#allocation13 + $0x59c] sm:$0xf0]  ;;  %v12174_v11 = vld [vmem:[#allocation13 + $0x2c] sm:$0xf0] }
 0x661   :  { %8550 = vmatpush.bf16.msra.mxu1 %v12453_v53  ;;  %8560 = vmatpush.bf16.msra.mxu2 %v12789_v55  ;;  %v13975_v53 = vld [vmem:[#allocation13 + $0x2b4] sm:$0xf]  ;;  %v12869_v57 = vor.u32 %v14065_v40, %v12866_v20  ;;  %v12376_v55 = vld [vmem:[#allocation13 + $0x1a0] sm:$0xf]  ;;  %v12177_v60 = vor.u32 %v13891_v50, %v12174_v11  ;;  %v13916_v11 = vld [vmem:[#allocation13 + $0xd8] sm:$0xf0] }
 0x662   :  { %v13947_v20 = vld [vmem:[#allocation13 + $0x1d4] sm:$0xf] }
 0x664   :  { %8589 = vmatpush.bf16.msrb.mxu0 %v12317_v56  ;;  %8519 = vmatpush.bf16.msrb.mxu3 %v12981_v39  ;;  %v13944_v56 = vld [vmem:[#allocation13 + $0x1b8] sm:$0xf0]  ;;  %v12513_v39 = vor.u32 %v13975_v53, %v12510_v54  ;;  %v12600_v53 = vld [vmem:[#allocation13 + $0x360] sm:$0xf]  ;;  %v12928_v54 = vld [vmem:[#allocation13 + $0x5f8] sm:$0xf] }
 0x665   :  { %8551 = vmatpush.bf16.msra.mxu1 %v12425_v3  ;;  %8561 = vmatpush.bf16.msra.mxu2 %v12761_v8  ;;  %v12377_v3 = vor.u32 %v13944_v56, %v12376_v55  ;;  %v13968_v8 = vld [vmem:[#allocation13 + $0x27c] sm:$0xf]  ;;  %v14083_v55 = vld [vmem:[#allocation13 + $0x610] sm:$0xf0] }
 0x668   :  { %8590 = vmatpush.bf16.msrb.mxu0 %v12289_v10  ;;  %8520 = vmatpush.bf16.msrb.mxu3 %v12953_v19  ;;  %v12841_v10 = vor.u32 %v14058_v58, %v12838_v62  ;;  %v12621_v19 = vor.u32 %v14006_v51, %v12620_v7  ;;  %v12737_v58 = vor.u32 %v14031_v38, %v12734_v46  ;;  %v12572_v7 = vld [vmem:[#allocation13 + $0x328] sm:$0xf]  ;;  %v13993_v51 = vld [vmem:[#allocation13 + $0x340] sm:$0xf0]  ;;  %v13014_v46 = vld [vmem:[#allocation13 + $0x6bc] sm:$0xf0] }
 0x669   :  { %8552 = vmatpush.bf16.msra.mxu1 %v12397_v21  ;;  %8562 = vmatpush.bf16.msra.mxu2 %v12733_v9  ;;  %v12485_v21 = vor.u32 %v13968_v8, %v12482_v12  ;;  %v12349_v9 = vor.u32 %v13937_v1, %v12348_v18  ;;  %v12900_v8 = vld [vmem:[#allocation13 + $0x5c0] sm:$0xf]  ;;  %v12573_v14 = vor.u32 %v13993_v51, %v12572_v7  ;;  %v12208_v1 = vld [vmem:[#allocation13 + $0x50] sm:$0xf]  ;;  %v14101_v38 = vld [vmem:[#allocation13 + $0x6a4] sm:$0xf] }
 0x66a   :  { %v12678_v18 = vld [vmem:[#allocation13 + $0x41c] sm:$0xf0]  ;;  %v14087_v7 = vld [vmem:[#allocation13 + $0x634] sm:$0xf]  ;;  %v12958_v51 = vld [vmem:[#allocation13 + $0x64c] sm:$0xf0] }
 0x66c   :  { %8591 = vmatpush.bf16.msrb.mxu0 %v12261_v42  ;;  %8521 = vmatpush.bf16.msrb.mxu3 %v12925_v25  ;;  %v12454_v42 = vld [vmem:[#allocation13 + $0x25c] sm:$0xf0]  ;;  %v12984_v25 = vld [vmem:[#allocation13 + $0x668] sm:$0xf] }
 0x66d   :  { %8601 = vmatpush.bf16.msrb.mxu1 %v12597_v52  ;;  %8563 = vmatpush.bf16.msra.mxu2 %v12705_v41  ;;  %v12790_v52 = vld [vmem:[#allocation13 + $0x4fc] sm:$0xf0]  ;;  %v12457_v30 = vor.u32 %v13961_v6, %v12454_v42  ;;  %v12321_v41 = vor.u32 %v13930_v29, %v12320_v4  ;;  %v12985_v37 = vor.u32 %v14097_v59, %v12984_v25  ;;  %v14069_v6 = vld [vmem:[#allocation13 + $0x5a0] sm:$0xf0]  ;;  %v12180_v4 = vld [vmem:[#allocation13 + $0x18] sm:$0xf] }
 0x66e   :  { %8553 = vmatmul.bf16.vlgmr.msra.gmra.mxu1 %v14847_v35  ;;  %v12793_v31 = vor.u32 %v14045_v27, %v12790_v52  ;;  %v12209_v42 = vor.u32 %v13902_v16, %v12208_v1  ;;  %v14010_v52 = vld [vmem:[#allocation13 + $0x3cc] sm:$0xf]  ;;  %v13895_v25 = vld [vmem:[#allocation13 + $0x30] sm:$0xf0]  ;;  %v12516_v59 = vld [vmem:[#allocation13 + $0x2b8] sm:$0xf] }
 0x66f   :  { %v12930_v1 = vld [vmem:[#allocation13 + $0x614] sm:$0xf0] }
 0x670   :  { %8592 = vmatpush.bf16.msrb.mxu0 %v12233_v32  ;;  %8522 = vmatpush.bf16.msrb.mxu3 %v12897_v26  ;;  %v12426_v32 = vld [vmem:[#allocation13 + $0x224] sm:$0xf0]  ;;  %v12956_v26 = vld [vmem:[#allocation13 + $0x630] sm:$0xf] }
 0x671   :  { %8602 = vmatpush.bf16.msrb.mxu1 %v12569_v34  ;;  %8564 = vmatpush.bf16.msra.mxu2 %v12677_v44  ;;  %v12762_v34 = vld [vmem:[#allocation13 + $0x4c4] sm:$0xf0]  ;;  %v12429_v43 = vor.u32 %v13954_v49, %v12426_v32  ;;  %v12398_v44 = vld [vmem:[#allocation13 + $0x1ec] sm:$0xf0]  ;;  %v12957_v50 = vor.u32 %v14090_v15, %v12956_v26  ;;  %v14062_v49 = vld [vmem:[#allocation13 + $0x568] sm:$0xf0] }
 0x672   :  { %v12765_v40 = vor.u32 %v14038_v33, %v12762_v34  ;;  %v12401_v56 = vor.u32 %v13947_v20, %v12398_v44  ;;  %v14108_v32 = vld [vmem:[#allocation13 + $0x6dc] sm:$0xf]  ;;  %v13042_v33 = vld [vmem:[#allocation13 + $0x6f4] sm:$0xf0]  ;;  %v12181_v34 = vor.u32 %v13895_v25, %v12180_v4  ;;  %v12488_v26 = vld [vmem:[#allocation13 + $0x280] sm:$0xf] }
 0x673   :  { %v14056_v20 = vld [vmem:[#allocation13 + $0x538] sm:$0xf0]  ;;  %v13045_v44 = vor.u32 %v14108_v32, %v13042_v33  ;;  %v14066_v4 = vld [vmem:[#allocation13 + $0x58c] sm:$0xf]  ;;  %v13048_v33 = vld [vmem:[#allocation13 + $0x6e0] sm:$0xf] }
 0x674   :  { %8593 = vmatpush.bf16.msrb.mxu0 %v12205_v45  ;;  %8523 = vmatpush.bf16.msrb.mxu3 %v12869_v57  ;;  %v12293_v45 = vor.u32 %v13923_v2, %v12292_v36  ;;  %v14000_v57 = vld [vmem:[#allocation13 + $0x378] sm:$0xf0]  ;;  %v14003_v36 = vld [vmem:[#allocation13 + $0x394] sm:$0xf]  ;;  %v12622_v2 = vld [vmem:[#allocation13 + $0x3ac] sm:$0xf0] }
 0x675   :  { %8603 = vmatpush.bf16.msrb.mxu1 %v12541_v48  ;;  %8565 = vmatpush.bf16.msra.mxu2 %v12649_v0  ;;  %v12264_v48 = vld [vmem:[#allocation13 + $0xc0] sm:$0xf]  ;;  %v12601_v0 = vor.u32 %v14000_v57, %v12600_v53  ;;  %v13965_v53 = vld [vmem:[#allocation13 + $0x260] sm:$0xf0]  ;;  %v12796_v57 = vld [vmem:[#allocation13 + $0x4e8] sm:$0xf] }
 0x676   :  { %v12265_v62 = vor.u32 %v13916_v11, %v12264_v48  ;;  %v12460_v11 = vld [vmem:[#allocation13 + $0x248] sm:$0xf] }
 0x678   :  { %8594 = vmatpush.bf16.msrb.mxu0 %v12177_v60  ;;  %8524 = vmatpush.bf16.msrb.mxu3 %v12841_v10  ;;  %v14024_v60 = vld [vmem:[#allocation13 + $0x43c] sm:$0xf] }
 0x679   :  { %8604 = vmatpush.bf16.msrb.mxu1 %v12513_v39  ;;  %8566 = vmatpush.bf16.msra.mxu2 %v12621_v19  ;;  %v12929_v39 = vor.u32 %v14083_v55, %v12928_v54  ;;  %v14076_v10 = vld [vmem:[#allocation13 + $0x5d8] sm:$0xf0]  ;;  %v12709_v12 = vor.u32 %v14024_v60, %v12706_v28  ;;  %v14049_v54 = vld [vmem:[#allocation13 + $0x500] sm:$0xf0]  ;;  %v13017_v55 = vor.u32 %v14101_v38, %v13014_v46  ;;  %v12432_v60 = vld [vmem:[#allocation13 + $0x210] sm:$0xf] }
 0x67a   :  { %v12901_v19 = vor.u32 %v14076_v10, %v12900_v8  ;;  %v13958_v28 = vld [vmem:[#allocation13 + $0x228] sm:$0xf0]  ;;  %v12404_v10 = vld [vmem:[#allocation13 + $0x1d8] sm:$0xf] }
 0x67b   :  { %8595 = vmatmul.bf16.vlgmr.msrb.gmra.mxu0 %v14843_v47  ;;  %8525 = vmatmul.bf16.vlgmr.msrb.gmra.mxu3 %v14859_v17 }
 0x67c   :  { %8643 = vmatpush.bf16.msra.mxu0 %v12377_v3  ;;  %8573 = vmatpush.bf16.msra.mxu3 %v13041_v63  ;;  %v13909_v3 = vld [vmem:[#allocation13 + $0xa0] sm:$0xf0] }
 0x67d   :  { %8605 = vmatpush.bf16.msrb.mxu1 %v12485_v21  ;;  %8615 = vmatpush.bf16.msrb.mxu2 %v12821_v24  ;;  %v12237_v13 = vor.u32 %v13909_v3, %v12236_v61  ;;  %v14017_v63 = vld [vmem:[#allocation13 + $0x404] sm:$0xf]  ;;  %v13986_v21 = vld [vmem:[#allocation13 + $0x308] sm:$0xf0]  ;;  %v12872_v24 = vld [vmem:[#allocation13 + $0x588] sm:$0xf] }
 0x67e   :  { %8567 = vmatmul.bf16.vlgmr.msra.gmra.mxu2 %v14851_v22  ;;  %v12545_v27 = vor.u32 %v13986_v21, %v12544_v23  ;;  %v12873_v29 = vor.u32 %v14069_v6, %v12872_v24  ;;  %v12768_v61 = vld [vmem:[#allocation13 + $0x4b0] sm:$0xf]  ;;  %v12712_v23 = vld [vmem:[#allocation13 + $0x440] sm:$0xf]  ;;  %v14028_v21 = vld [vmem:[#allocation13 + $0x458] sm:$0xf0] }
 0x67f   :  { %v14073_v6 = vld [vmem:[#allocation13 + $0x5c4] sm:$0xf] }
 0x680   :  { %8644 = vmatpush.bf16.msra.mxu0 %v12349_v9  ;;  %8574 = vmatpush.bf16.msra.mxu3 %v13013_v5  ;;  %v12681_v9 = vor.u32 %v14017_v63, %v12678_v18  ;;  %v12650_v5 = vld [vmem:[#allocation13 + $0x3e4] sm:$0xf0]  ;;  %v12961_v63 = vor.u32 %v14087_v7, %v12958_v51  ;;  %v14080_v18 = vld [vmem:[#allocation13 + $0x5fc] sm:$0xf] }
 0x681   :  { %8606 = vmatpush.bf16.msrb.mxu1 %v12457_v30  ;;  %8616 = vmatpush.bf16.msrb.mxu2 %v12793_v31  ;;  %v13979_v30 = vld [vmem:[#allocation13 + $0x2d0] sm:$0xf0]  ;;  %v12844_v31 = vld [vmem:[#allocation13 + $0x550] sm:$0xf]  ;;  %v12933_v24 = vor.u32 %v14080_v18, %v12930_v1 }
 0x682   :  { %v12845_v15 = vor.u32 %v14062_v49, %v12844_v31  ;;  %v14059_v49 = vld [vmem:[#allocation13 + $0x554] sm:$0xf] }
 0x683   :  { %v14063_v18 = vld [vmem:[#allocation13 + $0x570] sm:$0xf0] }
 0x684   :  { %8645 = vmatpush.bf16.msra.mxu0 %v12321_v41  ;;  %8575 = vmatpush.bf16.msra.mxu3 %v12985_v37  ;;  %v12653_v41 = vor.u32 %v14010_v52, %v12650_v5  ;;  %v12517_v37 = vor.u32 %v13979_v30, %v12516_v59  ;;  %v14021_v52 = vld [vmem:[#allocation13 + $0x420] sm:$0xf0]  ;;  %v12656_v59 = vld [vmem:[#allocation13 + $0x3d0] sm:$0xf]  ;;  %v14014_v30 = vld [vmem:[#allocation13 + $0x3e8] sm:$0xf0] }
 0x685   :  { %8607 = vmatpush.bf16.msrb.mxu1 %v12429_v43  ;;  %8617 = vmatpush.bf16.msrb.mxu2 %v12765_v40  ;;  %v13972_v43 = vld [vmem:[#allocation13 + $0x298] sm:$0xf0]  ;;  %v12824_v40 = vld [vmem:[#allocation13 + $0x520] sm:$0xf]  ;;  %v12657_v32 = vor.u32 %v14014_v30, %v12656_v59 }
 0x686   :  { %v12489_v48 = vor.u32 %v13972_v43, %v12488_v26  ;;  %v14105_v43 = vld [vmem:[#allocation13 + $0x6c0] sm:$0xf0] }
 0x688   :  { %8646 = vmatpush.bf16.msra.mxu0 %v12293_v45  ;;  %8576 = vmatpush.bf16.msra.mxu3 %v12957_v50  ;;  %v12625_v45 = vor.u32 %v14003_v36, %v12622_v2  ;;  %v12825_v50 = vor.u32 %v14056_v20, %v12824_v40  ;;  %v14007_v36 = vld [vmem:[#allocation13 + $0x3b0] sm:$0xf0]  ;;  %v8316_v40 = vpop.f32.mrf.mxu0  ;;  %v8330_v38 = vpop.f32.mrf.mxu1 }
 0x689   :  { %8608 = vmatpush.bf16.msrb.mxu1 %v12401_v56  ;;  %8618 = vmatpush.bf16.msrb.mxu2 %v12737_v58  ;;  %v14094_v56 = vld [vmem:[#allocation13 + $0x66c] sm:$0xf]  ;;  %v12986_v58 = vld [vmem:[#allocation13 + $0x684] sm:$0xf0] }
 0x68a   :  { %v12989_v3 = vor.u32 %v14094_v56, %v12986_v58  ;;  %v14084_v56 = vld [vmem:[#allocation13 + $0x618] sm:$0xf0] }
 0x68c   :  { %8647 = vmatpush.bf16.msra.mxu0 %v12265_v62  ;;  %8577 = vmatpush.bf16.msra.mxu3 %v12929_v39  ;;  %v12461_v62 = vor.u32 %v13965_v53, %v12460_v11  ;;  %v14042_v39 = vld [vmem:[#allocation13 + $0x4c8] sm:$0xf0]  ;;  %v14091_v11 = vld [vmem:[#allocation13 + $0x650] sm:$0xf0]  ;;  %v14883_v53 = vld [vmem:[%s14934_s17] sm:$0xff] }
 0x68d   :  { %8657 = vmatpush.bf16.msra.mxu1 %v12601_v0  ;;  %8619 = vmatpush.bf16.msrb.mxu2 %v12709_v12  ;;  %v12797_v0 = vor.u32 %v14049_v54, %v12796_v57  ;;  %v12769_v8 = vor.u32 %v14042_v39, %v12768_v61  ;;  %v13951_v12 = vld [vmem:[#allocation13 + $0x1f0] sm:$0xf0]  ;;  %v7141_v54 = vperm.slane %v14883_v53, 0 }
 0x68e   :  { %8609 = vmatmul.bf16.vlgmr.msrb.gmra.mxu1 %v14847_v35 }
 0x690   :  { %8648 = vmatpush.bf16.msra.mxu0 %v12237_v13  ;;  %8578 = vmatpush.bf16.msra.mxu3 %v12901_v19  ;;  %v12740_v13 = vld [vmem:[#allocation13 + $0x478] sm:$0xf]  ;;  %v12405_v19 = vor.u32 %v13951_v12, %v12404_v10  ;;  %v8318_v58 = vpop.f32.mrf.mxu0 }
 0x691   :  { %8658 = vmatpush.bf16.msra.mxu1 %v12573_v14  ;;  %8620 = vmatpush.bf16.msrb.mxu2 %v12681_v9  ;;  %v14035_v14 = vld [vmem:[#allocation13 + $0x490] sm:$0xf0]  ;;  %v12902_v9 = vld [vmem:[#allocation13 + $0x5dc] sm:$0xf0]  ;;  %v8319_v1 = vadd.f32 %v8318_v58, %v7141_v54 }
 0x692   :  { %v12741_v16 = vor.u32 %v14035_v14, %v12740_v13  ;;  %v12905_v5 = vor.u32 %v14073_v6, %v12902_v9  ;;  %v7142_v14 = vperm.slane %v14883_v53, 1 }
 0x694   :  { %8649 = vmatpush.bf16.msra.mxu0 %v12209_v42  ;;  %8579 = vmatpush.bf16.msra.mxu3 %v12873_v29  ;;  %v12713_v42 = vor.u32 %v14028_v21, %v12712_v23  ;;  %v12874_v29 = vld [vmem:[#allocation13 + $0x5a4] sm:$0xf0] }
 0x695   :  { %8659 = vmatpush.bf16.msra.mxu1 %v12545_v27  ;;  %8621 = vmatpush.bf16.msrb.mxu2 %v12653_v41  ;;  %v12684_v27 = vld [vmem:[#allocation13 + $0x408] sm:$0xf]  ;;  %v12877_v31 = vor.u32 %v14066_v4, %v12874_v29  ;;  %v12846_v41 = vld [vmem:[#allocation13 + $0x56c] sm:$0xf0] }
 0x696   :  { %v12685_v25 = vor.u32 %v14021_v52, %v12684_v27  ;;  %v12849_v2 = vor.u32 %v14059_v49, %v12846_v41 }
 0x698   :  { %8650 = vmatpush.bf16.msra.mxu0 %v12181_v34  ;;  %8580 = vmatpush.bf16.msra.mxu3 %v12845_v15  ;;  %v14112_v34 = vld [vmem:[#allocation13 + $0x6f8] sm:$0xf0]  ;;  %v13020_v15 = vld [vmem:[#allocation13 + $0x6a8] sm:$0xf]  ;;  %v8372_v12 = vpop.f32.mrf.mxu0 }
 0x699   :  { %8660 = vmatpush.bf16.msra.mxu1 %v12517_v37  ;;  %8622 = vmatpush.bf16.msrb.mxu2 %v12625_v45  ;;  %v12628_v37 = vld [vmem:[#allocation13 + $0x398] sm:$0xf]  ;;  %v13049_v26 = vor.u32 %v14112_v34, %v13048_v33  ;;  %v13021_v20 = vor.u32 %v14105_v43, %v13020_v15  ;;  %v14098_v45 = vld [vmem:[#allocation13 + $0x688] sm:$0xf0]  ;;  %v8373_v9 = vadd.f32 %v8372_v12, %v7142_v14 }
 0x69b   :  { %8651 = vmatmul.bf16.vlgmr.msra.gmra.mxu0 %v14843_v47  ;;  %8581 = vmatmul.bf16.vlgmr.msra.gmra.mxu3 %v14859_v17  ;;  %v12433_v47 = vor.u32 %v13958_v28, %v12432_v60  ;;  %v12908_v60 = vld [vmem:[#allocation13 + $0x5c8] sm:$0xf]  ;;  %v14077_v28 = vld [vmem:[#allocation13 + $0x5e0] sm:$0xf0] }
 0x69c   :  { %8629 = vmatpush.bf16.msrb.mxu3 %v13045_v44  ;;  %8623 = vmatmul.bf16.vlgmr.msrb.gmra.mxu2 %v14851_v22  ;;  %v12992_v44 = vld [vmem:[#allocation13 + $0x670] sm:$0xf]  ;;  %v12909_v7 = vor.u32 %v14077_v28, %v12908_v60 }
 0x69d   :  { %8661 = vmatpush.bf16.msra.mxu1 %v12489_v48  ;;  %8671 = vmatpush.bf16.msra.mxu2 %v12825_v50  ;;  %v12993_v48 = vor.u32 %v14098_v45, %v12992_v44  ;;  %v12964_v50 = vld [vmem:[#allocation13 + $0x638] sm:$0xf] }
 0x69e   :  { %v8344_v46 = vpop.f32.mrf.mxu2  ;;  %v12965_v57 = vor.u32 %v14091_v11, %v12964_v50 }
 0x6a0   :  { %8630 = vmatpush.bf16.msrb.mxu3 %v13017_v55  ;;  %v12936_v55 = vld [vmem:[#allocation13 + $0x600] sm:$0xf]  ;;  %v8374_v29 = vpop.f32.mrf.mxu0 }
 0x6a1   :  { %8662 = vmatpush.bf16.msra.mxu1 %v12461_v62  ;;  %8672 = vmatpush.bf16.msra.mxu2 %v12797_v0  ;;  %v8332_v62 = vpop.f32.mrf.mxu1  ;;  %v12937_v0 = vor.u32 %v14084_v56, %v12936_v55  ;;  %v8375_v49 = vadd.f32 %v8374_v29, %v7142_v14  ;;  %v7143_v56 = vperm.slane %v14883_v53, 2 }
 0x6a2   :  { %v8333_v21 = vadd.f32 %v8332_v62, %v8319_v1 }
 0x6a4   :  { %8631 = vmatpush.bf16.msrb.mxu3 %v12989_v3 }
 0x6a5   :  { %8663 = vmatpush.bf16.msra.mxu1 %v12433_v47  ;;  %8673 = vmatpush.bf16.msra.mxu2 %v12769_v8  ;;  %v12880_v47 = vld [vmem:[#allocation13 + $0x590] sm:$0xf]  ;;  %v14070_v8 = vld [vmem:[#allocation13 + $0x5a8] sm:$0xf0] }
 0x6a6   :  { %v8346_v61 = vpop.f32.mrf.mxu2  ;;  %v12881_v13 = vor.u32 %v14070_v8, %v12880_v47  ;;  %v7144_v8 = vperm.slane %v14883_v53, 3 }
 0x6a8   :  { %8632 = vmatpush.bf16.msrb.mxu3 %v12961_v63  ;;  %v12852_v63 = vld [vmem:[#allocation13 + $0x558] sm:$0xf]  ;;  %v8428_v45 = vpop.f32.mrf.mxu0 }
 0x6a9   :  { %8664 = vmatpush.bf16.msra.mxu1 %v12405_v19  ;;  %8674 = vmatpush.bf16.msra.mxu2 %v12741_v16  ;;  %v8386_v19 = vpop.f32.mrf.mxu1  ;;  %v12853_v6 = vor.u32 %v14063_v18, %v12852_v63 }
 0x6aa   :  { %v8387_v27 = vadd.f32 %v8386_v19, %v8373_v9 }
 0x6ac   :  { %8633 = vmatpush.bf16.msrb.mxu3 %v12933_v24  ;;  %8665 = vmatmul.bf16.vlgmr.msra.gmra.mxu1 %v14847_v35  ;;  %v12629_v35 = vor.u32 %v14007_v36, %v12628_v37 }
 0x6ad   :  { %8675 = vmatpush.bf16.msra.mxu2 %v12713_v42  ;;  %v8347_v42 = vadd.f32 %v8346_v61, %v8333_v21 }
 0x6ae   :  { %v8400_v24 = vpop.f32.mrf.mxu2 }
 0x6af   :  { %v8401_v4 = vadd.f32 %v8400_v24, %v8387_v27 }
 0x6b0   :  { %8634 = vmatpush.bf16.msrb.mxu3 %v12905_v5  ;;  %v8430_v58 = vpop.f32.mrf.mxu0 }
 0x6b1   :  { %8676 = vmatpush.bf16.msra.mxu2 %v12685_v25  ;;  %v8388_v30 = vpop.f32.mrf.mxu1 }
 0x6b2   :  { %v8389_v33 = vadd.f32 %v8388_v30, %v8375_v49 }
 0x6b4   :  { %8635 = vmatpush.bf16.msrb.mxu3 %v12877_v31 }
 0x6b5   :  { %8677 = vmatpush.bf16.msra.mxu2 %v12657_v32 }
 0x6b6   :  { %v8402_v32 = vpop.f32.mrf.mxu2 }
 0x6b8   :  { %8636 = vmatpush.bf16.msrb.mxu3 %v12849_v2  ;;  %v8403_v2 = vadd.f32 %v8402_v32, %v8389_v33  ;;  %v8484_v47 = vpop.f32.mrf.mxu0 }
 0x6b9   :  { %8678 = vmatpush.bf16.msra.mxu2 %v12629_v35  ;;  %v8485_v1 = vadd.f32 %v8484_v47, %v7144_v8 }
 0x6bb   :  { %8637 = vmatmul.bf16.vlgmr.msrb.gmra.mxu3 %v14859_v17 }
 0x6bc   :  { %8685 = vmatpush.bf16.msra.mxu3 %v13049_v26  ;;  %8679 = vmatmul.bf16.vlgmr.msra.gmra.mxu2 %v14851_v22  ;;  %v8317_v22 = vadd.f32 %v8316_v40, %v7141_v54 }
 0x6be   :  { %v8358_v39 = vpop.f32.mrf.mxu3  ;;  %v8331_v3 = vadd.f32 %v8330_v38, %v8317_v22  ;;  %v8429_v22 = vadd.f32 %v8428_v45, %v7143_v56 }
 0x6c0   :  { %8686 = vmatpush.bf16.msra.mxu3 %v13021_v20  ;;  %v8345_v51 = vadd.f32 %v8344_v46, %v8331_v3 }
 0x6c2   :  { %v8359_v10 = vadd.f32 %v8358_v39, %v8345_v51 }
 0x6c4   :  { %8687 = vmatpush.bf16.msra.mxu3 %v12993_v48  ;;  %v8699_v23 = vsub.f32 0.0, %v8359_v10  ;;  %v8442_v48 = vpop.f32.mrf.mxu1  ;;  %v8431_v10 = vadd.f32 %v8430_v58, %v7143_v56 }
 0x6c5   :  { %v8443_v61 = vadd.f32 %v8442_v48, %v8429_v22 }
 0x6c6   :  { %v8360_v16 = vpop.f32.mrf.mxu3  ;;  %v8713_v52 = vmul.f32 1.442695, %v8699_v23 }
 0x6c7   :  { %v8361_v5 = vadd.f32 %v8360_v16, %v8347_v42 }
 0x6c8   :  { %8688 = vmatpush.bf16.msra.mxu3 %v12965_v57  ;;  %14135 = vpow2.f32 %v8713_v52  ;;  %v8456_v57 = vpop.f32.mrf.mxu2 }
 0x6c9   :  { %v8706_v31 = vsub.f32 0.0, %v8361_v5 }
 0x6cb   :  { %v8727_v37 = vmul.f32 1.442695, %v8706_v31 }
 0x6cc   :  { %8689 = vmatpush.bf16.msra.mxu3 %v12937_v0  ;;  %v8444_v28 = vpop.f32.mrf.mxu1 }
 0x6cd   :  { %v8445_v63 = vadd.f32 %v8444_v28, %v8431_v10  ;;  %v7146_v28 = vperm.slane %v14883_v53, 5 }
 0x6ce   :  { %v8414_v25 = vpop.f32.mrf.mxu3  ;;  %v14136_v36 = vpop.eup %14135 }
 0x6cf   :  { %v8415_v59 = vadd.f32 %v8414_v25, %v8401_v4  ;;  %v8741_v15 = vadd.f32 1.0, %v14136_v36 }
 0x6d0   :  { %8690 = vmatpush.bf16.msra.mxu3 %v12909_v7  ;;  %v8458_v3 = vpop.f32.mrf.mxu2  ;;  %v8457_v7 = vadd.f32 %v8456_v57, %v8443_v61 }
 0x6d1   :  { %v8700_v41 = vsub.f32 0.0, %v8415_v59  ;;  %v8459_v19 = vadd.f32 %v8458_v3, %v8445_v63 }
 0x6d3   :  { %v8715_v34 = vmul.f32 1.442695, %v8700_v41 }
 0x6d4   :  { %8691 = vmatpush.bf16.msra.mxu3 %v12881_v13  ;;  %v8498_v12 = vpop.f32.mrf.mxu1 }
 0x6d5   :  { %14137 = vpow2.f32 %v8715_v34  ;;  %v8499_v16 = vadd.f32 %v8498_v12, %v8485_v1 }
 0x6d6   :  { %v8416_v26 = vpop.f32.mrf.mxu3  ;;  %14139 = vpow2.f32 %v8727_v37 }
 0x6d7   :  { %v8417_v35 = vadd.f32 %v8416_v26, %v8403_v2  ;;  %14141 = vrcp.f32 %v8741_v15 }
 0x6d8   :  { %8692 = vmatpush.bf16.msra.mxu3 %v12853_v6  ;;  %v8486_v6 = vpop.f32.mrf.mxu0 }
 0x6d9   :  { %v8707_v43 = vsub.f32 0.0, %v8417_v35  ;;  %v8487_v5 = vadd.f32 %v8486_v6, %v7144_v8 }
 0x6db   :  { %8693 = vmatmul.bf16.vlgmr.msra.gmra.mxu3 %v14859_v17  ;;  %v14138_v40 = vpop.eup %14137  ;;  %v8729_v20 = vmul.f32 1.442695, %v8707_v43 }
 0x6dc   :  { %v8742_v17 = vadd.f32 1.0, %v14138_v40  ;;  %v14140_v44 = vpop.eup %14139  ;;  %v8500_v27 = vpop.f32.mrf.mxu1 }
 0x6dd   :  { %14143 = vpow2.f32 %v8729_v20  ;;  %v8748_v38 = vadd.f32 1.0, %v14140_v44  ;;  %v14142_v46 = vpop.eup %14141  ;;  %v8501_v25 = vadd.f32 %v8500_v27, %v8487_v5 }
 0x6de   :  { %14145 = vrcp.f32 %v8742_v17  ;;  %v8470_v62 = vpop.f32.mrf.mxu3 }
 0x6df   :  { %14147 = vrcp.f32 %v8748_v38  ;;  %v8471_v51 = vadd.f32 %v8470_v62, %v8457_v7 }
 0x6e0   :  { %v8540_v45 = vpop.f32.mrf.mxu0 }
 0x6e1   :  { %v8701_v14 = vsub.f32 0.0, %v8471_v51  ;;  %v8512_v18 = vpop.f32.mrf.mxu2 }
 0x6e2   :  { %v8513_v24 = vadd.f32 %v8512_v18, %v8499_v16 }
 0x6e3   :  { %v14144_v50 = vpop.eup %14143  ;;  %v8717_v23 = vmul.f32 1.442695, %v8701_v14 }
 0x6e4   :  { %v14146_v11 = vpop.eup %14145  ;;  %v8749_v54 = vadd.f32 1.0, %v14144_v50 }
 0x6e5   :  { %v8769_v55 = vpack.c.bf16 %v14146_v11, %v14142_v46  ;;  %v14148_v0 = vpop.eup %14147  ;;  %v7145_v11 = vperm.slane %v14883_v53, 4 }
 0x6e6   :  { %14149 = vrcp.f32 %v8749_v54  ;;  %v8472_v13 = vpop.f32.mrf.mxu3 }
 0x6e7   :  { %8777 = vst [vmem:[%s14949_s28] sm:$0xff] %v8769_v55  ;;  %v8473_v21 = vadd.f32 %v8472_v13, %v8459_v19  ;;  %14151 = vpow2.f32 %v8717_v23  ;;  %v8541_v55 = vadd.f32 %v8540_v45, %v7145_v11 }
 0x6e8   :  { %v8542_v57 = vpop.f32.mrf.mxu0 }
 0x6e9   :  { %v8708_v52 = vsub.f32 0.0, %v8473_v21  ;;  %v8514_v29 = vpop.f32.mrf.mxu2  ;;  %v8543_v61 = vadd.f32 %v8542_v57, %v7145_v11 }
 0x6ea   :  { %v8515_v49 = vadd.f32 %v8514_v29, %v8501_v25 }
 0x6eb   :  { %v8731_v30 = vmul.f32 1.442695, %v8708_v52  ;;  %v8554_v46 = vpop.f32.mrf.mxu1 }
 0x6ec   :  { %v14150_v60 = vpop.eup %14149  ;;  %v8555_v58 = vadd.f32 %v8554_v46, %v8541_v55 }
 0x6ed   :  { %v8773_v39 = vpack.c.bf16 %v14150_v60, %v14148_v0  ;;  %v14152_v31 = vpop.eup %14151 }
 0x6ee   :  { %v8743_v33 = vadd.f32 1.0, %v14152_v31 }
 0x6ef   :  { %8781 = vst [vmem:[%s14949_s28 + $0x1c] sm:$0xff] %v8773_v39 }
 0x6f3   :  { %v8556_v56 = vpop.f32.mrf.mxu1 }
 0x6f4   :  { %v8557_v51 = vadd.f32 %v8556_v56, %v8543_v61 }
 0x6f8   :  { %v8596_v60 = vpop.f32.mrf.mxu0 }
 0x6f9   :  { %v8597_v8 = vadd.f32 %v8596_v60, %v7146_v28 }
 0x6fe   :  { %v8526_v9 = vpop.f32.mrf.mxu3 }
 0x6ff   :  { %v8527_v42 = vadd.f32 %v8526_v9, %v8513_v24 }
 0x700   :  { %v8598_v18 = vpop.f32.mrf.mxu0 }
 0x701   :  { %v8702_v4 = vsub.f32 0.0, %v8527_v42  ;;  %v8568_v50 = vpop.f32.mrf.mxu2  ;;  %v8599_v21 = vadd.f32 %v8598_v18, %v7146_v28 }
 0x702   :  { %v8569_v0 = vadd.f32 %v8568_v50, %v8555_v58 }
 0x703   :  { %v8719_v59 = vmul.f32 1.442695, %v8702_v4 }
 0x705   :  { %14153 = vpow2.f32 %v8719_v59 }
 0x706   :  { %v8528_v41 = vpop.f32.mrf.mxu3  ;;  %14155 = vpow2.f32 %v8731_v30 }
 0x707   :  { %v8529_v32 = vadd.f32 %v8528_v41, %v8515_v49  ;;  %14157 = vrcp.f32 %v8743_v33 }
 0x709   :  { %v8709_v34 = vsub.f32 0.0, %v8529_v32  ;;  %v8570_v62 = vpop.f32.mrf.mxu2 }
 0x70a   :  { %v8571_v10 = vadd.f32 %v8570_v62, %v8557_v51 }
 0x70b   :  { %v14154_v37 = vpop.eup %14153  ;;  %v8733_v36 = vmul.f32 1.442695, %v8709_v34  ;;  %v8610_v39 = vpop.f32.mrf.mxu1 }
 0x70c   :  { %v8744_v2 = vadd.f32 1.0, %v14154_v37  ;;  %v14156_v26 = vpop.eup %14155  ;;  %v8611_v12 = vadd.f32 %v8610_v39, %v8597_v8  ;;  %v7147_v37 = vperm.slane %v14883_v53, 6 }
 0x70d   :  { %14159 = vpow2.f32 %v8733_v36  ;;  %v8750_v35 = vadd.f32 1.0, %v14156_v26  ;;  %v14158_v15 = vpop.eup %14157 }
 0x70e   :  { %14161 = vrcp.f32 %v8744_v2 }
 0x70f   :  { %14163 = vrcp.f32 %v8750_v35 }
 0x713   :  { %v14160_v43 = vpop.eup %14159  ;;  %v8612_v16 = vpop.f32.mrf.mxu1 }
 0x714   :  { %v14162_v40 = vpop.eup %14161  ;;  %v8751_v20 = vadd.f32 1.0, %v14160_v43  ;;  %v8613_v9 = vadd.f32 %v8612_v16, %v8599_v21 }
 0x715   :  { %v8770_v17 = vpack.c.bf16 %v14162_v40, %v14158_v15  ;;  %v14164_v44 = vpop.eup %14163 }
 0x716   :  { %14165 = vrcp.f32 %v8751_v20 }
 0x717   :  { %8778 = vst [vmem:[%s14949_s28 + $0x8] sm:$0xff] %v8770_v17 }
 0x718   :  { %v8652_v32 = vpop.f32.mrf.mxu0 }
 0x719   :  { %v8653_v40 = vadd.f32 %v8652_v32, %v7147_v37 }
 0x71c   :  { %v14166_v38 = vpop.eup %14165 }
 0x71d   :  { %v8774_v48 = vpack.c.bf16 %v14166_v38, %v14164_v44 }
 0x71e   :  { %v8582_v54 = vpop.f32.mrf.mxu3 }
 0x71f   :  { %8782 = vst [vmem:[%s14949_s28 + $0x24] sm:$0xff] %v8774_v48  ;;  %v8583_v22 = vadd.f32 %v8582_v54, %v8569_v0  ;;  %v8624_v47 = vpop.f32.mrf.mxu2 }
 0x720   :  { %v8625_v63 = vadd.f32 %v8624_v47, %v8611_v12  ;;  %v8654_v45 = vpop.f32.mrf.mxu0 }
 0x721   :  { %v8703_v7 = vsub.f32 0.0, %v8583_v22  ;;  %v8655_v11 = vadd.f32 %v8654_v45, %v7147_v37 }
 0x723   :  { %v8721_v13 = vmul.f32 1.442695, %v8703_v7 }
 0x725   :  { %14167 = vpow2.f32 %v8721_v13 }
 0x726   :  { %v8584_v3 = vpop.f32.mrf.mxu3 }
 0x727   :  { %v8585_v14 = vadd.f32 %v8584_v3, %v8571_v10  ;;  %v8626_v6 = vpop.f32.mrf.mxu2 }
 0x728   :  { %v8627_v5 = vadd.f32 %v8626_v6, %v8613_v9 }
 0x729   :  { %v8710_v23 = vsub.f32 0.0, %v8585_v14  ;;  %v8666_v2 = vpop.f32.mrf.mxu1 }
 0x72a   :  { %v8667_v20 = vadd.f32 %v8666_v2, %v8653_v40 }
 0x72b   :  { %v8735_v27 = vmul.f32 1.442695, %v8710_v23  ;;  %v14168_v52 = vpop.eup %14167 }
 0x72c   :  { %v8745_v25 = vadd.f32 1.0, %v14168_v52 }
 0x731   :  { %v8668_v48 = vpop.f32.mrf.mxu1 }
 0x732   :  { %v8669_v55 = vadd.f32 %v8668_v48, %v8655_v11 }
 0x73e   :  { %v8638_v1 = vpop.f32.mrf.mxu3 }
 0x73f   :  { %v8639_v19 = vadd.f32 %v8638_v1, %v8625_v63  ;;  %v8680_v43 = vpop.f32.mrf.mxu2 }
 0x740   :  { %v8681_v17 = vadd.f32 %v8680_v43, %v8667_v20 }
 0x741   :  { %v8704_v24 = vsub.f32 0.0, %v8639_v19 }
 0x743   :  { %v8723_v42 = vmul.f32 1.442695, %v8704_v24 }
 0x745   :  { %14169 = vpow2.f32 %v8723_v42 }
 0x746   :  { %v8640_v4 = vpop.f32.mrf.mxu3  ;;  %14171 = vpow2.f32 %v8735_v27 }
 0x747   :  { %v8641_v29 = vadd.f32 %v8640_v4, %v8627_v5  ;;  %14173 = vrcp.f32 %v8745_v25  ;;  %v8682_v54 = vpop.f32.mrf.mxu2 }
 0x748   :  { %v8683_v58 = vadd.f32 %v8682_v54, %v8669_v55 }
 0x749   :  { %v8711_v59 = vsub.f32 0.0, %v8641_v29 }
 0x74b   :  { %v14170_v30 = vpop.eup %14169  ;;  %v8737_v31 = vmul.f32 1.442695, %v8711_v59 }
 0x74c   :  { %v8746_v49 = vadd.f32 1.0, %v14170_v30  ;;  %v14172_v41 = vpop.eup %14171 }
 0x74d   :  { %14175 = vpow2.f32 %v8737_v31  ;;  %v8752_v33 = vadd.f32 1.0, %v14172_v41  ;;  %v14174_v34 = vpop.eup %14173 }
 0x74e   :  { %14177 = vrcp.f32 %v8746_v49 }
 0x74f   :  { %14179 = vrcp.f32 %v8752_v33 }
 0x753   :  { %v14176_v36 = vpop.eup %14175 }
 0x754   :  { %v14178_v26 = vpop.eup %14177  ;;  %v8753_v35 = vadd.f32 1.0, %v14176_v36 }
 0x755   :  { %v8771_v15 = vpack.c.bf16 %v14178_v26, %v14174_v34  ;;  %v14180_v44 = vpop.eup %14179 }
 0x756   :  { %14181 = vrcp.f32 %v8753_v35 }
 0x757   :  { %8779 = vst [vmem:[%s14949_s28 + $0x10] sm:$0xff] %v8771_v15 }
 0x75c   :  { %v14182_v46 = vpop.eup %14181 }
 0x75d   :  { %v8775_v50 = vpack.c.bf16 %v14182_v46, %v14180_v44 }
 0x75e   :  { %v8694_v38 = vpop.f32.mrf.mxu3 }
 0x75f   :  { %v8695_v53 = vadd.f32 %v8694_v38, %v8681_v17  ;;  %8783 = vst [vmem:[%s14949_s28 + $0x2c] sm:$0xff] %v8775_v50 }
 0x761   :  { %v8705_v57 = vsub.f32 0.0, %v8695_v53 }
 0x763   :  { %v8725_v56 = vmul.f32 1.442695, %v8705_v57 }
 0x765   :  { %14183 = vpow2.f32 %v8725_v56 }
 0x766   :  { %v8696_v62 = vpop.f32.mrf.mxu3 }
 0x767   :  { %v8697_v0 = vadd.f32 %v8696_v62, %v8683_v58 }
 0x769   :  { %v8712_v22 = vsub.f32 0.0, %v8697_v0 }
 0x76b   :  { %v14184_v60 = vpop.eup %14183  ;;  %v8739_v28 = vmul.f32 1.442695, %v8712_v22 }
 0x76c   :  { %v8747_v61 = vadd.f32 1.0, %v14184_v60 }
 0x76d   :  { %14185 = vpow2.f32 %v8739_v28 }
 0x76e   :  { %14187 = vrcp.f32 %v8747_v61 }
 0x773   :  { %v14186_v39 = vpop.eup %14185 }
 0x774   :  { %v14188_v3 = vpop.eup %14187  ;;  %v8754_v7 = vadd.f32 1.0, %v14186_v39 }
 0x775   :  { %v8772_v51 = vpack.c.bf16 %v14188_v3, %v14188_v3 }
 0x776   :  { %14189 = vrcp.f32 %v8754_v7 }
 0x777   :  { %8780 = vst [vmem:[%s14949_s28 + $0x18] sm:$0xf] %v8772_v51 }
 0x77c   :  { %v14190_v47 = vpop.eup %14189 }
 0x77d   :  { %v8776_v8 = vpack.c.bf16 %v14190_v47, %v14190_v47 }
 0x77f   :  { %8784 = vst [vmem:[%s14949_s28 + $0x34] sm:$0xf] %v8776_v8 }
 0x780   :  { %8793 = vsyncpa [#allocation3], 1 }
 0x781   :  { %8794 = vsyncpa [#allocation5], 1 }
 0x782   :  { %8795 = vsyncpa [#allocation8], 1 }
 0x783   :  { %8796 = vsyncpa [#allocation11], 1 }
 0x784   :  { %8797 = vsyncpa [#allocation14], 1 }

</bundles_post_ra>
